<compile_context>
chip_gen: v7x
topology: tpu7x:2x2x1
jax: 0.10.0
libtpu: 0.0.40
codegen_flags: <defaults>
</compile_context>

<pallas_src>
import jax
import jax.numpy as jnp
from jax import lax
from jax.experimental import pallas as pl
from jax.experimental.pallas import tpu as pltpu

IN_STEPS    = 20                      # self.in_steps
NUM_HEADS   = 28                      # GRUModel_former4 num_heads
HEAD_DIM    = 10                      # forced: AttentionLayer3.input_proj = Linear(10, 1)
ATTN_DIM    = NUM_HEADS * HEAD_DIM    # 280
HIDDEN_DIM  = ATTN_DIM - IN_STEPS     # 260   (attn_dim = hidden_dim + 20)
HEADS_X     = HIDDEN_DIM // HEAD_DIM  # 26 heads taken entirely from x
HEADS_A     = IN_STEPS // HEAD_DIM    # 2 heads taken entirely from att0
INV_SQRT_HD = 1.0 / (HEAD_DIM ** 0.5)
TB          = 8                       # batches per grid step

assert HIDDEN_DIM % HEAD_DIM == 0 and HEADS_X + HEADS_A == NUM_HEADS


# ---------------------------------------------------------------------------
# In-kernel helpers (pure 2-D math, one batch at a time)
# ---------------------------------------------------------------------------
def _corr(m):
    # np.corrcoef semantics: rows = variables, columns = observations.
    mc = m - jnp.mean(m, axis=1, keepdims=True)                       # (S, D)
    gram = lax.dot_general(mc, mc, (((1,), (1,)), ((), ())),
                           preferred_element_type=jnp.float32)        # (S, S)
    d = jnp.sum(mc * mc, axis=1, keepdims=True)                       # (S, 1)
    inv = lax.rsqrt(d)                                                # EUP rsqrt
    # NaN on zero-variance rows, matching numpy's corrcoef; numpy clips [-1,1].
    return jnp.clip(gram * inv * inv.T, -1.0, 1.0)


def _head_block(part, e_mat, w_part):
    """AttentionLayer3 + seq-reduction + output projection for the heads that
    live entirely inside `part` (a contiguous slice of h whose width is a
    multiple of HEAD_DIM).

    part  : (S, Dp)   features of Dp//10 heads, lane-dense
    e_mat : (Dp, Hp)  block-indicator matrix, e_mat[d, k] = 1 iff d//10 == k
    w_part: (Hp, OUT) the matching rows of output_proj.weight.T
    returns (1, OUT)  this slice's contribution to output_proj (without bias)
    """
    # key.transpose(-1,-2).sum(3).unsqueeze(2) == per-head sum over sequence
    ks = jnp.sum(part, axis=0, keepdims=True)                         # (1, Dp)
    s = jnp.tanh(part * ks * INV_SQRT_HD)                             # (S, Dp)
    # softmax over head_dim: s = tanh(.) in [-1, 1], so exp needs no max-sub.
    e = jnp.exp(s)
    # per-(seq, head) segment sums via block-indicator matmuls (lane-dense):
    #   v_value[s, k] = sum_seg(e * value) / sum_seg(e)
    num = jnp.dot(e * part, e_mat, preferred_element_type=jnp.float32)  # (S, Hp)
    den = jnp.dot(e, e_mat, preferred_element_type=jnp.float32)         # (S, Hp)
    v_val = num / den                                                    # (S, Hp)
    # NOTE: the reference's v_attn_score is softmax over a size-1 axis == 1.0,
    # so the input_proj/tanh chain is dead and dropped here (output unchanged).
    # c_t = sum over sequence, then output_proj; fold the seq-sum after the
    # matmul so the MXU sees (S, Hp) x (Hp, OUT) instead of a rank-1 product.
    return jnp.sum(jnp.dot(v_val, w_part, preferred_element_type=jnp.float32),
                   axis=0, keepdims=True)                              # (1, OUT)


def _make_kernel(tb):
    def kernel(x_ref, a_ref, ex_ref, ea_ref, wx_ref, wa_ref, b_ref, o_ref):
        ex = ex_ref[...]            # (260, 26)
        ea = ea_ref[...]            # (20, 2)
        wx = wx_ref[...]            # (26, OUT)
        wa = wa_ref[...]            # (2, OUT)
        bo = b_ref[...]             # (1, OUT)
        # Unrolled loop over the TB batches of this grid step (static indices).
        for i in range(tb):
            x_b = x_ref[i]                                   # (20, 260)
            a_b = a_ref[i]                                   # (20, Da)
            att0 = _corr(x_b) - _corr(a_b)                   # (20, 20)  = val - att
            # h_b = concat(x_b, att0) split into 28 heads of width 10:
            # heads 0..25 live in x_b, heads 26..27 live in att0.
            y = _head_block(x_b, ex, wx) + _head_block(att0, ea, wa) + bo
            o_ref[i] = y                                     # (1, OUT)
    return kernel


# ---------------------------------------------------------------------------
# Wrapper
# ---------------------------------------------------------------------------
def gru_former4_forward(params, x, att1, *, tb=TB):
    B, S, Dx = x.shape
    assert S == IN_STEPS and Dx == HIDDEN_DIM, (S, Dx)
    Da = att1.shape[2]
    out_dim = params["w_out"].shape[0]

    # Pad the batch to a multiple of tb (edge-replicate so corrcoef stays finite).
    Bp = ((B + tb - 1) // tb) * tb
    if Bp != B:
        pad = Bp - B
        x_p = jnp.pad(x, ((0, pad), (0, 0), (0, 0)), mode="edge")
        a_p = jnp.pad(att1, ((0, pad), (0, 0), (0, 0)), mode="edge")
    else:
        x_p, a_p = x, att1

    # Constants / reshaped weights, prepared once outside the kernel.
    ex = (jnp.arange(HIDDEN_DIM)[:, None] // HEAD_DIM ==
          jnp.arange(HEADS_X)[None, :]).astype(jnp.float32)          # (260, 26)
    ea = (jnp.arange(IN_STEPS)[:, None] // HEAD_DIM ==
          jnp.arange(HEADS_A)[None, :]).astype(jnp.float32)          # (20, 2)
    w_t = jnp.transpose(params["w_out"])                             # (28, OUT)
    wx = w_t[:HEADS_X]                                               # (26, OUT)
    wa = w_t[HEADS_X:]                                               # (2, OUT)
    bo = params["b_out"].reshape(1, out_dim)                         # (1, OUT)

    grid = (Bp // tb,)
    y = pl.pallas_call(
        _make_kernel(tb),
        out_shape=jax.ShapeDtypeStruct((Bp, 1, out_dim), jnp.float32),
        grid_spec=pltpu.PrefetchScalarGridSpec(
            num_scalar_prefetch=0,
            grid=grid,
            in_specs=[
                pl.BlockSpec((tb, S, Dx), lambda t: (t, 0, 0)),
                pl.BlockSpec((tb, S, Da), lambda t: (t, 0, 0)),
                pl.BlockSpec((HIDDEN_DIM, HEADS_X), lambda t: (0, 0)),
                pl.BlockSpec((IN_STEPS, HEADS_A), lambda t: (0, 0)),
                pl.BlockSpec((HEADS_X, out_dim), lambda t: (0, 0)),
                pl.BlockSpec((HEADS_A, out_dim), lambda t: (0, 0)),
                pl.BlockSpec((1, out_dim), lambda t: (0, 0)),
            ],
            out_specs=pl.BlockSpec((tb, 1, out_dim), lambda t: (t, 0, 0))),
        compiler_params=pltpu.CompilerParams(
            dimension_semantics=("parallel",)),
    )(x_p, a_p, ex, ea, wx, wa, bo)

    return y[:B, 0, :]                                               # (B, OUT)


def init_params(key, input_dim):
    # Deterministic nn.Linear-style init (uniform +-1/sqrt(fan_in)).
    k1, k2, k3, k4 = jax.random.split(key, 4)
    out_dim = 2 * input_dim
    lim_ip = 1.0 / (HEAD_DIM ** 0.5)
    lim_o = 1.0 / (NUM_HEADS ** 0.5)
    return {
        # output_proj: Linear(28, 2*input_dim) -- the only weights that affect
        # the forward output.
        "w_out": jax.random.uniform(k3, (out_dim, NUM_HEADS), jnp.float32, -lim_o, lim_o),
        "b_out": jax.random.uniform(k4, (out_dim,), jnp.float32, -lim_o, lim_o),
        # input_proj: Linear(10, 1).  Kept for parameter fidelity; it feeds a
        # softmax over a size-1 axis (identically 1.0), so it never changes
        # the output and is not passed to the kernel.
        "w_ip": jax.random.uniform(k1, (1, HEAD_DIM), jnp.float32, -lim_ip, lim_ip),
        "b_ip": jax.random.uniform(k2, (1,), jnp.float32, -lim_ip, lim_ip),
        # aug_w_vari / bias_vari are declared in __init__ but unused in forward.
        "aug_w_vari": jnp.zeros((1, 1, HEAD_DIM), jnp.float32),
        "bias_vari": jnp.ones((1,), jnp.float32),
    }


if __name__ == "__main__":
    key = jax.random.PRNGKey(0)
    kx, ka, kp = jax.random.split(key, 3)
    # Small demo shapes consistent with the module (hidden_dim is forced to 260).
    B, input_dim, att1_feat = 16, 4, 16            # grid = (2,), TB = 8 per step
    x = jax.random.normal(kx, (B, IN_STEPS, HIDDEN_DIM), jnp.float32)
    att1 = jax.random.normal(ka, (B, IN_STEPS, att1_feat), jnp.float32)
    params = init_params(kp, input_dim)

    fwd = jax.jit(lambda xx, aa: gru_former4_forward(params, xx, aa))
    out = jax.block_until_ready(fwd(x, att1))
    assert out.shape == (B, 2 * input_dim), out.shape
    assert bool(jnp.all(jnp.isfinite(out)))
    print("KERNEL_OK")
</pallas_src>

<mosaic_0001>
module attributes {stable_mosaic.version = 11 : i64} {
  func.func @kernel(%arg0: i32, %arg1: memref<8x20x260xf32, #tpu.memory_space<vmem>>, %arg2: memref<8x20x16xf32, #tpu.memory_space<vmem>>, %arg3: memref<260x26xf32, #tpu.memory_space<vmem>>, %arg4: memref<20x2xf32, #tpu.memory_space<vmem>>, %arg5: memref<26x8xf32, #tpu.memory_space<vmem>>, %arg6: memref<2x8xf32, #tpu.memory_space<vmem>>, %arg7: memref<1x8xf32, #tpu.memory_space<vmem>>, %arg8: memref<8x1x8xf32, #tpu.memory_space<vmem>>) attributes {dimension_semantics = [#tpu.dimension_semantics<parallel>], iteration_bounds = array<i64: 2>, scalar_prefetch = 0 : i64, scratch_operands = 0 : i64, tpu.core_type = #tpu.core_type<tc>, window_params = [{transform_indices = @transform_0, window_bounds = array<i64: 8, 20, 260>}, {transform_indices = @transform_1, window_bounds = array<i64: 8, 20, 16>}, {pipeline_mode = #tpu.pipeline_mode<synchronous>, transform_indices = @transform_2, window_bounds = array<i64: 260, 26>}, {pipeline_mode = #tpu.pipeline_mode<synchronous>, transform_indices = @transform_3, window_bounds = array<i64: 20, 2>}, {pipeline_mode = #tpu.pipeline_mode<synchronous>, transform_indices = @transform_4, window_bounds = array<i64: 26, 8>}, {pipeline_mode = #tpu.pipeline_mode<synchronous>, transform_indices = @transform_5, window_bounds = array<i64: 2, 8>}, {pipeline_mode = #tpu.pipeline_mode<synchronous>, transform_indices = @transform_6, window_bounds = array<i64: 1, 8>}, {transform_indices = @transform_7, window_bounds = array<i64: 8, 1, 8>}]} {
    %c0 = arith.constant 0 : index
    %c0_0 = arith.constant 0 : index
    %0 = vector.load %arg3[%c0, %c0_0] : memref<260x26xf32, #tpu.memory_space<vmem>>, vector<260x26xf32>
    %c0_1 = arith.constant 0 : index
    %c0_2 = arith.constant 0 : index
    %1 = vector.load %arg4[%c0_1, %c0_2] : memref<20x2xf32, #tpu.memory_space<vmem>>, vector<20x2xf32>
    %c0_3 = arith.constant 0 : index
    %c0_4 = arith.constant 0 : index
    %2 = vector.load %arg5[%c0_3, %c0_4] : memref<26x8xf32, #tpu.memory_space<vmem>>, vector<26x8xf32>
    %c0_5 = arith.constant 0 : index
    %c0_6 = arith.constant 0 : index
    %3 = vector.load %arg6[%c0_5, %c0_6] : memref<2x8xf32, #tpu.memory_space<vmem>>, vector<2x8xf32>
    %c0_7 = arith.constant 0 : index
    %c0_8 = arith.constant 0 : index
    %4 = vector.load %arg7[%c0_7, %c0_8] : memref<1x8xf32, #tpu.memory_space<vmem>>, vector<1x8xf32>
    %c0_9 = arith.constant 0 : index
    %c0_10 = arith.constant 0 : index
    %c0_11 = arith.constant 0 : index
    %5 = vector.load %arg1[%c0_9, %c0_10, %c0_11] : memref<8x20x260xf32, #tpu.memory_space<vmem>>, vector<1x20x260xf32>
    %6 = vector.shape_cast %5 : vector<1x20x260xf32> to vector<20x260xf32>
    %c0_12 = arith.constant 0 : index
    %c0_13 = arith.constant 0 : index
    %c0_14 = arith.constant 0 : index
    %7 = vector.load %arg2[%c0_12, %c0_13, %c0_14] : memref<8x20x16xf32, #tpu.memory_space<vmem>>, vector<1x20x16xf32>
    %8 = vector.shape_cast %7 : vector<1x20x16xf32> to vector<20x16xf32>
    %cst = arith.constant dense<0.000000e+00> : vector<20xf32>
    %9 = vector.multi_reduction <add>, %6, %cst [1] : vector<20x260xf32> to vector<20xf32>
    %10 = vector.shape_cast %9 : vector<20xf32> to vector<20x1xf32>
    %cst_15 = arith.constant 2.600000e+02 : f32
    %11 = vector.broadcast %cst_15 : f32 to vector<20x1xf32>
    %12 = arith.divf %10, %11 : vector<20x1xf32>
    %13 = vector.broadcast %12 : vector<20x1xf32> to vector<20x260xf32>
    %14 = arith.subf %6, %13 : vector<20x260xf32>
    %cst_16 = arith.constant dense<0.000000e+00> : vector<20x20xf32>
    %15 = tpu.matmul %14, %14, %cst_16 {dimension_numbers = #tpu.dot_dimension_numbers<[1], [1], [0], [0], [0, 0, 1, 0], [], []>} : vector<20x260xf32>, vector<20x260xf32>, vector<20x20xf32> -> vector<20x20xf32>
    %16 = arith.mulf %14, %14 : vector<20x260xf32>
    %cst_17 = arith.constant dense<0.000000e+00> : vector<20xf32>
    %17 = vector.multi_reduction <add>, %16, %cst_17 [1] : vector<20x260xf32> to vector<20xf32>
    %18 = vector.shape_cast %17 : vector<20xf32> to vector<20x1xf32>
    %19 = math.rsqrt %18 : vector<20x1xf32>
    %20 = vector.broadcast %19 : vector<20x1xf32> to vector<20x20xf32>
    %21 = arith.mulf %15, %20 : vector<20x20xf32>
    %22 = tpu.transpose %19, [1, 0] : vector<20x1xf32> -> vector<1x20xf32>
    %23 = vector.broadcast %22 : vector<1x20xf32> to vector<20x20xf32>
    %24 = arith.mulf %21, %23 : vector<20x20xf32>
    %cst_18 = arith.constant -1.000000e+00 : f32
    %cst_19 = arith.constant 1.000000e+00 : f32
    %25 = vector.broadcast %cst_18 : f32 to vector<20x20xf32>
    %26 = arith.maximumf %25, %24 : vector<20x20xf32>
    %27 = vector.broadcast %cst_19 : f32 to vector<20x20xf32>
    %28 = arith.minimumf %27, %26 : vector<20x20xf32>
    %cst_20 = arith.constant dense<0.000000e+00> : vector<20xf32>
    %29 = vector.multi_reduction <add>, %8, %cst_20 [1] : vector<20x16xf32> to vector<20xf32>
    %30 = vector.shape_cast %29 : vector<20xf32> to vector<20x1xf32>
    %cst_21 = arith.constant 1.600000e+01 : f32
    %31 = vector.broadcast %cst_21 : f32 to vector<20x1xf32>
    %32 = arith.divf %30, %31 : vector<20x1xf32>
    %33 = vector.broadcast %32 : vector<20x1xf32> to vector<20x16xf32>
    %34 = arith.subf %8, %33 : vector<20x16xf32>
    %cst_22 = arith.constant dense<0.000000e+00> : vector<20x20xf32>
    %35 = tpu.matmul %34, %34, %cst_22 {dimension_numbers = #tpu.dot_dimension_numbers<[1], [1], [0], [0], [0, 0, 1, 0], [], []>} : vector<20x16xf32>, vector<20x16xf32>, vector<20x20xf32> -> vector<20x20xf32>
    %36 = arith.mulf %34, %34 : vector<20x16xf32>
    %cst_23 = arith.constant dense<0.000000e+00> : vector<20xf32>
    %37 = vector.multi_reduction <add>, %36, %cst_23 [1] : vector<20x16xf32> to vector<20xf32>
    %38 = vector.shape_cast %37 : vector<20xf32> to vector<20x1xf32>
    %39 = math.rsqrt %38 : vector<20x1xf32>
    %40 = vector.broadcast %39 : vector<20x1xf32> to vector<20x20xf32>
    %41 = arith.mulf %35, %40 : vector<20x20xf32>
    %42 = tpu.transpose %39, [1, 0] : vector<20x1xf32> -> vector<1x20xf32>
    %43 = vector.broadcast %42 : vector<1x20xf32> to vector<20x20xf32>
    %44 = arith.mulf %41, %43 : vector<20x20xf32>
    %cst_24 = arith.constant -1.000000e+00 : f32
    %cst_25 = arith.constant 1.000000e+00 : f32
    %45 = vector.broadcast %cst_24 : f32 to vector<20x20xf32>
    %46 = arith.maximumf %45, %44 : vector<20x20xf32>
    %47 = vector.broadcast %cst_25 : f32 to vector<20x20xf32>
    %48 = arith.minimumf %47, %46 : vector<20x20xf32>
    %49 = arith.subf %28, %48 : vector<20x20xf32>
    %cst_26 = arith.constant dense<0.000000e+00> : vector<260xf32>
    %50 = vector.multi_reduction <add>, %6, %cst_26 [0] : vector<20x260xf32> to vector<260xf32>
    %51 = vector.shape_cast %50 : vector<260xf32> to vector<1x260xf32>
    %52 = vector.broadcast %51 : vector<1x260xf32> to vector<20x260xf32>
    %53 = arith.mulf %6, %52 : vector<20x260xf32>
    %cst_27 = arith.constant 0.316227764 : f32
    %54 = vector.broadcast %cst_27 : f32 to vector<20x260xf32>
    %55 = arith.mulf %53, %54 : vector<20x260xf32>
    %56 = math.tanh %55 : vector<20x260xf32>
    %57 = math.exp %56 : vector<20x260xf32>
    %58 = arith.mulf %57, %6 : vector<20x260xf32>
    %cst_28 = arith.constant dense<0.000000e+00> : vector<20x26xf32>
    %59 = tpu.matmul %58, %0, %cst_28 {dimension_numbers = #tpu.dot_dimension_numbers<[1], [0], [0], [1], [0, 0, 1, 1], [], []>} : vector<20x260xf32>, vector<260x26xf32>, vector<20x26xf32> -> vector<20x26xf32>
    %cst_29 = arith.constant dense<0.000000e+00> : vector<20x26xf32>
    %60 = tpu.matmul %57, %0, %cst_29 {dimension_numbers = #tpu.dot_dimension_numbers<[1], [0], [0], [1], [0, 0, 1, 1], [], []>} : vector<20x260xf32>, vector<260x26xf32>, vector<20x26xf32> -> vector<20x26xf32>
    %61 = arith.divf %59, %60 : vector<20x26xf32>
    %cst_30 = arith.constant dense<0.000000e+00> : vector<20x8xf32>
    %62 = tpu.matmul %61, %2, %cst_30 {dimension_numbers = #tpu.dot_dimension_numbers<[1], [0], [0], [1], [0, 0, 1, 1], [], []>} : vector<20x26xf32>, vector<26x8xf32>, vector<20x8xf32> -> vector<20x8xf32>
    %cst_31 = arith.constant dense<0.000000e+00> : vector<8xf32>
    %63 = vector.multi_reduction <add>, %62, %cst_31 [0] : vector<20x8xf32> to vector<8xf32>
    %64 = vector.shape_cast %63 : vector<8xf32> to vector<1x8xf32>
    %cst_32 = arith.constant dense<0.000000e+00> : vector<20xf32>
    %65 = vector.multi_reduction <add>, %49, %cst_32 [0] : vector<20x20xf32> to vector<20xf32>
    %66 = vector.shape_cast %65 : vector<20xf32> to vector<1x20xf32>
    %67 = vector.broadcast %66 : vector<1x20xf32> to vector<20x20xf32>
    %68 = arith.mulf %49, %67 : vector<20x20xf32>
    %cst_33 = arith.constant 0.316227764 : f32
    %69 = vector.broadcast %cst_33 : f32 to vector<20x20xf32>
    %70 = arith.mulf %68, %69 : vector<20x20xf32>
    %71 = math.tanh %70 : vector<20x20xf32>
    %72 = math.exp %71 : vector<20x20xf32>
    %73 = arith.mulf %72, %49 : vector<20x20xf32>
    %cst_34 = arith.constant dense<0.000000e+00> : vector<20x2xf32>
    %74 = tpu.matmul %73, %1, %cst_34 {dimension_numbers = #tpu.dot_dimension_numbers<[1], [0], [0], [1], [0, 0, 1, 1], [], []>} : vector<20x20xf32>, vector<20x2xf32>, vector<20x2xf32> -> vector<20x2xf32>
    %cst_35 = arith.constant dense<0.000000e+00> : vector<20x2xf32>
    %75 = tpu.matmul %72, %1, %cst_35 {dimension_numbers = #tpu.dot_dimension_numbers<[1], [0], [0], [1], [0, 0, 1, 1], [], []>} : vector<20x20xf32>, vector<20x2xf32>, vector<20x2xf32> -> vector<20x2xf32>
    %76 = arith.divf %74, %75 : vector<20x2xf32>
    %cst_36 = arith.constant dense<0.000000e+00> : vector<20x8xf32>
    %77 = tpu.matmul %76, %3, %cst_36 {dimension_numbers = #tpu.dot_dimension_numbers<[1], [0], [0], [1], [0, 0, 1, 1], [], []>} : vector<20x2xf32>, vector<2x8xf32>, vector<20x8xf32> -> vector<20x8xf32>
    %cst_37 = arith.constant dense<0.000000e+00> : vector<8xf32>
    %78 = vector.multi_reduction <add>, %77, %cst_37 [0] : vector<20x8xf32> to vector<8xf32>
    %79 = vector.shape_cast %78 : vector<8xf32> to vector<1x8xf32>
    %80 = arith.addf %64, %79 : vector<1x8xf32>
    %81 = arith.addf %80, %4 : vector<1x8xf32>
    %c0_38 = arith.constant 0 : index
    %c0_39 = arith.constant 0 : index
    %c0_40 = arith.constant 0 : index
    %82 = vector.load %arg8[%c0_38, %c0_39, %c0_40] : memref<8x1x8xf32, #tpu.memory_space<vmem>>, vector<1x1x8xf32>
    %83 = vector.shape_cast %82 : vector<1x1x8xf32> to vector<1x8xf32>
    %84 = vector.shape_cast %81 : vector<1x8xf32> to vector<1x1x8xf32>
    tpu.vector_store %arg8[%c0_38, %c0_39, %c0_40], %84 {strides = array<i32>} : memref<8x1x8xf32, #tpu.memory_space<vmem>>, vector<1x1x8xf32>,
    %c1 = arith.constant 1 : index
    %c0_41 = arith.constant 0 : index
    %c0_42 = arith.constant 0 : index
    %85 = vector.load %arg1[%c1, %c0_41, %c0_42] : memref<8x20x260xf32, #tpu.memory_space<vmem>>, vector<1x20x260xf32>
    %86 = vector.shape_cast %85 : vector<1x20x260xf32> to vector<20x260xf32>
    %c1_43 = arith.constant 1 : index
    %c0_44 = arith.constant 0 : index
    %c0_45 = arith.constant 0 : index
    %87 = vector.load %arg2[%c1_43, %c0_44, %c0_45] : memref<8x20x16xf32, #tpu.memory_space<vmem>>, vector<1x20x16xf32>
    %88 = vector.shape_cast %87 : vector<1x20x16xf32> to vector<20x16xf32>
    %cst_46 = arith.constant dense<0.000000e+00> : vector<20xf32>
    %89 = vector.multi_reduction <add>, %86, %cst_46 [1] : vector<20x260xf32> to vector<20xf32>
    %90 = vector.shape_cast %89 : vector<20xf32> to vector<20x1xf32>
    %cst_47 = arith.constant 2.600000e+02 : f32
    %91 = vector.broadcast %cst_47 : f32 to vector<20x1xf32>
    %92 = arith.divf %90, %91 : vector<20x1xf32>
    %93 = vector.broadcast %92 : vector<20x1xf32> to vector<20x260xf32>
    %94 = arith.subf %86, %93 : vector<20x260xf32>
    %cst_48 = arith.constant dense<0.000000e+00> : vector<20x20xf32>
    %95 = tpu.matmul %94, %94, %cst_48 {dimension_numbers = #tpu.dot_dimension_numbers<[1], [1], [0], [0], [0, 0, 1, 0], [], []>} : vector<20x260xf32>, vector<20x260xf32>, vector<20x20xf32> -> vector<20x20xf32>
    %96 = arith.mulf %94, %94 : vector<20x260xf32>
    %cst_49 = arith.constant dense<0.000000e+00> : vector<20xf32>
    %97 = vector.multi_reduction <add>, %96, %cst_49 [1] : vector<20x260xf32> to vector<20xf32>
    %98 = vector.shape_cast %97 : vector<20xf32> to vector<20x1xf32>
    %99 = math.rsqrt %98 : vector<20x1xf32>
    %100 = vector.broadcast %99 : vector<20x1xf32> to vector<20x20xf32>
    %101 = arith.mulf %95, %100 : vector<20x20xf32>
    %102 = tpu.transpose %99, [1, 0] : vector<20x1xf32> -> vector<1x20xf32>
    %103 = vector.broadcast %102 : vector<1x20xf32> to vector<20x20xf32>
    %104 = arith.mulf %101, %103 : vector<20x20xf32>
    %cst_50 = arith.constant -1.000000e+00 : f32
    %cst_51 = arith.constant 1.000000e+00 : f32
    %105 = vector.broadcast %cst_50 : f32 to vector<20x20xf32>
    %106 = arith.maximumf %105, %104 : vector<20x20xf32>
    %107 = vector.broadcast %cst_51 : f32 to vector<20x20xf32>
    %108 = arith.minimumf %107, %106 : vector<20x20xf32>
    %cst_52 = arith.constant dense<0.000000e+00> : vector<20xf32>
    %109 = vector.multi_reduction <add>, %88, %cst_52 [1] : vector<20x16xf32> to vector<20xf32>
    %110 = vector.shape_cast %109 : vector<20xf32> to vector<20x1xf32>
    %cst_53 = arith.constant 1.600000e+01 : f32
    %111 = vector.broadcast %cst_53 : f32 to vector<20x1xf32>
    %112 = arith.divf %110, %111 : vector<20x1xf32>
    %113 = vector.broadcast %112 : vector<20x1xf32> to vector<20x16xf32>
    %114 = arith.subf %88, %113 : vector<20x16xf32>
    %cst_54 = arith.constant dense<0.000000e+00> : vector<20x20xf32>
    %115 = tpu.matmul %114, %114, %cst_54 {dimension_numbers = #tpu.dot_dimension_numbers<[1], [1], [0], [0], [0, 0, 1, 0], [], []>} : vector<20x16xf32>, vector<20x16xf32>, vector<20x20xf32> -> vector<20x20xf32>
    %116 = arith.mulf %114, %114 : vector<20x16xf32>
    %cst_55 = arith.constant dense<0.000000e+00> : vector<20xf32>
    %117 = vector.multi_reduction <add>, %116, %cst_55 [1] : vector<20x16xf32> to vector<20xf32>
    %118 = vector.shape_cast %117 : vector<20xf32> to vector<20x1xf32>
    %119 = math.rsqrt %118 : vector<20x1xf32>
    %120 = vector.broadcast %119 : vector<20x1xf32> to vector<20x20xf32>
    %121 = arith.mulf %115, %120 : vector<20x20xf32>
    %122 = tpu.transpose %119, [1, 0] : vector<20x1xf32> -> vector<1x20xf32>
    %123 = vector.broadcast %122 : vector<1x20xf32> to vector<20x20xf32>
    %124 = arith.mulf %121, %123 : vector<20x20xf32>
    %cst_56 = arith.constant -1.000000e+00 : f32
    %cst_57 = arith.constant 1.000000e+00 : f32
    %125 = vector.broadcast %cst_56 : f32 to vector<20x20xf32>
    %126 = arith.maximumf %125, %124 : vector<20x20xf32>
    %127 = vector.broadcast %cst_57 : f32 to vector<20x20xf32>
    %128 = arith.minimumf %127, %126 : vector<20x20xf32>
    %129 = arith.subf %108, %128 : vector<20x20xf32>
    %cst_58 = arith.constant dense<0.000000e+00> : vector<260xf32>
    %130 = vector.multi_reduction <add>, %86, %cst_58 [0] : vector<20x260xf32> to vector<260xf32>
    %131 = vector.shape_cast %130 : vector<260xf32> to vector<1x260xf32>
    %132 = vector.broadcast %131 : vector<1x260xf32> to vector<20x260xf32>
    %133 = arith.mulf %86, %132 : vector<20x260xf32>
    %cst_59 = arith.constant 0.316227764 : f32
    %134 = vector.broadcast %cst_59 : f32 to vector<20x260xf32>
    %135 = arith.mulf %133, %134 : vector<20x260xf32>
    %136 = math.tanh %135 : vector<20x260xf32>
    %137 = math.exp %136 : vector<20x260xf32>
    %138 = arith.mulf %137, %86 : vector<20x260xf32>
    %cst_60 = arith.constant dense<0.000000e+00> : vector<20x26xf32>
    %139 = tpu.matmul %138, %0, %cst_60 {dimension_numbers = #tpu.dot_dimension_numbers<[1], [0], [0], [1], [0, 0, 1, 1], [], []>} : vector<20x260xf32>, vector<260x26xf32>, vector<20x26xf32> -> vector<20x26xf32>
    %cst_61 = arith.constant dense<0.000000e+00> : vector<20x26xf32>
    %140 = tpu.matmul %137, %0, %cst_61 {dimension_numbers = #tpu.dot_dimension_numbers<[1], [0], [0], [1], [0, 0, 1, 1], [], []>} : vector<20x260xf32>, vector<260x26xf32>, vector<20x26xf32> -> vector<20x26xf32>
    %141 = arith.divf %139, %140 : vector<20x26xf32>
    %cst_62 = arith.constant dense<0.000000e+00> : vector<20x8xf32>
    %142 = tpu.matmul %141, %2, %cst_62 {dimension_numbers = #tpu.dot_dimension_numbers<[1], [0], [0], [1], [0, 0, 1, 1], [], []>} : vector<20x26xf32>, vector<26x8xf32>, vector<20x8xf32> -> vector<20x8xf32>
    %cst_63 = arith.constant dense<0.000000e+00> : vector<8xf32>
    %143 = vector.multi_reduction <add>, %142, %cst_63 [0] : vector<20x8xf32> to vector<8xf32>
    %144 = vector.shape_cast %143 : vector<8xf32> to vector<1x8xf32>
    %cst_64 = arith.constant dense<0.000000e+00> : vector<20xf32>
    %145 = vector.multi_reduction <add>, %129, %cst_64 [0] : vector<20x20xf32> to vector<20xf32>
    %146 = vector.shape_cast %145 : vector<20xf32> to vector<1x20xf32>
    %147 = vector.broadcast %146 : vector<1x20xf32> to vector<20x20xf32>
    %148 = arith.mulf %129, %147 : vector<20x20xf32>
    %cst_65 = arith.constant 0.316227764 : f32
    %149 = vector.broadcast %cst_65 : f32 to vector<20x20xf32>
    %150 = arith.mulf %148, %149 : vector<20x20xf32>
    %151 = math.tanh %150 : vector<20x20xf32>
    %152 = math.exp %151 : vector<20x20xf32>
    %153 = arith.mulf %152, %129 : vector<20x20xf32>
    %cst_66 = arith.constant dense<0.000000e+00> : vector<20x2xf32>
    %154 = tpu.matmul %153, %1, %cst_66 {dimension_numbers = #tpu.dot_dimension_numbers<[1], [0], [0], [1], [0, 0, 1, 1], [], []>} : vector<20x20xf32>, vector<20x2xf32>, vector<20x2xf32> -> vector<20x2xf32>
    %cst_67 = arith.constant dense<0.000000e+00> : vector<20x2xf32>
    %155 = tpu.matmul %152, %1, %cst_67 {dimension_numbers = #tpu.dot_dimension_numbers<[1], [0], [0], [1], [0, 0, 1, 1], [], []>} : vector<20x20xf32>, vector<20x2xf32>, vector<20x2xf32> -> vector<20x2xf32>
    %156 = arith.divf %154, %155 : vector<20x2xf32>
    %cst_68 = arith.constant dense<0.000000e+00> : vector<20x8xf32>
    %157 = tpu.matmul %156, %3, %cst_68 {dimension_numbers = #tpu.dot_dimension_numbers<[1], [0], [0], [1], [0, 0, 1, 1], [], []>} : vector<20x2xf32>, vector<2x8xf32>, vector<20x8xf32> -> vector<20x8xf32>
    %cst_69 = arith.constant dense<0.000000e+00> : vector<8xf32>
    %158 = vector.multi_reduction <add>, %157, %cst_69 [0] : vector<20x8xf32> to vector<8xf32>
    %159 = vector.shape_cast %158 : vector<8xf32> to vector<1x8xf32>
    %160 = arith.addf %144, %159 : vector<1x8xf32>
    %161 = arith.addf %160, %4 : vector<1x8xf32>
    %c1_70 = arith.constant 1 : index
    %c0_71 = arith.constant 0 : index
    %c0_72 = arith.constant 0 : index
    %162 = vector.load %arg8[%c1_70, %c0_71, %c0_72] : memref<8x1x8xf32, #tpu.memory_space<vmem>>, vector<1x1x8xf32>
    %163 = vector.shape_cast %162 : vector<1x1x8xf32> to vector<1x8xf32>
    %164 = vector.shape_cast %161 : vector<1x8xf32> to vector<1x1x8xf32>
    tpu.vector_store %arg8[%c1_70, %c0_71, %c0_72], %164 {strides = array<i32>} : memref<8x1x8xf32, #tpu.memory_space<vmem>>, vector<1x1x8xf32>,
    %c2 = arith.constant 2 : index
    %c0_73 = arith.constant 0 : index
    %c0_74 = arith.constant 0 : index
    %165 = vector.load %arg1[%c2, %c0_73, %c0_74] : memref<8x20x260xf32, #tpu.memory_space<vmem>>, vector<1x20x260xf32>
    %166 = vector.shape_cast %165 : vector<1x20x260xf32> to vector<20x260xf32>
    %c2_75 = arith.constant 2 : index
    %c0_76 = arith.constant 0 : index
    %c0_77 = arith.constant 0 : index
    %167 = vector.load %arg2[%c2_75, %c0_76, %c0_77] : memref<8x20x16xf32, #tpu.memory_space<vmem>>, vector<1x20x16xf32>
    %168 = vector.shape_cast %167 : vector<1x20x16xf32> to vector<20x16xf32>
    %cst_78 = arith.constant dense<0.000000e+00> : vector<20xf32>
    %169 = vector.multi_reduction <add>, %166, %cst_78 [1] : vector<20x260xf32> to vector<20xf32>
    %170 = vector.shape_cast %169 : vector<20xf32> to vector<20x1xf32>
    %cst_79 = arith.constant 2.600000e+02 : f32
    %171 = vector.broadcast %cst_79 : f32 to vector<20x1xf32>
    %172 = arith.divf %170, %171 : vector<20x1xf32>
    %173 = vector.broadcast %172 : vector<20x1xf32> to vector<20x260xf32>
    %174 = arith.subf %166, %173 : vector<20x260xf32>
    %cst_80 = arith.constant dense<0.000000e+00> : vector<20x20xf32>
    %175 = tpu.matmul %174, %174, %cst_80 {dimension_numbers = #tpu.dot_dimension_numbers<[1], [1], [0], [0], [0, 0, 1, 0], [], []>} : vector<20x260xf32>, vector<20x260xf32>, vector<20x20xf32> -> vector<20x20xf32>
    %176 = arith.mulf %174, %174 : vector<20x260xf32>
    %cst_81 = arith.constant dense<0.000000e+00> : vector<20xf32>
    %177 = vector.multi_reduction <add>, %176, %cst_81 [1] : vector<20x260xf32> to vector<20xf32>
    %178 = vector.shape_cast %177 : vector<20xf32> to vector<20x1xf32>
    %179 = math.rsqrt %178 : vector<20x1xf32>
    %180 = vector.broadcast %179 : vector<20x1xf32> to vector<20x20xf32>
    %181 = arith.mulf %175, %180 : vector<20x20xf32>
    %182 = tpu.transpose %179, [1, 0] : vector<20x1xf32> -> vector<1x20xf32>
    %183 = vector.broadcast %182 : vector<1x20xf32> to vector<20x20xf32>
    %184 = arith.mulf %181, %183 : vector<20x20xf32>
    %cst_82 = arith.constant -1.000000e+00 : f32
    %cst_83 = arith.constant 1.000000e+00 : f32
    %185 = vector.broadcast %cst_82 : f32 to vector<20x20xf32>
    %186 = arith.maximumf %185, %184 : vector<20x20xf32>
    %187 = vector.broadcast %cst_83 : f32 to vector<20x20xf32>
    %188 = arith.minimumf %187, %186 : vector<20x20xf32>
    %cst_84 = arith.constant dense<0.000000e+00> : vector<20xf32>
    %189 = vector.multi_reduction <add>, %168, %cst_84 [1] : vector<20x16xf32> to vector<20xf32>
    %190 = vector.shape_cast %189 : vector<20xf32> to vector<20x1xf32>
    %cst_85 = arith.constant 1.600000e+01 : f32
    %191 = vector.broadcast %cst_85 : f32 to vector<20x1xf32>
    %192 = arith.divf %190, %191 : vector<20x1xf32>
    %193 = vector.broadcast %192 : vector<20x1xf32> to vector<20x16xf32>
    %194 = arith.subf %168, %193 : vector<20x16xf32>
    %cst_86 = arith.constant dense<0.000000e+00> : vector<20x20xf32>
    %195 = tpu.matmul %194, %194, %cst_86 {dimension_numbers = #tpu.dot_dimension_numbers<[1], [1], [0], [0], [0, 0, 1, 0], [], []>} : vector<20x16xf32>, vector<20x16xf32>, vector<20x20xf32> -> vector<20x20xf32>
    %196 = arith.mulf %194, %194 : vector<20x16xf32>
    %cst_87 = arith.constant dense<0.000000e+00> : vector<20xf32>
    %197 = vector.multi_reduction <add>, %196, %cst_87 [1] : vector<20x16xf32> to vector<20xf32>
    %198 = vector.shape_cast %197 : vector<20xf32> to vector<20x1xf32>
    %199 = math.rsqrt %198 : vector<20x1xf32>
    %200 = vector.broadcast %199 : vector<20x1xf32> to vector<20x20xf32>
    %201 = arith.mulf %195, %200 : vector<20x20xf32>
    %202 = tpu.transpose %199, [1, 0] : vector<20x1xf32> -> vector<1x20xf32>
    %203 = vector.broadcast %202 : vector<1x20xf32> to vector<20x20xf32>
    %204 = arith.mulf %201, %203 : vector<20x20xf32>
    %cst_88 = arith.constant -1.000000e+00 : f32
    %cst_89 = arith.constant 1.000000e+00 : f32
    %205 = vector.broadcast %cst_88 : f32 to vector<20x20xf32>
    %206 = arith.maximumf %205, %204 : vector<20x20xf32>
    %207 = vector.broadcast %cst_89 : f32 to vector<20x20xf32>
    %208 = arith.minimumf %207, %206 : vector<20x20xf32>
    %209 = arith.subf %188, %208 : vector<20x20xf32>
    %cst_90 = arith.constant dense<0.000000e+00> : vector<260xf32>
    %210 = vector.multi_reduction <add>, %166, %cst_90 [0] : vector<20x260xf32> to vector<260xf32>
    %211 = vector.shape_cast %210 : vector<260xf32> to vector<1x260xf32>
    %212 = vector.broadcast %211 : vector<1x260xf32> to vector<20x260xf32>
    %213 = arith.mulf %166, %212 : vector<20x260xf32>
    %cst_91 = arith.constant 0.316227764 : f32
    %214 = vector.broadcast %cst_91 : f32 to vector<20x260xf32>
    %215 = arith.mulf %213, %214 : vector<20x260xf32>
    %216 = math.tanh %215 : vector<20x260xf32>
    %217 = math.exp %216 : vector<20x260xf32>
    %218 = arith.mulf %217, %166 : vector<20x260xf32>
    %cst_92 = arith.constant dense<0.000000e+00> : vector<20x26xf32>
    %219 = tpu.matmul %218, %0, %cst_92 {dimension_numbers = #tpu.dot_dimension_numbers<[1], [0], [0], [1], [0, 0, 1, 1], [], []>} : vector<20x260xf32>, vector<260x26xf32>, vector<20x26xf32> -> vector<20x26xf32>
    %cst_93 = arith.constant dense<0.000000e+00> : vector<20x26xf32>
    %220 = tpu.matmul %217, %0, %cst_93 {dimension_numbers = #tpu.dot_dimension_numbers<[1], [0], [0], [1], [0, 0, 1, 1], [], []>} : vector<20x260xf32>, vector<260x26xf32>, vector<20x26xf32> -> vector<20x26xf32>
    %221 = arith.divf %219, %220 : vector<20x26xf32>
    %cst_94 = arith.constant dense<0.000000e+00> : vector<20x8xf32>
    %222 = tpu.matmul %221, %2, %cst_94 {dimension_numbers = #tpu.dot_dimension_numbers<[1], [0], [0], [1], [0, 0, 1, 1], [], []>} : vector<20x26xf32>, vector<26x8xf32>, vector<20x8xf32> -> vector<20x8xf32>
    %cst_95 = arith.constant dense<0.000000e+00> : vector<8xf32>
    %223 = vector.multi_reduction <add>, %222, %cst_95 [0] : vector<20x8xf32> to vector<8xf32>
    %224 = vector.shape_cast %223 : vector<8xf32> to vector<1x8xf32>
    %cst_96 = arith.constant dense<0.000000e+00> : vector<20xf32>
    %225 = vector.multi_reduction <add>, %209, %cst_96 [0] : vector<20x20xf32> to vector<20xf32>
    %226 = vector.shape_cast %225 : vector<20xf32> to vector<1x20xf32>
    %227 = vector.broadcast %226 : vector<1x20xf32> to vector<20x20xf32>
    %228 = arith.mulf %209, %227 : vector<20x20xf32>
    %cst_97 = arith.constant 0.316227764 : f32
    %229 = vector.broadcast %cst_97 : f32 to vector<20x20xf32>
    %230 = arith.mulf %228, %229 : vector<20x20xf32>
    %231 = math.tanh %230 : vector<20x20xf32>
    %232 = math.exp %231 : vector<20x20xf32>
    %233 = arith.mulf %232, %209 : vector<20x20xf32>
    %cst_98 = arith.constant dense<0.000000e+00> : vector<20x2xf32>
    %234 = tpu.matmul %233, %1, %cst_98 {dimension_numbers = #tpu.dot_dimension_numbers<[1], [0], [0], [1], [0, 0, 1, 1], [], []>} : vector<20x20xf32>, vector<20x2xf32>, vector<20x2xf32> -> vector<20x2xf32>
    %cst_99 = arith.constant dense<0.000000e+00> : vector<20x2xf32>
    %235 = tpu.matmul %232, %1, %cst_99 {dimension_numbers = #tpu.dot_dimension_numbers<[1], [0], [0], [1], [0, 0, 1, 1], [], []>} : vector<20x20xf32>, vector<20x2xf32>, vector<20x2xf32> -> vector<20x2xf32>
    %236 = arith.divf %234, %235 : vector<20x2xf32>
    %cst_100 = arith.constant dense<0.000000e+00> : vector<20x8xf32>
    %237 = tpu.matmul %236, %3, %cst_100 {dimension_numbers = #tpu.dot_dimension_numbers<[1], [0], [0], [1], [0, 0, 1, 1], [], []>} : vector<20x2xf32>, vector<2x8xf32>, vector<20x8xf32> -> vector<20x8xf32>
    %cst_101 = arith.constant dense<0.000000e+00> : vector<8xf32>
    %238 = vector.multi_reduction <add>, %237, %cst_101 [0] : vector<20x8xf32> to vector<8xf32>
    %239 = vector.shape_cast %238 : vector<8xf32> to vector<1x8xf32>
    %240 = arith.addf %224, %239 : vector<1x8xf32>
    %241 = arith.addf %240, %4 : vector<1x8xf32>
    %c2_102 = arith.constant 2 : index
    %c0_103 = arith.constant 0 : index
    %c0_104 = arith.constant 0 : index
    %242 = vector.load %arg8[%c2_102, %c0_103, %c0_104] : memref<8x1x8xf32, #tpu.memory_space<vmem>>, vector<1x1x8xf32>
    %243 = vector.shape_cast %242 : vector<1x1x8xf32> to vector<1x8xf32>
    %244 = vector.shape_cast %241 : vector<1x8xf32> to vector<1x1x8xf32>
    tpu.vector_store %arg8[%c2_102, %c0_103, %c0_104], %244 {strides = array<i32>} : memref<8x1x8xf32, #tpu.memory_space<vmem>>, vector<1x1x8xf32>,
    %c3 = arith.constant 3 : index
    %c0_105 = arith.constant 0 : index
    %c0_106 = arith.constant 0 : index
    %245 = vector.load %arg1[%c3, %c0_105, %c0_106] : memref<8x20x260xf32, #tpu.memory_space<vmem>>, vector<1x20x260xf32>
    %246 = vector.shape_cast %245 : vector<1x20x260xf32> to vector<20x260xf32>
    %c3_107 = arith.constant 3 : index
    %c0_108 = arith.constant 0 : index
    %c0_109 = arith.constant 0 : index
    %247 = vector.load %arg2[%c3_107, %c0_108, %c0_109] : memref<8x20x16xf32, #tpu.memory_space<vmem>>, vector<1x20x16xf32>
    %248 = vector.shape_cast %247 : vector<1x20x16xf32> to vector<20x16xf32>
    %cst_110 = arith.constant dense<0.000000e+00> : vector<20xf32>
    %249 = vector.multi_reduction <add>, %246, %cst_110 [1] : vector<20x260xf32> to vector<20xf32>
    %250 = vector.shape_cast %249 : vector<20xf32> to vector<20x1xf32>
    %cst_111 = arith.constant 2.600000e+02 : f32
    %251 = vector.broadcast %cst_111 : f32 to vector<20x1xf32>
    %252 = arith.divf %250, %251 : vector<20x1xf32>
    %253 = vector.broadcast %252 : vector<20x1xf32> to vector<20x260xf32>
    %254 = arith.subf %246, %253 : vector<20x260xf32>
    %cst_112 = arith.constant dense<0.000000e+00> : vector<20x20xf32>
    %255 = tpu.matmul %254, %254, %cst_112 {dimension_numbers = #tpu.dot_dimension_numbers<[1], [1], [0], [0], [0, 0, 1, 0], [], []>} : vector<20x260xf32>, vector<20x260xf32>, vector<20x20xf32> -> vector<20x20xf32>
    %256 = arith.mulf %254, %254 : vector<20x260xf32>
    %cst_113 = arith.constant dense<0.000000e+00> : vector<20xf32>
    %257 = vector.multi_reduction <add>, %256, %cst_113 [1] : vector<20x260xf32> to vector<20xf32>
    %258 = vector.shape_cast %257 : vector<20xf32> to vector<20x1xf32>
    %259 = math.rsqrt %258 : vector<20x1xf32>
    %260 = vector.broadcast %259 : vector<20x1xf32> to vector<20x20xf32>
    %261 = arith.mulf %255, %260 : vector<20x20xf32>
    %262 = tpu.transpose %259, [1, 0] : vector<20x1xf32> -> vector<1x20xf32>
    %263 = vector.broadcast %262 : vector<1x20xf32> to vector<20x20xf32>
    %264 = arith.mulf %261, %263 : vector<20x20xf32>
    %cst_114 = arith.constant -1.000000e+00 : f32
    %cst_115 = arith.constant 1.000000e+00 : f32
    %265 = vector.broadcast %cst_114 : f32 to vector<20x20xf32>
    %266 = arith.maximumf %265, %264 : vector<20x20xf32>
    %267 = vector.broadcast %cst_115 : f32 to vector<20x20xf32>
    %268 = arith.minimumf %267, %266 : vector<20x20xf32>
    %cst_116 = arith.constant dense<0.000000e+00> : vector<20xf32>
    %269 = vector.multi_reduction <add>, %248, %cst_116 [1] : vector<20x16xf32> to vector<20xf32>
    %270 = vector.shape_cast %269 : vector<20xf32> to vector<20x1xf32>
    %cst_117 = arith.constant 1.600000e+01 : f32
    %271 = vector.broadcast %cst_117 : f32 to vector<20x1xf32>
    %272 = arith.divf %270, %271 : vector<20x1xf32>
    %273 = vector.broadcast %272 : vector<20x1xf32> to vector<20x16xf32>
    %274 = arith.subf %248, %273 : vector<20x16xf32>
    %cst_118 = arith.constant dense<0.000000e+00> : vector<20x20xf32>
    %275 = tpu.matmul %274, %274, %cst_118 {dimension_numbers = #tpu.dot_dimension_numbers<[1], [1], [0], [0], [0, 0, 1, 0], [], []>} : vector<20x16xf32>, vector<20x16xf32>, vector<20x20xf32> -> vector<20x20xf32>
    %276 = arith.mulf %274, %274 : vector<20x16xf32>
    %cst_119 = arith.constant dense<0.000000e+00> : vector<20xf32>
    %277 = vector.multi_reduction <add>, %276, %cst_119 [1] : vector<20x16xf32> to vector<20xf32>
    %278 = vector.shape_cast %277 : vector<20xf32> to vector<20x1xf32>
    %279 = math.rsqrt %278 : vector<20x1xf32>
    %280 = vector.broadcast %279 : vector<20x1xf32> to vector<20x20xf32>
    %281 = arith.mulf %275, %280 : vector<20x20xf32>
    %282 = tpu.transpose %279, [1, 0] : vector<20x1xf32> -> vector<1x20xf32>
    %283 = vector.broadcast %282 : vector<1x20xf32> to vector<20x20xf32>
    %284 = arith.mulf %281, %283 : vector<20x20xf32>
    %cst_120 = arith.constant -1.000000e+00 : f32
    %cst_121 = arith.constant 1.000000e+00 : f32
    %285 = vector.broadcast %cst_120 : f32 to vector<20x20xf32>
    %286 = arith.maximumf %285, %284 : vector<20x20xf32>
    %287 = vector.broadcast %cst_121 : f32 to vector<20x20xf32>
    %288 = arith.minimumf %287, %286 : vector<20x20xf32>
    %289 = arith.subf %268, %288 : vector<20x20xf32>
    %cst_122 = arith.constant dense<0.000000e+00> : vector<260xf32>
    %290 = vector.multi_reduction <add>, %246, %cst_122 [0] : vector<20x260xf32> to vector<260xf32>
    %291 = vector.shape_cast %290 : vector<260xf32> to vector<1x260xf32>
    %292 = vector.broadcast %291 : vector<1x260xf32> to vector<20x260xf32>
    %293 = arith.mulf %246, %292 : vector<20x260xf32>
    %cst_123 = arith.constant 0.316227764 : f32
    %294 = vector.broadcast %cst_123 : f32 to vector<20x260xf32>
    %295 = arith.mulf %293, %294 : vector<20x260xf32>
    %296 = math.tanh %295 : vector<20x260xf32>
    %297 = math.exp %296 : vector<20x260xf32>
    %298 = arith.mulf %297, %246 : vector<20x260xf32>
    %cst_124 = arith.constant dense<0.000000e+00> : vector<20x26xf32>
    %299 = tpu.matmul %298, %0, %cst_124 {dimension_numbers = #tpu.dot_dimension_numbers<[1], [0], [0], [1], [0, 0, 1, 1], [], []>} : vector<20x260xf32>, vector<260x26xf32>, vector<20x26xf32> -> vector<20x26xf32>
    %cst_125 = arith.constant dense<0.000000e+00> : vector<20x26xf32>
    %300 = tpu.matmul %297, %0, %cst_125 {dimension_numbers = #tpu.dot_dimension_numbers<[1], [0], [0], [1], [0, 0, 1, 1], [], []>} : vector<20x260xf32>, vector<260x26xf32>, vector<20x26xf32> -> vector<20x26xf32>
    %301 = arith.divf %299, %300 : vector<20x26xf32>
    %cst_126 = arith.constant dense<0.000000e+00> : vector<20x8xf32>
    %302 = tpu.matmul %301, %2, %cst_126 {dimension_numbers = #tpu.dot_dimension_numbers<[1], [0], [0], [1], [0, 0, 1, 1], [], []>} : vector<20x26xf32>, vector<26x8xf32>, vector<20x8xf32> -> vector<20x8xf32>
    %cst_127 = arith.constant dense<0.000000e+00> : vector<8xf32>
    %303 = vector.multi_reduction <add>, %302, %cst_127 [0] : vector<20x8xf32> to vector<8xf32>
    %304 = vector.shape_cast %303 : vector<8xf32> to vector<1x8xf32>
    %cst_128 = arith.constant dense<0.000000e+00> : vector<20xf32>
    %305 = vector.multi_reduction <add>, %289, %cst_128 [0] : vector<20x20xf32> to vector<20xf32>
    %306 = vector.shape_cast %305 : vector<20xf32> to vector<1x20xf32>
    %307 = vector.broadcast %306 : vector<1x20xf32> to vector<20x20xf32>
    %308 = arith.mulf %289, %307 : vector<20x20xf32>
    %cst_129 = arith.constant 0.316227764 : f32
    %309 = vector.broadcast %cst_129 : f32 to vector<20x20xf32>
    %310 = arith.mulf %308, %309 : vector<20x20xf32>
    %311 = math.tanh %310 : vector<20x20xf32>
    %312 = math.exp %311 : vector<20x20xf32>
    %313 = arith.mulf %312, %289 : vector<20x20xf32>
    %cst_130 = arith.constant dense<0.000000e+00> : vector<20x2xf32>
    %314 = tpu.matmul %313, %1, %cst_130 {dimension_numbers = #tpu.dot_dimension_numbers<[1], [0], [0], [1], [0, 0, 1, 1], [], []>} : vector<20x20xf32>, vector<20x2xf32>, vector<20x2xf32> -> vector<20x2xf32>
    %cst_131 = arith.constant dense<0.000000e+00> : vector<20x2xf32>
    %315 = tpu.matmul %312, %1, %cst_131 {dimension_numbers = #tpu.dot_dimension_numbers<[1], [0], [0], [1], [0, 0, 1, 1], [], []>} : vector<20x20xf32>, vector<20x2xf32>, vector<20x2xf32> -> vector<20x2xf32>
    %316 = arith.divf %314, %315 : vector<20x2xf32>
    %cst_132 = arith.constant dense<0.000000e+00> : vector<20x8xf32>
    %317 = tpu.matmul %316, %3, %cst_132 {dimension_numbers = #tpu.dot_dimension_numbers<[1], [0], [0], [1], [0, 0, 1, 1], [], []>} : vector<20x2xf32>, vector<2x8xf32>, vector<20x8xf32> -> vector<20x8xf32>
    %cst_133 = arith.constant dense<0.000000e+00> : vector<8xf32>
    %318 = vector.multi_reduction <add>, %317, %cst_133 [0] : vector<20x8xf32> to vector<8xf32>
    %319 = vector.shape_cast %318 : vector<8xf32> to vector<1x8xf32>
    %320 = arith.addf %304, %319 : vector<1x8xf32>
    %321 = arith.addf %320, %4 : vector<1x8xf32>
    %c3_134 = arith.constant 3 : index
    %c0_135 = arith.constant 0 : index
    %c0_136 = arith.constant 0 : index
    %322 = vector.load %arg8[%c3_134, %c0_135, %c0_136] : memref<8x1x8xf32, #tpu.memory_space<vmem>>, vector<1x1x8xf32>
    %323 = vector.shape_cast %322 : vector<1x1x8xf32> to vector<1x8xf32>
    %324 = vector.shape_cast %321 : vector<1x8xf32> to vector<1x1x8xf32>
    tpu.vector_store %arg8[%c3_134, %c0_135, %c0_136], %324 {strides = array<i32>} : memref<8x1x8xf32, #tpu.memory_space<vmem>>, vector<1x1x8xf32>,
    %c4 = arith.constant 4 : index
    %c0_137 = arith.constant 0 : index
    %c0_138 = arith.constant 0 : index
    %325 = vector.load %arg1[%c4, %c0_137, %c0_138] : memref<8x20x260xf32, #tpu.memory_space<vmem>>, vector<1x20x260xf32>
    %326 = vector.shape_cast %325 : vector<1x20x260xf32> to vector<20x260xf32>
    %c4_139 = arith.constant 4 : index
    %c0_140 = arith.constant 0 : index
    %c0_141 = arith.constant 0 : index
    %327 = vector.load %arg2[%c4_139, %c0_140, %c0_141] : memref<8x20x16xf32, #tpu.memory_space<vmem>>, vector<1x20x16xf32>
    %328 = vector.shape_cast %327 : vector<1x20x16xf32> to vector<20x16xf32>
    %cst_142 = arith.constant dense<0.000000e+00> : vector<20xf32>
    %329 = vector.multi_reduction <add>, %326, %cst_142 [1] : vector<20x260xf32> to vector<20xf32>
    %330 = vector.shape_cast %329 : vector<20xf32> to vector<20x1xf32>
    %cst_143 = arith.constant 2.600000e+02 : f32
    %331 = vector.broadcast %cst_143 : f32 to vector<20x1xf32>
    %332 = arith.divf %330, %331 : vector<20x1xf32>
    %333 = vector.broadcast %332 : vector<20x1xf32> to vector<20x260xf32>
    %334 = arith.subf %326, %333 : vector<20x260xf32>
    %cst_144 = arith.constant dense<0.000000e+00> : vector<20x20xf32>
    %335 = tpu.matmul %334, %334, %cst_144 {dimension_numbers = #tpu.dot_dimension_numbers<[1], [1], [0], [0], [0, 0, 1, 0], [], []>} : vector<20x260xf32>, vector<20x260xf32>, vector<20x20xf32> -> vector<20x20xf32>
    %336 = arith.mulf %334, %334 : vector<20x260xf32>
    %cst_145 = arith.constant dense<0.000000e+00> : vector<20xf32>
    %337 = vector.multi_reduction <add>, %336, %cst_145 [1] : vector<20x260xf32> to vector<20xf32>
    %338 = vector.shape_cast %337 : vector<20xf32> to vector<20x1xf32>
    %339 = math.rsqrt %338 : vector<20x1xf32>
    %340 = vector.broadcast %339 : vector<20x1xf32> to vector<20x20xf32>
    %341 = arith.mulf %335, %340 : vector<20x20xf32>
    %342 = tpu.transpose %339, [1, 0] : vector<20x1xf32> -> vector<1x20xf32>
    %343 = vector.broadcast %342 : vector<1x20xf32> to vector<20x20xf32>
    %344 = arith.mulf %341, %343 : vector<20x20xf32>
    %cst_146 = arith.constant -1.000000e+00 : f32
    %cst_147 = arith.constant 1.000000e+00 : f32
    %345 = vector.broadcast %cst_146 : f32 to vector<20x20xf32>
    %346 = arith.maximumf %345, %344 : vector<20x20xf32>
    %347 = vector.broadcast %cst_147 : f32 to vector<20x20xf32>
    %348 = arith.minimumf %347, %346 : vector<20x20xf32>
    %cst_148 = arith.constant dense<0.000000e+00> : vector<20xf32>
    %349 = vector.multi_reduction <add>, %328, %cst_148 [1] : vector<20x16xf32> to vector<20xf32>
    %350 = vector.shape_cast %349 : vector<20xf32> to vector<20x1xf32>
    %cst_149 = arith.constant 1.600000e+01 : f32
    %351 = vector.broadcast %cst_149 : f32 to vector<20x1xf32>
    %352 = arith.divf %350, %351 : vector<20x1xf32>
    %353 = vector.broadcast %352 : vector<20x1xf32> to vector<20x16xf32>
    %354 = arith.subf %328, %353 : vector<20x16xf32>
    %cst_150 = arith.constant dense<0.000000e+00> : vector<20x20xf32>
    %355 = tpu.matmul %354, %354, %cst_150 {dimension_numbers = #tpu.dot_dimension_numbers<[1], [1], [0], [0], [0, 0, 1, 0], [], []>} : vector<20x16xf32>, vector<20x16xf32>, vector<20x20xf32> -> vector<20x20xf32>
    %356 = arith.mulf %354, %354 : vector<20x16xf32>
    %cst_151 = arith.constant dense<0.000000e+00> : vector<20xf32>
    %357 = vector.multi_reduction <add>, %356, %cst_151 [1] : vector<20x16xf32> to vector<20xf32>
    %358 = vector.shape_cast %357 : vector<20xf32> to vector<20x1xf32>
    %359 = math.rsqrt %358 : vector<20x1xf32>
    %360 = vector.broadcast %359 : vector<20x1xf32> to vector<20x20xf32>
    %361 = arith.mulf %355, %360 : vector<20x20xf32>
    %362 = tpu.transpose %359, [1, 0] : vector<20x1xf32> -> vector<1x20xf32>
    %363 = vector.broadcast %362 : vector<1x20xf32> to vector<20x20xf32>
    %364 = arith.mulf %361, %363 : vector<20x20xf32>
    %cst_152 = arith.constant -1.000000e+00 : f32
    %cst_153 = arith.constant 1.000000e+00 : f32
    %365 = vector.broadcast %cst_152 : f32 to vector<20x20xf32>
    %366 = arith.maximumf %365, %364 : vector<20x20xf32>
    %367 = vector.broadcast %cst_153 : f32 to vector<20x20xf32>
    %368 = arith.minimumf %367, %366 : vector<20x20xf32>
    %369 = arith.subf %348, %368 : vector<20x20xf32>
    %cst_154 = arith.constant dense<0.000000e+00> : vector<260xf32>
    %370 = vector.multi_reduction <add>, %326, %cst_154 [0] : vector<20x260xf32> to vector<260xf32>
    %371 = vector.shape_cast %370 : vector<260xf32> to vector<1x260xf32>
    %372 = vector.broadcast %371 : vector<1x260xf32> to vector<20x260xf32>
    %373 = arith.mulf %326, %372 : vector<20x260xf32>
    %cst_155 = arith.constant 0.316227764 : f32
    %374 = vector.broadcast %cst_155 : f32 to vector<20x260xf32>
    %375 = arith.mulf %373, %374 : vector<20x260xf32>
    %376 = math.tanh %375 : vector<20x260xf32>
    %377 = math.exp %376 : vector<20x260xf32>
    %378 = arith.mulf %377, %326 : vector<20x260xf32>
    %cst_156 = arith.constant dense<0.000000e+00> : vector<20x26xf32>
    %379 = tpu.matmul %378, %0, %cst_156 {dimension_numbers = #tpu.dot_dimension_numbers<[1], [0], [0], [1], [0, 0, 1, 1], [], []>} : vector<20x260xf32>, vector<260x26xf32>, vector<20x26xf32> -> vector<20x26xf32>
    %cst_157 = arith.constant dense<0.000000e+00> : vector<20x26xf32>
    %380 = tpu.matmul %377, %0, %cst_157 {dimension_numbers = #tpu.dot_dimension_numbers<[1], [0], [0], [1], [0, 0, 1, 1], [], []>} : vector<20x260xf32>, vector<260x26xf32>, vector<20x26xf32> -> vector<20x26xf32>
    %381 = arith.divf %379, %380 : vector<20x26xf32>
    %cst_158 = arith.constant dense<0.000000e+00> : vector<20x8xf32>
    %382 = tpu.matmul %381, %2, %cst_158 {dimension_numbers = #tpu.dot_dimension_numbers<[1], [0], [0], [1], [0, 0, 1, 1], [], []>} : vector<20x26xf32>, vector<26x8xf32>, vector<20x8xf32> -> vector<20x8xf32>
    %cst_159 = arith.constant dense<0.000000e+00> : vector<8xf32>
    %383 = vector.multi_reduction <add>, %382, %cst_159 [0] : vector<20x8xf32> to vector<8xf32>
    %384 = vector.shape_cast %383 : vector<8xf32> to vector<1x8xf32>
    %cst_160 = arith.constant dense<0.000000e+00> : vector<20xf32>
    %385 = vector.multi_reduction <add>, %369, %cst_160 [0] : vector<20x20xf32> to vector<20xf32>
    %386 = vector.shape_cast %385 : vector<20xf32> to vector<1x20xf32>
    %387 = vector.broadcast %386 : vector<1x20xf32> to vector<20x20xf32>
    %388 = arith.mulf %369, %387 : vector<20x20xf32>
    %cst_161 = arith.constant 0.316227764 : f32
    %389 = vector.broadcast %cst_161 : f32 to vector<20x20xf32>
    %390 = arith.mulf %388, %389 : vector<20x20xf32>
    %391 = math.tanh %390 : vector<20x20xf32>
    %392 = math.exp %391 : vector<20x20xf32>
    %393 = arith.mulf %392, %369 : vector<20x20xf32>
    %cst_162 = arith.constant dense<0.000000e+00> : vector<20x2xf32>
    %394 = tpu.matmul %393, %1, %cst_162 {dimension_numbers = #tpu.dot_dimension_numbers<[1], [0], [0], [1], [0, 0, 1, 1], [], []>} : vector<20x20xf32>, vector<20x2xf32>, vector<20x2xf32> -> vector<20x2xf32>
    %cst_163 = arith.constant dense<0.000000e+00> : vector<20x2xf32>
    %395 = tpu.matmul %392, %1, %cst_163 {dimension_numbers = #tpu.dot_dimension_numbers<[1], [0], [0], [1], [0, 0, 1, 1], [], []>} : vector<20x20xf32>, vector<20x2xf32>, vector<20x2xf32> -> vector<20x2xf32>
    %396 = arith.divf %394, %395 : vector<20x2xf32>
    %cst_164 = arith.constant dense<0.000000e+00> : vector<20x8xf32>
    %397 = tpu.matmul %396, %3, %cst_164 {dimension_numbers = #tpu.dot_dimension_numbers<[1], [0], [0], [1], [0, 0, 1, 1], [], []>} : vector<20x2xf32>, vector<2x8xf32>, vector<20x8xf32> -> vector<20x8xf32>
    %cst_165 = arith.constant dense<0.000000e+00> : vector<8xf32>
    %398 = vector.multi_reduction <add>, %397, %cst_165 [0] : vector<20x8xf32> to vector<8xf32>
    %399 = vector.shape_cast %398 : vector<8xf32> to vector<1x8xf32>
    %400 = arith.addf %384, %399 : vector<1x8xf32>
    %401 = arith.addf %400, %4 : vector<1x8xf32>
    %c4_166 = arith.constant 4 : index
    %c0_167 = arith.constant 0 : index
    %c0_168 = arith.constant 0 : index
    %402 = vector.load %arg8[%c4_166, %c0_167, %c0_168] : memref<8x1x8xf32, #tpu.memory_space<vmem>>, vector<1x1x8xf32>
    %403 = vector.shape_cast %402 : vector<1x1x8xf32> to vector<1x8xf32>
    %404 = vector.shape_cast %401 : vector<1x8xf32> to vector<1x1x8xf32>
    tpu.vector_store %arg8[%c4_166, %c0_167, %c0_168], %404 {strides = array<i32>} : memref<8x1x8xf32, #tpu.memory_space<vmem>>, vector<1x1x8xf32>,
    %c5 = arith.constant 5 : index
    %c0_169 = arith.constant 0 : index
    %c0_170 = arith.constant 0 : index
    %405 = vector.load %arg1[%c5, %c0_169, %c0_170] : memref<8x20x260xf32, #tpu.memory_space<vmem>>, vector<1x20x260xf32>
    %406 = vector.shape_cast %405 : vector<1x20x260xf32> to vector<20x260xf32>
    %c5_171 = arith.constant 5 : index
    %c0_172 = arith.constant 0 : index
    %c0_173 = arith.constant 0 : index
    %407 = vector.load %arg2[%c5_171, %c0_172, %c0_173] : memref<8x20x16xf32, #tpu.memory_space<vmem>>, vector<1x20x16xf32>
    %408 = vector.shape_cast %407 : vector<1x20x16xf32> to vector<20x16xf32>
    %cst_174 = arith.constant dense<0.000000e+00> : vector<20xf32>
    %409 = vector.multi_reduction <add>, %406, %cst_174 [1] : vector<20x260xf32> to vector<20xf32>
    %410 = vector.shape_cast %409 : vector<20xf32> to vector<20x1xf32>
    %cst_175 = arith.constant 2.600000e+02 : f32
    %411 = vector.broadcast %cst_175 : f32 to vector<20x1xf32>
    %412 = arith.divf %410, %411 : vector<20x1xf32>
    %413 = vector.broadcast %412 : vector<20x1xf32> to vector<20x260xf32>
    %414 = arith.subf %406, %413 : vector<20x260xf32>
    %cst_176 = arith.constant dense<0.000000e+00> : vector<20x20xf32>
    %415 = tpu.matmul %414, %414, %cst_176 {dimension_numbers = #tpu.dot_dimension_numbers<[1], [1], [0], [0], [0, 0, 1, 0], [], []>} : vector<20x260xf32>, vector<20x260xf32>, vector<20x20xf32> -> vector<20x20xf32>
    %416 = arith.mulf %414, %414 : vector<20x260xf32>
    %cst_177 = arith.constant dense<0.000000e+00> : vector<20xf32>
    %417 = vector.multi_reduction <add>, %416, %cst_177 [1] : vector<20x260xf32> to vector<20xf32>
    %418 = vector.shape_cast %417 : vector<20xf32> to vector<20x1xf32>
    %419 = math.rsqrt %418 : vector<20x1xf32>
    %420 = vector.broadcast %419 : vector<20x1xf32> to vector<20x20xf32>
    %421 = arith.mulf %415, %420 : vector<20x20xf32>
    %422 = tpu.transpose %419, [1, 0] : vector<20x1xf32> -> vector<1x20xf32>
    %423 = vector.broadcast %422 : vector<1x20xf32> to vector<20x20xf32>
    %424 = arith.mulf %421, %423 : vector<20x20xf32>
    %cst_178 = arith.constant -1.000000e+00 : f32
    %cst_179 = arith.constant 1.000000e+00 : f32
    %425 = vector.broadcast %cst_178 : f32 to vector<20x20xf32>
    %426 = arith.maximumf %425, %424 : vector<20x20xf32>
    %427 = vector.broadcast %cst_179 : f32 to vector<20x20xf32>
    %428 = arith.minimumf %427, %426 : vector<20x20xf32>
    %cst_180 = arith.constant dense<0.000000e+00> : vector<20xf32>
    %429 = vector.multi_reduction <add>, %408, %cst_180 [1] : vector<20x16xf32> to vector<20xf32>
    %430 = vector.shape_cast %429 : vector<20xf32> to vector<20x1xf32>
    %cst_181 = arith.constant 1.600000e+01 : f32
    %431 = vector.broadcast %cst_181 : f32 to vector<20x1xf32>
    %432 = arith.divf %430, %431 : vector<20x1xf32>
    %433 = vector.broadcast %432 : vector<20x1xf32> to vector<20x16xf32>
    %434 = arith.subf %408, %433 : vector<20x16xf32>
    %cst_182 = arith.constant dense<0.000000e+00> : vector<20x20xf32>
    %435 = tpu.matmul %434, %434, %cst_182 {dimension_numbers = #tpu.dot_dimension_numbers<[1], [1], [0], [0], [0, 0, 1, 0], [], []>} : vector<20x16xf32>, vector<20x16xf32>, vector<20x20xf32> -> vector<20x20xf32>
    %436 = arith.mulf %434, %434 : vector<20x16xf32>
    %cst_183 = arith.constant dense<0.000000e+00> : vector<20xf32>
    %437 = vector.multi_reduction <add>, %436, %cst_183 [1] : vector<20x16xf32> to vector<20xf32>
    %438 = vector.shape_cast %437 : vector<20xf32> to vector<20x1xf32>
    %439 = math.rsqrt %438 : vector<20x1xf32>
    %440 = vector.broadcast %439 : vector<20x1xf32> to vector<20x20xf32>
    %441 = arith.mulf %435, %440 : vector<20x20xf32>
    %442 = tpu.transpose %439, [1, 0] : vector<20x1xf32> -> vector<1x20xf32>
    %443 = vector.broadcast %442 : vector<1x20xf32> to vector<20x20xf32>
    %444 = arith.mulf %441, %443 : vector<20x20xf32>
    %cst_184 = arith.constant -1.000000e+00 : f32
    %cst_185 = arith.constant 1.000000e+00 : f32
    %445 = vector.broadcast %cst_184 : f32 to vector<20x20xf32>
    %446 = arith.maximumf %445, %444 : vector<20x20xf32>
    %447 = vector.broadcast %cst_185 : f32 to vector<20x20xf32>
    %448 = arith.minimumf %447, %446 : vector<20x20xf32>
    %449 = arith.subf %428, %448 : vector<20x20xf32>
    %cst_186 = arith.constant dense<0.000000e+00> : vector<260xf32>
    %450 = vector.multi_reduction <add>, %406, %cst_186 [0] : vector<20x260xf32> to vector<260xf32>
    %451 = vector.shape_cast %450 : vector<260xf32> to vector<1x260xf32>
    %452 = vector.broadcast %451 : vector<1x260xf32> to vector<20x260xf32>
    %453 = arith.mulf %406, %452 : vector<20x260xf32>
    %cst_187 = arith.constant 0.316227764 : f32
    %454 = vector.broadcast %cst_187 : f32 to vector<20x260xf32>
    %455 = arith.mulf %453, %454 : vector<20x260xf32>
    %456 = math.tanh %455 : vector<20x260xf32>
    %457 = math.exp %456 : vector<20x260xf32>
    %458 = arith.mulf %457, %406 : vector<20x260xf32>
    %cst_188 = arith.constant dense<0.000000e+00> : vector<20x26xf32>
    %459 = tpu.matmul %458, %0, %cst_188 {dimension_numbers = #tpu.dot_dimension_numbers<[1], [0], [0], [1], [0, 0, 1, 1], [], []>} : vector<20x260xf32>, vector<260x26xf32>, vector<20x26xf32> -> vector<20x26xf32>
    %cst_189 = arith.constant dense<0.000000e+00> : vector<20x26xf32>
    %460 = tpu.matmul %457, %0, %cst_189 {dimension_numbers = #tpu.dot_dimension_numbers<[1], [0], [0], [1], [0, 0, 1, 1], [], []>} : vector<20x260xf32>, vector<260x26xf32>, vector<20x26xf32> -> vector<20x26xf32>
    %461 = arith.divf %459, %460 : vector<20x26xf32>
    %cst_190 = arith.constant dense<0.000000e+00> : vector<20x8xf32>
    %462 = tpu.matmul %461, %2, %cst_190 {dimension_numbers = #tpu.dot_dimension_numbers<[1], [0], [0], [1], [0, 0, 1, 1], [], []>} : vector<20x26xf32>, vector<26x8xf32>, vector<20x8xf32> -> vector<20x8xf32>
    %cst_191 = arith.constant dense<0.000000e+00> : vector<8xf32>
    %463 = vector.multi_reduction <add>, %462, %cst_191 [0] : vector<20x8xf32> to vector<8xf32>
    %464 = vector.shape_cast %463 : vector<8xf32> to vector<1x8xf32>
    %cst_192 = arith.constant dense<0.000000e+00> : vector<20xf32>
    %465 = vector.multi_reduction <add>, %449, %cst_192 [0] : vector<20x20xf32> to vector<20xf32>
    %466 = vector.shape_cast %465 : vector<20xf32> to vector<1x20xf32>
    %467 = vector.broadcast %466 : vector<1x20xf32> to vector<20x20xf32>
    %468 = arith.mulf %449, %467 : vector<20x20xf32>
    %cst_193 = arith.constant 0.316227764 : f32
    %469 = vector.broadcast %cst_193 : f32 to vector<20x20xf32>
    %470 = arith.mulf %468, %469 : vector<20x20xf32>
    %471 = math.tanh %470 : vector<20x20xf32>
    %472 = math.exp %471 : vector<20x20xf32>
    %473 = arith.mulf %472, %449 : vector<20x20xf32>
    %cst_194 = arith.constant dense<0.000000e+00> : vector<20x2xf32>
    %474 = tpu.matmul %473, %1, %cst_194 {dimension_numbers = #tpu.dot_dimension_numbers<[1], [0], [0], [1], [0, 0, 1, 1], [], []>} : vector<20x20xf32>, vector<20x2xf32>, vector<20x2xf32> -> vector<20x2xf32>
    %cst_195 = arith.constant dense<0.000000e+00> : vector<20x2xf32>
    %475 = tpu.matmul %472, %1, %cst_195 {dimension_numbers = #tpu.dot_dimension_numbers<[1], [0], [0], [1], [0, 0, 1, 1], [], []>} : vector<20x20xf32>, vector<20x2xf32>, vector<20x2xf32> -> vector<20x2xf32>
    %476 = arith.divf %474, %475 : vector<20x2xf32>
    %cst_196 = arith.constant dense<0.000000e+00> : vector<20x8xf32>
    %477 = tpu.matmul %476, %3, %cst_196 {dimension_numbers = #tpu.dot_dimension_numbers<[1], [0], [0], [1], [0, 0, 1, 1], [], []>} : vector<20x2xf32>, vector<2x8xf32>, vector<20x8xf32> -> vector<20x8xf32>
    %cst_197 = arith.constant dense<0.000000e+00> : vector<8xf32>
    %478 = vector.multi_reduction <add>, %477, %cst_197 [0] : vector<20x8xf32> to vector<8xf32>
    %479 = vector.shape_cast %478 : vector<8xf32> to vector<1x8xf32>
    %480 = arith.addf %464, %479 : vector<1x8xf32>
    %481 = arith.addf %480, %4 : vector<1x8xf32>
    %c5_198 = arith.constant 5 : index
    %c0_199 = arith.constant 0 : index
    %c0_200 = arith.constant 0 : index
    %482 = vector.load %arg8[%c5_198, %c0_199, %c0_200] : memref<8x1x8xf32, #tpu.memory_space<vmem>>, vector<1x1x8xf32>
    %483 = vector.shape_cast %482 : vector<1x1x8xf32> to vector<1x8xf32>
    %484 = vector.shape_cast %481 : vector<1x8xf32> to vector<1x1x8xf32>
    tpu.vector_store %arg8[%c5_198, %c0_199, %c0_200], %484 {strides = array<i32>} : memref<8x1x8xf32, #tpu.memory_space<vmem>>, vector<1x1x8xf32>,
    %c6 = arith.constant 6 : index
    %c0_201 = arith.constant 0 : index
    %c0_202 = arith.constant 0 : index
    %485 = vector.load %arg1[%c6, %c0_201, %c0_202] : memref<8x20x260xf32, #tpu.memory_space<vmem>>, vector<1x20x260xf32>
    %486 = vector.shape_cast %485 : vector<1x20x260xf32> to vector<20x260xf32>
    %c6_203 = arith.constant 6 : index
    %c0_204 = arith.constant 0 : index
    %c0_205 = arith.constant 0 : index
    %487 = vector.load %arg2[%c6_203, %c0_204, %c0_205] : memref<8x20x16xf32, #tpu.memory_space<vmem>>, vector<1x20x16xf32>
    %488 = vector.shape_cast %487 : vector<1x20x16xf32> to vector<20x16xf32>
    %cst_206 = arith.constant dense<0.000000e+00> : vector<20xf32>
    %489 = vector.multi_reduction <add>, %486, %cst_206 [1] : vector<20x260xf32> to vector<20xf32>
    %490 = vector.shape_cast %489 : vector<20xf32> to vector<20x1xf32>
    %cst_207 = arith.constant 2.600000e+02 : f32
    %491 = vector.broadcast %cst_207 : f32 to vector<20x1xf32>
    %492 = arith.divf %490, %491 : vector<20x1xf32>
    %493 = vector.broadcast %492 : vector<20x1xf32> to vector<20x260xf32>
    %494 = arith.subf %486, %493 : vector<20x260xf32>
    %cst_208 = arith.constant dense<0.000000e+00> : vector<20x20xf32>
    %495 = tpu.matmul %494, %494, %cst_208 {dimension_numbers = #tpu.dot_dimension_numbers<[1], [1], [0], [0], [0, 0, 1, 0], [], []>} : vector<20x260xf32>, vector<20x260xf32>, vector<20x20xf32> -> vector<20x20xf32>
    %496 = arith.mulf %494, %494 : vector<20x260xf32>
    %cst_209 = arith.constant dense<0.000000e+00> : vector<20xf32>
    %497 = vector.multi_reduction <add>, %496, %cst_209 [1] : vector<20x260xf32> to vector<20xf32>
    %498 = vector.shape_cast %497 : vector<20xf32> to vector<20x1xf32>
    %499 = math.rsqrt %498 : vector<20x1xf32>
    %500 = vector.broadcast %499 : vector<20x1xf32> to vector<20x20xf32>
    %501 = arith.mulf %495, %500 : vector<20x20xf32>
    %502 = tpu.transpose %499, [1, 0] : vector<20x1xf32> -> vector<1x20xf32>
    %503 = vector.broadcast %502 : vector<1x20xf32> to vector<20x20xf32>
    %504 = arith.mulf %501, %503 : vector<20x20xf32>
    %cst_210 = arith.constant -1.000000e+00 : f32
    %cst_211 = arith.constant 1.000000e+00 : f32
    %505 = vector.broadcast %cst_210 : f32 to vector<20x20xf32>
    %506 = arith.maximumf %505, %504 : vector<20x20xf32>
    %507 = vector.broadcast %cst_211 : f32 to vector<20x20xf32>
    %508 = arith.minimumf %507, %506 : vector<20x20xf32>
    %cst_212 = arith.constant dense<0.000000e+00> : vector<20xf32>
    %509 = vector.multi_reduction <add>, %488, %cst_212 [1] : vector<20x16xf32> to vector<20xf32>
    %510 = vector.shape_cast %509 : vector<20xf32> to vector<20x1xf32>
    %cst_213 = arith.constant 1.600000e+01 : f32
    %511 = vector.broadcast %cst_213 : f32 to vector<20x1xf32>
    %512 = arith.divf %510, %511 : vector<20x1xf32>
    %513 = vector.broadcast %512 : vector<20x1xf32> to vector<20x16xf32>
    %514 = arith.subf %488, %513 : vector<20x16xf32>
    %cst_214 = arith.constant dense<0.000000e+00> : vector<20x20xf32>
    %515 = tpu.matmul %514, %514, %cst_214 {dimension_numbers = #tpu.dot_dimension_numbers<[1], [1], [0], [0], [0, 0, 1, 0], [], []>} : vector<20x16xf32>, vector<20x16xf32>, vector<20x20xf32> -> vector<20x20xf32>
    %516 = arith.mulf %514, %514 : vector<20x16xf32>
    %cst_215 = arith.constant dense<0.000000e+00> : vector<20xf32>
    %517 = vector.multi_reduction <add>, %516, %cst_215 [1] : vector<20x16xf32> to vector<20xf32>
    %518 = vector.shape_cast %517 : vector<20xf32> to vector<20x1xf32>
    %519 = math.rsqrt %518 : vector<20x1xf32>
    %520 = vector.broadcast %519 : vector<20x1xf32> to vector<20x20xf32>
    %521 = arith.mulf %515, %520 : vector<20x20xf32>
    %522 = tpu.transpose %519, [1, 0] : vector<20x1xf32> -> vector<1x20xf32>
    %523 = vector.broadcast %522 : vector<1x20xf32> to vector<20x20xf32>
    %524 = arith.mulf %521, %523 : vector<20x20xf32>
    %cst_216 = arith.constant -1.000000e+00 : f32
    %cst_217 = arith.constant 1.000000e+00 : f32
    %525 = vector.broadcast %cst_216 : f32 to vector<20x20xf32>
    %526 = arith.maximumf %525, %524 : vector<20x20xf32>
    %527 = vector.broadcast %cst_217 : f32 to vector<20x20xf32>
    %528 = arith.minimumf %527, %526 : vector<20x20xf32>
    %529 = arith.subf %508, %528 : vector<20x20xf32>
    %cst_218 = arith.constant dense<0.000000e+00> : vector<260xf32>
    %530 = vector.multi_reduction <add>, %486, %cst_218 [0] : vector<20x260xf32> to vector<260xf32>
    %531 = vector.shape_cast %530 : vector<260xf32> to vector<1x260xf32>
    %532 = vector.broadcast %531 : vector<1x260xf32> to vector<20x260xf32>
    %533 = arith.mulf %486, %532 : vector<20x260xf32>
    %cst_219 = arith.constant 0.316227764 : f32
    %534 = vector.broadcast %cst_219 : f32 to vector<20x260xf32>
    %535 = arith.mulf %533, %534 : vector<20x260xf32>
    %536 = math.tanh %535 : vector<20x260xf32>
    %537 = math.exp %536 : vector<20x260xf32>
    %538 = arith.mulf %537, %486 : vector<20x260xf32>
    %cst_220 = arith.constant dense<0.000000e+00> : vector<20x26xf32>
    %539 = tpu.matmul %538, %0, %cst_220 {dimension_numbers = #tpu.dot_dimension_numbers<[1], [0], [0], [1], [0, 0, 1, 1], [], []>} : vector<20x260xf32>, vector<260x26xf32>, vector<20x26xf32> -> vector<20x26xf32>
    %cst_221 = arith.constant dense<0.000000e+00> : vector<20x26xf32>
    %540 = tpu.matmul %537, %0, %cst_221 {dimension_numbers = #tpu.dot_dimension_numbers<[1], [0], [0], [1], [0, 0, 1, 1], [], []>} : vector<20x260xf32>, vector<260x26xf32>, vector<20x26xf32> -> vector<20x26xf32>
    %541 = arith.divf %539, %540 : vector<20x26xf32>
    %cst_222 = arith.constant dense<0.000000e+00> : vector<20x8xf32>
    %542 = tpu.matmul %541, %2, %cst_222 {dimension_numbers = #tpu.dot_dimension_numbers<[1], [0], [0], [1], [0, 0, 1, 1], [], []>} : vector<20x26xf32>, vector<26x8xf32>, vector<20x8xf32> -> vector<20x8xf32>
    %cst_223 = arith.constant dense<0.000000e+00> : vector<8xf32>
    %543 = vector.multi_reduction <add>, %542, %cst_223 [0] : vector<20x8xf32> to vector<8xf32>
    %544 = vector.shape_cast %543 : vector<8xf32> to vector<1x8xf32>
    %cst_224 = arith.constant dense<0.000000e+00> : vector<20xf32>
    %545 = vector.multi_reduction <add>, %529, %cst_224 [0] : vector<20x20xf32> to vector<20xf32>
    %546 = vector.shape_cast %545 : vector<20xf32> to vector<1x20xf32>
    %547 = vector.broadcast %546 : vector<1x20xf32> to vector<20x20xf32>
    %548 = arith.mulf %529, %547 : vector<20x20xf32>
    %cst_225 = arith.constant 0.316227764 : f32
    %549 = vector.broadcast %cst_225 : f32 to vector<20x20xf32>
    %550 = arith.mulf %548, %549 : vector<20x20xf32>
    %551 = math.tanh %550 : vector<20x20xf32>
    %552 = math.exp %551 : vector<20x20xf32>
    %553 = arith.mulf %552, %529 : vector<20x20xf32>
    %cst_226 = arith.constant dense<0.000000e+00> : vector<20x2xf32>
    %554 = tpu.matmul %553, %1, %cst_226 {dimension_numbers = #tpu.dot_dimension_numbers<[1], [0], [0], [1], [0, 0, 1, 1], [], []>} : vector<20x20xf32>, vector<20x2xf32>, vector<20x2xf32> -> vector<20x2xf32>
    %cst_227 = arith.constant dense<0.000000e+00> : vector<20x2xf32>
    %555 = tpu.matmul %552, %1, %cst_227 {dimension_numbers = #tpu.dot_dimension_numbers<[1], [0], [0], [1], [0, 0, 1, 1], [], []>} : vector<20x20xf32>, vector<20x2xf32>, vector<20x2xf32> -> vector<20x2xf32>
    %556 = arith.divf %554, %555 : vector<20x2xf32>
    %cst_228 = arith.constant dense<0.000000e+00> : vector<20x8xf32>
    %557 = tpu.matmul %556, %3, %cst_228 {dimension_numbers = #tpu.dot_dimension_numbers<[1], [0], [0], [1], [0, 0, 1, 1], [], []>} : vector<20x2xf32>, vector<2x8xf32>, vector<20x8xf32> -> vector<20x8xf32>
    %cst_229 = arith.constant dense<0.000000e+00> : vector<8xf32>
    %558 = vector.multi_reduction <add>, %557, %cst_229 [0] : vector<20x8xf32> to vector<8xf32>
    %559 = vector.shape_cast %558 : vector<8xf32> to vector<1x8xf32>
    %560 = arith.addf %544, %559 : vector<1x8xf32>
    %561 = arith.addf %560, %4 : vector<1x8xf32>
    %c6_230 = arith.constant 6 : index
    %c0_231 = arith.constant 0 : index
    %c0_232 = arith.constant 0 : index
    %562 = vector.load %arg8[%c6_230, %c0_231, %c0_232] : memref<8x1x8xf32, #tpu.memory_space<vmem>>, vector<1x1x8xf32>
    %563 = vector.shape_cast %562 : vector<1x1x8xf32> to vector<1x8xf32>
    %564 = vector.shape_cast %561 : vector<1x8xf32> to vector<1x1x8xf32>
    tpu.vector_store %arg8[%c6_230, %c0_231, %c0_232], %564 {strides = array<i32>} : memref<8x1x8xf32, #tpu.memory_space<vmem>>, vector<1x1x8xf32>,
    %c7 = arith.constant 7 : index
    %c0_233 = arith.constant 0 : index
    %c0_234 = arith.constant 0 : index
    %565 = vector.load %arg1[%c7, %c0_233, %c0_234] : memref<8x20x260xf32, #tpu.memory_space<vmem>>, vector<1x20x260xf32>
    %566 = vector.shape_cast %565 : vector<1x20x260xf32> to vector<20x260xf32>
    %c7_235 = arith.constant 7 : index
    %c0_236 = arith.constant 0 : index
    %c0_237 = arith.constant 0 : index
    %567 = vector.load %arg2[%c7_235, %c0_236, %c0_237] : memref<8x20x16xf32, #tpu.memory_space<vmem>>, vector<1x20x16xf32>
    %568 = vector.shape_cast %567 : vector<1x20x16xf32> to vector<20x16xf32>
    %cst_238 = arith.constant dense<0.000000e+00> : vector<20xf32>
    %569 = vector.multi_reduction <add>, %566, %cst_238 [1] : vector<20x260xf32> to vector<20xf32>
    %570 = vector.shape_cast %569 : vector<20xf32> to vector<20x1xf32>
    %cst_239 = arith.constant 2.600000e+02 : f32
    %571 = vector.broadcast %cst_239 : f32 to vector<20x1xf32>
    %572 = arith.divf %570, %571 : vector<20x1xf32>
    %573 = vector.broadcast %572 : vector<20x1xf32> to vector<20x260xf32>
    %574 = arith.subf %566, %573 : vector<20x260xf32>
    %cst_240 = arith.constant dense<0.000000e+00> : vector<20x20xf32>
    %575 = tpu.matmul %574, %574, %cst_240 {dimension_numbers = #tpu.dot_dimension_numbers<[1], [1], [0], [0], [0, 0, 1, 0], [], []>} : vector<20x260xf32>, vector<20x260xf32>, vector<20x20xf32> -> vector<20x20xf32>
    %576 = arith.mulf %574, %574 : vector<20x260xf32>
    %cst_241 = arith.constant dense<0.000000e+00> : vector<20xf32>
    %577 = vector.multi_reduction <add>, %576, %cst_241 [1] : vector<20x260xf32> to vector<20xf32>
    %578 = vector.shape_cast %577 : vector<20xf32> to vector<20x1xf32>
    %579 = math.rsqrt %578 : vector<20x1xf32>
    %580 = vector.broadcast %579 : vector<20x1xf32> to vector<20x20xf32>
    %581 = arith.mulf %575, %580 : vector<20x20xf32>
    %582 = tpu.transpose %579, [1, 0] : vector<20x1xf32> -> vector<1x20xf32>
    %583 = vector.broadcast %582 : vector<1x20xf32> to vector<20x20xf32>
    %584 = arith.mulf %581, %583 : vector<20x20xf32>
    %cst_242 = arith.constant -1.000000e+00 : f32
    %cst_243 = arith.constant 1.000000e+00 : f32
    %585 = vector.broadcast %cst_242 : f32 to vector<20x20xf32>
    %586 = arith.maximumf %585, %584 : vector<20x20xf32>
    %587 = vector.broadcast %cst_243 : f32 to vector<20x20xf32>
    %588 = arith.minimumf %587, %586 : vector<20x20xf32>
    %cst_244 = arith.constant dense<0.000000e+00> : vector<20xf32>
    %589 = vector.multi_reduction <add>, %568, %cst_244 [1] : vector<20x16xf32> to vector<20xf32>
    %590 = vector.shape_cast %589 : vector<20xf32> to vector<20x1xf32>
    %cst_245 = arith.constant 1.600000e+01 : f32
    %591 = vector.broadcast %cst_245 : f32 to vector<20x1xf32>
    %592 = arith.divf %590, %591 : vector<20x1xf32>
    %593 = vector.broadcast %592 : vector<20x1xf32> to vector<20x16xf32>
    %594 = arith.subf %568, %593 : vector<20x16xf32>
    %cst_246 = arith.constant dense<0.000000e+00> : vector<20x20xf32>
    %595 = tpu.matmul %594, %594, %cst_246 {dimension_numbers = #tpu.dot_dimension_numbers<[1], [1], [0], [0], [0, 0, 1, 0], [], []>} : vector<20x16xf32>, vector<20x16xf32>, vector<20x20xf32> -> vector<20x20xf32>
    %596 = arith.mulf %594, %594 : vector<20x16xf32>
    %cst_247 = arith.constant dense<0.000000e+00> : vector<20xf32>
    %597 = vector.multi_reduction <add>, %596, %cst_247 [1] : vector<20x16xf32> to vector<20xf32>
    %598 = vector.shape_cast %597 : vector<20xf32> to vector<20x1xf32>
    %599 = math.rsqrt %598 : vector<20x1xf32>
    %600 = vector.broadcast %599 : vector<20x1xf32> to vector<20x20xf32>
    %601 = arith.mulf %595, %600 : vector<20x20xf32>
    %602 = tpu.transpose %599, [1, 0] : vector<20x1xf32> -> vector<1x20xf32>
    %603 = vector.broadcast %602 : vector<1x20xf32> to vector<20x20xf32>
    %604 = arith.mulf %601, %603 : vector<20x20xf32>
    %cst_248 = arith.constant -1.000000e+00 : f32
    %cst_249 = arith.constant 1.000000e+00 : f32
    %605 = vector.broadcast %cst_248 : f32 to vector<20x20xf32>
    %606 = arith.maximumf %605, %604 : vector<20x20xf32>
    %607 = vector.broadcast %cst_249 : f32 to vector<20x20xf32>
    %608 = arith.minimumf %607, %606 : vector<20x20xf32>
    %609 = arith.subf %588, %608 : vector<20x20xf32>
    %cst_250 = arith.constant dense<0.000000e+00> : vector<260xf32>
    %610 = vector.multi_reduction <add>, %566, %cst_250 [0] : vector<20x260xf32> to vector<260xf32>
    %611 = vector.shape_cast %610 : vector<260xf32> to vector<1x260xf32>
    %612 = vector.broadcast %611 : vector<1x260xf32> to vector<20x260xf32>
    %613 = arith.mulf %566, %612 : vector<20x260xf32>
    %cst_251 = arith.constant 0.316227764 : f32
    %614 = vector.broadcast %cst_251 : f32 to vector<20x260xf32>
    %615 = arith.mulf %613, %614 : vector<20x260xf32>
    %616 = math.tanh %615 : vector<20x260xf32>
    %617 = math.exp %616 : vector<20x260xf32>
    %618 = arith.mulf %617, %566 : vector<20x260xf32>
    %cst_252 = arith.constant dense<0.000000e+00> : vector<20x26xf32>
    %619 = tpu.matmul %618, %0, %cst_252 {dimension_numbers = #tpu.dot_dimension_numbers<[1], [0], [0], [1], [0, 0, 1, 1], [], []>} : vector<20x260xf32>, vector<260x26xf32>, vector<20x26xf32> -> vector<20x26xf32>
    %cst_253 = arith.constant dense<0.000000e+00> : vector<20x26xf32>
    %620 = tpu.matmul %617, %0, %cst_253 {dimension_numbers = #tpu.dot_dimension_numbers<[1], [0], [0], [1], [0, 0, 1, 1], [], []>} : vector<20x260xf32>, vector<260x26xf32>, vector<20x26xf32> -> vector<20x26xf32>
    %621 = arith.divf %619, %620 : vector<20x26xf32>
    %cst_254 = arith.constant dense<0.000000e+00> : vector<20x8xf32>
    %622 = tpu.matmul %621, %2, %cst_254 {dimension_numbers = #tpu.dot_dimension_numbers<[1], [0], [0], [1], [0, 0, 1, 1], [], []>} : vector<20x26xf32>, vector<26x8xf32>, vector<20x8xf32> -> vector<20x8xf32>
    %cst_255 = arith.constant dense<0.000000e+00> : vector<8xf32>
    %623 = vector.multi_reduction <add>, %622, %cst_255 [0] : vector<20x8xf32> to vector<8xf32>
    %624 = vector.shape_cast %623 : vector<8xf32> to vector<1x8xf32>
    %cst_256 = arith.constant dense<0.000000e+00> : vector<20xf32>
    %625 = vector.multi_reduction <add>, %609, %cst_256 [0] : vector<20x20xf32> to vector<20xf32>
    %626 = vector.shape_cast %625 : vector<20xf32> to vector<1x20xf32>
    %627 = vector.broadcast %626 : vector<1x20xf32> to vector<20x20xf32>
    %628 = arith.mulf %609, %627 : vector<20x20xf32>
    %cst_257 = arith.constant 0.316227764 : f32
    %629 = vector.broadcast %cst_257 : f32 to vector<20x20xf32>
    %630 = arith.mulf %628, %629 : vector<20x20xf32>
    %631 = math.tanh %630 : vector<20x20xf32>
    %632 = math.exp %631 : vector<20x20xf32>
    %633 = arith.mulf %632, %609 : vector<20x20xf32>
    %cst_258 = arith.constant dense<0.000000e+00> : vector<20x2xf32>
    %634 = tpu.matmul %633, %1, %cst_258 {dimension_numbers = #tpu.dot_dimension_numbers<[1], [0], [0], [1], [0, 0, 1, 1], [], []>} : vector<20x20xf32>, vector<20x2xf32>, vector<20x2xf32> -> vector<20x2xf32>
    %cst_259 = arith.constant dense<0.000000e+00> : vector<20x2xf32>
    %635 = tpu.matmul %632, %1, %cst_259 {dimension_numbers = #tpu.dot_dimension_numbers<[1], [0], [0], [1], [0, 0, 1, 1], [], []>} : vector<20x20xf32>, vector<20x2xf32>, vector<20x2xf32> -> vector<20x2xf32>
    %636 = arith.divf %634, %635 : vector<20x2xf32>
    %cst_260 = arith.constant dense<0.000000e+00> : vector<20x8xf32>
    %637 = tpu.matmul %636, %3, %cst_260 {dimension_numbers = #tpu.dot_dimension_numbers<[1], [0], [0], [1], [0, 0, 1, 1], [], []>} : vector<20x2xf32>, vector<2x8xf32>, vector<20x8xf32> -> vector<20x8xf32>
    %cst_261 = arith.constant dense<0.000000e+00> : vector<8xf32>
    %638 = vector.multi_reduction <add>, %637, %cst_261 [0] : vector<20x8xf32> to vector<8xf32>
    %639 = vector.shape_cast %638 : vector<8xf32> to vector<1x8xf32>
    %640 = arith.addf %624, %639 : vector<1x8xf32>
    %641 = arith.addf %640, %4 : vector<1x8xf32>
    %c7_262 = arith.constant 7 : index
    %c0_263 = arith.constant 0 : index
    %c0_264 = arith.constant 0 : index
    %642 = vector.load %arg8[%c7_262, %c0_263, %c0_264] : memref<8x1x8xf32, #tpu.memory_space<vmem>>, vector<1x1x8xf32>
    %643 = vector.shape_cast %642 : vector<1x1x8xf32> to vector<1x8xf32>
    %644 = vector.shape_cast %641 : vector<1x8xf32> to vector<1x1x8xf32>
    tpu.vector_store %arg8[%c7_262, %c0_263, %c0_264], %644 {strides = array<i32>} : memref<8x1x8xf32, #tpu.memory_space<vmem>>, vector<1x1x8xf32>,
    return
  }
  func.func @transform_0(%arg0: i32) -> (i32, i32, i32) {
    %c0_i32 = arith.constant 0 : i32
    %c0_i32_0 = arith.constant 0 : i32
    %c0_i32_1 = arith.constant 0 : i32
    return %arg0, %c0_i32, %c0_i32_0 : i32, i32, i32
  }
  func.func @transform_1(%arg0: i32) -> (i32, i32, i32) {
    %c0_i32 = arith.constant 0 : i32
    %c0_i32_0 = arith.constant 0 : i32
    %c0_i32_1 = arith.constant 0 : i32
    return %arg0, %c0_i32, %c0_i32_0 : i32, i32, i32
  }
  func.func @transform_2(%arg0: i32) -> (i32, i32) {
    %c0_i32 = arith.constant 0 : i32
    %c0_i32_0 = arith.constant 0 : i32
    %c0_i32_1 = arith.constant 0 : i32
    return %c0_i32, %c0_i32_0 : i32, i32
  }
  func.func @transform_3(%arg0: i32) -> (i32, i32) {
    %c0_i32 = arith.constant 0 : i32
    %c0_i32_0 = arith.constant 0 : i32
    %c0_i32_1 = arith.constant 0 : i32
    return %c0_i32, %c0_i32_0 : i32, i32
  }
  func.func @transform_4(%arg0: i32) -> (i32, i32) {
    %c0_i32 = arith.constant 0 : i32
    %c0_i32_0 = arith.constant 0 : i32
    %c0_i32_1 = arith.constant 0 : i32
    return %c0_i32, %c0_i32_0 : i32, i32
  }
  func.func @transform_5(%arg0: i32) -> (i32, i32) {
    %c0_i32 = arith.constant 0 : i32
    %c0_i32_0 = arith.constant 0 : i32
    %c0_i32_1 = arith.constant 0 : i32
    return %c0_i32, %c0_i32_0 : i32, i32
  }
  func.func @transform_6(%arg0: i32) -> (i32, i32) {
    %c0_i32 = arith.constant 0 : i32
    %c0_i32_0 = arith.constant 0 : i32
    %c0_i32_1 = arith.constant 0 : i32
    return %c0_i32, %c0_i32_0 : i32, i32
  }
  func.func @transform_7(%arg0: i32) -> (i32, i32, i32) {
    %c0_i32 = arith.constant 0 : i32
    %c0_i32_0 = arith.constant 0 : i32
    %c0_i32_1 = arith.constant 0 : i32
    return %arg0, %c0_i32, %c0_i32_0 : i32, i32, i32
  }
}

</mosaic_0001>

<bundles_post_ra>
// kernel: _lambda_.1
= control target key start
LH: loop header
LB: loop body
LE: loop exit
PB: predicated region body
PF: predicated region fallthrough
CT: control target
= control target key end

     0   :  { %s14600_s24 = smov 0   ;;  %s18360_s0 = inlined_call_operand.vmem [shape: f32[16,20,260], index: 0, kind: input, shape index: {}]   ;;  %s18361_s1 = inlined_call_operand.vmem [shape: f32[16,20,16], index: 1, kind: input, shape index: {}]   ;;  %s18362_s2 = inlined_call_operand.vmem [shape: f32[260,26], index: 2, kind: input, shape index: {}]   ;;  %s18363_s3 = inlined_call_operand.vmem [shape: f32[20,2], index: 3, kind: input, shape index: {}]   ;;  %s18364_s4 = inlined_call_operand.vmem [shape: f32[26,8], index: 4, kind: input, shape index: {}]   ;;  %s18365_s5 = inlined_call_operand.vmem [shape: f32[2,8], index: 5, kind: input, shape index: {}]   ;;  %s18366_s6 = inlined_call_operand.vmem [shape: f32[1,8], index: 6, kind: input, shape index: {}]   ;;  %s18367_s7 = inlined_call_operand.vmem [shape: f32[16,1,8], index: 7, kind: output, shape index: {}]  }
   0x1 LB: > { %s10820_s25 = sadd.s32 4294967295, %s14554_s24   ;;  %p10824_p0 = scmp.ge.s32.totalorder %s14554_s24, 1  ;;  %s14554_s24 = sphi %s14600_s24, %s17_s24  }
   0x2   : > { %p251_p1 = scmp.lt.s32.totalorder %s14554_s24, 3 }
   0x4   : > { %p252_p2 = pnand %p10824_p0, %p251_p1 }
   0x6   : > { %255 = sbr.rel (%p252_p2) target bundleno = 4628 (0x1214), region = 48 }
   0xd   : > { %s10825_s26 = sshll.u32 %s10820_s25, 3  ;;  %vm363_vm0 = vcmask 31744   ;;  %vm373_vm1 = vcmask 1043456   ;;  %vm377_vm2 = vcmask 27648   ;;  %vm641_vm3 = vcmask 130048  }
   0xe   : > { %p290_p3 = scmp.lt.s32.totalorder %s10825_s26, 15  ;;  %vm648_vm4 = vcmask 125952   ;;  %v18368_v28 = vmov 0.0|0.0   ;;  %vm14557_vm5 = vmmov 0   ;;  %v18370_v29 = vmov 0.0   ;;  %vm14747_vm6 = vmpackc.low %vm641_vm3, %vm641_vm3 }
   0xf   : > { %13147 = vmatprep.subr.bf16.mxu1 %v18368_v28  ;;  %12280 = vmatprep.mubr.msk.f32.mxu1 %vm14557_vm5, %v18370_v29  ;;  %vm14789_vm7 = vmpackc.low %vm363_vm0, %vm363_vm0  ;;  %vm18429_vm8 = vcmask 1041408   ;;  %vm14559_vm9 = vmmov 1   ;;  %vm1346_vm11 = vcmask 162816   ;;  %vm1350_vm12 = vcmask 158720  }
  0x10   : > { %s18770_s26 = smov (!%p290_p3, %s10825_s26), 15  ;;  %vm15097_vm10 = vmpackc.low %vm18429_vm8, %vm14559_vm9  ;;  %vm18430_vm13 = vcmask 211968   ;;  %vm1333_vm14 = vcmask 64512   ;;  %vm1337_vm15 = vcmask 60416   ;;  %vm18425_vm9 = vcmask 15360  }
  0x11   : > { %s13899_s27 = smul.u32 72, %s18770_s26  ;;  %s15636_s25 = scalar_lea.vmem %s18367_s7, %s18770_s26 }
  0x12   : > { %s13900_s28 = smul.u32 24, %s18770_s26 }
  0x13   : > { %s14615_s8 = scalar_lea.vmem %s18360_s0, %s13899_s27 }
  0x14   : > { %v14618_v0 = vld [vmem:[%s14615_s8] sm:$0xff]  ;;  %v14621_v1 = vld [vmem:[%s14615_s8 + $0x8] sm:$0xff]  ;;  %v14624_v2 = vld [vmem:[%s14615_s8 + $0x10] sm:$0xff]  ;;  %s14654_s11 = scalar_lea.vmem %s18361_s1, %s13900_s28 }
  0x15   : > { %v14627_v3 = vld [vmem:[%s14615_s8 + $0x28] sm:$0xff]  ;;  %v362_v4 = vadd.f32 %v14621_v1, %v14618_v0  ;;  %v364_v5 = vsel %vm363_vm0, %v14624_v2, 0.0  ;;  %v14634_v6 = vld [vmem:[%s14615_s8 + $0x30] sm:$0xf]  ;;  %v14637_v7 = vld [vmem:[%s14615_s8 + $0x38] sm:$0xf] }
  0x16   : > { %v369_v8 = vsel %vm363_vm0, %v14627_v3, 0.0  ;;  %v14642_v9 = vld [vmem:[%s14615_s8 + $0x40] sm:$0xf]  ;;  %v374_v10 = vsel %vm373_vm1, %v14634_v6, 0.0  ;;  %v375_v11 = vsel %vm373_vm1, %v14637_v7, 0.0  ;;  %v14649_v12 = vld [vmem:[%s14615_s8 + $0x18] sm:$0xff] }
  0x17   : > { %v365_v13 = vadd.f32 %v364_v5, %v362_v4  ;;  %v830_v14 = vadd.f32 %v369_v8, %v364_v5  ;;  %v376_v15 = vadd.f32 %v375_v11, %v374_v10  ;;  %v378_v16 = vsel %vm377_vm2, %v14642_v9, 0.0  ;;  %v14659_v17 = vld [vmem:[%s14615_s8 + $0x20] sm:$0xff]  ;;  %v14667_v23 = vld [vmem:[%s14654_s11 + $0x8] sm:$0xff]  ;;  %v14672_v25 = vld [vmem:[%s14654_s11 + $0x10] sm:$0xf] }
  0x18   : > { %v368_v18 = vadd.f32 %v14659_v17, %v14649_v12  ;;  %v14664_v21 = vld [vmem:[%s14654_s11] sm:$0xff]  ;;  %v645_v26 = vsel %vm641_vm3, %v14667_v23, 0.0  ;;  %v649_v27 = vsel %vm648_vm4, %v14672_v25, 0.0  ;;  %v822_v30 = vadd.f32 %v14659_v17, %v14621_v1 }
  0x19   : > { %366 = vadd.xlane.f32.xlu0 %v365_v13  ;;  %v379_v19 = vadd.f32 %v378_v16, %v376_v15  ;;  %v831_v20 = vadd.f32 %v830_v14, %v378_v16  ;;  %v642_v24 = vsel %vm641_vm3, %v14664_v21, 0.0  ;;  %v814_v34 = vadd.f32 %v14649_v12, %v14618_v0 }
  0x1a   : > { %v370_v22 = vadd.f32 %v369_v8, %v368_v18  ;;  %v823_v31 = vadd.f32 %v822_v30, %v375_v11 }
  0x1b   : > { %380 = vadd.xlane.f32.xlu1 %v379_v19  ;;  %v832_v35 = vrot.slane %v831_v20, 4  ;;  %v815_v37 = vadd.f32 %v814_v34, %v374_v10 }
  0x1c   : > { %v824_v32 = vrot.slane %v823_v31, 4 }
  0x1d   : > { %371 = vadd.xlane.f32.xlu0 %v370_v22  ;;  %v833_v38 = vadd.f32 %v832_v35, %v831_v20  ;;  %v816_v40 = vrot.slane %v815_v37, 4 }
  0x1e   : > { %v825_v33 = vadd.f32 %v824_v32, %v823_v31 }
  0x1f   : > { %643 = vadd.xlane.f32.xlu1 %v642_v24  ;;  %v834_v41 = vrot.slane %v833_v38, 2  ;;  %v817_v43 = vadd.f32 %v816_v40, %v815_v37 }
  0x20   : > { %v826_v36 = vrot.slane %v825_v33, 2 }
  0x21   : > { %646 = vadd.xlane.f32.xlu0 %v645_v26  ;;  %v835_v44 = vadd.f32 %v834_v41, %v833_v38  ;;  %v818_v46 = vrot.slane %v817_v43, 2 }
  0x22   : > { %v827_v39 = vadd.f32 %v826_v36, %v825_v33 }
  0x23   : > { %650 = vadd.xlane.f32.xlu1 %v649_v27  ;;  %v836_v47 = vrot.slane %v835_v44, 1  ;;  %v819_v49 = vadd.f32 %v818_v46, %v817_v43 }
  0x24   : > { %v828_v42 = vrot.slane %v827_v39, 1 }
  0x25   : > { %v837_v50 = vadd.f32 %v836_v47, %v835_v44  ;;  %v820_v52 = vrot.slane %v819_v49, 1 }
  0x26   : > { %v14685_v45 = vadd.f32 %v828_v42, %v827_v39 }
  0x27   : > { %v840_v53 = vmul.f32 %v837_v50, %v14624_v2  ;;  %v843_v55 = vmul.f32 %v837_v50, %v14627_v3  ;;  %v14698_v62 = vadd.f32 %v820_v52, %v819_v49  ;;  %v846_v63 = vmul.f32 %v837_v50, %v14642_v9 }
  0x28   : > { %v839_v48 = vmul.f32 %v14685_v45, %v14621_v1 }
  0x29   : > { %v849_v4 = vmul.f32 0.31622776, %v840_v53  ;;  %v852_v8 = vmul.f32 0.31622776, %v843_v55 }
  0x2a   : > { %v848_v51 = vmul.f32 0.31622776, %v839_v48  ;;  %v18524_v48 = vmov 0 }
  0x2b   : > { %v18525_v48 = vsel %vm14747_vm6, 4294967295, %v18524_v48 }
  0x2c   : > { %13913 = vtanh.f32 %v848_v51  ;;  %18526 = vst [vmem:[#allocation2_spill] sm:$0xff] %v18525_v48 }
  0x2d   : > { %13915 = vtanh.f32 %v849_v4  ;;  %v855_v4 = vmul.f32 0.31622776, %v846_v63  ;;  %v842_v63 = vmul.f32 %v14685_v45, %v14659_v17 }
  0x2e   : > { %13917 = vtanh.f32 %v852_v8 }
  0x36   : > { %v13914_v42 = vpop.eup %13913 }
  0xa6   : > { %v367_v54 = vpop.xlane.xlu0 %366 }
  0xa7   : > { %v383_v56 = vmul.f32 0.0038461538, %v367_v54 }
  0xa8   : > { %v381_v57 = vpop.xlane.xlu1 %380 }
  0xa9   : > { %v14692_v58 = vsub.f32 %v14618_v0, %v383_v56  ;;  %v14695_v59 = vsub.f32 %v14624_v2, %v383_v56  ;;  %v385_v60 = vmul.f32 0.0038461538, %v381_v57  ;;  %v387_v61 = vsub.f32 %v14621_v1, %v383_v56 }
  0xaa   : > { %v372_v5 = vpop.xlane.xlu0 %371 }
  0xab   : > { %v14702_v10 = vsub.f32 %v14634_v6, %v385_v60  ;;  %v384_v11 = vmul.f32 0.0038461538, %v372_v5  ;;  %468 = vmatprep.mubr.f32.mxu0 %v387_v61  ;;  %v564_v13 = vmul.f32 %v14692_v58, %v14692_v58  ;;  %v14707_v14 = vsub.f32 %v14642_v9, %v385_v60 }
  0xac   : > { %v644_v15 = vpop.xlane.xlu1 %643  ;;  %v565_v16 = vmul.f32 %v387_v61, %v387_v61  ;;  %v566_v18 = vmul.f32 %v14695_v59, %v14695_v59  ;;  %v14712_v19 = vsub.f32 %v14637_v7, %v385_v60  ;;  %v867_v60 = vmul.f32 1.442695, %v13914_v42 }
  0xad   : > { %v14715_v20 = vsub.f32 %v14627_v3, %v384_v11  ;;  %v653_v22 = vmul.f32 0.0625, %v644_v15  ;;  %v14718_v24 = vsub.f32 %v14659_v17, %v384_v11  ;;  %v14721_v26 = vsub.f32 %v14649_v12, %v384_v11  ;;  %v324_v15 = vld [vmem:[%s18362_s2 + $0x80] sm:$0xff] }
  0xae   : > { %v647_v27 = vpop.xlane.xlu0 %646  ;;  %v573_v30 = vadd.f32 %v565_v16, %v564_v13  ;;  %v574_v31 = vsel %vm363_vm0, %v566_v18, 0.0  ;;  %v570_v32 = vmul.f32 %v14702_v10, %v14702_v10  ;;  %v571_v33 = vmul.f32 %v14712_v19, %v14712_v19  ;;  %v325_v16 = vld [vmem:[%s18362_s2 + $0x88] sm:$0xff]  ;;  %v13916_v18 = vpop.eup %13915 }
  0xaf   : > { %v14729_v34 = vsub.f32 %v14664_v21, %v653_v22  ;;  %v654_v35 = vmul.f32 0.0625, %v647_v27  ;;  %v13139_v36 = vpack.c.bf16 %v14718_v24, %v387_v61  ;;  %v13141_v38 = vpack.c.bf16 %v14721_v26, %v14692_v58 }
  0xb0   : > { %v575_v37 = vadd.f32 %v574_v31, %v573_v30  ;;  %v651_v39 = vpop.xlane.xlu1 %650  ;;  %v567_v40 = vmul.f32 %v14721_v26, %v14721_v26  ;;  %v568_v41 = vmul.f32 %v14718_v24, %v14718_v24  ;;  %v569_v46 = vmul.f32 %v14715_v20, %v14715_v20  ;;  %v308_v31 = vld [vmem:[%s18362_s2] sm:$0xff] }
  0xb1   : > { %v14739_v43 = vsub.f32 %v14667_v23, %v654_v35  ;;  %13140 = vmatprep.subr.bf16.mxu0 %v13139_v36  ;;  %v748_v21 = vmul.f32 %v14729_v34, %v14729_v34  ;;  %v655_v44 = vmul.f32 0.0625, %v651_v39  ;;  %v572_v23 = vmul.f32 %v14707_v14, %v14707_v14  ;;  %v326_v36 = vld [vmem:[%s18362_s2 + $0x90] sm:$0xff] }
  0xb2   : > { %576 = vadd.xlane.f32.xlu0 %v575_v37  ;;  %13142 = vmatpush1.bf16.xpose.msra.mxu0 %v13141_v38  ;;  %v578_v47 = vadd.f32 %v568_v41, %v567_v40  ;;  %v583_v49 = vsel %vm373_vm1, %v570_v32, 0.0  ;;  %v584_v50 = vsel %vm373_vm1, %v571_v33, 0.0  ;;  %v579_v53 = vsel %vm363_vm0, %v569_v46, 0.0  ;;  %v309_v32 = vld [vmem:[%s18362_s2 + $0x8] sm:$0xff]  ;;  %v327_v37 = vld [vmem:[%s18362_s2 + $0x98] sm:$0xff] }
  0xb3   : > { %v751_v51 = vsel %vm641_vm3, %v748_v21, 0.0  ;;  %v14757_v52 = vsub.f32 %v14672_v25, %v655_v44  ;;  %408 = vmatprep.subr.mxu0 %v14712_v19  ;;  %v13148_v54 = vpack.c.bf16 %v14739_v43, %v14729_v34  ;;  %v749_v56 = vmul.f32 %v14739_v43, %v14739_v43  ;;  %v13918_v21 = vpop.eup %13917  ;;  %v329_v46 = vld [vmem:[%s18362_s2 + $0xa8] sm:$0xff] }
  0xb4   : > { %752 = vadd.xlane.f32.xlu1 %v751_v51  ;;  %v580_v55 = vadd.f32 %v579_v53, %v578_v47  ;;  %v585_v57 = vadd.f32 %v584_v50, %v583_v49  ;;  %v586_v5 = vsel %vm377_vm2, %v572_v23, 0.0  ;;  %v838_v11 = vmul.f32 %v14698_v62, %v14618_v0  ;;  %v312_v51 = vld [vmem:[%s18362_s2 + $0x20] sm:$0xff] }
  0xb5   : > { %13150 = vmatpush3.bf16.xpose.msk.msra.mxu1 %vm14747_vm6, %v13148_v54  ;;  %v750_v25 = vmul.f32 %v14757_v52, %v14757_v52  ;;  %v754_v61 = vsel %vm641_vm3, %v749_v56, 0.0  ;;  %13919 = vpow2.f32 %v867_v60  ;;  %v841_v22 = vmul.f32 %v14698_v62, %v14649_v12  ;;  %v331_v54 = vld [vmem:[%s18362_s2 + $0xb8] sm:$0xff]  ;;  %v314_v60 = vld [vmem:[%s18362_s2 + $0x30] sm:$0xff] }
  0xb6   : > { %581 = vadd.xlane.f32.xlu0 %v580_v55  ;;  %12278 = vmatprep.subr.mxu1 %v18370_v29  ;;  %v587_v13 = vadd.f32 %v586_v5, %v585_v57  ;;  %13921 = vtanh.f32 %v855_v4  ;;  %v18527_v27 = vmov 0  ;;  %v14793_v30 = vpack.c.bf16 %v325_v16, %v324_v15  ;;  %v317_v15 = vld [vmem:[%s18362_s2 + $0x48] sm:$0xff] }
  0xb7   : > { %v757_v8 = vsel %vm648_vm4, %v750_v25, 0.0  ;;  %v18528_v27 = vsel %vm14789_vm7, 4294967295, %v18527_v27  ;;  %v847_v33 = vmul.f32 0.31622776, %v838_v11  ;;  %v13144_v35 = vpack.c.bf16 %v14715_v20, %v14695_v59  ;;  %v315_v25 = vld [vmem:[%s18362_s2 + $0x38] sm:$0xff] }
  0xb8   : > { %755 = vadd.xlane.f32.xlu1 %v754_v61  ;;  %18529 = vst [vmem:[#allocation3_spill] sm:$0xff] %v18528_v27  ;;  %v845_v38 = vmul.f32 %v14685_v45, %v14637_v7  ;;  %v851_v39 = vmul.f32 0.31622776, %v842_v63  ;;  %v14817_v40 = vpack.c.bf16 %v309_v32, %v308_v31  ;;  %v844_v41 = vmul.f32 %v14698_v62, %v14634_v6  ;;  %v311_v62 = vld [vmem:[%s18362_s2 + $0x18] sm:$0xff]  ;;  %v332_v61 = vld [vmem:[%s18362_s2 + $0xc0] sm:$0xff]  ;;  %v334_v63 = vld [vmem:[%s18362_s2 + $0xd0] sm:$0xff] }
  0xb9   : > { %v850_v42 = vmul.f32 0.31622776, %v841_v22  ;;  %v14823_v45 = vpack.c.bf16 %v327_v37, %v326_v36  ;;  %13923 = vtanh.f32 %v847_v33  ;;  %v875_v49 = vmul.f32 1.442695, %v13918_v21  ;;  %v319_v36 = vld [vmem:[%s18362_s2 + $0x58] sm:$0xff]  ;;  %v321_v21 = vld [vmem:[%s18362_s2 + $0x68] sm:$0xff] }
  0xba   : > { %588 = vadd.xlane.f32.xlu0 %v587_v13  ;;  %409 = vmatpush1.xpose.msra.mxu0 %v14702_v10  ;;  %v854_v44 = vmul.f32 0.31622776, %v845_v38  ;;  %13925 = vtanh.f32 %v851_v39  ;;  %v853_v23 = vmul.f32 0.31622776, %v844_v41  ;;  %v316_v13 = vld [vmem:[%s18362_s2 + $0x40] sm:$0xff]  ;;  %v337_v41 = vld [vmem:[%s18362_s2 + $0xe8] sm:$0xff] }
  0xbb   : > { %13143 = vmatprep.subr.bf16.mxu0 %v18368_v28  ;;  %18530 = vst [vmem:[#allocation4_spill] sm:$0xff] %v14823_v45  ;;  %13927 = vtanh.f32 %v850_v42  ;;  %v14932_v33 = vpack.c.bf16 %v317_v15, %v316_v13  ;;  %v336_v39 = vld [vmem:[%s18362_s2 + $0xe0] sm:$0xff]  ;;  %v15054_v13 = vld [vmem:[%s14615_s8 + $0x88] sm:$0xf] }
  0xbc   : > { %758 = vadd.xlane.f32.xlu1 %v757_v8  ;;  %v335_v8 = vld [vmem:[%s18362_s2 + $0xd8] sm:$0xff]  ;;  %v1699_v15 = vsel %vm377_vm2, %v15054_v13, 0.0 }
  0xbd   : > { %469 = vmatmul.mubr.f32.vlgmr.msra.gmra.mrb[0].mxu0 %v14692_v58  ;;  %12279 = vmatpush3.xpose.msk.msra.mxu1 %vm641_vm3, %v14757_v52  ;;  %v869_v58 = vmul.f32 1.442695, %v13916_v18  ;;  %18537 = vst [vmem:[#allocation11_spill] sm:$0xff] %v14932_v33 }
  0xbe   : > { %473 = vmatprep.mubr.f32.mxu0 %v14718_v24  ;;  %13146 = vmatpush3.bf16.xpose.msk.msra.mxu0 %vm14789_vm7, %v13144_v35  ;;  %v310_v24 = vld [vmem:[%s18362_s2 + $0x10] sm:$0xff] }
  0xbf   : > { %12263 = vmatprep.subr.mxu0 %v18370_v29  ;;  %13152 = vmatprep.subr.bf16.mxu1 %v14793_v30  ;;  %v14842_v47 = vpop.eup %13919  ;;  %13929 = vpow2.f32 %v869_v58  ;;  %v318_v35 = vld [vmem:[%s18362_s2 + $0x50] sm:$0xff] }
  0xc0   : > { %12281 = vmatmul.mubr.msk.f32.vlgmr.msra.gmra.mrb[0].mxu1 %vm641_vm3, %v14729_v34  ;;  %v328_v34 = vld [vmem:[%s18362_s2 + $0xa0] sm:$0xff]  ;;  %v13922_v53 = vpop.eup %13921  ;;  %13931 = vtanh.f32 %v854_v44  ;;  %v884_v55 = vmul.f32 %v14842_v47, %v14621_v1 }
  0xc1   : > { %474 = vmatmul.mubr.f32.gmra.mrb[2].mxu0 %v14721_v26  ;;  %12283 = vmatprep.mubr.msk.f32.mxu1 %vm14557_vm5, %v18370_v29  ;;  %v14847_v26 = vpack.c.bf16 %v311_v62, %v310_v24  ;;  %v14851_v50 = vpack.c.bf16 %v329_v46, %v328_v34  ;;  %13933 = vtanh.f32 %v853_v23  ;;  %v881_v1 = vmul.f32 1.442695, %v13922_v53  ;;  %v320_v62 = vld [vmem:[%s18362_s2 + $0x60] sm:$0xff]  ;;  %v338_v34 = vld [vmem:[%s18362_s2 + $0xf0] sm:$0xff]  ;;  %v339_v46 = vld [vmem:[%s18362_s2 + $0xf8] sm:$0xff] }
  0xc2   : > { %478 = vmatprep.mubr.f32.mxu0 %v14712_v19  ;;  %13154 = vmatpush3.bf16.msra.mxu1 %v14817_v40  ;;  %v313_v19 = vld [vmem:[%s18362_s2 + $0x28] sm:$0xff]  ;;  %13935 = vpow2.f32 %v875_v49  ;;  %v323_v53 = vld [vmem:[%s18362_s2 + $0x78] sm:$0xff] }
  0xc3   : > { %13156 = vmatprep.subr.bf16.mxu1 %v14823_v45  ;;  %18531 = vst [vmem:[#allocation5_spill] sm:$0xff] %v14847_v26  ;;  %18532 = vst [vmem:[#allocation6_spill] sm:$0xff] %v14851_v50  ;;  %v14881_v56 = vpack.c.bf16 %v313_v19, %v312_v51  ;;  %v13924_v4 = vpop.eup %13923  ;;  %13937 = vpow2.f32 %v881_v1  ;;  %v14983_v51 = vpack.c.bf16 %v321_v21, %v320_v62  ;;  %v346_v62 = vld [vmem:[%s18364_s4 + $0x10] sm:$0xff]  ;;  %v347_v21 = vld [vmem:[%s18364_s4 + $0x18] sm:$0x3] }
  0xc4   : > { %12284 = vmatmul.mubr.msk.f32.gmra.mrb[2].mxu1 %vm641_vm3, %v14739_v43  ;;  %v330_v43 = vld [vmem:[%s18362_s2 + $0xb0] sm:$0xff]  ;;  %v13926_v5 = vpop.eup %13925  ;;  %v865_v18 = vmul.f32 1.442695, %v13924_v4  ;;  %v14986_v19 = vpack.c.bf16 %v339_v46, %v338_v34  ;;  %v18546_v34 = vmov 0  ;;  %v15106_v46 = vld [vmem:[%s14615_s8 + $0x60] sm:$0xff] }
  0xc5   : > { %479 = vmatmul.mubr.f32.gmra.mrb[4].mxu0 %v14702_v10  ;;  %12286 = vmatprep.mubr.msk.f32.mxu1 %vm14557_vm5, %v18370_v29  ;;  %v14879_v10 = vld [vmem:[%s18362_s2 + $0x100] sm:$0xf]  ;;  %18533 = vst [vmem:[#allocation7_spill] sm:$0xff] %v14881_v56  ;;  %v14886_v57 = vpack.c.bf16 %v331_v54, %v330_v43  ;;  %v13928_v16 = vpop.eup %13927  ;;  %v873_v31 = vmul.f32 1.442695, %v13926_v5  ;;  %18541 = vst [vmem:[#allocation15_spill] sm:$0xff] %v14983_v51 }
  0xc6   : > { %12264 = vmatpush3.xpose.msk.msra.mxu0 %vm363_vm0, %v14707_v14  ;;  %12265 = vmatprep.mubr.msk.f32.mxu0 %vm14557_vm5, %v18370_v29  ;;  %13939 = vpow2.f32 %v865_v18  ;;  %v871_v42 = vmul.f32 1.442695, %v13928_v16  ;;  %18542 = vst [vmem:[#allocation16_spill] sm:$0xff] %v14986_v19  ;;  %v18547_v34 = vsel %vm15097_vm10, 4294967295, %v18546_v34 }
  0xc7   : > { %13158 = vmatpush3.bf16.msra.mxu1 %v14847_v26  ;;  %12289 = vmatprep.subr.mxu0 %v18370_v29  ;;  %18534 = vst [vmem:[#allocation8_spill] sm:$0xff] %v14886_v57  ;;  %13941 = vpow2.f32 %v873_v31  ;;  %18548 = vst [vmem:[#allocation20_spill] sm:$0xff] %v18547_v34 }
  0xc8   : > { %12287 = vmatmul.mubr.msk.f32.gmra.mrb[4].mxu1 %vm641_vm3, %v14757_v52  ;;  %13160 = vmatprep.subr.bf16.mxu1 %v14851_v50  ;;  %v333_v52 = vld [vmem:[%s18362_s2 + $0xc8] sm:$0xff]  ;;  %13943 = vpow2.f32 %v871_v42  ;;  %v344_v42 = vld [vmem:[%s18364_s4] sm:$0xff] }
  0xc9   : > { %12266 = vmatmul.mubr.msk.f32.vlgmr.msra.gmra.mrb[0].mxu0 %vm363_vm0, %v14695_v59  ;;  %968 = vmatprep.mubr.f32.mxu1 %v884_v55  ;;  %v14908_v59 = vpack.c.bf16 %v315_v25, %v314_v60  ;;  %v14911_v11 = vpack.c.bf16 %v333_v52, %v332_v61  ;;  %v14927_v22 = vpop.eup %13929 }
  0xca   : > { %12268 = vmatprep.mubr.msk.f32.mxu0 %vm14557_vm5, %v18370_v29  ;;  %12290 = vmatpush3.msk.msra.mxu0 %vm373_vm1, %v14879_v10  ;;  %v13932_v32 = vpop.eup %13931  ;;  %v885_v38 = vmul.f32 %v14927_v22, %v14624_v2  ;;  %v14961_v2 = vpack.c.bf16 %v337_v41, %v336_v39 }
  0xcb   : > { %13162 = vmatpush3.bf16.msra.mxu1 %v14881_v56  ;;  %13184 = vmatprep.subr.bf16.mxu0 %v14793_v30  ;;  %18535 = vst [vmem:[#allocation9_spill] sm:$0xff] %v14908_v59  ;;  %18536 = vst [vmem:[#allocation10_spill] sm:$0xff] %v14911_v11  ;;  %v13934_v37 = vpop.eup %13933  ;;  %v879_v24 = vmul.f32 1.442695, %v13932_v32 }
  0xcc   : > { %13164 = vmatprep.subr.bf16.mxu1 %v14886_v57  ;;  %v14953_v58 = vpop.eup %13935  ;;  %18540 = vst [vmem:[#allocation14_spill] sm:$0xff] %v14961_v2  ;;  %v877_v44 = vmul.f32 1.442695, %v13934_v37 }
  0xcd   : > { %12269 = vmatmul.mubr.msk.f32.gmra.mrb[2].mxu0 %vm363_vm0, %v14715_v20  ;;  %v14935_v20 = vpack.c.bf16 %v335_v8, %v334_v63  ;;  %v888_v23 = vmul.f32 %v14953_v58, %v14627_v3  ;;  %v13938_v49 = vpop.eup %13937  ;;  %13945 = vpow2.f32 %v879_v24  ;;  %v322_v3 = vld [vmem:[%s18362_s2 + $0x70] sm:$0xff] }
  0xce   : > { %12271 = vmatprep.mubr.msk.f32.mxu0 %vm14557_vm5, %v18370_v29  ;;  %v891_v43 = vmul.f32 %v13938_v49, %v14642_v9  ;;  %13947 = vpow2.f32 %v877_v44  ;;  %v15001_v55 = vpack.c.bf16 %v323_v53, %v322_v3  ;;  %v15094_v44 = vpack.c.bf16 %v347_v21, %v346_v62  ;;  %v15114_v3 = vld [vmem:[%s14615_s8 + $0x48] sm:$0xff]  ;;  %v15117_v53 = vld [vmem:[%s14615_s8 + $0x50] sm:$0xff] }
  0xcf   : > { %13166 = vmatpush3.bf16.msra.mxu1 %v14908_v59  ;;  %18538 = vst [vmem:[#allocation12_spill] sm:$0xff] %v14935_v20 }
  0xd0   : > { %13168 = vmatprep.subr.bf16.mxu1 %v14911_v11  ;;  %v13940_v54 = vpop.eup %13939  ;;  %18543 = vst [vmem:[#allocation17_spill] sm:$0xff] %v15001_v55  ;;  %18545 = vst [vmem:[#allocation19_spill] sm:$0xff] %v15094_v44 }
  0xd1   : > { %12272 = vmatmul.mubr.msk.f32.gmra.mrb[4].mxu0 %vm363_vm0, %v14707_v14  ;;  %v14958_v14 = vpack.c.bf16 %v319_v36, %v318_v35  ;;  %v13942_v1 = vpop.eup %13941  ;;  %v883_v9 = vmul.f32 %v13940_v54, %v14618_v0 }
  0xd2   : > { %12291 = vmatprep.mubr.msk.f32.mxu0 %vm14557_vm5, %v18370_v29  ;;  %v13944_v60 = vpop.eup %13943  ;;  %v887_v25 = vmul.f32 %v13942_v1, %v14659_v17 }
  0xd3   : > { %13170 = vmatpush3.bf16.msra.mxu1 %v14932_v33  ;;  %18539 = vst [vmem:[#allocation13_spill] sm:$0xff] %v14958_v14  ;;  %v886_v52 = vmul.f32 %v13944_v60, %v14649_v12 }
  0xd4   : > { %13172 = vmatprep.subr.bf16.mxu1 %v14935_v20 }
  0xd5   : > { %12292 = vmatmul.mubr.msk.f32.vlgmr.msra.gmra.mrb[6].mxu0 %vm363_vm0, %v885_v38 }
  0xd6   : > { %13186 = vmatpush3.bf16.msra.mxu0 %v14817_v40  ;;  %12294 = vmatprep.mubr.msk.f32.mxu0 %vm14557_vm5, %v18370_v29 }
  0xd7   : > { %13188 = vmatprep.subr.bf16.mxu0 %v14823_v45  ;;  %13174 = vmatpush3.bf16.msra.mxu1 %v14958_v14  ;;  %v13946_v61 = vpop.eup %13945 }
  0xd8   : > { %13176 = vmatprep.subr.bf16.mxu1 %v14961_v2  ;;  %v13948_v4 = vpop.eup %13947  ;;  %v890_v0 = vmul.f32 %v13946_v61, %v14637_v7  ;;  %v15047_v7 = vld [vmem:[%s14615_s8 + $0x70] sm:$0xff] }
  0xd9   : > { %12295 = vmatmul.mubr.msk.f32.gmra.mrb[8].mxu0 %vm363_vm0, %v888_v23  ;;  %v889_v17 = vmul.f32 %v13948_v4, %v14634_v6  ;;  %v15044_v6 = vld [vmem:[%s14615_s8 + $0x58] sm:$0xff]  ;;  %v15109_v23 = vld [vmem:[%s14615_s8 + $0x68] sm:$0xff] }
  0xda   : > { %13190 = vmatpush3.bf16.msra.mxu0 %v14847_v26  ;;  %12297 = vmatprep.mubr.msk.f32.mxu0 %vm14557_vm5, %v18370_v29  ;;  %v1687_v12 = vsel %vm363_vm0, %v15044_v6, 0.0 }
  0xdb   : > { %13192 = vmatprep.subr.bf16.mxu0 %v14851_v50  ;;  %13178 = vmatpush3.bf16.msra.mxu1 %v14983_v51 }
  0xdc   : > { %13180 = vmatprep.subr.bf16.mxu1 %v14986_v19 }
  0xdd   : > { %12298 = vmatmul.mubr.msk.f32.gmra.mrb[10].mxu0 %vm363_vm0, %v891_v43  ;;  %v15120_v43 = vld [vmem:[%s14615_s8 + $0x78] sm:$0xf] }
  0xde   : > { %13194 = vmatpush3.bf16.msra.mxu0 %v14881_v56  ;;  %1137 = vmatprep.mubr.f32.mxu0 %v14842_v47  ;;  %v1692_v47 = vsel %vm363_vm0, %v15047_v7, 0.0 }
  0xdf   : > { %13196 = vmatprep.subr.bf16.mxu0 %v14886_v57  ;;  %13182 = vmatpush3.bf16.msra.mxu1 %v15001_v55  ;;  %v2147_v5 = vadd.f32 %v1692_v47, %v1687_v12 }
  0xe0   : > { %12300 = vmatprep.subr.mxu1 %v18370_v29 }
  0xe1   : > { %v15058_v16 = vadd.f32 %v2147_v5, %v1699_v15  ;;  %v15156_v5 = vld [vmem:[%s14654_s11 + $0x18] sm:$0xff] }
  0xe2   : > { %13198 = vmatpush3.bf16.msra.mxu0 %v14908_v59  ;;  %969 = vmatmul.mubr.f32.vlgmr.msra.gmra.mrb[6].mxu1 %v883_v9 }
  0xe3   : > { %13200 = vmatprep.subr.bf16.mxu0 %v14911_v11  ;;  %973 = vmatprep.mubr.f32.mxu1 %v887_v25 }
  0xe4   : > { %12301 = vmatpush3.msk.msra.mxu1 %vm373_vm1, %v14879_v10 }
  0xe5   : > { %13215 = vmatprep.subr.bf16.mxu1 %v18368_v28 }
  0xe6   : > { %13202 = vmatpush3.bf16.msra.mxu0 %v14932_v33  ;;  %974 = vmatmul.mubr.f32.gmra.mrb[8].mxu1 %v886_v52 }
  0xe7   : > { %13204 = vmatprep.subr.bf16.mxu0 %v14935_v20  ;;  %978 = vmatprep.mubr.f32.mxu1 %v890_v0  ;;  %v341_v0 = vld [vmem:[%s18363_s3] sm:$0xff] }
  0xea   : > { %13206 = vmatpush3.bf16.msra.mxu0 %v14958_v14  ;;  %979 = vmatmul.mubr.f32.gmra.mrb[10].mxu1 %v889_v17  ;;  %v342_v17 = vld [vmem:[%s18363_s3 + $0x8] sm:$0xff] }
  0xeb   : > { %13208 = vmatprep.subr.bf16.mxu0 %v14961_v2  ;;  %12302 = vmatprep.mubr.msk.f32.mxu1 %vm14557_vm5, %v18370_v29 }
  0xee   : > { %13210 = vmatpush3.bf16.msra.mxu0 %v14983_v51  ;;  %12303 = vmatmul.mubr.msk.f32.vlgmr.msra.gmra.mrb[12].mxu1 %vm363_vm0, %v14927_v22 }
  0xef   : > { %13212 = vmatprep.subr.bf16.mxu0 %v14986_v19  ;;  %12305 = vmatprep.mubr.msk.f32.mxu1 %vm14557_vm5, %v18370_v29 }
  0xf2   : > { %13214 = vmatpush3.bf16.msra.mxu0 %v15001_v55  ;;  %12306 = vmatmul.mubr.msk.f32.gmra.mrb[14].mxu1 %vm363_vm0, %v14953_v58  ;;  %v345_v58 = vld [vmem:[%s18364_s4 + $0x8] sm:$0xff] }
  0xf3   : > { %12308 = vmatprep.mubr.msk.f32.mxu1 %vm14557_vm5, %v18370_v29  ;;  %13222 = vmatprep.subr.bf16.mxu0 %v18368_v28  ;;  %v15084_v24 = vpack.c.bf16 %v345_v58, %v344_v42 }
  0xf5   : > { %1138 = vmatmul.mubr.f32.vlgmr.msra.gmra.mrb[12].mxu0 %v13940_v54  ;;  %18544 = vst [vmem:[#allocation18_spill] sm:$0xff] %v15084_v24  ;;  %13217 = vmatpush3.bf16.msra.mxu1 %v15084_v24  ;;  %v15123_v54 = vld [vmem:[%s14615_s8 + $0x80] sm:$0xf] }
  0xf6   : > { %1142 = vmatprep.mubr.f32.mxu0 %v13942_v1  ;;  %12309 = vmatmul.mubr.msk.f32.gmra.mrb[16].mxu1 %vm363_vm0, %v13938_v49  ;;  %v1691_v49 = vadd.f32 %v15109_v23, %v15106_v46  ;;  %v1686_v1 = vadd.f32 %v15117_v53, %v15114_v3  ;;  %v15133_v25 = vsel %vm373_vm1, %v15123_v54, 0.0 }
  0xf7   : > { %12319 = vmatprep.mubr.msk.f32.mxu1 %vm14557_vm5, %v18370_v29  ;;  %13218 = vmatprep.subr.bf16.mxu1 %v18368_v28 }
  0xf8   : > { %v1693_v9 = vadd.f32 %v1692_v47, %v1691_v49  ;;  %v15143_v47 = vpack.c.bf16 %v342_v17, %v341_v0 }
  0xf9   : > { %1143 = vmatmul.mubr.f32.gmra.mrb[14].mxu0 %v13944_v60  ;;  %13221 = vmatpush3.bf16.msk.msra.mxu1 %vm15097_vm10, %v15094_v44  ;;  %v15129_v60 = vsel %vm373_vm1, %v15120_v43, 0.0 }
  0xfa   : > { %1147 = vmatprep.mubr.f32.mxu0 %v13946_v61  ;;  %13225 = vmatprep.subr.bf16.mxu1 %v18368_v28  ;;  %v1688_v61 = vadd.f32 %v1687_v12, %v1686_v1  ;;  %v1698_v52 = vadd.f32 %v15133_v25, %v15129_v60  ;;  %18549 = vst [vmem:[#allocation21_spill] sm:$0xff] %v15143_v47  ;;  %v15150_v12 = vld [vmem:[%s18363_s3 + $0x10] sm:$0xf] }
  0xfb   : > { %13224 = vmatpush3.bf16.msra.mxu0 %v15143_v47 }
  0xfc   : > { %12332 = vmatprep.subr.mxu0 %v18370_v29 }
  0xfd   : > { %1148 = vmatmul.mubr.f32.gmra.mrb[16].mxu0 %v13948_v4  ;;  %v1700_v4 = vadd.f32 %v1699_v15, %v1698_v52  ;;  %v15159_v15 = vld [vmem:[%s14654_s11 + $0x20] sm:$0xff] }
  0xfe   : > { %12334 = vmatprep.mubr.msk.f32.mxu0 %vm14557_vm5, %v18370_v29 }
  0xff   : > { %12333 = vmatpush3.msk.msra.mxu0 %vm373_vm1, %v15150_v12 }
 0x100   : > { %12358 = vmatprep.subr.mxu0 %v18370_v29 }
 0x13f   : > { %v577_v18 = vpop.xlane.xlu0 %576 }
 0x140   : > { %13949 = vrsqrt.f32 %v577_v18  ;;  %v15162_v18 = vld [vmem:[%s14654_s11 + $0x28] sm:$0xf] }
 0x141   : > { %v753_v63 = vpop.xlane.xlu1 %752 }
 0x142   : > { %13951 = vrsqrt.f32 %v753_v63  ;;  %v1961_v63 = vsel %vm641_vm3, %v15156_v5, 0.0 }
 0x143   : > { %v582_v8 = vpop.xlane.xlu0 %581 }
 0x144   : > { %13953 = vrsqrt.f32 %v582_v8  ;;  %v1964_v8 = vsel %vm641_vm3, %v15159_v15, 0.0 }
 0x145   : > { %v756_v22 = vpop.xlane.xlu1 %755 }
 0x146   : > { %13955 = vrsqrt.f32 %v756_v22  ;;  %v1967_v22 = vsel %vm648_vm4, %v15162_v18, 0.0 }
 0x147   : > { %v589_v31 = vpop.xlane.xlu0 %588 }
 0x148   : > { %13957 = vrsqrt.f32 %v589_v31 }
 0x149   : > { %v759_v32 = vpop.xlane.xlu1 %758 }
 0x14a   : > { %v15060_v35 = vpop.eup %13949  ;;  %13959 = vrsqrt.f32 %v759_v32 }
 0x14b   : > { %596 = vxpose.xlu0.b32.start [1/3] (short) (narrow) %v15060_v35, 8 }
 0x14c   : > { %v15063_v36 = vpop.eup %13951 }
 0x14d   : > { %766 = vxpose.xlu1.b32.start [1/3] (short) (narrow) %v15063_v36, 8 }
 0x14e   : > { %v15066_v37 = vpop.eup %13953 }
 0x14f   : > { %597 = vxpose.xlu0.b32.cont [2/3] (short) (narrow) %v15066_v37, 8 }
 0x150   : > { %v15069_v38 = vpop.eup %13955 }
 0x151   : > { %767 = vxpose.xlu1.b32.cont [2/3] (short) (narrow) %v15069_v38, 8 }
 0x152   : > { %v15072_v39 = vpop.eup %13957 }
 0x153   : > { %598 = vxpose.xlu0.b32.end [3/3] (short) (narrow) %v15072_v39, 8 }
 0x154   : > { %v15075_v41 = vpop.eup %13959 }
 0x155   : > { %768 = vxpose.xlu1.b32.end [3/3] (short) (narrow) %v15075_v41, 8 }
 0x17c   : > { %1694 = vadd.xlane.f32.xlu1 %v1693_v9 }
 0x180   : > { %1689 = vadd.xlane.f32.xlu0 %v1688_v61  ;;  %1962 = vadd.xlane.f32.xlu1 %v1961_v63 }
 0x184   : > { %1701 = vadd.xlane.f32.xlu0 %v1700_v4  ;;  %1968 = vadd.xlane.f32.xlu1 %v1967_v22 }
 0x188   : > { %1965 = vadd.xlane.f32.xlu0 %v1964_v8 }
 0x193   : > { %v734_v31 = vpop.f32.mrb[0].mxu1 }
 0x194   : > { %v12282_v32 = vpop.f32.mrb[1].mxu1 }
 0x197   : > { %v739_v42 = vpop.f32.mrb[2].mxu1 }
 0x198   : > { %v12285_v58 = vpop.f32.mrb[3].mxu1 }
 0x19b   : > { %v744_v62 = vpop.f32.mrb[4].mxu1 }
 0x19c   : > { %v550_v21 = vpop.f32.mrb[0].mxu0  ;;  %v12288_v49 = vpop.f32.mrb[5].mxu1 }
 0x19d   : > { %v12267_v1 = vpop.f32.mrb[1].mxu0 }
 0x1a0   : > { %v555_v9 = vpop.f32.mrb[2].mxu0 }
 0x1a1   : > { %v12270_v61 = vpop.f32.mrb[3].mxu0 }
 0x1a4   : > { %v560_v52 = vpop.f32.mrb[4].mxu0 }
 0x1a5   : > { %v12273_v4 = vpop.f32.mrb[5].mxu0 }
 0x1a6   : > { %v628_v4 = vlaneseq }
 0x1a8   : > { %v1050_v0 = vpop.f32.mrb[6].mxu0  ;;  %v629_v51 = vshrl.u32 %v628_v4, 7 }
 0x1a9   : > { %v12293_v17 = vpop.f32.mrb[7].mxu0 }
 0x1ac   : > { %v1055_v63 = vpop.f32.mrb[8].mxu0 }
 0x1ad   : > { %v12296_v8 = vpop.f32.mrb[9].mxu0 }
 0x1b0   : > { %v1060_v28 = vpop.f32.mrb[10].mxu0 }
 0x1b1   : > { %v12299_v29 = vpop.f32.mrb[11].mxu0 }
 0x1b5   : > { %v11303_v34 = vpop.f32.mrb[6].mxu1 }
 0x1b6   : > { %v11304_v44 = vpop.f32.mrb[7].mxu1 }
 0x1b7   : > { %v11305_v32 = vadd.f32 %v11304_v44, %v11303_v34  ;;  %v15176_v44 = vsub.s32 0, %v629_v51 }
 0x1b9   : > { %v15170_v22 = vadd.f32 %v11305_v32, %v1050_v0  ;;  %v11306_v58 = vpop.f32.mrb[8].mxu1  ;;  %18550 = vst [vmem:[#allocation22_spill] sm:$0xff] %v15176_v44 }
 0x1ba   : > { %v11307_v24 = vpop.f32.mrb[9].mxu1 }
 0x1bb   : > { %v11308_v48 = vadd.f32 %v11307_v24, %v11306_v58  ;;  %v594_v58 = vmul.f32 %v15066_v37, %v555_v9 }
 0x1bd   : > { %v15172_v49 = vadd.f32 %v11308_v48, %v1055_v63  ;;  %v11309_v1 = vpop.f32.mrb[10].mxu1  ;;  %v593_v48 = vmul.f32 %v15060_v35, %v550_v21  ;;  %v765_v35 = vmul.f32 %v15075_v41, %v744_v62 }
 0x1be   : > { %v11310_v61 = vpop.f32.mrb[11].mxu1 }
 0x1bf   : > { %v11311_v55 = vadd.f32 %v11310_v61, %v11309_v1 }
 0x1c1   : > { %v15174_v19 = vadd.f32 %v11311_v55, %v1060_v28  ;;  %v1219_v17 = vpop.f32.mrb[12].mxu1  ;;  %v595_v28 = vmul.f32 %v15072_v39, %v560_v52 }
 0x1c2   : > { %v12304_v8 = vpop.f32.mrb[13].mxu1 }
 0x1c5   : > { %v1224_v29 = vpop.f32.mrb[14].mxu1 }
 0x1c6   : > { %v12307_v2 = vpop.f32.mrb[15].mxu1 }
 0x1c7   : > { %v763_v2 = vmul.f32 %v15063_v36, %v734_v31 }
 0x1c8   : > { %v11348_v14 = vpop.f32.mrb[12].mxu0 }
 0x1c9   : > { %v11349_v34 = vpop.f32.mrb[13].mxu0  ;;  %v1229_v0 = vpop.f32.mrb[16].mxu1 }
 0x1ca   : > { %v11350_v32 = vadd.f32 %v11349_v34, %v11348_v14  ;;  %v12310_v24 = vpop.f32.mrb[17].mxu1  ;;  %v764_v34 = vmul.f32 %v15069_v38, %v739_v42 }
 0x1cb   : > { %v612_v63 = vpop.trf.xlu0 }
 0x1cc   : > { %v1220_v55 = vadd.f32 %v11350_v32, %v1219_v17  ;;  %v631_v1 = vrot.slane %v612_v63, %v15176_v44  ;;  %v11351_v61 = vpop.f32.mrb[14].mxu0 }
 0x1cd   : > { %v11352_v4 = vpop.f32.mrb[15].mxu0  ;;  %v782_v51 = vpop.trf.xlu1 }
 0x1ce   : > { %13961 = vrcp.f32 %v1220_v55  ;;  %v632_v8 = vmul.f32 %v631_v1, %v593_v48  ;;  %v633_v20 = vmul.f32 %v631_v1, %v594_v58  ;;  %v634_v14 = vmul.f32 %v631_v1, %v595_v28 }
 0x1cf   : > { %v11353_v21 = vadd.f32 %v11352_v4, %v11351_v61  ;;  %v801_v37 = vrot.slane %v782_v51, %v15176_v44 }
 0x1d0   : > { %v11354_v39 = vpop.f32.mrb[16].mxu0  ;;  %v10836_v36 = vclamps-f32 %v632_v8, 1.0  ;;  %v10837_v31 = vclamps-f32 %v633_v20, 1.0  ;;  %v10838_v63 = vclamps-f32 %v634_v14, 1.0  ;;  %v18551_v8 = vmov 0.0  }
 0x1d1   : > { %v802_v9 = vmul.f32 %v801_v37, %v763_v2  ;;  %v803_v52 = vmul.f32 %v801_v37, %v764_v34  ;;  %v804_v17 = vmul.f32 %v801_v37, %v765_v35  ;;  %v1225_v32 = vadd.f32 %v11353_v21, %v1224_v29  ;;  %v11355_v24 = vpop.f32.mrb[17].mxu0 }
 0x1d2   : > { %v11356_v55 = vadd.f32 %v11355_v24, %v11354_v39 }
 0x1d3   : > { %v10845_v48 = vclamps-f32 %v802_v9, 1.0  ;;  %v10846_v58 = vclamps-f32 %v803_v52, 1.0  ;;  %v10847_v28 = vclamps-f32 %v804_v17, 1.0  ;;  %13963 = vrcp.f32 %v1225_v32 }
 0x1d4   : > { %v1230_v38 = vadd.f32 %v11356_v55, %v1229_v0 }
 0x1d5   : > { %v811_v41 = vsub.f32 %v10836_v36, %v10845_v48  ;;  %v812_v42 = vsub.f32 %v10837_v31, %v10846_v58  ;;  %v813_v62 = vsub.f32 %v10838_v63, %v10847_v28 }
 0x1d6   : > { %13965 = vrcp.f32 %v1230_v38 }
 0x1d7   : > { %v1347_v1 = vsel %vm1346_vm11, %v811_v41, 0.0  ;;  %v1348_v29 = vsel %vm1346_vm11, %v812_v42, 0.0  ;;  %v1351_v4 = vsel %vm1350_vm12, %v813_v62, 0.0 }
 0x1d8   : > { %v13962_v61 = vpop.eup %13961  ;;  %v1349_v2 = vadd.f32 %v1348_v29, %v1347_v1 }
 0x1d9   : > { %v1234_v20 = vmul.f32 %v13962_v61, %v15170_v22 }
 0x1da   : > { %v1352_v51 = vadd.f32 %v1351_v4, %v1349_v2 }
 0x1db   : > { %12320 = vmatmul.mubr.msk.f32.vlgmr.msra.gmra.mrb[18].mxu1 %vm18430_vm13, %v1234_v20 }
 0x1dc   : > { %v1353_v0 = vrot.slane %v1352_v51, 4  ;;  %12322 = vmatprep.mubr.msk.f32.mxu1 %vm14557_vm5, %v18551_v8  ;;  %13227 = vmatpush3.bf16.msra.mxu1 %v15143_v47 }
 0x1dd   : > { %v13964_v14 = vpop.eup %13963  ;;  %12347 = vmatprep.subr.mxu1 %v18551_v8 }
 0x1de   : > { %v1354_v34 = vadd.f32 %v1353_v0, %v1352_v51  ;;  %v1236_v35 = vmul.f32 %v13964_v14, %v15172_v49 }
 0x1e0   : > { %v13966_v21 = vpop.eup %13965  ;;  %v1355_v37 = vrot.slane %v1354_v34, 2  ;;  %12323 = vmatmul.mubr.msk.f32.gmra.mrb[20].mxu1 %vm18430_vm13, %v1236_v35 }
 0x1e1   : > { %12325 = vmatprep.mubr.msk.f32.mxu1 %vm14557_vm5, %v18551_v8  ;;  %v1238_v22 = vmul.f32 %v13966_v21, %v15174_v19  ;;  %12348 = vmatpush3.msk.msra.mxu1 %vm373_vm1, %v15150_v12 }
 0x1e2   : > { %v1356_v39 = vadd.f32 %v1355_v37, %v1354_v34 }
 0x1e4   : > { %v1357_v9 = vrot.slane %v1356_v39, 1  ;;  %12326 = vmatmul.mubr.msk.f32.gmra.mrb[22].mxu1 %vm18430_vm13, %v1238_v22 }
 0x1e5   : > { %12349 = vmatprep.mubr.msk.f32.mxu1 %vm14557_vm5, %v18551_v8 }
 0x1e6   : > { %v1358_v49 = vadd.f32 %v1357_v9, %v1356_v39 }
 0x1e8   : > { %v1359_v52 = vmul.f32 %v1358_v49, %v811_v41  ;;  %v1360_v17 = vmul.f32 %v1358_v49, %v812_v42  ;;  %v1361_v32 = vmul.f32 %v1358_v49, %v813_v62 }
 0x1ea   : > { %v1362_v24 = vmul.f32 0.31622776, %v1359_v52  ;;  %v1363_v36 = vmul.f32 0.31622776, %v1360_v17  ;;  %v1364_v31 = vmul.f32 0.31622776, %v1361_v32 }
 0x1ec   : > { %13967 = vtanh.f32 %v1362_v24 }
 0x1ed   : > { %13969 = vtanh.f32 %v1363_v36 }
 0x1ee   : > { %13971 = vtanh.f32 %v1364_v31 }
 0x1f6   : > { %v13968_v19 = vpop.eup %13967 }
 0x1f7   : > { %v13970_v63 = vpop.eup %13969  ;;  %v1368_v55 = vmul.f32 1.442695, %v13968_v19 }
 0x1f8   : > { %v13972_v48 = vpop.eup %13971  ;;  %v1370_v58 = vmul.f32 1.442695, %v13970_v63 }
 0x1f9   : > { %13973 = vpow2.f32 %v1368_v55  ;;  %v1372_v28 = vmul.f32 1.442695, %v13972_v48 }
 0x1fa   : > { %13975 = vpow2.f32 %v1370_v58 }
 0x1fb   : > { %13977 = vpow2.f32 %v1372_v28 }
 0x203   : > { %v13974_v38 = vpop.eup %13973 }
 0x204   : > { %v13976_v1 = vpop.eup %13975  ;;  %v1374_v29 = vmul.f32 %v13974_v38, %v811_v41  ;;  %12350 = vmatmul.mubr.msk.f32.vlgmr.msra.gmra.mrb[24].mxu1 %vm1346_vm11, %v13974_v38 }
 0x205   : > { %v13978_v61 = vpop.eup %13977  ;;  %12352 = vmatprep.mubr.msk.f32.mxu1 %vm14557_vm5, %v18551_v8  ;;  %v1375_v2 = vmul.f32 %v13976_v1, %v812_v42 }
 0x206   : > { %12335 = vmatmul.mubr.msk.f32.vlgmr.msra.gmra.mrb[18].mxu0 %vm1346_vm11, %v1374_v29  ;;  %v1376_v20 = vmul.f32 %v13978_v61, %v813_v62 }
 0x207   : > { %12337 = vmatprep.mubr.msk.f32.mxu0 %vm14557_vm5, %v18551_v8 }
 0x208   : > { %12353 = vmatmul.mubr.msk.f32.gmra.mrb[26].mxu1 %vm1346_vm11, %v13976_v1 }
 0x209   : > { %12355 = vmatprep.mubr.msk.f32.mxu1 %vm14557_vm5, %v18551_v8  ;;  %v1695_v4 = vpop.xlane.xlu1 %1694 }
 0x20a   : > { %12338 = vmatmul.mubr.msk.f32.gmra.mrb[20].mxu0 %vm1346_vm11, %v1375_v2  ;;  %v1704_v41 = vmul.f32 0.0038461538, %v1695_v4 }
 0x20b   : > { %12340 = vmatprep.mubr.msk.f32.mxu0 %vm14557_vm5, %v18551_v8 }
 0x20c   : > { %12356 = vmatmul.mubr.msk.f32.gmra.mrb[28].mxu1 %vm1346_vm11, %v13978_v61  ;;  %v1709_v42 = vsub.f32 %v15106_v46, %v1704_v41  ;;  %v1710_v62 = vsub.f32 %v15109_v23, %v1704_v41  ;;  %v15221_v0 = vsub.f32 %v15047_v7, %v1704_v41 }
 0x20d   : > { %v1690_v51 = vpop.xlane.xlu0 %1689 }
 0x20e   : > { %12341 = vmatmul.mubr.msk.f32.gmra.mrb[22].mxu0 %vm1346_vm11, %v1376_v20  ;;  %v1703_v14 = vmul.f32 0.0038461538, %v1690_v51  ;;  %v1887_v34 = vmul.f32 %v1709_v42, %v1709_v42  ;;  %v1888_v35 = vmul.f32 %v1710_v62, %v1710_v62  ;;  %v1889_v9 = vmul.f32 %v15221_v0, %v15221_v0 }
 0x20f   : > { %12360 = vmatprep.mubr.msk.f32.mxu0 %vm14557_vm5, %v18551_v8 }
 0x210   : > { %v1706_v21 = vsub.f32 %v15114_v3, %v1703_v14  ;;  %v1707_v37 = vsub.f32 %v15117_v53, %v1703_v14  ;;  %v1708_v22 = vsub.f32 %v15044_v6, %v1703_v14  ;;  %v1898_v24 = vadd.f32 %v1888_v35, %v1887_v34  ;;  %v1963_v34 = vpop.xlane.xlu1 %1962 }
 0x211   : > { %v1702_v39 = vpop.xlane.xlu0 %1701  ;;  %v1899_v28 = vsel %vm363_vm0, %v1889_v9, 0.0 }
 0x212   : > { %v1705_v49 = vmul.f32 0.0038461538, %v1702_v39  ;;  %v1884_v52 = vmul.f32 %v1706_v21, %v1706_v21  ;;  %v1885_v17 = vmul.f32 %v1707_v37, %v1707_v37  ;;  %1788 = vmatprep.mubr.f32.mxu1 %v1707_v37  ;;  %v1886_v32 = vmul.f32 %v1708_v22, %v1708_v22 }
 0x213   : > { %v13228_v36 = vpack.c.bf16 %v1710_v62, %v1707_v37  ;;  %v13230_v31 = vpack.c.bf16 %v1709_v42, %v1706_v21  ;;  %v1900_v2 = vadd.f32 %v1899_v28, %v1898_v24  ;;  %v13233_v35 = vpack.c.bf16 %v15221_v0, %v1708_v22 }
 0x214   : > { %v1712_v19 = vsub.f32 %v15120_v43, %v1705_v49  ;;  %v1713_v63 = vsub.f32 %v15123_v54, %v1705_v49  ;;  %v1714_v55 = vsub.f32 %v15054_v13, %v1705_v49  ;;  %v1893_v48 = vadd.f32 %v1885_v17, %v1884_v52 }
 0x215   : > { %v1894_v58 = vsel %vm363_vm0, %v1886_v32, 0.0  ;;  %13229 = vmatprep.subr.bf16.mxu1 %v13228_v36  ;;  %v1970_v37 = vmul.f32 0.0625, %v1963_v34  ;;  %v18552_v39 = vmov 0.0|0.0   ;;  %v1966_v52 = vpop.xlane.xlu0 %1965 }
 0x216   : > { %v1895_v38 = vadd.f32 %v1894_v58, %v1893_v48  ;;  %v1890_v1 = vmul.f32 %v1712_v19, %v1712_v19  ;;  %v1891_v29 = vmul.f32 %v1713_v63, %v1713_v63  ;;  %v1892_v61 = vmul.f32 %v1714_v55, %v1714_v55  ;;  %13231 = vmatpush1.bf16.xpose.msra.mxu1 %v13230_v31 }
 0x217   : > { %1728 = vmatprep.subr.mxu1 %v1713_v63  ;;  %v15242_v9 = vsub.f32 %v15156_v5, %v1970_v37  ;;  %v1971_v32 = vmul.f32 0.0625, %v1966_v52  ;;  %v1969_v5 = vpop.xlane.xlu1 %1968  ;;  %v2139_v48 = vadd.f32 %v15109_v23, %v15117_v53 }
 0x218   : > { %1896 = vadd.xlane.f32.xlu0 %v1895_v38  ;;  %v1903_v20 = vsel %vm373_vm1, %v1890_v1, 0.0  ;;  %v1904_v4 = vsel %vm373_vm1, %v1891_v29, 0.0  ;;  %v1906_v51 = vsel %vm377_vm2, %v1892_v61, 0.0 }
 0x219   : > { %v1905_v41 = vadd.f32 %v1904_v4, %v1903_v20  ;;  %v2065_v49 = vmul.f32 %v15242_v9, %v15242_v9  ;;  %v2140_v28 = vadd.f32 %v2139_v48, %v15133_v25 }
 0x21b   : > { %v1907_v14 = vadd.f32 %v1906_v51, %v1905_v41  ;;  %v2068_v17 = vsel %vm641_vm3, %v2065_v49, 0.0  ;;  %v2141_v29 = vrot.slane %v2140_v28, 4 }
 0x21c   : > { %1901 = vadd.xlane.f32.xlu0 %v1900_v2  ;;  %2069 = vadd.xlane.f32.xlu1 %v2068_v17  ;;  %v15291_v2 = vld [vmem:[%s18365_s5] sm:$0x3] }
 0x21d   : > { %v2142_v61 = vadd.f32 %v2141_v29, %v2140_v28  ;;  %18553 = vst [vmem:[#allocation23_spill] sm:$0xff] %v15291_v2  ;;  %12359 = vmatpush3.msk.msra.mxu0 %vm18429_vm8, %v15291_v2 }
 0x21e   : > { %1729 = vmatpush1.xpose.msra.mxu1 %v1712_v19  ;;  %13236 = vmatprep.subr.bf16.mxu0 %v18552_v39 }
 0x21f   : > { %13232 = vmatprep.subr.bf16.mxu1 %v18552_v39  ;;  %v2143_v4 = vrot.slane %v2142_v61, 2 }
 0x220   : > { %1908 = vadd.xlane.f32.xlu0 %v1907_v14 }
 0x221   : > { %1789 = vmatmul.mubr.f32.vlgmr.msra.gmra.mrb[30].mxu1 %v1706_v21  ;;  %v1972_v21 = vmul.f32 0.0625, %v1969_v5  ;;  %v2144_v51 = vadd.f32 %v2143_v4, %v2142_v61 }
 0x222   : > { %13235 = vmatpush3.bf16.xpose.msk.msra.mxu1 %vm14789_vm7, %v13233_v35  ;;  %1793 = vmatprep.mubr.f32.mxu1 %v1710_v62  ;;  %v15254_v62 = vsub.f32 %v15159_v15, %v1971_v32 }
 0x223   : > { %12373 = vmatprep.subr.mxu1 %v18551_v8  ;;  %v15266_v24 = vsub.f32 %v15162_v18, %v1972_v21  ;;  %v2149_v18 = vrot.slane %v15058_v16, 4  ;;  %v2145_v35 = vrot.slane %v2144_v51, 1 }
 0x225   : > { %1794 = vmatmul.mubr.f32.gmra.mrb[32].mxu1 %v1709_v42  ;;  %v2066_v42 = vmul.f32 %v15254_v62, %v15254_v62  ;;  %v2146_v17 = vadd.f32 %v2145_v35, %v2144_v51  ;;  %v18554_v51 = vld [vmem:[#allocation12_spill] sm:$0xff]  ;;  %v18555_v35 = vld [vmem:[#allocation13_spill] sm:$0xff] }
 0x226   : > { %1798 = vmatprep.mubr.f32.mxu1 %v1713_v63 }
 0x227   : > { %v2071_v15 = vsel %vm641_vm3, %v2066_v42, 0.0  ;;  %v2156_v21 = vmul.f32 %v15117_v53, %v2146_v17 }
 0x228   : > { %2072 = vadd.xlane.f32.xlu1 %v2071_v15 }
 0x229   : > { %1799 = vmatmul.mubr.f32.gmra.mrb[34].mxu1 %v1712_v19 }
 0x22a   : > { %12374 = vmatpush3.xpose.msk.msra.mxu1 %vm363_vm0, %v1714_v55  ;;  %12375 = vmatprep.mubr.msk.f32.mxu1 %vm14557_vm5, %v18551_v8 }
 0x22b   : > { %12399 = vmatprep.subr.mxu1 %v18551_v8 }
 0x22d   : > { %12376 = vmatmul.mubr.msk.f32.vlgmr.msra.gmra.mrb[30].mxu1 %vm363_vm0, %v1708_v22 }
 0x22e   : > { %12378 = vmatprep.mubr.msk.f32.mxu1 %vm14557_vm5, %v18551_v8  ;;  %12400 = vmatpush3.msk.msra.mxu1 %vm373_vm1, %v14879_v10  ;;  %v2067_v10 = vmul.f32 %v15266_v24, %v15266_v24 }
 0x22f   : > { %13273 = vmatprep.subr.bf16.mxu1 %v14793_v30 }
 0x230   : > { %v2074_v22 = vsel %vm648_vm4, %v2067_v10, 0.0  ;;  %v2165_v10 = vmul.f32 0.31622776, %v2156_v21 }
 0x231   : > { %12379 = vmatmul.mubr.msk.f32.gmra.mrb[32].mxu1 %vm363_vm0, %v15221_v0  ;;  %2075 = vadd.xlane.f32.xlu1 %v2074_v22  ;;  %v2150_v0 = vadd.f32 %v2149_v18, %v15058_v16  ;;  %v2159_v22 = vmul.f32 %v15109_v23, %v2146_v17 }
 0x232   : > { %12381 = vmatprep.mubr.msk.f32.mxu1 %vm14557_vm5, %v18551_v8 }
 0x233   : > { %v2151_v36 = vrot.slane %v2150_v0, 2 }
 0x235   : > { %12382 = vmatmul.mubr.msk.f32.gmra.mrb[34].mxu1 %vm363_vm0, %v1714_v55  ;;  %v2152_v31 = vadd.f32 %v2151_v36, %v2150_v0  ;;  %v2131_v55 = vadd.f32 %v15106_v46, %v15114_v3 }
 0x236   : > { %12401 = vmatprep.mubr.msk.f32.mxu1 %vm14557_vm5, %v18551_v8 }
 0x237   : > { %v2153_v19 = vrot.slane %v2152_v31, 1  ;;  %v2132_v1 = vadd.f32 %v2131_v55, %v15129_v60 }
 0x239   : > { %v2154_v63 = vadd.f32 %v2153_v19, %v2152_v31  ;;  %v2133_v16 = vrot.slane %v2132_v1, 4  ;;  %v2162_v19 = vmul.f32 %v15123_v54, %v2146_v17  ;;  %v18556_v17 = vld [vmem:[#allocation14_spill] sm:$0xff] }
 0x23b   : > { %v2157_v58 = vmul.f32 %v15044_v6, %v2154_v63  ;;  %v2134_v20 = vadd.f32 %v2133_v16, %v2132_v1  ;;  %v2160_v14 = vmul.f32 %v15047_v7, %v2154_v63  ;;  %v2163_v37 = vmul.f32 %v15054_v13, %v2154_v63 }
 0x23c   : > { %v2168_v63 = vmul.f32 0.31622776, %v2159_v22  ;;  %v2171_v28 = vmul.f32 0.31622776, %v2162_v19  ;;  %v18559_v22 = vld [vmem:[#allocation17_spill] sm:$0xff] }
 0x23d   : > { %v2166_v38 = vmul.f32 0.31622776, %v2157_v58  ;;  %v2135_v41 = vrot.slane %v2134_v20, 2  ;;  %v2169_v49 = vmul.f32 0.31622776, %v2160_v14 }
 0x23e   : > { %v2172_v32 = vmul.f32 0.31622776, %v2163_v37 }
 0x23f   : > { %13979 = vtanh.f32 %v2166_v38  ;;  %v2136_v34 = vadd.f32 %v2135_v41, %v2134_v20 }
 0x241   : > { %v2137_v52 = vrot.slane %v2136_v34, 1 }
 0x243   : > { %v2138_v5 = vadd.f32 %v2137_v52, %v2136_v34 }
 0x245   : > { %v2155_v15 = vmul.f32 %v15114_v3, %v2138_v5  ;;  %v2158_v0 = vmul.f32 %v15106_v46, %v2138_v5  ;;  %v2161_v48 = vmul.f32 %v15120_v43, %v2138_v5  ;;  %v18557_v5 = vld [vmem:[#allocation15_spill] sm:$0xff] }
 0x247   : > { %v2164_v36 = vmul.f32 0.31622776, %v2155_v15  ;;  %v2170_v38 = vmul.f32 0.31622776, %v2161_v48 }
 0x249   : > { %v13980_v25 = vpop.eup %13979 }
 0x24a   : > { %v2186_v60 = vmul.f32 1.442695, %v13980_v25 }
 0x24c   : > { %13981 = vpow2.f32 %v2186_v60 }
 0x24d   : > { %13983 = vtanh.f32 %v2169_v49 }
 0x24e   : > { %13985 = vtanh.f32 %v2172_v32 }
 0x24f   : > { %13987 = vtanh.f32 %v2165_v10 }
 0x250   : > { %13989 = vtanh.f32 %v2164_v36 }
 0x251   : > { %13991 = vtanh.f32 %v2168_v63 }
 0x256   : > { %v15299_v42 = vpop.eup %13981 }
 0x257   : > { %v2202_v18 = vmul.f32 %v15299_v42, %v15044_v6  ;;  %v13984_v31 = vpop.eup %13983  ;;  %v2167_v6 = vmul.f32 0.31622776, %v2158_v0 }
 0x258   : > { %v2192_v58 = vmul.f32 1.442695, %v13984_v31  ;;  %v13986_v55 = vpop.eup %13985 }
 0x259   : > { %12402 = vmatmul.mubr.msk.f32.vlgmr.msra.gmra.mrb[36].mxu1 %vm363_vm0, %v2202_v18  ;;  %13993 = vtanh.f32 %v2167_v6  ;;  %v2198_v1 = vmul.f32 1.442695, %v13986_v55  ;;  %v13988_v29 = vpop.eup %13987 }
 0x25a   : > { %13275 = vmatpush3.bf16.msra.mxu1 %v14817_v40  ;;  %12404 = vmatprep.mubr.msk.f32.mxu1 %vm14557_vm5, %v18551_v8  ;;  %13995 = vpow2.f32 %v2192_v58  ;;  %v2184_v16 = vmul.f32 1.442695, %v13988_v29  ;;  %v13990_v61 = vpop.eup %13989 }
 0x25b   : > { %13277 = vmatprep.subr.bf16.mxu1 %v14823_v45  ;;  %13997 = vtanh.f32 %v2171_v28  ;;  %v13992_v20 = vpop.eup %13991  ;;  %v2182_v25 = vmul.f32 1.442695, %v13990_v61 }
 0x25c   : > { %13999 = vtanh.f32 %v2170_v38  ;;  %v2190_v60 = vmul.f32 1.442695, %v13992_v20  ;;  %v15373_v20 = vld [vmem:[%s14615_s8 + $0xa0] sm:$0xff] }
 0x25d   : > { %14001 = vpow2.f32 %v2198_v1 }
 0x25e   : > { %13279 = vmatpush3.bf16.msra.mxu1 %v14847_v26  ;;  %14003 = vpow2.f32 %v2184_v16 }
 0x25f   : > { %13281 = vmatprep.subr.bf16.mxu1 %v14851_v50  ;;  %14005 = vpow2.f32 %v2182_v25  ;;  %v15376_v25 = vld [vmem:[%s14615_s8 + $0xb8] sm:$0xff] }
 0x260   : > { %14007 = vpow2.f32 %v2190_v60 }
 0x262   : > { %13283 = vmatpush3.bf16.msra.mxu1 %v14881_v56 }
 0x263   : > { %13285 = vmatprep.subr.bf16.mxu1 %v14886_v57  ;;  %v13994_v4 = vpop.eup %13993 }
 0x264   : > { %v15320_v41 = vpop.eup %13995  ;;  %v2188_v49 = vmul.f32 1.442695, %v13994_v4 }
 0x265   : > { %v13998_v14 = vpop.eup %13997  ;;  %v2205_v37 = vmul.f32 %v15320_v41, %v15047_v7  ;;  %v18558_v7 = vld [vmem:[#allocation16_spill] sm:$0xff] }
 0x266   : > { %13287 = vmatpush3.bf16.msra.mxu1 %v14908_v59  ;;  %v14000_v34 = vpop.eup %13999  ;;  %v2196_v32 = vmul.f32 1.442695, %v13998_v14  ;;  %14009 = vpow2.f32 %v2188_v49  ;;  %v15385_v49 = vsel %vm363_vm0, %v15376_v25, 0.0 }
 0x267   : > { %13289 = vmatprep.subr.bf16.mxu1 %v14911_v11  ;;  %v15326_v52 = vpop.eup %14001  ;;  %12405 = vmatmul.mubr.msk.f32.gmra.mrb[38].mxu1 %vm363_vm0, %v2205_v37  ;;  %v2194_v15 = vmul.f32 1.442695, %v14000_v34  ;;  %v2985_v37 = vsel %vm363_vm0, %v15373_v20, 0.0 }
 0x268   : > { %12407 = vmatprep.mubr.msk.f32.mxu1 %vm14557_vm5, %v18551_v8  ;;  %v2208_v21 = vmul.f32 %v15326_v52, %v15054_v13  ;;  %14011 = vpow2.f32 %v2196_v32  ;;  %v15336_v10 = vpop.eup %14003 }
 0x269   : > { %14013 = vpow2.f32 %v2194_v15  ;;  %v15342_v18 = vpop.eup %14005  ;;  %v15392_v15 = vld [vmem:[%s14615_s8 + $0xd0] sm:$0xf] }
 0x26a   : > { %13291 = vmatpush3.bf16.msra.mxu1 %v14932_v33  ;;  %v15344_v0 = vpop.eup %14007 }
 0x26b   : > { %13293 = vmatprep.subr.bf16.mxu1 %v18554_v51  ;;  %12408 = vmatmul.mubr.msk.f32.gmra.mrb[40].mxu1 %vm363_vm0, %v2208_v21  ;;  %v3445_v21 = vadd.f32 %v15385_v49, %v2985_v37 }
 0x26c   : > { %2451 = vmatprep.mubr.f32.mxu1 %v15336_v10 }
 0x26e   : > { %13295 = vmatpush3.bf16.msra.mxu1 %v18555_v35 }
 0x26f   : > { %13297 = vmatprep.subr.bf16.mxu1 %v18556_v17 }
 0x270   : > { %v15350_v13 = vpop.eup %14009 }
 0x272   : > { %13299 = vmatpush3.bf16.msra.mxu1 %v18557_v5  ;;  %v15352_v36 = vpop.eup %14011 }
 0x273   : > { %13301 = vmatprep.subr.bf16.mxu1 %v18558_v7  ;;  %v15359_v31 = vpop.eup %14013 }
 0x276   : > { %13303 = vmatpush3.bf16.msra.mxu1 %v18559_v22 }
 0x277   : > { %13311 = vmatprep.subr.bf16.mxu1 %v18552_v39 }
 0x279   : > { %2452 = vmatmul.mubr.f32.vlgmr.msra.gmra.mrb[42].mxu1 %v15342_v18 }
 0x27a   : > { %2456 = vmatprep.mubr.f32.mxu1 %v15344_v0  ;;  %13313 = vmatpush3.bf16.msra.mxu1 %v15143_v47 }
 0x27b   : > { %12442 = vmatprep.subr.mxu1 %v18551_v8 }
 0x27d   : > { %2457 = vmatmul.mubr.f32.gmra.mrb[44].mxu1 %v15350_v13 }
 0x27e   : > { %2461 = vmatprep.mubr.f32.mxu1 %v15352_v36  ;;  %12443 = vmatpush3.msk.msra.mxu1 %vm373_vm1, %v15150_v12 }
 0x27f   : > { %12468 = vmatprep.subr.mxu1 %v18551_v8 }
 0x281   : > { %2462 = vmatmul.mubr.f32.gmra.mrb[46].mxu1 %v15359_v31 }
 0x282   : > { %12444 = vmatprep.mubr.msk.f32.mxu1 %vm14557_vm5, %v18551_v8 }
 0x2a5   : > { %v1897_v19 = vpop.xlane.xlu0 %1896 }
 0x2a6   : > { %14015 = vrsqrt.f32 %v1897_v19  ;;  %v2997_v19 = vsel %vm377_vm2, %v15392_v15, 0.0 }
 0x2a9   : > { %v1902_v63 = vpop.xlane.xlu0 %1901  ;;  %v2070_v55 = vpop.xlane.xlu1 %2069 }
 0x2aa   : > { %14017 = vrsqrt.f32 %v1902_v63  ;;  %v15396_v63 = vadd.f32 %v3445_v21, %v2997_v19  ;;  %v15411_v21 = vld [vmem:[%s14615_s8 + $0x98] sm:$0xff] }
 0x2ac   : > { %18561 = vst [vmem:[#allocation25_spill] sm:$0xff] %v15396_v63  ;;  %v15417_v63 = vld [vmem:[%s14615_s8 + $0xc8] sm:$0xf] }
 0x2ad   : > { %v1909_v48 = vpop.xlane.xlu0 %1908 }
 0x2ae   : > { %v1319_v6 = vpop.f32.mrb[18].mxu1  ;;  %14019 = vrsqrt.f32 %v1909_v48 }
 0x2af   : > { %v12321_v58 = vpop.f32.mrb[19].mxu1  ;;  %14021 = vrsqrt.f32 %v2070_v55  ;;  %v1334_v1 = vsel %vm1333_vm14, %v1319_v6, 0.0 }
 0x2b0   : > { %v15364_v12 = vpop.eup %14015 }
 0x2b1   : > { %1916 = vxpose.xlu0.b32.start [1/3] (short) (narrow) %v15364_v12, 8 }
 0x2b3   : > { %v1324_v28 = vpop.f32.mrb[20].mxu1 }
 0x2b4   : > { %v15367_v38 = vpop.eup %14017  ;;  %v1335_v29 = vsel %vm1333_vm14, %v1324_v28, 0.0  ;;  %v12324_v16 = vpop.f32.mrb[21].mxu1 }
 0x2b5   : > { %v1336_v61 = vadd.f32 %v1335_v29, %v1334_v1  ;;  %1917 = vxpose.xlu0.b32.cont [2/3] (short) (narrow) %v15367_v38, 8  ;;  %v2073_v6 = vpop.xlane.xlu1 %2072 }
 0x2b6   : > { %14023 = vrsqrt.f32 %v2073_v6 }
 0x2b7   : > { %v1329_v4 = vpop.f32.mrb[22].mxu1 }
 0x2b8   : > { %v15378_v60 = vpop.eup %14019  ;;  %v1338_v14 = vsel %vm1337_vm15, %v1329_v4, 0.0  ;;  %v12327_v34 = vpop.f32.mrb[23].mxu1 }
 0x2b9   : > { %18560 = vst [vmem:[#allocation24_spill] sm:$0xff] %v15378_v60  ;;  %v15387_v32 = vadd.f32 %v1338_v14, %v1336_v61  ;;  %1918 = vxpose.xlu0.b32.end [3/3] (short) (narrow) %v15378_v60, 8  ;;  %v15398_v48 = vpop.eup %14021  ;;  %v15408_v34 = vld [vmem:[%s14615_s8 + $0x90] sm:$0xff] }
 0x2ba   : > { %18562 = vst [vmem:[#allocation26_spill] sm:$0xff] %v15398_v48  ;;  %2083 = vxpose.xlu1.b32.start [1/3] (short) (narrow) %v15398_v48, 8 }
 0x2be   : > { %v2076_v58 = vpop.xlane.xlu1 %2075 }
 0x2bf   : > { %14025 = vrsqrt.f32 %v2076_v58  ;;  %v15414_v58 = vld [vmem:[%s14615_s8 + $0xc0] sm:$0xf] }
 0x2c0   : > { %v15401_v55 = vpop.eup %14023  ;;  %18565 = vst [vmem:[#allocation29_spill] sm:$0xff] %v15414_v58 }
 0x2c1   : > { %18563 = vst [vmem:[#allocation27_spill] sm:$0xff] %v15401_v55  ;;  %2084 = vxpose.xlu1.b32.cont [2/3] (short) (narrow) %v15401_v55, 8 }
 0x2c9   : > { %v15404_v28 = vpop.eup %14025 }
 0x2ca   : > { %18564 = vst [vmem:[#allocation28_spill] sm:$0xff] %v15404_v28  ;;  %2085 = vxpose.xlu1.b32.end [3/3] (short) (narrow) %v15404_v28, 8 }
 0x2d7   : > { %v1544_v1 = vpop.f32.mrb[24].mxu1 }
 0x2d8   : > { %14027 = vrcp.f32 %v1544_v1  ;;  %v12351_v29 = vpop.f32.mrb[25].mxu1  ;;  %v2984_v1 = vadd.f32 %v15411_v21, %v15408_v34 }
 0x2d9   : > { %v1455_v16 = vpop.f32.mrb[18].mxu0 }
 0x2da   : > { %v12336_v61 = vpop.f32.mrb[19].mxu0 }
 0x2db   : > { %v1549_v4 = vpop.f32.mrb[26].mxu1  ;;  %v15423_v61 = vsel %vm373_vm1, %v15414_v58, 0.0 }
 0x2dc   : > { %14029 = vrcp.f32 %v1549_v4  ;;  %v12354_v14 = vpop.f32.mrb[27].mxu1  ;;  %v15427_v4 = vsel %vm373_vm1, %v15417_v63, 0.0 }
 0x2dd   : > { %v1460_v6 = vpop.f32.mrb[20].mxu0  ;;  %v2996_v60 = vadd.f32 %v15427_v4, %v15423_v61 }
 0x2de   : > { %v12339_v27 = vpop.f32.mrb[21].mxu0 }
 0x2df   : > { %v1554_v2 = vpop.f32.mrb[28].mxu1  ;;  %v2986_v27 = vadd.f32 %v2985_v37, %v2984_v1  ;;  %v15446_v1 = vld [vmem:[%s14615_s8 + $0xb0] sm:$0xff] }
 0x2e0   : > { %14031 = vrcp.f32 %v1554_v2  ;;  %v12357_v29 = vpop.f32.mrb[29].mxu1  ;;  %v13237_v2 = vpack.c.bf16 %v15254_v62, %v15242_v9 }
 0x2e1   : > { %v1465_v14 = vpop.f32.mrb[22].mxu0 }
 0x2e2   : > { %v14028_v47 = vpop.eup %14027  ;;  %v12342_v28 = vpop.f32.mrb[23].mxu0 }
 0x2e3   : > { %v1559_v55 = vmul.f32 %v14028_v47, %v1455_v16  ;;  %v2998_v47 = vadd.f32 %v2997_v19, %v2996_v60 }
 0x2e5   : > { %12361 = vmatmul.mubr.msk.f32.vlgmr.msra.gmra.mrb[24].mxu0 %vm18425_vm9, %v1559_v55  ;;  %v15443_v55 = vld [vmem:[%s14615_s8 + $0xa8] sm:$0xff] }
 0x2e6   : > { %v14030_v29 = vpop.eup %14029  ;;  %13239 = vmatpush3.bf16.xpose.msk.msra.mxu0 %vm14747_vm6, %v13237_v2  ;;  %12363 = vmatprep.mubr.msk.f32.mxu0 %vm14557_vm5, %v18551_v8  ;;  %v2989_v60 = vadd.f32 %v15446_v1, %v15443_v55  ;;  %v2203_v2 = vmul.f32 %v15350_v13, %v15106_v46  ;;  %v18567_v46 = vld [vmem:[#allocation18_spill] sm:$0xff] }
 0x2e7   : > { %v1561_v28 = vmul.f32 %v14030_v29, %v1460_v6  ;;  %12388 = vmatprep.subr.mxu0 %v18551_v8  ;;  %2987 = vadd.xlane.f32.xlu0 %v2986_v27  ;;  %v2204_v27 = vmul.f32 %v15344_v0, %v15109_v23  ;;  %v15500_v29 = vld [vmem:[%s18362_s2 + $0x100] sm:$0xf]  ;;  %v2206_v23 = vmul.f32 %v15359_v31, %v15120_v43  ;;  %v18568_v43 = vld [vmem:[#allocation19_spill] sm:$0xff] }
 0x2e8   : > { %v2991_v19 = vadd.f32 %v15385_v49, %v2989_v60 }
 0x2e9   : > { %12364 = vmatmul.mubr.msk.f32.gmra.mrb[26].mxu0 %vm18425_vm9, %v1561_v28 }
 0x2ea   : > { %v14032_v37 = vpop.eup %14031  ;;  %12366 = vmatprep.mubr.msk.f32.mxu0 %vm14557_vm5, %v18551_v8 }
 0x2eb   : > { %v1563_v16 = vmul.f32 %v14032_v37, %v1465_v14  ;;  %2999 = vadd.xlane.f32.xlu0 %v2998_v47  ;;  %v2200_v14 = vmul.f32 %v15342_v18, %v15114_v3  ;;  %v2207_v3 = vmul.f32 %v15352_v36, %v15123_v54 }
 0x2ed   : > { %12367 = vmatmul.mubr.msk.f32.gmra.mrb[28].mxu0 %vm18425_vm9, %v1563_v16  ;;  %vm1670_vm9 = vcmask 57344  }
 0x2ee   : > { %12389 = vmatpush3.xpose.msk.msra.mxu0 %vm641_vm3, %v15266_v24  ;;  %12390 = vmatprep.mubr.msk.f32.mxu0 %vm14557_vm5, %v18551_v8 }
 0x2ef   : > { %13241 = vmatprep.subr.bf16.mxu0 %v14793_v30 }
 0x2f1   : > { %12391 = vmatmul.mubr.msk.f32.vlgmr.msra.gmra.mrb[30].mxu0 %vm641_vm3, %v15242_v9  ;;  %v2201_v9 = vmul.f32 %v15336_v10, %v15117_v53  ;;  %2992 = vadd.xlane.f32.xlu1 %v2991_v19 }
 0x2f2   : > { %13243 = vmatpush3.bf16.msra.mxu0 %v14817_v40  ;;  %12393 = vmatprep.mubr.msk.f32.mxu0 %vm14557_vm5, %v18551_v8 }
 0x2f3   : > { %13245 = vmatprep.subr.bf16.mxu0 %v14823_v45 }
 0x2f5   : > { %12394 = vmatmul.mubr.msk.f32.gmra.mrb[32].mxu0 %vm641_vm3, %v15254_v62 }
 0x2f6   : > { %13247 = vmatpush3.bf16.msra.mxu0 %v14847_v26  ;;  %12396 = vmatprep.mubr.msk.f32.mxu0 %vm14557_vm5, %v18551_v8 }
 0x2f7   : > { %13249 = vmatprep.subr.bf16.mxu0 %v14851_v50 }
 0x2f9   : > { %12397 = vmatmul.mubr.msk.f32.gmra.mrb[34].mxu0 %vm641_vm3, %v15266_v24 }
 0x2fa   : > { %13251 = vmatpush3.bf16.msra.mxu0 %v14881_v56  ;;  %2282 = vmatprep.mubr.f32.mxu0 %v2201_v9 }
 0x2fb   : > { %13253 = vmatprep.subr.bf16.mxu0 %v14886_v57 }
 0x2fe   : > { %13255 = vmatpush3.bf16.msra.mxu0 %v14908_v59 }
 0x2ff   : > { %13257 = vmatprep.subr.bf16.mxu0 %v14911_v11 }
 0x300   : > { %v15477_v62 = vpop.f32.mrb[30].mxu1 }
 0x301   : > { %v12377_v49 = vpop.f32.mrb[31].mxu1 }
 0x302   : > { %13259 = vmatpush3.bf16.msra.mxu0 %v14932_v33 }
 0x303   : > { %13261 = vmatprep.subr.bf16.mxu0 %v18554_v51 }
 0x304   : > { %v15481_v53 = vpop.f32.mrb[32].mxu1 }
 0x305   : > { %v12380_v10 = vpop.f32.mrb[33].mxu1 }
 0x306   : > { %13263 = vmatpush3.bf16.msra.mxu0 %v18555_v35 }
 0x307   : > { %13265 = vmatprep.subr.bf16.mxu0 %v18556_v17 }
 0x308   : > { %v15485_v24 = vpop.f32.mrb[34].mxu1 }
 0x309   : > { %v12383_v6 = vpop.f32.mrb[35].mxu1 }
 0x30a   : > { %13267 = vmatpush3.bf16.msra.mxu0 %v18557_v5  ;;  %v15544_v6 = vld [vmem:[%s14654_s11 + $0x30] sm:$0xff] }
 0x30b   : > { %13269 = vmatprep.subr.bf16.mxu0 %v18558_v7 }
 0x30e   : > { %13271 = vmatpush3.bf16.msra.mxu0 %v18559_v22 }
 0x30f   : > { %12410 = vmatprep.subr.mxu0 %v18551_v8 }
 0x311   : > { %2283 = vmatmul.mubr.f32.vlgmr.msra.gmra.mrb[36].mxu0 %v2200_v14  ;;  %v15547_v14 = vld [vmem:[%s14654_s11 + $0x38] sm:$0xff] }
 0x312   : > { %12411 = vmatpush3.msk.msra.mxu0 %vm373_vm1, %v15500_v29  ;;  %2287 = vmatprep.mubr.f32.mxu0 %v2204_v27  ;;  %v15550_v27 = vld [vmem:[%s14654_s11 + $0x40] sm:$0xf] }
 0x313   : > { %13304 = vmatprep.subr.bf16.mxu0 %v18552_v39 }
 0x315   : > { %2288 = vmatmul.mubr.f32.gmra.mrb[38].mxu0 %v2203_v2 }
 0x316   : > { %2292 = vmatprep.mubr.f32.mxu0 %v2207_v3 }
 0x319   : > { %2293 = vmatmul.mubr.f32.gmra.mrb[40].mxu0 %v2206_v23  ;;  %v3259_v23 = vsel %vm641_vm3, %v15544_v6, 0.0 }
 0x31a   : > { %12412 = vmatprep.mubr.msk.f32.mxu0 %vm14557_vm5, %v18551_v8  ;;  %3260 = vadd.xlane.f32.xlu1 %v3259_v23 }
 0x31d   : > { %12413 = vmatmul.mubr.msk.f32.vlgmr.msra.gmra.mrb[42].mxu0 %vm363_vm0, %v15299_v42 }
 0x31e   : > { %12415 = vmatprep.mubr.msk.f32.mxu0 %vm14557_vm5, %v18551_v8  ;;  %13306 = vmatpush3.bf16.msra.mxu0 %v18567_v46 }
 0x31f   : > { %13307 = vmatprep.subr.bf16.mxu0 %v18552_v39 }
 0x321   : > { %12416 = vmatmul.mubr.msk.f32.gmra.mrb[44].mxu0 %vm363_vm0, %v15320_v41 }
 0x322   : > { %12418 = vmatprep.mubr.msk.f32.mxu0 %vm14557_vm5, %v18551_v8  ;;  %13310 = vmatpush3.bf16.msk.msra.mxu0 %vm15097_vm10, %v18568_v43 }
 0x323   : > { %13314 = vmatprep.subr.bf16.mxu0 %v18552_v39 }
 0x325   : > { %12419 = vmatmul.mubr.msk.f32.gmra.mrb[46].mxu0 %vm363_vm0, %v15326_v52 }
 0x326   : > { %12429 = vmatprep.mubr.msk.f32.mxu0 %vm14557_vm5, %v18551_v8 }
 0x32c   : > { %v15529_v42 = vpop.f32.mrb[36].mxu1 }
 0x32d   : > { %v12403_v18 = vpop.f32.mrb[37].mxu1 }
 0x32e   : > { %v3262_v18 = vsel %vm641_vm3, %v15547_v14, 0.0 }
 0x32f   : > { %3263 = vadd.xlane.f32.xlu0 %v3262_v18 }
 0x331   : > { %v1932_v49 = vpop.trf.xlu0 }
 0x33a   : > { %v15531_v41 = vpop.f32.mrb[38].mxu1 }
 0x33b   : > { %v12406_v0 = vpop.f32.mrb[39].mxu1 }
 0x33e   : > { %v15533_v13 = vpop.f32.mrb[40].mxu1 }
 0x33f   : > { %v12409_v36 = vpop.f32.mrb[41].mxu1 }
 0x342   : > { %v15541_v10 = vpop.trf.xlu1 }
 0x34c   : > { %v11473_v31 = vpop.f32.mrb[42].mxu1 }
 0x34d   : > { %v11474_v28 = vpop.f32.mrb[43].mxu1 }
 0x34e   : > { %v15535_v47 = vadd.f32 %v11474_v28, %v11473_v31  ;;  %v3265_v31 = vsel %vm648_vm4, %v15550_v27, 0.0 }
 0x34f   : > { %3266 = vadd.xlane.f32.xlu1 %v3265_v31 }
 0x350   : > { %v11476_v52 = vpop.f32.mrb[44].mxu1 }
 0x351   : > { %v11477_v37 = vpop.f32.mrb[45].mxu1 }
 0x352   : > { %v15537_v16 = vadd.f32 %v11477_v37, %v11476_v52 }
 0x354   : > { %v11479_v60 = vpop.f32.mrb[46].mxu1 }
 0x355   : > { %v11480_v19 = vpop.f32.mrb[47].mxu1 }
 0x356   : > { %v15539_v9 = vadd.f32 %v11480_v19, %v11479_v60 }
 0x374   : > { %v2988_v2 = vpop.xlane.xlu0 %2987 }
 0x375   : > { %v3001_v0 = vmul.f32 0.0038461538, %v2988_v2 }
 0x377   : > { %v15559_v28 = vsub.f32 %v15408_v34, %v3001_v0  ;;  %v15562_v52 = vsub.f32 %v15411_v21, %v3001_v0  ;;  %v15565_v37 = vsub.f32 %v15373_v20, %v3001_v0 }
 0x379   : > { %v3182_v18 = vmul.f32 %v15559_v28, %v15559_v28  ;;  %v3183_v54 = vmul.f32 %v15562_v52, %v15562_v52  ;;  %v3184_v0 = vmul.f32 %v15565_v37, %v15565_v37 }
 0x37b   : > { %v3191_v7 = vadd.f32 %v3183_v54, %v3182_v18  ;;  %v3192_v31 = vsel %vm363_vm0, %v3184_v0, 0.0 }
 0x37d   : > { %v3193_v35 = vadd.f32 %v3192_v31, %v3191_v7 }
 0x37e   : > { %v2993_v3 = vpop.xlane.xlu1 %2992 }
 0x37f   : > { %v3002_v36 = vmul.f32 0.0038461538, %v2993_v3  ;;  %v3000_v3 = vpop.xlane.xlu0 %2999  ;;  %3194 = vadd.xlane.f32.xlu0 %v3193_v35 }
 0x380   : > { %v3003_v23 = vmul.f32 0.0038461538, %v3000_v3 }
 0x381   : > { %v15568_v60 = vsub.f32 %v15443_v55, %v3002_v36  ;;  %v15571_v19 = vsub.f32 %v15446_v1, %v3002_v36  ;;  %v15574_v2 = vsub.f32 %v15376_v25, %v3002_v36 }
 0x382   : > { %v15589_v3 = vsub.f32 %v15414_v58, %v3003_v23  ;;  %v15592_v48 = vsub.f32 %v15417_v63, %v3003_v23  ;;  %v15595_v22 = vsub.f32 %v15392_v15, %v3003_v23 }
 0x383   : > { %v3185_v43 = vmul.f32 %v15568_v60, %v15568_v60  ;;  %v3186_v46 = vmul.f32 %v15571_v19, %v15571_v19  ;;  %v3187_v36 = vmul.f32 %v15574_v2, %v15574_v2 }
 0x384   : > { %v3188_v51 = vmul.f32 %v15589_v3, %v15589_v3  ;;  %v3189_v33 = vmul.f32 %v15592_v48, %v15592_v48  ;;  %v3190_v11 = vmul.f32 %v15595_v22, %v15595_v22 }
 0x385   : > { %v3196_v5 = vadd.f32 %v3186_v46, %v3185_v43  ;;  %v3197_v17 = vsel %vm363_vm0, %v3187_v36, 0.0  ;;  %v1340_v36 = vrot.slane %v15387_v32, 4 }
 0x386   : > { %v3201_v23 = vsel %vm373_vm1, %v3188_v51, 0.0  ;;  %v3202_v54 = vsel %vm373_vm1, %v3189_v33, 0.0  ;;  %v3204_v46 = vsel %vm377_vm2, %v3190_v11, 0.0  ;;  %v1913_v11 = vmul.f32 %v15364_v12, %v15477_v62 }
 0x387   : > { %v3198_v59 = vadd.f32 %v3197_v17, %v3196_v5  ;;  %v3203_v18 = vadd.f32 %v3202_v54, %v3201_v23  ;;  %v1341_v51 = vadd.f32 %v1340_v36, %v15387_v32  ;;  %v18570_v32 = vld [vmem:[#allocation26_spill] sm:$0xff] }
 0x389   : > { %3199 = vadd.xlane.f32.xlu0 %v3198_v59  ;;  %v3205_v7 = vadd.f32 %v3204_v46, %v3203_v18  ;;  %v1951_v59 = vrot.slane %v1932_v49, %v15176_v44  ;;  %v1342_v18 = vrot.slane %v1341_v51, 2 }
 0x38b   : > { %v1343_v12 = vadd.f32 %v1342_v18, %v1341_v51 }
 0x38d   : > { %3206 = vadd.xlane.f32.xlu0 %v3205_v7  ;;  %v2118_v7 = vrot.slane %v15541_v10, %v15176_v44  ;;  %v18572_v44 = vld [vmem:[#allocation27_spill] sm:$0xff]  ;;  %v1344_v26 = vrot.slane %v1343_v12, 1 }
 0x3b8   : > { %v1643_v43 = vpop.f32.mrb[24].mxu0 }
 0x3b9   : > { %v12362_v0 = vpop.f32.mrb[25].mxu0  ;;  %v1657_v57 = vsel %vm1333_vm14, %v1643_v43, 0.0 }
 0x3bc   : > { %v1648_v31 = vpop.f32.mrb[26].mxu0 }
 0x3bd   : > { %v1658_v35 = vsel %vm1333_vm14, %v1648_v31, 0.0  ;;  %v12365_v17 = vpop.f32.mrb[27].mxu0  ;;  %v1952_v31 = vmul.f32 %v1951_v59, %v1913_v11 }
 0x3be   : > { %v1659_v5 = vadd.f32 %v1658_v35, %v1657_v57  ;;  %v1914_v57 = vmul.f32 %v15367_v38, %v15481_v53  ;;  %v18571_v17 = vld [vmem:[#allocation24_spill] sm:$0xff] }
 0x3c0   : > { %v1653_v33 = vpop.f32.mrb[28].mxu0  ;;  %v1953_v56 = vmul.f32 %v1951_v59, %v1914_v57 }
 0x3c1   : > { %v1660_v23 = vsel %vm1337_vm15, %v1653_v33, 0.0  ;;  %v12368_v54 = vpop.f32.mrb[29].mxu0  ;;  %v1915_v33 = vmul.f32 %v18571_v17, %v15485_v24  ;;  %v18573_v24 = vld [vmem:[#allocation28_spill] sm:$0xff] }
 0x3c2   : > { %v1661_v46 = vadd.f32 %v1660_v23, %v1659_v5  ;;  %v10890_v23 = vclamps-f32 %v1952_v31, 1.0  ;;  %v1345_v31 = vadd.f32 %v1344_v26, %v1343_v12 }
 0x3c3   : > { %v1954_v51 = vmul.f32 %v1951_v59, %v1915_v33 }
 0x3c4   : > { %v1662_v43 = vrot.slane %v1661_v46, 4  ;;  %v2051_v0 = vpop.f32.mrb[30].mxu0 }
 0x3c5   : > { %v2080_v36 = vmul.f32 %v18570_v32, %v2051_v0  ;;  %v12392_v35 = vpop.f32.mrb[31].mxu0 }
 0x3c6   : > { %v1663_v62 = vadd.f32 %v1662_v43, %v1661_v46  ;;  %v10891_v43 = vclamps-f32 %v1953_v56, 1.0 }
 0x3c7   : > { %v2119_v49 = vmul.f32 %v2118_v7, %v2080_v36 }
 0x3c8   : > { %v1664_v54 = vrot.slane %v1663_v62, 2  ;;  %v2056_v5 = vpop.f32.mrb[32].mxu0 }
 0x3c9   : > { %v10899_v10 = vclamps-f32 %v2119_v49, 1.0  ;;  %v2081_v50 = vmul.f32 %v18572_v44, %v2056_v5  ;;  %v12395_v11 = vpop.f32.mrb[33].mxu0  ;;  %v349_v44 = vld [vmem:[%s18366_s6] sm:$0x1]  ;;  %v10892_v49 = vclamps-f32 %v1954_v51, 1.0 }
 0x3ca   : > { %v1665_v58 = vadd.f32 %v1664_v54, %v1663_v62 }
 0x3cb   : > { %v15624_v38 = vsub.f32 %v10890_v23, %v10899_v10  ;;  %v2120_v53 = vmul.f32 %v2118_v7, %v2081_v50 }
 0x3cc   : > { %v1666_v18 = vrot.slane %v1665_v58, 1  ;;  %v2061_v46 = vpop.f32.mrb[34].mxu0 }
 0x3cd   : > { %v10900_v0 = vclamps-f32 %v2120_v53, 1.0  ;;  %v2082_v32 = vmul.f32 %v18573_v24, %v2061_v46  ;;  %v12398_v36 = vpop.f32.mrb[35].mxu0  ;;  %v2653_v26 = vsel %vm1346_vm11, %v15624_v38, 0.0 }
 0x3ce   : > { %v1667_v57 = vadd.f32 %v1666_v18, %v1665_v58 }
 0x3cf   : > { %v15630_v35 = vsub.f32 %v10891_v43, %v10900_v0  ;;  %v2121_v62 = vmul.f32 %v2118_v7, %v2082_v32 }
 0x3d0   : > { %v1668_v17 = vadd.f32 %v1667_v57, %v1345_v31 }
 0x3d1   : > { %v2654_v50 = vsel %vm1346_vm11, %v15630_v35, 0.0  ;;  %v10901_v56 = vclamps-f32 %v2121_v62, 1.0 }
 0x3d2   : > { %v1669_v58 = vadd.f32 %v1668_v17, %v349_v44  ;;  %v2655_v59 = vadd.f32 %v2654_v50, %v2653_v26 }
 0x3d3   : > { %v15642_v12 = vsub.f32 %v10892_v49, %v10901_v56 }
 0x3d4   : > { %1671 = vst.msk [vmem:[%s15636_s25] sm:$0x1] %vm1670_vm9, %v1669_v58 }
 0x3d5   : > { %v2656_v7 = vsel %vm1350_vm12, %v15642_v12, 0.0 }
 0x3d6   : > { %v2657_v33 = vadd.f32 %v2656_v7, %v2655_v59 }
 0x3d8   : > { %v2658_v54 = vrot.slane %v2657_v33, 4 }
 0x3da   : > { %v2659_v5 = vadd.f32 %v2658_v54, %v2657_v33 }
 0x3dc   : > { %v2660_v23 = vrot.slane %v2659_v5, 2 }
 0x3de   : > { %v2661_v10 = vadd.f32 %v2660_v23, %v2659_v5 }
 0x3e0   : > { %v2662_v11 = vrot.slane %v2661_v10, 1 }
 0x3e2   : > { %v2663_v53 = vadd.f32 %v2662_v11, %v2661_v10 }
 0x3e4   : > { %v2664_v51 = vmul.f32 %v2663_v53, %v15624_v38  ;;  %v2665_v18 = vmul.f32 %v2663_v53, %v15630_v35  ;;  %v2666_v46 = vmul.f32 %v2663_v53, %v15642_v12  ;;  %v11428_v43 = vpop.f32.mrb[36].mxu0 }
 0x3e5   : > { %v11429_v0 = vpop.f32.mrb[37].mxu0 }
 0x3e6   : > { %v2667_v24 = vmul.f32 0.31622776, %v2664_v51  ;;  %v2668_v32 = vmul.f32 0.31622776, %v2665_v18  ;;  %v2669_v36 = vmul.f32 0.31622776, %v2666_v46  ;;  %v11430_v31 = vadd.f32 %v11429_v0, %v11428_v43 }
 0x3e8   : > { %14033 = vtanh.f32 %v2667_v24  ;;  %v2365_v57 = vadd.f32 %v11430_v31, %v15529_v42  ;;  %v11431_v44 = vpop.f32.mrb[38].mxu0  ;;  %v18574_v31 = vld [vmem:[#allocation21_spill] sm:$0xff] }
 0x3e9   : > { %14035 = vtanh.f32 %v2668_v32  ;;  %v11432_v62 = vpop.f32.mrb[39].mxu0 }
 0x3ea   : > { %14037 = vtanh.f32 %v2669_v36  ;;  %v11433_v49 = vadd.f32 %v11432_v62, %v11431_v44  ;;  %v13317_v62 = vpack.c.bf16 %v15571_v19, %v15562_v52 }
 0x3ec   : > { %v2370_v17 = vadd.f32 %v11433_v49, %v15531_v41  ;;  %v11434_v26 = vpop.f32.mrb[40].mxu0  ;;  %v15680_v49 = vld [vmem:[%s18363_s3 + $0x10] sm:$0xf] }
 0x3ed   : > { %v11435_v50 = vpop.f32.mrb[41].mxu0 }
 0x3ee   : > { %v11436_v56 = vadd.f32 %v11435_v50, %v11434_v26  ;;  %v13322_v26 = vpack.c.bf16 %v15574_v2, %v15565_v37 }
 0x3f0   : > { %v2375_v58 = vadd.f32 %v11436_v56, %v15533_v13  ;;  %v2533_v59 = vpop.f32.mrb[42].mxu0 }
 0x3f1   : > { %v2534_v7 = vadd.f32 %v15535_v47, %v2533_v59  ;;  %v12414_v33 = vpop.f32.mrb[43].mxu0 }
 0x3f2   : > { %v14034_v54 = vpop.eup %14033 }
 0x3f3   : > { %v14036_v5 = vpop.eup %14035  ;;  %v2673_v23 = vmul.f32 1.442695, %v14034_v54  ;;  %14039 = vrcp.f32 %v2534_v7 }
 0x3f4   : > { %v14038_v42 = vpop.eup %14037  ;;  %v2538_v10 = vpop.f32.mrb[44].mxu0  ;;  %v2675_v11 = vmul.f32 1.442695, %v14036_v5  ;;  %v18577_v5 = vld [vmem:[#allocation25_spill] sm:$0xff] }
 0x3f5   : > { %14041 = vpow2.f32 %v2673_v23  ;;  %v2677_v53 = vmul.f32 1.442695, %v14038_v42  ;;  %v2539_v41 = vadd.f32 %v15537_v16, %v2538_v10  ;;  %v12417_v51 = vpop.f32.mrb[45].mxu0  ;;  %v3447_v23 = vrot.slane %v18577_v5, 4 }
 0x3f6   : > { %14043 = vpow2.f32 %v2675_v11 }
 0x3f7   : > { %14045 = vpow2.f32 %v2677_v53  ;;  %v3448_v42 = vadd.f32 %v3447_v23, %v18577_v5 }
 0x3f8   : > { %14047 = vrcp.f32 %v2539_v41  ;;  %v2543_v13 = vpop.f32.mrb[46].mxu0 }
 0x3f9   : > { %v2544_v18 = vadd.f32 %v15539_v9, %v2543_v13  ;;  %v12420_v47 = vpop.f32.mrb[47].mxu0  ;;  %v3449_v10 = vrot.slane %v3448_v42, 2  ;;  %v3437_v13 = vadd.f32 %v15446_v1, %v15411_v21 }
 0x3fb   : > { %14049 = vrcp.f32 %v2544_v18  ;;  %v3450_v11 = vadd.f32 %v3449_v10, %v3448_v42  ;;  %v18579_v42 = vld [vmem:[#allocation5_spill] sm:$0xff]  ;;  %v18580_v10 = vld [vmem:[#allocation6_spill] sm:$0xff] }
 0x3fd   : > { %v14040_v46 = vpop.eup %14039  ;;  %v3451_v53 = vrot.slane %v3450_v11, 1 }
 0x3fe   : > { %v2548_v43 = vmul.f32 %v14040_v46, %v2365_v57  ;;  %v3429_v46 = vadd.f32 %v15443_v55, %v15408_v34 }
 0x3ff   : > { %v14042_v0 = vpop.eup %14041  ;;  %v3452_v51 = vadd.f32 %v3451_v53, %v3450_v11  ;;  %v18581_v53 = vld [vmem:[#allocation7_spill] sm:$0xff] }
 0x400   : > { %v14044_v24 = vpop.eup %14043  ;;  %12430 = vmatmul.mubr.msk.f32.vlgmr.msra.gmra.mrb[48].mxu0 %vm18430_vm13, %v2548_v43  ;;  %v2679_v32 = vmul.f32 %v14042_v0, %v15624_v38  ;;  %v18575_v38 = vld [vmem:[#allocation23_spill] sm:$0xff]  ;;  %v3438_v43 = vadd.f32 %v3437_v13, %v15427_v4  ;;  %v18583_v13 = vld [vmem:[#allocation9_spill] sm:$0xff] }
 0x401   : > { %v14046_v36 = vpop.eup %14045  ;;  %13316 = vmatpush3.bf16.msra.mxu0 %v18574_v31  ;;  %12432 = vmatprep.mubr.msk.f32.mxu0 %vm14557_vm5, %v18551_v8  ;;  %v2680_v16 = vmul.f32 %v14044_v24, %v15630_v35  ;;  %v3455_v18 = vmul.f32 %v15373_v20, %v3452_v51  ;;  %v3461_v4 = vmul.f32 %v15392_v15, %v3452_v51 }
 0x402   : > { %v14048_v44 = vpop.eup %14047  ;;  %12445 = vmatmul.mubr.msk.f32.vlgmr.msra.gmra.mrb[48].mxu1 %vm1346_vm11, %v2679_v32  ;;  %12457 = vmatprep.subr.mxu0 %v18551_v8  ;;  %v2681_v9 = vmul.f32 %v14046_v36, %v15642_v12  ;;  %v3439_v32 = vrot.slane %v3438_v43, 4 }
 0x403   : > { %v2550_v57 = vmul.f32 %v14048_v44, %v2370_v17  ;;  %12447 = vmatprep.mubr.msk.f32.mxu1 %vm14557_vm5, %v18551_v8  ;;  %12469 = vmatpush3.msk.msra.mxu1 %vm18429_vm8, %v18575_v38  ;;  %v13319_v17 = vpack.c.bf16 %v15568_v60, %v15559_v28  ;;  %vm18596_vm8 = vcmask 15360  }
 0x404   : > { %13325 = vmatprep.subr.bf16.mxu1 %v18552_v39 }
 0x405   : > { %v14050_v35 = vpop.eup %14049  ;;  %12433 = vmatmul.mubr.msk.f32.gmra.mrb[50].mxu0 %vm18430_vm13, %v2550_v57 }
 0x406   : > { %12435 = vmatprep.mubr.msk.f32.mxu0 %vm14557_vm5, %v18551_v8  ;;  %12448 = vmatmul.mubr.msk.f32.gmra.mrb[50].mxu1 %vm1346_vm11, %v2680_v16  ;;  %v2552_v12 = vmul.f32 %v14050_v35, %v2375_v58  ;;  %v3440_v16 = vadd.f32 %v3439_v32, %v3438_v43  ;;  %v18584_v43 = vld [vmem:[#allocation10_spill] sm:$0xff] }
 0x407   : > { %12458 = vmatpush3.msk.msra.mxu0 %vm373_vm1, %v15680_v49  ;;  %12450 = vmatprep.mubr.msk.f32.mxu1 %vm14557_vm5, %v18551_v8 }
 0x408   : > { %13318 = vmatprep.subr.bf16.mxu0 %v13317_v62 }
 0x409   : > { %12436 = vmatmul.mubr.msk.f32.gmra.mrb[52].mxu0 %vm18430_vm13, %v2552_v12  ;;  %v3458_v12 = vmul.f32 %v15376_v25, %v3452_v51  ;;  %v18582_v51 = vld [vmem:[#allocation8_spill] sm:$0xff]  ;;  %vm18598_vm13 = vmmov %vm18596_vm8 }
 0x40a   : > { %12451 = vmatmul.mubr.msk.f32.gmra.mrb[52].mxu1 %vm1346_vm11, %v2681_v9  ;;  %12459 = vmatprep.mubr.msk.f32.mxu0 %vm14557_vm5, %v18551_v8  ;;  %v3441_v9 = vrot.slane %v3440_v16, 2 }
 0x40b   : > { %12470 = vmatprep.mubr.msk.f32.mxu1 %vm14557_vm5, %v18551_v8 }
 0x40c   : > { %v3442_v62 = vadd.f32 %v3441_v9, %v3440_v16 }
 0x40d   : > { %12460 = vmatmul.mubr.msk.f32.vlgmr.msra.gmra.mrb[54].mxu0 %vm1346_vm11, %v14042_v0  ;;  %v3464_v0 = vmul.f32 0.31622776, %v3455_v18 }
 0x40e   : > { %12462 = vmatprep.mubr.msk.f32.mxu0 %vm14557_vm5, %v18551_v8  ;;  %13320 = vmatpush1.bf16.xpose.msra.mxu0 %v13319_v17 }
 0x40f   : > { %3026 = vmatprep.subr.mxu0 %v15592_v48 }
 0x411   : > { %12463 = vmatmul.mubr.msk.f32.gmra.mrb[56].mxu0 %vm1346_vm11, %v14044_v24  ;;  %v3430_v24 = vadd.f32 %v3429_v46, %v15423_v61 }
 0x412   : > { %12465 = vmatprep.mubr.msk.f32.mxu0 %vm14557_vm5, %v18551_v8 }
 0x415   : > { %12466 = vmatmul.mubr.msk.f32.gmra.mrb[58].mxu0 %vm1346_vm11, %v14046_v36  ;;  %v3431_v36 = vrot.slane %v3430_v24, 4 }
 0x416   : > { %3027 = vmatpush1.xpose.msra.mxu0 %v15589_v3  ;;  %3086 = vmatprep.mubr.f32.mxu0 %v15562_v52  ;;  %v3264_v52 = vpop.xlane.xlu0 %3263 }
 0x417   : > { %13321 = vmatprep.subr.bf16.mxu0 %v18552_v39  ;;  %v3269_v56 = vmul.f32 0.0625, %v3264_v52  ;;  %v3432_v44 = vadd.f32 %v3431_v36, %v3430_v24  ;;  %v18585_v36 = vld [vmem:[#allocation11_spill] sm:$0xff] }
 0x419   : > { %3087 = vmatmul.mubr.f32.vlgmr.msra.gmra.mrb[60].mxu0 %v15559_v28  ;;  %v3261_v28 = vpop.xlane.xlu1 %3260  ;;  %v3433_v38 = vrot.slane %v3432_v44, 2 }
 0x41a   : > { %13324 = vmatpush3.bf16.xpose.msk.msra.mxu0 %vm14789_vm7, %v13322_v26  ;;  %3091 = vmatprep.mubr.f32.mxu0 %v15571_v19  ;;  %v3268_v19 = vmul.f32 0.0625, %v3261_v28  ;;  %v3195_v7 = vpop.xlane.xlu0 %3194  ;;  %v3443_v26 = vrot.slane %v3442_v62, 1  ;;  %v3467_v28 = vmul.f32 0.31622776, %v3458_v12 }
 0x41b   : > { %12483 = vmatprep.subr.mxu0 %v18551_v8  ;;  %14051 = vrsqrt.f32 %v3195_v7  ;;  %v3434_v17 = vadd.f32 %v3433_v38, %v3432_v44  ;;  %v18586_v44 = vld [vmem:[#allocation12_spill] sm:$0xff] }
 0x41c   : > { %v3444_v61 = vadd.f32 %v3443_v26, %v3442_v62  ;;  %v18587_v62 = vld [vmem:[#allocation13_spill] sm:$0xff]  ;;  %v18588_v26 = vld [vmem:[#allocation14_spill] sm:$0xff] }
 0x41d   : > { %3092 = vmatmul.mubr.f32.gmra.mrb[62].mxu0 %v15568_v60  ;;  %v15730_v60 = vsub.f32 %v15547_v14, %v3269_v56  ;;  %v3435_v52 = vrot.slane %v3434_v17, 1 }
 0x41e   : > { %3096 = vmatprep.mubr.f32.mxu0 %v15592_v48  ;;  %v15727_v48 = vsub.f32 %v15544_v6, %v3268_v19  ;;  %v3200_v54 = vpop.xlane.xlu0 %3199  ;;  %v3470_v19 = vmul.f32 0.31622776, %v3461_v4 }
 0x41f   : > { %v3364_v59 = vmul.f32 %v15730_v60, %v15730_v60  ;;  %14053 = vrsqrt.f32 %v3200_v54  ;;  %v3436_v56 = vadd.f32 %v3435_v52, %v3434_v17 }
 0x421   : > { %3097 = vmatmul.mubr.f32.gmra.mrb[64].mxu0 %v15589_v3  ;;  %v3267_v3 = vpop.xlane.xlu1 %3266  ;;  %v3369_v14 = vsel %vm641_vm3, %v3364_v59, 0.0 }
 0x422   : > { %12484 = vmatpush3.xpose.msk.msra.mxu0 %vm363_vm0, %v15595_v22  ;;  %12485 = vmatprep.mubr.msk.f32.mxu0 %vm14557_vm5, %v18551_v8  ;;  %v3270_v58 = vmul.f32 0.0625, %v3267_v3  ;;  %v3207_v41 = vpop.xlane.xlu0 %3206  ;;  %v3454_v3 = vmul.f32 %v15411_v21, %v3444_v61  ;;  %v3460_v21 = vmul.f32 %v15417_v63, %v3444_v61 }
 0x423   : > { %12509 = vmatprep.subr.mxu0 %v18551_v8  ;;  %14055 = vrsqrt.f32 %v3207_v41 }
 0x424   : > { %v15743_v6 = vsub.f32 %v15550_v27, %v3270_v58  ;;  %14057 = vtanh.f32 %v3464_v0  ;;  %v3453_v58 = vmul.f32 %v15408_v34, %v3436_v56  ;;  %v3463_v59 = vmul.f32 0.31622776, %v3454_v3  ;;  %v18578_v34 = vld [vmem:[#allocation29_spill] sm:$0xff] }
 0x425   : > { %12486 = vmatmul.mubr.msk.f32.vlgmr.msra.gmra.mrb[60].mxu0 %vm363_vm0, %v15565_v37  ;;  %v3363_v37 = vmul.f32 %v15727_v48, %v15727_v48  ;;  %v15753_v27 = vpop.eup %14051  ;;  %v3469_v23 = vmul.f32 0.31622776, %v3460_v21  ;;  %v15853_v21 = vld [vmem:[%s14615_s8 + $0x100] sm:$0xff] }
 0x426   : > { %12488 = vmatprep.mubr.msk.f32.mxu0 %vm14557_vm5, %v18551_v8  ;;  %12510 = vmatpush3.msk.msra.mxu0 %vm373_vm1, %v15500_v29  ;;  %v3462_v7 = vmul.f32 0.31622776, %v3453_v58 }
 0x427   : > { %13362 = vmatprep.subr.bf16.mxu0 %v14793_v30  ;;  %v3366_v29 = vsel %vm641_vm3, %v3363_v37, 0.0  ;;  %3214 = vxpose.xlu0.b32.start [1/3] (short) (narrow) %v15753_v27, 8 }
 0x428   : > { %3367 = vadd.xlane.f32.xlu1 %v3366_v29  ;;  %v3457_v29 = vmul.f32 %v15446_v1, %v3444_v61  ;;  %v3459_v1 = vmul.f32 %v18578_v34, %v3436_v56  ;;  %v15860_v34 = vld [vmem:[%s14615_s8 + $0x108] sm:$0xf] }
 0x429   : > { %12489 = vmatmul.mubr.msk.f32.gmra.mrb[62].mxu0 %vm363_vm0, %v15574_v2  ;;  %v3365_v2 = vmul.f32 %v15743_v6, %v15743_v6  ;;  %18592 = vst [vmem:[#allocation26_spill] sm:$0xff] %v15860_v34 }
 0x42a   : > { %12491 = vmatprep.mubr.msk.f32.mxu0 %vm14557_vm5, %v18551_v8  ;;  %v3466_v54 = vmul.f32 0.31622776, %v3457_v29  ;;  %v3468_v63 = vmul.f32 0.31622776, %v3459_v1  ;;  %v15863_v1 = vld [vmem:[%s14615_s8 + $0x110] sm:$0xf] }
 0x42b   : > { %v3372_v33 = vsel %vm648_vm4, %v3365_v2, 0.0  ;;  %v3456_v2 = vmul.f32 %v15443_v55, %v3436_v56  ;;  %v18591_v56 = vld [vmem:[#allocation17_spill] sm:$0xff] }
 0x42c   : > { %3370 = vadd.xlane.f32.xlu1 %v3369_v14 }
 0x42d   : > { %12492 = vmatmul.mubr.msk.f32.gmra.mrb[64].mxu0 %vm363_vm0, %v15595_v22  ;;  %v15756_v22 = vpop.eup %14053 }
 0x42e   : > { %12511 = vmatprep.mubr.msk.f32.mxu0 %vm14557_vm5, %v18551_v8  ;;  %3215 = vxpose.xlu0.b32.cont [2/3] (short) (narrow) %v15756_v22, 8  ;;  %v15764_v47 = vpop.eup %14055 }
 0x42f   : > { %v14058_v57 = vpop.eup %14057 }
 0x430   : > { %3373 = vadd.xlane.f32.xlu1 %v3372_v33  ;;  %v3484_v35 = vmul.f32 1.442695, %v14058_v57 }
 0x432   : > { %3216 = vxpose.xlu0.b32.end [3/3] (short) (narrow) %v15764_v47, 8  ;;  %14059 = vpow2.f32 %v3484_v35 }
 0x433   : > { %14061 = vtanh.f32 %v3467_v28  ;;  %v18589_v28 = vld [vmem:[#allocation15_spill] sm:$0xff] }
 0x434   : > { %14063 = vtanh.f32 %v3470_v19 }
 0x435   : > { %14065 = vtanh.f32 %v3463_v59 }
 0x436   : > { %14067 = vtanh.f32 %v3462_v7  ;;  %v15846_v7 = vld [vmem:[%s14615_s8 + $0xe8] sm:$0xff] }
 0x437   : > { %14069 = vtanh.f32 %v3466_v54  ;;  %v15857_v54 = vsel %vm363_vm0, %v15853_v21, 0.0 }
 0x43c   : > { %v15774_v37 = vpop.eup %14059 }
 0x43d   : > { %v3500_v14 = vmul.f32 %v15774_v37, %v15373_v20  ;;  %v14062_v33 = vpop.eup %14061  ;;  %v3465_v20 = vmul.f32 0.31622776, %v3456_v2  ;;  %v15843_v2 = vld [vmem:[%s14615_s8 + $0xe0] sm:$0xff] }
 0x43e   : > { %v3490_v55 = vmul.f32 1.442695, %v14062_v33  ;;  %v14064_v5 = vpop.eup %14063 }
 0x43f   : > { %12512 = vmatmul.mubr.msk.f32.vlgmr.msra.gmra.mrb[66].mxu0 %vm363_vm0, %v3500_v14  ;;  %14071 = vtanh.f32 %v3465_v20  ;;  %v3496_v11 = vmul.f32 1.442695, %v14064_v5  ;;  %v14066_v41 = vpop.eup %14065  ;;  %v15840_v14 = vld [vmem:[%s14615_s8 + $0xd8] sm:$0xff] }
 0x440   : > { %13364 = vmatpush3.bf16.msra.mxu0 %v14817_v40  ;;  %12514 = vmatprep.mubr.msk.f32.mxu0 %vm14557_vm5, %v18551_v8  ;;  %14073 = vpow2.f32 %v3490_v55  ;;  %v3482_v18 = vmul.f32 1.442695, %v14066_v41  ;;  %v14068_v46 = vpop.eup %14067  ;;  %v4282_v33 = vadd.f32 %v15843_v2, %v15840_v14  ;;  %v15867_v5 = vld [vmem:[%s14615_s8 + $0x118] sm:$0xf] }
 0x441   : > { %13366 = vmatprep.subr.bf16.mxu0 %v14823_v45  ;;  %14075 = vtanh.f32 %v3469_v23  ;;  %v14070_v0 = vpop.eup %14069  ;;  %v3480_v32 = vmul.f32 1.442695, %v14068_v46  ;;  %v15871_v23 = vsel %vm373_vm1, %v15860_v34, 0.0  ;;  %v4295_v41 = vsel %vm377_vm2, %v15867_v5, 0.0 }
 0x442   : > { %14077 = vtanh.f32 %v3468_v63  ;;  %v3488_v9 = vmul.f32 1.442695, %v14070_v0  ;;  %18593 = vst [vmem:[#allocation24_spill] sm:$0xff] %v15871_v23  ;;  %v15875_v63 = vsel %vm373_vm1, %v15863_v1, 0.0 }
 0x443   : > { %14079 = vpow2.f32 %v3496_v11  ;;  %18594 = vst [vmem:[#allocation27_spill] sm:$0xff] %v15875_v63  ;;  %v4294_v11 = vadd.f32 %v15875_v63, %v15871_v23 }
 0x444   : > { %13368 = vmatpush3.bf16.msra.mxu0 %v18579_v42  ;;  %14081 = vpow2.f32 %v3482_v18 }
 0x445   : > { %13370 = vmatprep.subr.bf16.mxu0 %v18580_v10  ;;  %14083 = vpow2.f32 %v3480_v32  ;;  %v4296_v46 = vadd.f32 %v4295_v41, %v4294_v11 }
 0x446   : > { %14085 = vpow2.f32 %v3488_v9 }
 0x448   : > { %13372 = vmatpush3.bf16.msra.mxu0 %v18581_v53 }
 0x449   : > { %13374 = vmatprep.subr.bf16.mxu0 %v18582_v51  ;;  %v14072_v24 = vpop.eup %14071 }
 0x44a   : > { %v15795_v16 = vpop.eup %14073  ;;  %v3486_v12 = vmul.f32 1.442695, %v14072_v24 }
 0x44b   : > { %v14076_v57 = vpop.eup %14075  ;;  %v3503_v35 = vmul.f32 %v15795_v16, %v15376_v25  ;;  %v18590_v25 = vld [vmem:[#allocation16_spill] sm:$0xff] }
 0x44c   : > { %13376 = vmatpush3.bf16.msra.mxu0 %v18583_v13  ;;  %v14078_v38 = vpop.eup %14077  ;;  %v3494_v4 = vmul.f32 1.442695, %v14076_v57  ;;  %14087 = vpow2.f32 %v3486_v12 }
 0x44d   : > { %13378 = vmatprep.subr.bf16.mxu0 %v18584_v43  ;;  %v15801_v17 = vpop.eup %14079  ;;  %12515 = vmatmul.mubr.msk.f32.gmra.mrb[68].mxu0 %vm363_vm0, %v3503_v35  ;;  %v3492_v61 = vmul.f32 1.442695, %v14078_v38 }
 0x44e   : > { %12517 = vmatprep.mubr.msk.f32.mxu0 %vm14557_vm5, %v18551_v8  ;;  %v3506_v52 = vmul.f32 %v15801_v17, %v15392_v15  ;;  %14089 = vpow2.f32 %v3494_v4  ;;  %v15811_v19 = vpop.eup %14081 }
 0x44f   : > { %14091 = vpow2.f32 %v3492_v61  ;;  %v15817_v3 = vpop.eup %14083 }
 0x450   : > { %13380 = vmatpush3.bf16.msra.mxu0 %v18585_v36  ;;  %v15819_v15 = vpop.eup %14085 }
 0x451   : > { %13382 = vmatprep.subr.bf16.mxu0 %v18586_v44  ;;  %12518 = vmatmul.mubr.msk.f32.gmra.mrb[70].mxu0 %vm363_vm0, %v3506_v52 }
 0x452   : > { %3749 = vmatprep.mubr.f32.mxu0 %v15811_v19 }
 0x454   : > { %13384 = vmatpush3.bf16.msra.mxu0 %v18587_v62 }
 0x455   : > { %13386 = vmatprep.subr.bf16.mxu0 %v18588_v26 }
 0x456   : > { %v15825_v58 = vpop.eup %14087 }
 0x458   : > { %13388 = vmatpush3.bf16.msra.mxu0 %v18589_v28  ;;  %v15827_v59 = vpop.eup %14089 }
 0x459   : > { %13390 = vmatprep.subr.bf16.mxu0 %v18590_v25  ;;  %v15834_v29 = vpop.eup %14091 }
 0x45c   : > { %13392 = vmatpush3.bf16.msra.mxu0 %v18591_v56 }
 0x45d   : > { %13400 = vmatprep.subr.bf16.mxu0 %v18552_v39 }
 0x45f   : > { %3750 = vmatmul.mubr.f32.vlgmr.msra.gmra.mrb[72].mxu0 %v15817_v3 }
 0x460   : > { %3754 = vmatprep.mubr.f32.mxu0 %v15819_v15  ;;  %13402 = vmatpush3.bf16.msra.mxu0 %v18574_v31 }
 0x461   : > { %12552 = vmatprep.subr.mxu0 %v18551_v8 }
 0x463   : > { %3755 = vmatmul.mubr.f32.gmra.mrb[74].mxu0 %v15825_v58 }
 0x464   : > { %3759 = vmatprep.mubr.f32.mxu0 %v15827_v59  ;;  %12553 = vmatpush3.msk.msra.mxu0 %vm373_vm1, %v15680_v49  ;;  %v4283_v49 = vsel %vm363_vm0, %v15846_v7, 0.0 }
 0x465   : > { %12578 = vmatprep.subr.mxu0 %v18551_v8  ;;  %v4284_v20 = vadd.f32 %v4283_v49, %v4282_v33  ;;  %v4743_v55 = vadd.f32 %v15857_v54, %v4283_v49 }
 0x467   : > { %3760 = vmatmul.mubr.f32.gmra.mrb[76].mxu0 %v15834_v29  ;;  %4285 = vadd.xlane.f32.xlu0 %v4284_v20  ;;  %v15881_v18 = vadd.f32 %v4743_v55, %v4295_v41 }
 0x468   : > { %12554 = vmatprep.mubr.msk.f32.mxu0 %vm14557_vm5, %v18551_v8 }
 0x469   : > { %18595 = vst [vmem:[#allocation28_spill] sm:$0xff] %v15881_v18 }
 0x46b   : > { %4297 = vadd.xlane.f32.xlu0 %v4296_v46 }
 0x4b5   : > { %v3368_v0 = vpop.xlane.xlu1 %3367 }
 0x4b6   : > { %14093 = vrsqrt.f32 %v3368_v0 }
 0x4b9   : > { %v3371_v24 = vpop.xlane.xlu1 %3370 }
 0x4ba   : > { %14095 = vrsqrt.f32 %v3371_v24 }
 0x4bd   : > { %v3374_v32 = vpop.xlane.xlu1 %3373 }
 0x4be   : > { %14097 = vrsqrt.f32 %v3374_v32 }
 0x4c0   : > { %v15883_v9 = vpop.eup %14093 }
 0x4c1   : > { %3381 = vxpose.xlu1.b32.start [1/3] (short) (narrow) %v15883_v9, 8 }
 0x4c4   : > { %v15886_v57 = vpop.eup %14095 }
 0x4c5   : > { %3382 = vxpose.xlu1.b32.cont [2/3] (short) (narrow) %v15886_v57, 8 }
 0x4c8   : > { %v15889_v38 = vpop.eup %14097 }
 0x4c9   : > { %3383 = vxpose.xlu1.b32.end [3/3] (short) (narrow) %v15889_v38, 8 }
 0x4d3   : > { %v2628_v35 = vpop.f32.mrb[48].mxu0 }
 0x4d4   : > { %v12431_v12 = vpop.f32.mrb[49].mxu0  ;;  %v2642_v33 = vsel %vm1333_vm14, %v2628_v35, 0.0 }
 0x4d5   : > { %v2757_v4 = vpop.f32.mrb[48].mxu1 }
 0x4d6   : > { %v12446_v52 = vpop.f32.mrb[49].mxu1 }
 0x4d8   : > { %v2633_v61 = vpop.f32.mrb[50].mxu0 }
 0x4d9   : > { %v2643_v49 = vsel %vm1333_vm14, %v2633_v61, 0.0  ;;  %v12434_v20 = vpop.f32.mrb[51].mxu0  ;;  %v2762_v55 = vpop.f32.mrb[50].mxu1 }
 0x4da   : > { %v2644_v11 = vadd.f32 %v2643_v49, %v2642_v33  ;;  %v12449_v41 = vpop.f32.mrb[51].mxu1  ;;  %v15898_v49 = vld [vmem:[%s14615_s8 + $0xf0] sm:$0xff] }
 0x4db   : > { %v15901_v41 = vld [vmem:[%s14615_s8 + $0xf8] sm:$0xff] }
 0x4dc   : > { %v2638_v46 = vpop.f32.mrb[52].mxu0 }
 0x4dd   : > { %v2645_v0 = vsel %vm1337_vm15, %v2638_v46, 0.0  ;;  %v12437_v24 = vpop.f32.mrb[53].mxu0  ;;  %v2767_v32 = vpop.f32.mrb[52].mxu1 }
 0x4de   : > { %v15895_v23 = vadd.f32 %v2645_v0, %v2644_v11  ;;  %v12452_v12 = vpop.f32.mrb[53].mxu1  ;;  %v4287_v11 = vadd.f32 %v15901_v41, %v15898_v49  ;;  %v13326_v0 = vpack.c.bf16 %v15730_v60, %v15727_v48 }
 0x4e0   : > { %v2846_v52 = vpop.f32.mrb[54].mxu0 }
 0x4e1   : > { %14099 = vrcp.f32 %v2846_v52  ;;  %v12461_v63 = vpop.f32.mrb[55].mxu0 }
 0x4e4   : > { %v2851_v35 = vpop.f32.mrb[56].mxu0 }
 0x4e5   : > { %14101 = vrcp.f32 %v2851_v35  ;;  %v12464_v61 = vpop.f32.mrb[57].mxu0 }
 0x4e6   : > { %v14491_v61 = vld [vmem:[%s14615_s8 + $0x98] sm:$0xff] }
 0x4e8   : > { %v2856_v20 = vpop.f32.mrb[58].mxu0 }
 0x4e9   : > { %14103 = vrcp.f32 %v2856_v20  ;;  %v12467_v33 = vpop.f32.mrb[59].mxu0 }
 0x4eb   : > { %v14100_v18 = vpop.eup %14099 }
 0x4ec   : > { %v2861_v46 = vmul.f32 %v14100_v18, %v2757_v4  ;;  %v4289_v18 = vadd.f32 %v15857_v54, %v4287_v11  ;;  %v14494_v11 = vld [vmem:[%s14615_s8 + $0xa8] sm:$0xff] }
 0x4ee   : > { %12471 = vmatmul.mubr.msk.f32.vlgmr.msra.gmra.mrb[54].mxu1 %vm18596_vm8, %v2861_v46 }
 0x4ef   : > { %v14102_v63 = vpop.eup %14101  ;;  %13328 = vmatpush3.bf16.xpose.msk.msra.mxu1 %vm14747_vm6, %v13326_v0  ;;  %12473 = vmatprep.mubr.msk.f32.mxu1 %vm14557_vm5, %v18551_v8  ;;  %v3501_v0 = vmul.f32 %v14494_v11, %v15825_v58  ;;  %v18599_v58 = vld [vmem:[#allocation18_spill] sm:$0xff] }
 0x4f0   : > { %v2863_v12 = vmul.f32 %v14102_v63, %v2762_v55  ;;  %12498 = vmatprep.subr.mxu1 %v18551_v8  ;;  %4290 = vadd.xlane.f32.xlu1 %v4289_v18  ;;  %v15966_v63 = vld [vmem:[%s18362_s2 + $0x100] sm:$0xf] }
 0x4f2   : > { %12474 = vmatmul.mubr.msk.f32.gmra.mrb[56].mxu1 %vm18598_vm13, %v2863_v12  ;;  %vm18603_vm13 = vcmask 211968  }
 0x4f3   : > { %v14104_v4 = vpop.eup %14103  ;;  %12476 = vmatprep.mubr.msk.f32.mxu1 %vm14557_vm5, %v18551_v8 }
 0x4f4   : > { %v2865_v52 = vmul.f32 %v14104_v4, %v2767_v32 }
 0x4f6   : > { %12477 = vmatmul.mubr.msk.f32.gmra.mrb[58].mxu1 %vm18596_vm8, %v2865_v52  ;;  %vm18604_vm8 = vcmask 1041408  }
 0x4f7   : > { %12499 = vmatpush3.xpose.msk.msra.mxu1 %vm641_vm3, %v15743_v6  ;;  %12500 = vmatprep.mubr.msk.f32.mxu1 %vm14557_vm5, %v18551_v8 }
 0x4f8   : > { %13330 = vmatprep.subr.bf16.mxu1 %v14793_v30  ;;  %v15923_v54 = vpop.f32.mrb[60].mxu0 }
 0x4f9   : > { %v12487_v55 = vpop.f32.mrb[61].mxu0 }
 0x4fa   : > { %12501 = vmatmul.mubr.msk.f32.vlgmr.msra.gmra.mrb[60].mxu1 %vm641_vm3, %v15727_v48  ;;  %v3499_v48 = vmul.f32 %v14491_v61, %v15811_v19  ;;  %v14493_v19 = vld [vmem:[%s14615_s8 + $0xb0] sm:$0xff] }
 0x4fb   : > { %13332 = vmatpush3.bf16.msra.mxu1 %v14817_v40  ;;  %12503 = vmatprep.mubr.msk.f32.mxu1 %vm14557_vm5, %v18551_v8  ;;  %v3502_v46 = vmul.f32 %v14493_v19, %v15819_v15  ;;  %v14497_v15 = vld [vmem:[%s14615_s8 + $0xc0] sm:$0xf] }
 0x4fc   : > { %13334 = vmatprep.subr.bf16.mxu1 %v14823_v45  ;;  %v15931_v32 = vpop.f32.mrb[62].mxu0  ;;  %v3504_v18 = vmul.f32 %v14497_v15, %v15834_v29  ;;  %v16013_v15 = vld [vmem:[%s14654_s11 + $0x50] sm:$0xff] }
 0x4fd   : > { %v12490_v35 = vpop.f32.mrb[63].mxu0 }
 0x4fe   : > { %12504 = vmatmul.mubr.msk.f32.gmra.mrb[62].mxu1 %vm641_vm3, %v15730_v60  ;;  %v14492_v60 = vld [vmem:[%s14615_s8 + $0x90] sm:$0xff] }
 0x4ff   : > { %13336 = vmatpush3.bf16.msra.mxu1 %v18579_v42  ;;  %12506 = vmatprep.mubr.msk.f32.mxu1 %vm14557_vm5, %v18551_v8 }
 0x500   : > { %13338 = vmatprep.subr.bf16.mxu1 %v18580_v10  ;;  %v15941_v20 = vpop.f32.mrb[64].mxu0 }
 0x501   : > { %v12493_v33 = vpop.f32.mrb[65].mxu0 }
 0x502   : > { %12507 = vmatmul.mubr.msk.f32.gmra.mrb[64].mxu1 %vm641_vm3, %v15743_v6  ;;  %v3498_v6 = vmul.f32 %v14492_v60, %v15817_v3  ;;  %v14496_v3 = vld [vmem:[%s14615_s8 + $0xc8] sm:$0xf] }
 0x503   : > { %13340 = vmatpush3.bf16.msra.mxu1 %v18581_v53  ;;  %3580 = vmatprep.mubr.f32.mxu1 %v3499_v48  ;;  %v3505_v12 = vmul.f32 %v14496_v3, %v15827_v59  ;;  %v18600_v59 = vld [vmem:[#allocation19_spill] sm:$0xff] }
 0x504   : > { %13342 = vmatprep.subr.bf16.mxu1 %v18582_v51 }
 0x507   : > { %13344 = vmatpush3.bf16.msra.mxu1 %v18583_v13 }
 0x508   : > { %13346 = vmatprep.subr.bf16.mxu1 %v18584_v43 }
 0x50b   : > { %13348 = vmatpush3.bf16.msra.mxu1 %v18585_v36 }
 0x50c   : > { %13350 = vmatprep.subr.bf16.mxu1 %v18586_v44 }
 0x50f   : > { %13352 = vmatpush3.bf16.msra.mxu1 %v18587_v62 }
 0x510   : > { %13354 = vmatprep.subr.bf16.mxu1 %v18588_v26 }
 0x513   : > { %13356 = vmatpush3.bf16.msra.mxu1 %v18589_v28 }
 0x514   : > { %13358 = vmatprep.subr.bf16.mxu1 %v18590_v25 }
 0x517   : > { %13360 = vmatpush3.bf16.msra.mxu1 %v18591_v56 }
 0x518   : > { %12520 = vmatprep.subr.mxu1 %v18551_v8 }
 0x51a   : > { %3581 = vmatmul.mubr.f32.vlgmr.msra.gmra.mrb[66].mxu1 %v3498_v6 }
 0x51b   : > { %12521 = vmatpush3.msk.msra.mxu1 %vm373_vm1, %v15966_v63  ;;  %3585 = vmatprep.mubr.f32.mxu1 %v3502_v46 }
 0x51c   : > { %13393 = vmatprep.subr.bf16.mxu1 %v18552_v39 }
 0x51e   : > { %3586 = vmatmul.mubr.f32.gmra.mrb[68].mxu1 %v3501_v0  ;;  %v3230_v0 = vpop.trf.xlu0 }
 0x51f   : > { %3590 = vmatprep.mubr.f32.mxu1 %v3505_v12  ;;  %v16010_v12 = vld [vmem:[%s14654_s11 + $0x48] sm:$0xff] }
 0x522   : > { %3591 = vmatmul.mubr.f32.gmra.mrb[70].mxu1 %v3504_v18  ;;  %v16016_v18 = vld [vmem:[%s14654_s11 + $0x58] sm:$0xf] }
 0x523   : > { %12522 = vmatprep.mubr.msk.f32.mxu1 %vm14557_vm5, %v18551_v8 }
 0x526   : > { %12523 = vmatmul.mubr.msk.f32.vlgmr.msra.gmra.mrb[72].mxu1 %vm363_vm0, %v15774_v37  ;;  %v15995_v37 = vpop.f32.mrb[66].mxu0 }
 0x527   : > { %12525 = vmatprep.mubr.msk.f32.mxu1 %vm14557_vm5, %v18551_v8  ;;  %13395 = vmatpush3.bf16.msra.mxu1 %v18599_v58  ;;  %v12513_v4 = vpop.f32.mrb[67].mxu0 }
 0x528   : > { %13396 = vmatprep.subr.bf16.mxu1 %v18552_v39  ;;  %v4286_v4 = vpop.xlane.xlu0 %4285 }
 0x52a   : > { %12526 = vmatmul.mubr.msk.f32.gmra.mrb[74].mxu1 %vm363_vm0, %v15795_v16  ;;  %v15997_v16 = vpop.f32.mrb[68].mxu0 }
 0x52b   : > { %12528 = vmatprep.mubr.msk.f32.mxu1 %vm14557_vm5, %v18551_v8  ;;  %13399 = vmatpush3.bf16.msk.msra.mxu1 %vm15097_vm10, %v18600_v59  ;;  %v12516_v52 = vpop.f32.mrb[69].mxu0 }
 0x52c   : > { %13403 = vmatprep.subr.bf16.mxu1 %v18552_v39  ;;  %v15999_v55 = vpop.f32.mrb[70].mxu0 }
 0x52d   : > { %v12519_v35 = vpop.f32.mrb[71].mxu0 }
 0x52e   : > { %12529 = vmatmul.mubr.msk.f32.gmra.mrb[76].mxu1 %vm363_vm0, %v15801_v17  ;;  %v4557_v35 = vsel %vm641_vm3, %v16010_v12, 0.0 }
 0x52f   : > { %12539 = vmatprep.mubr.msk.f32.mxu1 %vm14557_vm5, %v18551_v8  ;;  %4558 = vadd.xlane.f32.xlu1 %v4557_v35  ;;  %v4298_v35 = vpop.xlane.xlu0 %4297 }
 0x532   : > { %v11598_v61 = vpop.f32.mrb[72].mxu0 }
 0x533   : > { %v11599_v48 = vpop.f32.mrb[73].mxu0 }
 0x534   : > { %v16001_v33 = vadd.f32 %v11599_v48, %v11598_v61  ;;  %v4560_v61 = vsel %vm641_vm3, %v16013_v15, 0.0  ;;  %v4299_v48 = vmul.f32 0.0038461538, %v4286_v4 }
 0x535   : > { %4561 = vadd.xlane.f32.xlu0 %v4560_v61  ;;  %v4301_v61 = vmul.f32 0.0038461538, %v4298_v35 }
 0x536   : > { %v11601_v17 = vpop.f32.mrb[74].mxu0  ;;  %v16031_v29 = vsub.f32 %v15846_v7, %v4299_v48 }
 0x537   : > { %v11602_v60 = vpop.f32.mrb[75].mxu0  ;;  %v16055_v35 = vsub.f32 %v15860_v34, %v4301_v61  ;;  %v16058_v28 = vsub.f32 %v15863_v1, %v4301_v61  ;;  %v16061_v26 = vsub.f32 %v15867_v5, %v4301_v61 }
 0x538   : > { %v16003_v6 = vadd.f32 %v11602_v60, %v11601_v17  ;;  %v4563_v60 = vsel %vm648_vm4, %v16016_v18, 0.0 }
 0x539   : > { %4564 = vadd.xlane.f32.xlu1 %v4563_v60  ;;  %v4486_v13 = vmul.f32 %v16055_v35, %v16055_v35  ;;  %v4487_v51 = vmul.f32 %v16058_v28, %v16058_v28  ;;  %v4488_v53 = vmul.f32 %v16061_v26, %v16061_v26 }
 0x53a   : > { %v11604_v19 = vpop.f32.mrb[76].mxu0 }
 0x53b   : > { %v11605_v46 = vpop.f32.mrb[77].mxu0  ;;  %v4499_v61 = vsel %vm373_vm1, %v4486_v13, 0.0 }
 0x53c   : > { %v16005_v11 = vadd.f32 %v11605_v46, %v11604_v19  ;;  %v16025_v19 = vsub.f32 %v15840_v14, %v4299_v48  ;;  %v16028_v46 = vsub.f32 %v15843_v2, %v4299_v48  ;;  %v4482_v48 = vmul.f32 %v16031_v29, %v16031_v29 }
 0x53e   : > { %v4480_v58 = vmul.f32 %v16025_v19, %v16025_v19  ;;  %v4481_v24 = vmul.f32 %v16028_v46, %v16028_v46  ;;  %v4490_v60 = vsel %vm363_vm0, %v4482_v48, 0.0 }
 0x540   : > { %v4489_v62 = vadd.f32 %v4481_v24, %v4480_v58  ;;  %v4500_v24 = vsel %vm373_vm1, %v4487_v51, 0.0  ;;  %v3211_v51 = vmul.f32 %v15753_v27, %v15923_v54 }
 0x541   : > { %v16007_v3 = vpop.trf.xlu1  ;;  %v4501_v58 = vadd.f32 %v4500_v24, %v4499_v61 }
 0x542   : > { %v4491_v43 = vadd.f32 %v4490_v60, %v4489_v62 }
 0x544   : > { %4492 = vadd.xlane.f32.xlu0 %v4491_v43 }
 0x57d   : > { %v4291_v52 = vpop.xlane.xlu1 %4290 }
 0x57e   : > { %v4300_v17 = vmul.f32 0.0038461538, %v4291_v52 }
 0x580   : > { %v16034_v59 = vsub.f32 %v15898_v49, %v4300_v17  ;;  %v16037_v4 = vsub.f32 %v15901_v41, %v4300_v17  ;;  %v16040_v52 = vsub.f32 %v15853_v21, %v4300_v17 }
 0x582   : > { %v4483_v56 = vmul.f32 %v16034_v59, %v16034_v59  ;;  %v4484_v25 = vmul.f32 %v16037_v4, %v16037_v4  ;;  %v4485_v17 = vmul.f32 %v16040_v52, %v16040_v52 }
 0x584   : > { %v4494_v44 = vadd.f32 %v4484_v25, %v4483_v56  ;;  %v4495_v36 = vsel %vm363_vm0, %v4485_v17, 0.0  ;;  %v4502_v25 = vsel %vm377_vm2, %v4488_v53, 0.0  ;;  %v2647_v17 = vrot.slane %v15895_v23, 4  ;;  %v18602_v53 = vld [vmem:[#allocation22_spill] sm:$0xff] }
 0x585   : > { %v4503_v62 = vadd.f32 %v4502_v25, %v4501_v58 }
 0x586   : > { %v4496_v10 = vadd.f32 %v4495_v36, %v4494_v44  ;;  %v2648_v13 = vadd.f32 %v2647_v17, %v15895_v23 }
 0x588   : > { %4497 = vadd.xlane.f32.xlu0 %v4496_v10  ;;  %v3249_v10 = vrot.slane %v3230_v0, %v18602_v53  ;;  %v2649_v25 = vrot.slane %v2648_v13, 2 }
 0x58a   : > { %v2650_v54 = vadd.f32 %v2649_v25, %v2648_v13 }
 0x58c   : > { %4504 = vadd.xlane.f32.xlu0 %v4503_v62 }
 0x5c1   : > { %v2941_v56 = vpop.f32.mrb[54].mxu1 }
 0x5c2   : > { %v12472_v48 = vpop.f32.mrb[55].mxu1  ;;  %v2955_v42 = vsel %vm1333_vm14, %v2941_v56, 0.0  ;;  %v3416_v56 = vrot.slane %v16007_v3, %v18602_v53  ;;  %v2651_v53 = vrot.slane %v2650_v54, 1 }
 0x5c3   : > { %v3250_v48 = vmul.f32 %v3249_v10, %v3211_v51 }
 0x5c5   : > { %v2946_v60 = vpop.f32.mrb[56].mxu1 }
 0x5c6   : > { %v2956_v43 = vsel %vm1333_vm14, %v2946_v60, 0.0  ;;  %v12475_v36 = vpop.f32.mrb[57].mxu1 }
 0x5c7   : > { %v2957_v44 = vadd.f32 %v2956_v43, %v2955_v42  ;;  %v3212_v42 = vmul.f32 %v15756_v22, %v15931_v32  ;;  %v10945_v43 = vclamps-f32 %v3250_v48, 1.0 }
 0x5c9   : > { %v2951_v61 = vpop.f32.mrb[58].mxu1  ;;  %v3251_v34 = vmul.f32 %v3249_v10, %v3212_v42  ;;  %v2652_v42 = vadd.f32 %v2651_v53, %v2650_v54 }
 0x5ca   : > { %v2958_v24 = vsel %vm1337_vm15, %v2951_v61, 0.0  ;;  %v12478_v58 = vpop.f32.mrb[59].mxu1 }
 0x5cb   : > { %v2959_v62 = vadd.f32 %v2958_v24, %v2957_v44  ;;  %v3213_v44 = vmul.f32 %v15764_v47, %v15941_v20  ;;  %v10946_v25 = vclamps-f32 %v3251_v34, 1.0 }
 0x5cd   : > { %v2960_v60 = vrot.slane %v2959_v62, 4  ;;  %v3349_v36 = vpop.f32.mrb[60].mxu1 }
 0x5ce   : > { %v3378_v23 = vmul.f32 %v15883_v9, %v3349_v36  ;;  %v12502_v27 = vpop.f32.mrb[61].mxu1 }
 0x5cf   : > { %v2961_v0 = vadd.f32 %v2960_v60, %v2959_v62  ;;  %v3252_v62 = vmul.f32 %v3249_v10, %v3213_v44  ;;  %v14498_v10 = vld [vmem:[%s18366_s6] sm:$0x1] }
 0x5d0   : > { %v3417_v17 = vmul.f32 %v3416_v56, %v3378_v23 }
 0x5d1   : > { %v2962_v61 = vrot.slane %v2961_v0, 2  ;;  %v3354_v58 = vpop.f32.mrb[62].mxu1  ;;  %v10947_v27 = vclamps-f32 %v3252_v62, 1.0 }
 0x5d2   : > { %v10954_v3 = vclamps-f32 %v3417_v17, 1.0  ;;  %v3379_v51 = vmul.f32 %v15886_v57, %v3354_v58  ;;  %v12505_v24 = vpop.f32.mrb[63].mxu1 }
 0x5d3   : > { %v2963_v45 = vadd.f32 %v2962_v61, %v2961_v0 }
 0x5d4   : > { %v16090_v22 = vsub.f32 %v10945_v43, %v10954_v3  ;;  %v3418_v9 = vmul.f32 %v3416_v56, %v3379_v51 }
 0x5d5   : > { %v2964_v32 = vrot.slane %v2963_v45, 1  ;;  %v3359_v13 = vpop.f32.mrb[64].mxu1 }
 0x5d6   : > { %v10955_v48 = vclamps-f32 %v3418_v9, 1.0  ;;  %v3380_v60 = vmul.f32 %v15889_v38, %v3359_v13  ;;  %v12508_v36 = vpop.f32.mrb[65].mxu1  ;;  %v3951_v0 = vsel %vm1346_vm11, %v16090_v22, 0.0 }
 0x5d7   : > { %v2965_v47 = vadd.f32 %v2964_v32, %v2963_v45 }
 0x5d8   : > { %v16093_v20 = vsub.f32 %v10946_v25, %v10955_v48  ;;  %v3419_v57 = vmul.f32 %v3416_v56, %v3380_v60 }
 0x5d9   : > { %v2966_v23 = vadd.f32 %v2965_v47, %v2652_v42 }
 0x5da   : > { %v3952_v17 = vsel %vm1346_vm11, %v16093_v20, 0.0  ;;  %v10956_v34 = vclamps-f32 %v3419_v57, 1.0 }
 0x5db   : > { %v2967_v38 = vadd.f32 %v14498_v10, %v2966_v23  ;;  %v3953_v43 = vadd.f32 %v3952_v17, %v3951_v0 }
 0x5dc   : > { %v16102_v53 = vsub.f32 %v10947_v27, %v10956_v34 }
 0x5dd   : > { %10926 = vst.msk [vmem:[%s15636_s25 + $0x1] sm:$0x1] %vm1670_vm9, %v2967_v38 }
 0x5de   : > { %v3954_v45 = vsel %vm1350_vm12, %v16102_v53, 0.0 }
 0x5df   : > { %v3955_v56 = vadd.f32 %v3954_v45, %v3953_v43 }
 0x5e1   : > { %v3956_v54 = vrot.slane %v3955_v56, 4 }
 0x5e3   : > { %v3957_v61 = vadd.f32 %v3956_v54, %v3955_v56 }
 0x5e5   : > { %v3958_v58 = vrot.slane %v3957_v61, 2 }
 0x5e7   : > { %v3959_v44 = vadd.f32 %v3958_v58, %v3957_v61 }
 0x5e9   : > { %v3960_v3 = vrot.slane %v3959_v44, 1 }
 0x5eb   : > { %v3961_v51 = vadd.f32 %v3960_v3, %v3959_v44 }
 0x5ed   : > { %v3962_v24 = vmul.f32 %v3961_v51, %v16090_v22  ;;  %v3963_v9 = vmul.f32 %v3961_v51, %v16093_v20  ;;  %v3964_v32 = vmul.f32 %v3961_v51, %v16102_v53  ;;  %v11553_v13 = vpop.f32.mrb[66].mxu1 }
 0x5ee   : > { %v11554_v25 = vpop.f32.mrb[67].mxu1 }
 0x5ef   : > { %v3965_v62 = vmul.f32 0.31622776, %v3962_v24  ;;  %v3966_v48 = vmul.f32 0.31622776, %v3963_v9  ;;  %v3967_v60 = vmul.f32 0.31622776, %v3964_v32  ;;  %v11555_v36 = vadd.f32 %v11554_v25, %v11553_v13 }
 0x5f1   : > { %14105 = vtanh.f32 %v3965_v62  ;;  %v3663_v42 = vadd.f32 %v11555_v36, %v15995_v37  ;;  %v11556_v47 = vpop.f32.mrb[68].mxu1 }
 0x5f2   : > { %14107 = vtanh.f32 %v3966_v48  ;;  %v11557_v57 = vpop.f32.mrb[69].mxu1 }
 0x5f3   : > { %14109 = vtanh.f32 %v3967_v60  ;;  %v11558_v23 = vadd.f32 %v11557_v57, %v11556_v47  ;;  %v16142_v47 = vld [vmem:[%s18363_s3 + $0x10] sm:$0xf]  ;;  %v13408_v57 = vpack.c.bf16 %v16034_v59, %v16025_v19 }
 0x5f5   : > { %v3668_v27 = vadd.f32 %v11558_v23, %v15997_v16  ;;  %v11559_v0 = vpop.f32.mrb[70].mxu1  ;;  %v13411_v23 = vpack.c.bf16 %v16040_v52, %v16031_v29 }
 0x5f6   : > { %v11560_v17 = vpop.f32.mrb[71].mxu1 }
 0x5f7   : > { %v11561_v34 = vadd.f32 %v11560_v17, %v11559_v0 }
 0x5f9   : > { %v3673_v10 = vadd.f32 %v11561_v34, %v15999_v55  ;;  %v3831_v38 = vpop.f32.mrb[72].mxu1 }
 0x5fa   : > { %v3832_v43 = vadd.f32 %v16001_v33, %v3831_v38  ;;  %v12524_v45 = vpop.f32.mrb[73].mxu1 }
 0x5fb   : > { %v14106_v56 = vpop.eup %14105 }
 0x5fc   : > { %v14108_v54 = vpop.eup %14107  ;;  %v3971_v61 = vmul.f32 1.442695, %v14106_v56  ;;  %14111 = vrcp.f32 %v3832_v43  ;;  %v18606_v43 = vld [vmem:[#allocation28_spill] sm:$0xff] }
 0x5fd   : > { %v14110_v37 = vpop.eup %14109  ;;  %v3836_v58 = vpop.f32.mrb[74].mxu1  ;;  %v3973_v44 = vmul.f32 1.442695, %v14108_v54  ;;  %v4745_v45 = vrot.slane %v18606_v43, 4 }
 0x5fe   : > { %14113 = vpow2.f32 %v3971_v61  ;;  %v3975_v3 = vmul.f32 1.442695, %v14110_v37  ;;  %v3837_v16 = vadd.f32 %v16003_v6, %v3836_v58  ;;  %v12527_v51 = vpop.f32.mrb[75].mxu1 }
 0x5ff   : > { %14115 = vpow2.f32 %v3973_v44  ;;  %v4746_v56 = vadd.f32 %v4745_v45, %v18606_v43 }
 0x600   : > { %14117 = vpow2.f32 %v3975_v3  ;;  %v4735_v3 = vadd.f32 %v15901_v41, %v15843_v2 }
 0x601   : > { %14119 = vrcp.f32 %v3837_v16  ;;  %v3841_v55 = vpop.f32.mrb[76].mxu1  ;;  %v4747_v54 = vrot.slane %v4746_v56, 2 }
 0x602   : > { %v3842_v24 = vadd.f32 %v16005_v11, %v3841_v55  ;;  %v12530_v33 = vpop.f32.mrb[77].mxu1  ;;  %v4727_v55 = vadd.f32 %v15898_v49, %v15840_v14 }
 0x603   : > { %v4748_v61 = vadd.f32 %v4747_v54, %v4746_v56 }
 0x604   : > { %14121 = vrcp.f32 %v3842_v24  ;;  %v18607_v24 = vld [vmem:[#allocation27_spill] sm:$0xff] }
 0x605   : > { %v4749_v37 = vrot.slane %v4748_v61, 1  ;;  %v4736_v33 = vadd.f32 %v4735_v3, %v18607_v24 }
 0x606   : > { %v14112_v9 = vpop.eup %14111 }
 0x607   : > { %v3846_v32 = vmul.f32 %v14112_v9, %v3663_v42  ;;  %v4750_v44 = vadd.f32 %v4749_v37, %v4748_v61  ;;  %v18611_v61 = vld [vmem:[#allocation5_spill] sm:$0xff]  ;;  %v18612_v37 = vld [vmem:[#allocation6_spill] sm:$0xff] }
 0x608   : > { %v14114_v13 = vpop.eup %14113 }
 0x609   : > { %v14116_v25 = vpop.eup %14115  ;;  %12540 = vmatmul.mubr.msk.f32.vlgmr.msra.gmra.mrb[78].mxu1 %vm18603_vm13, %v3846_v32  ;;  %v3977_v62 = vmul.f32 %v14114_v13, %v16090_v22  ;;  %v14499_v22 = vld [vmem:[%s18365_s5] sm:$0x3]  ;;  %v4753_v16 = vmul.f32 %v15846_v7, %v4750_v44  ;;  %v18608_v32 = vld [vmem:[#allocation24_spill] sm:$0xff] }
 0x60a   : > { %v14118_v48 = vpop.eup %14117  ;;  %13405 = vmatpush3.bf16.msra.mxu1 %v18574_v31  ;;  %12542 = vmatprep.mubr.msk.f32.mxu1 %vm14557_vm5, %v18551_v8  ;;  %v3978_v6 = vmul.f32 %v14116_v25, %v16093_v20  ;;  %v13406_v20 = vpack.c.bf16 %v16037_v4, %v16028_v46 }
 0x60b   : > { %v14120_v60 = vpop.eup %14119  ;;  %12555 = vmatmul.mubr.msk.f32.vlgmr.msra.gmra.mrb[78].mxu0 %vm1346_vm11, %v3977_v62  ;;  %12567 = vmatprep.subr.mxu1 %v18551_v8  ;;  %v3979_v11 = vmul.f32 %v14118_v48, %v16102_v53  ;;  %v4762_v9 = vmul.f32 0.31622776, %v4753_v16  ;;  %v18614_v16 = vld [vmem:[#allocation8_spill] sm:$0xff] }
 0x60c   : > { %v3848_v36 = vmul.f32 %v14120_v60, %v3668_v27  ;;  %12557 = vmatprep.mubr.msk.f32.mxu0 %vm14557_vm5, %v18551_v8  ;;  %12579 = vmatpush3.msk.msra.mxu0 %vm18604_vm8, %v14499_v22  ;;  %vm18605_vm8 = vmmov %vm18603_vm13 }
 0x60d   : > { %13414 = vmatprep.subr.bf16.mxu0 %v18552_v39 }
 0x60e   : > { %v14122_v42 = vpop.eup %14121  ;;  %12543 = vmatmul.mubr.msk.f32.gmra.mrb[80].mxu1 %vm18603_vm13, %v3848_v36  ;;  %vm18628_vm13 = vcmask 15360  }
 0x60f   : > { %12545 = vmatprep.mubr.msk.f32.mxu1 %vm14557_vm5, %v18551_v8  ;;  %12558 = vmatmul.mubr.msk.f32.gmra.mrb[80].mxu0 %vm1346_vm11, %v3978_v6  ;;  %v3850_v53 = vmul.f32 %v14122_v42, %v3673_v10  ;;  %v4756_v42 = vmul.f32 %v15853_v21, %v4750_v44 }
 0x610   : > { %12568 = vmatpush3.msk.msra.mxu1 %vm373_vm1, %v16142_v47  ;;  %12560 = vmatprep.mubr.msk.f32.mxu0 %vm14557_vm5, %v18551_v8 }
 0x611   : > { %13407 = vmatprep.subr.bf16.mxu1 %v13406_v20 }
 0x612   : > { %12546 = vmatmul.mubr.msk.f32.gmra.mrb[82].mxu1 %vm18605_vm8, %v3850_v53  ;;  %vm18630_vm8 = vmmov %vm18628_vm13 }
 0x613   : > { %12561 = vmatmul.mubr.msk.f32.gmra.mrb[82].mxu0 %vm1346_vm11, %v3979_v11  ;;  %12569 = vmatprep.mubr.msk.f32.mxu1 %vm14557_vm5, %v18551_v8 }
 0x614   : > { %12580 = vmatprep.mubr.msk.f32.mxu0 %vm14557_vm5, %v18551_v8 }
 0x616   : > { %12570 = vmatmul.mubr.msk.f32.vlgmr.msra.gmra.mrb[84].mxu1 %vm1346_vm11, %v14114_v13  ;;  %v4728_v13 = vadd.f32 %v4727_v55, %v18608_v32  ;;  %v18615_v55 = vld [vmem:[#allocation9_spill] sm:$0xff] }
 0x617   : > { %12572 = vmatprep.mubr.msk.f32.mxu1 %vm14557_vm5, %v18551_v8  ;;  %13409 = vmatpush1.bf16.xpose.msra.mxu1 %v13408_v57 }
 0x618   : > { %4324 = vmatprep.subr.mxu1 %v16058_v28  ;;  %v4729_v62 = vrot.slane %v4728_v13, 4 }
 0x61a   : > { %12573 = vmatmul.mubr.msk.f32.gmra.mrb[86].mxu1 %vm1346_vm11, %v14116_v25  ;;  %v4737_v25 = vrot.slane %v4736_v33, 4  ;;  %v4730_v6 = vadd.f32 %v4729_v62, %v4728_v13  ;;  %v18617_v62 = vld [vmem:[#allocation11_spill] sm:$0xff] }
 0x61b   : > { %12575 = vmatprep.mubr.msk.f32.mxu1 %vm14557_vm5, %v18551_v8 }
 0x61c   : > { %v4731_v36 = vrot.slane %v4730_v6, 2 }
 0x61e   : > { %12576 = vmatmul.mubr.msk.f32.gmra.mrb[88].mxu1 %vm1346_vm11, %v14118_v48  ;;  %v4738_v48 = vadd.f32 %v4737_v25, %v4736_v33  ;;  %v4732_v53 = vadd.f32 %v4731_v36, %v4730_v6  ;;  %v18618_v6 = vld [vmem:[#allocation12_spill] sm:$0xff] }
 0x61f   : > { %4325 = vmatpush1.xpose.msra.mxu1 %v16055_v35  ;;  %4384 = vmatprep.mubr.f32.mxu1 %v16028_v46  ;;  %v4562_v46 = vpop.xlane.xlu0 %4561 }
 0x620   : > { %13410 = vmatprep.subr.bf16.mxu1 %v18552_v39  ;;  %v4567_v27 = vmul.f32 0.0625, %v4562_v46  ;;  %v4739_v60 = vrot.slane %v4738_v48, 2  ;;  %v4733_v46 = vrot.slane %v4732_v53, 1 }
 0x622   : > { %4385 = vmatmul.mubr.f32.vlgmr.msra.gmra.mrb[90].mxu1 %v16025_v19  ;;  %v4559_v19 = vpop.xlane.xlu1 %4558  ;;  %v4740_v22 = vadd.f32 %v4739_v60, %v4738_v48 }
 0x623   : > { %13413 = vmatpush3.bf16.xpose.msk.msra.mxu1 %vm14789_vm7, %v13411_v23  ;;  %4389 = vmatprep.mubr.f32.mxu1 %v16037_v4  ;;  %v4566_v4 = vmul.f32 0.0625, %v4559_v19  ;;  %v4493_v34 = vpop.xlane.xlu0 %4492  ;;  %v4759_v23 = vmul.f32 %v15867_v5, %v4750_v44  ;;  %v4765_v19 = vmul.f32 0.31622776, %v4756_v42  ;;  %v18613_v44 = vld [vmem:[#allocation7_spill] sm:$0xff] }
 0x624   : > { %12593 = vmatprep.subr.mxu1 %v18551_v8  ;;  %14123 = vrsqrt.f32 %v4493_v34  ;;  %v4741_v57 = vrot.slane %v4740_v22, 1 }
 0x626   : > { %4390 = vmatmul.mubr.f32.gmra.mrb[92].mxu1 %v16034_v59  ;;  %v16192_v59 = vsub.f32 %v16013_v15, %v4567_v27  ;;  %v4768_v27 = vmul.f32 0.31622776, %v4759_v23 }
 0x627   : > { %4394 = vmatprep.mubr.f32.mxu1 %v16058_v28  ;;  %v16189_v28 = vsub.f32 %v16010_v12, %v4566_v4  ;;  %v4498_v38 = vpop.xlane.xlu0 %4497  ;;  %v4742_v4 = vadd.f32 %v4741_v57, %v4740_v22  ;;  %v18619_v22 = vld [vmem:[#allocation13_spill] sm:$0xff]  ;;  %v18620_v57 = vld [vmem:[#allocation14_spill] sm:$0xff] }
 0x628   : > { %v4662_v17 = vmul.f32 %v16192_v59, %v16192_v59  ;;  %14125 = vrsqrt.f32 %v4498_v38 }
 0x62a   : > { %4395 = vmatmul.mubr.f32.gmra.mrb[94].mxu1 %v16055_v35  ;;  %v4565_v35 = vpop.xlane.xlu1 %4564  ;;  %v4667_v15 = vsel %vm641_vm3, %v4662_v17, 0.0 }
 0x62b   : > { %12594 = vmatpush3.xpose.msk.msra.mxu1 %vm363_vm0, %v16061_v26  ;;  %12595 = vmatprep.mubr.msk.f32.mxu1 %vm14557_vm5, %v18551_v8  ;;  %v4568_v0 = vmul.f32 0.0625, %v4565_v35  ;;  %v4505_v58 = vpop.xlane.xlu0 %4504  ;;  %v4734_v35 = vadd.f32 %v4733_v46, %v4732_v53 }
 0x62c   : > { %12619 = vmatprep.subr.mxu1 %v18551_v8  ;;  %14127 = vrsqrt.f32 %v4505_v58 }
 0x62d   : > { %v16205_v12 = vsub.f32 %v16016_v18, %v4568_v0  ;;  %14129 = vtanh.f32 %v4762_v9  ;;  %v4751_v17 = vmul.f32 %v15840_v14, %v4734_v35  ;;  %v4754_v34 = vmul.f32 %v15898_v49, %v4734_v35  ;;  %v18609_v14 = vld [vmem:[#allocation4_spill] sm:$0xff]  ;;  %v18616_v9 = vld [vmem:[#allocation10_spill] sm:$0xff] }
 0x62e   : > { %12596 = vmatmul.mubr.msk.f32.vlgmr.msra.gmra.mrb[90].mxu1 %vm363_vm0, %v16031_v29  ;;  %v4661_v29 = vmul.f32 %v16189_v28, %v16189_v28  ;;  %v16215_v18 = vpop.eup %14123 }
 0x62f   : > { %12598 = vmatprep.mubr.msk.f32.mxu1 %vm14557_vm5, %v18551_v8  ;;  %12620 = vmatpush3.msk.msra.mxu1 %vm373_vm1, %v15966_v63 }
 0x630   : > { %13451 = vmatprep.subr.bf16.mxu1 %v14793_v30  ;;  %v4664_v63 = vsel %vm641_vm3, %v4661_v29, 0.0  ;;  %4512 = vxpose.xlu0.b32.start [1/3] (short) (narrow) %v16215_v18, 8  ;;  %v4752_v29 = vmul.f32 %v15843_v2, %v4742_v4  ;;  %v4758_v2 = vmul.f32 %v15863_v1, %v4742_v4 }
 0x631   : > { %4665 = vadd.xlane.f32.xlu1 %v4664_v63 }
 0x632   : > { %12599 = vmatmul.mubr.msk.f32.gmra.mrb[92].mxu1 %vm363_vm0, %v16040_v52  ;;  %v4663_v52 = vmul.f32 %v16205_v12, %v16205_v12  ;;  %v4761_v63 = vmul.f32 0.31622776, %v4752_v29  ;;  %v4767_v54 = vmul.f32 0.31622776, %v4758_v2  ;;  %v16315_v2 = vld [vmem:[%s14615_s8 + $0x148] sm:$0xff] }
 0x633   : > { %12601 = vmatprep.mubr.msk.f32.mxu1 %vm14557_vm5, %v18551_v8 }
 0x634   : > { %v4670_v10 = vsel %vm648_vm4, %v4663_v52, 0.0 }
 0x635   : > { %4668 = vadd.xlane.f32.xlu1 %v4667_v15  ;;  %v4755_v15 = vmul.f32 %v15901_v41, %v4742_v4  ;;  %v18610_v41 = vld [vmem:[#allocation26_spill] sm:$0xff] }
 0x636   : > { %12602 = vmatmul.mubr.msk.f32.gmra.mrb[94].mxu1 %vm363_vm0, %v16061_v26  ;;  %v16218_v26 = vpop.eup %14125  ;;  %v4757_v45 = vmul.f32 %v18610_v41, %v4734_v35  ;;  %v18623_v35 = vld [vmem:[#allocation17_spill] sm:$0xff]  ;;  %v16322_v41 = vld [vmem:[%s14615_s8 + $0x150] sm:$0xf] }
 0x637   : > { %12621 = vmatprep.mubr.msk.f32.mxu1 %vm14557_vm5, %v18551_v8  ;;  %4513 = vxpose.xlu0.b32.cont [2/3] (short) (narrow) %v16218_v26, 8  ;;  %v16226_v51 = vpop.eup %14127  ;;  %v4764_v43 = vmul.f32 0.31622776, %v4755_v15  ;;  %18624 = vst [vmem:[#allocation21_spill] sm:$0xff] %v16322_v41 }
 0x638   : > { %v14130_v11 = vpop.eup %14129  ;;  %v4766_v1 = vmul.f32 0.31622776, %v4757_v45  ;;  %v16325_v45 = vld [vmem:[%s14615_s8 + $0x158] sm:$0xf] }
 0x639   : > { %4671 = vadd.xlane.f32.xlu1 %v4670_v10  ;;  %v4782_v20 = vmul.f32 1.442695, %v14130_v11  ;;  %v4760_v10 = vmul.f32 0.31622776, %v4751_v17 }
 0x63b   : > { %4514 = vxpose.xlu0.b32.end [3/3] (short) (narrow) %v16226_v51, 8  ;;  %14131 = vpow2.f32 %v4782_v20 }
 0x63c   : > { %14133 = vtanh.f32 %v4765_v19  ;;  %v18621_v19 = vld [vmem:[#allocation15_spill] sm:$0xff] }
 0x63d   : > { %14135 = vtanh.f32 %v4768_v27 }
 0x63e   : > { %14137 = vtanh.f32 %v4761_v63 }
 0x63f   : > { %14139 = vtanh.f32 %v4760_v10  ;;  %v16308_v10 = vld [vmem:[%s14615_s8 + $0x130] sm:$0xff] }
 0x640   : > { %14141 = vtanh.f32 %v4764_v43  ;;  %v16319_v43 = vsel %vm363_vm0, %v16315_v2, 0.0 }
 0x645   : > { %v16236_v0 = vpop.eup %14131 }
 0x646   : > { %v4798_v52 = vmul.f32 %v16236_v0, %v15846_v7  ;;  %v14134_v38 = vpop.eup %14133  ;;  %v4763_v7 = vmul.f32 0.31622776, %v4754_v34  ;;  %v16305_v34 = vld [vmem:[%s14615_s8 + $0x128] sm:$0xff] }
 0x647   : > { %v4788_v49 = vmul.f32 1.442695, %v14134_v38  ;;  %v14136_v56 = vpop.eup %14135 }
 0x648   : > { %12622 = vmatmul.mubr.msk.f32.vlgmr.msra.gmra.mrb[96].mxu1 %vm363_vm0, %v4798_v52  ;;  %14143 = vtanh.f32 %v4763_v7  ;;  %v4794_v58 = vmul.f32 1.442695, %v14136_v56  ;;  %v14138_v3 = vpop.eup %14137  ;;  %v16302_v52 = vld [vmem:[%s14615_s8 + $0x120] sm:$0xff] }
 0x649   : > { %13453 = vmatpush3.bf16.msra.mxu1 %v14817_v40  ;;  %12624 = vmatprep.mubr.msk.f32.mxu1 %vm14557_vm5, %v18551_v8  ;;  %14145 = vpow2.f32 %v4788_v49  ;;  %v4780_v24 = vmul.f32 1.442695, %v14138_v3  ;;  %v14140_v33 = vpop.eup %14139  ;;  %v5580_v38 = vadd.f32 %v16305_v34, %v16302_v52  ;;  %v16329_v56 = vld [vmem:[%s14615_s8 + $0x160] sm:$0xf] }
 0x64a   : > { %13455 = vmatprep.subr.bf16.mxu1 %v18609_v14  ;;  %14147 = vtanh.f32 %v4767_v54  ;;  %v14142_v32 = vpop.eup %14141  ;;  %v4778_v25 = vmul.f32 1.442695, %v14140_v33  ;;  %v16333_v54 = vsel %vm373_vm1, %v16322_v41, 0.0  ;;  %v5593_v3 = vsel %vm377_vm2, %v16329_v56, 0.0 }
 0x64b   : > { %14149 = vtanh.f32 %v4766_v1  ;;  %v4786_v60 = vmul.f32 1.442695, %v14142_v32  ;;  %18625 = vst [vmem:[#allocation23_spill] sm:$0xff] %v16333_v54  ;;  %v16337_v1 = vsel %vm373_vm1, %v16325_v45, 0.0 }
 0x64c   : > { %14151 = vpow2.f32 %v4794_v58  ;;  %18626 = vst [vmem:[#allocation3_spill] sm:$0xff] %v16337_v1  ;;  %v5592_v58 = vadd.f32 %v16337_v1, %v16333_v54 }
 0x64d   : > { %13457 = vmatpush3.bf16.msra.mxu1 %v18611_v61  ;;  %14153 = vpow2.f32 %v4780_v24 }
 0x64e   : > { %13459 = vmatprep.subr.bf16.mxu1 %v18612_v37  ;;  %14155 = vpow2.f32 %v4778_v25  ;;  %v5594_v33 = vadd.f32 %v5593_v3, %v5592_v58 }
 0x64f   : > { %14157 = vpow2.f32 %v4786_v60 }
 0x651   : > { %13461 = vmatpush3.bf16.msra.mxu1 %v18613_v44 }
 0x652   : > { %13463 = vmatprep.subr.bf16.mxu1 %v18614_v16  ;;  %v14144_v13 = vpop.eup %14143 }
 0x653   : > { %v16257_v48 = vpop.eup %14145  ;;  %v4784_v42 = vmul.f32 1.442695, %v14144_v13 }
 0x654   : > { %v14148_v11 = vpop.eup %14147  ;;  %v4801_v20 = vmul.f32 %v16257_v48, %v15853_v21  ;;  %v18622_v21 = vld [vmem:[#allocation16_spill] sm:$0xff] }
 0x655   : > { %13465 = vmatpush3.bf16.msra.mxu1 %v18615_v55  ;;  %v14150_v36 = vpop.eup %14149  ;;  %v4792_v23 = vmul.f32 1.442695, %v14148_v11  ;;  %14159 = vpow2.f32 %v4784_v42 }
 0x656   : > { %13467 = vmatprep.subr.bf16.mxu1 %v18616_v9  ;;  %v16263_v53 = vpop.eup %14151  ;;  %12625 = vmatmul.mubr.msk.f32.gmra.mrb[98].mxu1 %vm363_vm0, %v4801_v20  ;;  %v4790_v4 = vmul.f32 1.442695, %v14150_v36 }
 0x657   : > { %12627 = vmatprep.mubr.msk.f32.mxu1 %vm14557_vm5, %v18551_v8  ;;  %v4804_v46 = vmul.f32 %v16263_v53, %v15867_v5  ;;  %14161 = vpow2.f32 %v4792_v23  ;;  %v16273_v27 = vpop.eup %14153 }
 0x658   : > { %14163 = vpow2.f32 %v4790_v4  ;;  %v16279_v29 = vpop.eup %14155 }
 0x659   : > { %13469 = vmatpush3.bf16.msra.mxu1 %v18617_v62  ;;  %v16281_v5 = vpop.eup %14157 }
 0x65a   : > { %13471 = vmatprep.subr.bf16.mxu1 %v18618_v6  ;;  %12628 = vmatmul.mubr.msk.f32.gmra.mrb[100].mxu1 %vm363_vm0, %v4804_v46 }
 0x65b   : > { %5047 = vmatprep.mubr.f32.mxu1 %v16273_v27 }
 0x65d   : > { %13473 = vmatpush3.bf16.msra.mxu1 %v18619_v22 }
 0x65e   : > { %13475 = vmatprep.subr.bf16.mxu1 %v18620_v57 }
 0x65f   : > { %v16287_v17 = vpop.eup %14159 }
 0x661   : > { %13477 = vmatpush3.bf16.msra.mxu1 %v18621_v19  ;;  %v16289_v63 = vpop.eup %14161 }
 0x662   : > { %13479 = vmatprep.subr.bf16.mxu1 %v18622_v21  ;;  %v16296_v15 = vpop.eup %14163 }
 0x665   : > { %13481 = vmatpush3.bf16.msra.mxu1 %v18623_v35 }
 0x666   : > { %13489 = vmatprep.subr.bf16.mxu1 %v18552_v39 }
 0x668   : > { %5048 = vmatmul.mubr.f32.vlgmr.msra.gmra.mrb[102].mxu1 %v16279_v29 }
 0x669   : > { %5052 = vmatprep.mubr.f32.mxu1 %v16281_v5  ;;  %13491 = vmatpush3.bf16.msra.mxu1 %v18574_v31 }
 0x66a   : > { %12662 = vmatprep.subr.mxu1 %v18551_v8 }
 0x66c   : > { %5053 = vmatmul.mubr.f32.gmra.mrb[104].mxu1 %v16287_v17 }
 0x66d   : > { %5057 = vmatprep.mubr.f32.mxu1 %v16289_v63  ;;  %12663 = vmatpush3.msk.msra.mxu1 %vm373_vm1, %v16142_v47  ;;  %v5581_v47 = vsel %vm363_vm0, %v16308_v10, 0.0 }
 0x66e   : > { %12688 = vmatprep.subr.mxu1 %v18551_v8  ;;  %v5582_v7 = vadd.f32 %v5581_v47, %v5580_v38  ;;  %v6041_v49 = vadd.f32 %v16319_v43, %v5581_v47 }
 0x670   : > { %5058 = vmatmul.mubr.f32.gmra.mrb[106].mxu1 %v16296_v15  ;;  %5583 = vadd.xlane.f32.xlu0 %v5582_v7  ;;  %v16343_v24 = vadd.f32 %v6041_v49, %v5593_v3 }
 0x671   : > { %12664 = vmatprep.mubr.msk.f32.mxu1 %vm14557_vm5, %v18551_v8 }
 0x672   : > { %18627 = vst [vmem:[#allocation25_spill] sm:$0xff] %v16343_v24 }
 0x674   : > { %5595 = vadd.xlane.f32.xlu0 %v5594_v33 }
 0x6be   : > { %v4666_v32 = vpop.xlane.xlu1 %4665 }
 0x6bf   : > { %14165 = vrsqrt.f32 %v4666_v32 }
 0x6c2   : > { %v4669_v13 = vpop.xlane.xlu1 %4668 }
 0x6c3   : > { %14167 = vrsqrt.f32 %v4669_v13 }
 0x6c6   : > { %v4672_v25 = vpop.xlane.xlu1 %4671 }
 0x6c7   : > { %14169 = vrsqrt.f32 %v4672_v25 }
 0x6c9   : > { %v16345_v60 = vpop.eup %14165 }
 0x6ca   : > { %4679 = vxpose.xlu1.b32.start [1/3] (short) (narrow) %v16345_v60, 8 }
 0x6cd   : > { %v16348_v11 = vpop.eup %14167 }
 0x6ce   : > { %4680 = vxpose.xlu1.b32.cont [2/3] (short) (narrow) %v16348_v11, 8 }
 0x6d1   : > { %v16351_v36 = vpop.eup %14169 }
 0x6d2   : > { %4681 = vxpose.xlu1.b32.end [3/3] (short) (narrow) %v16351_v36, 8 }
 0x6dc   : > { %v3926_v20 = vpop.f32.mrb[78].mxu1 }
 0x6dd   : > { %v12541_v42 = vpop.f32.mrb[79].mxu1  ;;  %v3940_v38 = vsel %vm1333_vm14, %v3926_v20, 0.0 }
 0x6de   : > { %v4055_v23 = vpop.f32.mrb[78].mxu0 }
 0x6df   : > { %v12556_v46 = vpop.f32.mrb[79].mxu0 }
 0x6e1   : > { %v3931_v4 = vpop.f32.mrb[80].mxu1 }
 0x6e2   : > { %v3941_v47 = vsel %vm1333_vm14, %v3931_v4, 0.0  ;;  %v12544_v7 = vpop.f32.mrb[81].mxu1  ;;  %v4060_v49 = vpop.f32.mrb[80].mxu0 }
 0x6e3   : > { %v3942_v58 = vadd.f32 %v3941_v47, %v3940_v38  ;;  %v12559_v3 = vpop.f32.mrb[81].mxu0  ;;  %v16360_v47 = vld [vmem:[%s14615_s8 + $0x138] sm:$0xff] }
 0x6e4   : > { %v16363_v3 = vld [vmem:[%s14615_s8 + $0x140] sm:$0xff] }
 0x6e5   : > { %v3936_v33 = vpop.f32.mrb[82].mxu1 }
 0x6e6   : > { %v3943_v32 = vsel %vm1337_vm15, %v3936_v33, 0.0  ;;  %v12547_v13 = vpop.f32.mrb[83].mxu1  ;;  %v4065_v25 = vpop.f32.mrb[82].mxu0 }
 0x6e7   : > { %v16357_v54 = vadd.f32 %v3943_v32, %v3942_v58  ;;  %v12562_v42 = vpop.f32.mrb[83].mxu0  ;;  %v5585_v58 = vadd.f32 %v16363_v3, %v16360_v47  ;;  %v13415_v32 = vpack.c.bf16 %v16192_v59, %v16189_v28 }
 0x6e9   : > { %v4144_v46 = vpop.f32.mrb[84].mxu1 }
 0x6ea   : > { %14171 = vrcp.f32 %v4144_v46  ;;  %v12571_v1 = vpop.f32.mrb[85].mxu1 }
 0x6ed   : > { %v4149_v20 = vpop.f32.mrb[86].mxu1 }
 0x6ee   : > { %14173 = vrcp.f32 %v4149_v20  ;;  %v12574_v4 = vpop.f32.mrb[87].mxu1 }
 0x6ef   : > { %v14501_v4 = vld [vmem:[%s14615_s8 + $0xe0] sm:$0xff] }
 0x6f1   : > { %v4154_v7 = vpop.f32.mrb[88].mxu1 }
 0x6f2   : > { %14175 = vrcp.f32 %v4154_v7  ;;  %v12577_v38 = vpop.f32.mrb[89].mxu1 }
 0x6f4   : > { %v14172_v24 = vpop.eup %14171 }
 0x6f5   : > { %v4159_v33 = vmul.f32 %v14172_v24, %v4055_v23  ;;  %v5587_v24 = vadd.f32 %v16319_v43, %v5585_v58  ;;  %v14504_v58 = vld [vmem:[%s14615_s8 + $0xf0] sm:$0xff] }
 0x6f7   : > { %12581 = vmatmul.mubr.msk.f32.vlgmr.msra.gmra.mrb[84].mxu0 %vm18628_vm13, %v4159_v33  ;;  %vm18631_vm13 = vmmov %vm18630_vm8 }
 0x6f8   : > { %v14174_v1 = vpop.eup %14173  ;;  %13417 = vmatpush3.bf16.xpose.msk.msra.mxu0 %vm14747_vm6, %v13415_v32  ;;  %12583 = vmatprep.mubr.msk.f32.mxu0 %vm14557_vm5, %v18551_v8  ;;  %v4799_v32 = vmul.f32 %v14504_v58, %v16287_v17  ;;  %v18632_v17 = vld [vmem:[#allocation18_spill] sm:$0xff] }
 0x6f9   : > { %v4161_v42 = vmul.f32 %v14174_v1, %v4060_v49  ;;  %12608 = vmatprep.subr.mxu0 %v18551_v8  ;;  %5588 = vadd.xlane.f32.xlu1 %v5587_v24  ;;  %v16428_v1 = vld [vmem:[%s18362_s2 + $0x100] sm:$0xf] }
 0x6fb   : > { %12584 = vmatmul.mubr.msk.f32.gmra.mrb[86].mxu0 %vm18630_vm8, %v4161_v42  ;;  %vm18636_vm8 = vcmask 211968  }
 0x6fc   : > { %v14176_v23 = vpop.eup %14175  ;;  %12586 = vmatprep.mubr.msk.f32.mxu0 %vm14557_vm5, %v18551_v8 }
 0x6fd   : > { %v4163_v46 = vmul.f32 %v14176_v23, %v4065_v25 }
 0x6ff   : > { %12587 = vmatmul.mubr.msk.f32.gmra.mrb[88].mxu0 %vm18631_vm13, %v4163_v46  ;;  %vm18637_vm13 = vcmask 1041408  }
 0x700   : > { %12609 = vmatpush3.xpose.msk.msra.mxu0 %vm641_vm3, %v16205_v12  ;;  %12610 = vmatprep.mubr.msk.f32.mxu0 %vm14557_vm5, %v18551_v8 }
 0x701   : > { %13419 = vmatprep.subr.bf16.mxu0 %v14793_v30  ;;  %v16385_v43 = vpop.f32.mrb[90].mxu1 }
 0x702   : > { %v12597_v49 = vpop.f32.mrb[91].mxu1 }
 0x703   : > { %12611 = vmatmul.mubr.msk.f32.vlgmr.msra.gmra.mrb[90].mxu0 %vm641_vm3, %v16189_v28  ;;  %v4797_v28 = vmul.f32 %v14501_v4, %v16273_v27  ;;  %v14503_v27 = vld [vmem:[%s14615_s8 + $0xf8] sm:$0xff] }
 0x704   : > { %13421 = vmatpush3.bf16.msra.mxu0 %v14817_v40  ;;  %12613 = vmatprep.mubr.msk.f32.mxu0 %vm14557_vm5, %v18551_v8  ;;  %v4800_v33 = vmul.f32 %v14503_v27, %v16281_v5  ;;  %v14507_v5 = vld [vmem:[%s14615_s8 + $0x108] sm:$0xf] }
 0x705   : > { %13423 = vmatprep.subr.bf16.mxu0 %v18609_v14  ;;  %v16393_v25 = vpop.f32.mrb[92].mxu1  ;;  %v4802_v24 = vmul.f32 %v14507_v5, %v16296_v15  ;;  %v16475_v5 = vld [vmem:[%s14654_s11 + $0x68] sm:$0xff] }
 0x706   : > { %v12600_v20 = vpop.f32.mrb[93].mxu1 }
 0x707   : > { %12614 = vmatmul.mubr.msk.f32.gmra.mrb[92].mxu0 %vm641_vm3, %v16192_v59  ;;  %v14502_v59 = vld [vmem:[%s14615_s8 + $0xd8] sm:$0xff] }
 0x708   : > { %13425 = vmatpush3.bf16.msra.mxu0 %v18611_v61  ;;  %12616 = vmatprep.mubr.msk.f32.mxu0 %vm14557_vm5, %v18551_v8 }
 0x709   : > { %13427 = vmatprep.subr.bf16.mxu0 %v18612_v37  ;;  %v16403_v7 = vpop.f32.mrb[94].mxu1 }
 0x70a   : > { %v12603_v38 = vpop.f32.mrb[95].mxu1 }
 0x70b   : > { %12617 = vmatmul.mubr.msk.f32.gmra.mrb[94].mxu0 %vm641_vm3, %v16205_v12  ;;  %v4796_v12 = vmul.f32 %v14502_v59, %v16279_v29  ;;  %v14506_v29 = vld [vmem:[%s14615_s8 + $0x110] sm:$0xf] }
 0x70c   : > { %13429 = vmatpush3.bf16.msra.mxu0 %v18613_v44  ;;  %4878 = vmatprep.mubr.f32.mxu0 %v4797_v28  ;;  %v4803_v42 = vmul.f32 %v14506_v29, %v16289_v63  ;;  %v18633_v63 = vld [vmem:[#allocation19_spill] sm:$0xff] }
 0x70d   : > { %13431 = vmatprep.subr.bf16.mxu0 %v18614_v16 }
 0x710   : > { %13433 = vmatpush3.bf16.msra.mxu0 %v18615_v55 }
 0x711   : > { %13435 = vmatprep.subr.bf16.mxu0 %v18616_v9 }
 0x714   : > { %13437 = vmatpush3.bf16.msra.mxu0 %v18617_v62 }
 0x715   : > { %13439 = vmatprep.subr.bf16.mxu0 %v18618_v6 }
 0x718   : > { %13441 = vmatpush3.bf16.msra.mxu0 %v18619_v22 }
 0x719   : > { %13443 = vmatprep.subr.bf16.mxu0 %v18620_v57 }
 0x71c   : > { %13445 = vmatpush3.bf16.msra.mxu0 %v18621_v19 }
 0x71d   : > { %13447 = vmatprep.subr.bf16.mxu0 %v18622_v21 }
 0x720   : > { %13449 = vmatpush3.bf16.msra.mxu0 %v18623_v35 }
 0x721   : > { %12630 = vmatprep.subr.mxu0 %v18551_v8 }
 0x723   : > { %4879 = vmatmul.mubr.f32.vlgmr.msra.gmra.mrb[96].mxu0 %v4796_v12 }
 0x724   : > { %12631 = vmatpush3.msk.msra.mxu0 %vm373_vm1, %v16428_v1  ;;  %4883 = vmatprep.mubr.f32.mxu0 %v4800_v33 }
 0x725   : > { %13482 = vmatprep.subr.bf16.mxu0 %v18552_v39 }
 0x727   : > { %4884 = vmatmul.mubr.f32.gmra.mrb[98].mxu0 %v4799_v32  ;;  %v4528_v32 = vpop.trf.xlu0 }
 0x728   : > { %4888 = vmatprep.mubr.f32.mxu0 %v4803_v42  ;;  %v16472_v42 = vld [vmem:[%s14654_s11 + $0x60] sm:$0xff] }
 0x72b   : > { %4889 = vmatmul.mubr.f32.gmra.mrb[100].mxu0 %v4802_v24  ;;  %v16478_v24 = vld [vmem:[%s14654_s11 + $0x70] sm:$0xf] }
 0x72c   : > { %12632 = vmatprep.mubr.msk.f32.mxu0 %vm14557_vm5, %v18551_v8 }
 0x72f   : > { %12633 = vmatmul.mubr.msk.f32.vlgmr.msra.gmra.mrb[102].mxu0 %vm363_vm0, %v16236_v0  ;;  %v16457_v0 = vpop.f32.mrb[96].mxu1 }
 0x730   : > { %12635 = vmatprep.mubr.msk.f32.mxu0 %vm14557_vm5, %v18551_v8  ;;  %13484 = vmatpush3.bf16.msra.mxu0 %v18632_v17  ;;  %v12623_v23 = vpop.f32.mrb[97].mxu1 }
 0x731   : > { %13485 = vmatprep.subr.bf16.mxu0 %v18552_v39  ;;  %v5584_v23 = vpop.xlane.xlu0 %5583 }
 0x733   : > { %12636 = vmatmul.mubr.msk.f32.gmra.mrb[104].mxu0 %vm363_vm0, %v16257_v48  ;;  %v16459_v48 = vpop.f32.mrb[98].mxu1 }
 0x734   : > { %12638 = vmatprep.mubr.msk.f32.mxu0 %vm14557_vm5, %v18551_v8  ;;  %13488 = vmatpush3.bf16.msk.msra.mxu0 %vm15097_vm10, %v18633_v63  ;;  %v12626_v46 = vpop.f32.mrb[99].mxu1 }
 0x735   : > { %13492 = vmatprep.subr.bf16.mxu0 %v18552_v39  ;;  %v16461_v49 = vpop.f32.mrb[100].mxu1 }
 0x736   : > { %v12629_v20 = vpop.f32.mrb[101].mxu1 }
 0x737   : > { %12639 = vmatmul.mubr.msk.f32.gmra.mrb[106].mxu0 %vm363_vm0, %v16263_v53  ;;  %v5855_v20 = vsel %vm641_vm3, %v16472_v42, 0.0 }
 0x738   : > { %12649 = vmatprep.mubr.msk.f32.mxu0 %vm14557_vm5, %v18551_v8  ;;  %5856 = vadd.xlane.f32.xlu1 %v5855_v20  ;;  %v5596_v20 = vpop.xlane.xlu0 %5595 }
 0x73b   : > { %v11723_v4 = vpop.f32.mrb[102].mxu1 }
 0x73c   : > { %v11724_v28 = vpop.f32.mrb[103].mxu1 }
 0x73d   : > { %v16463_v38 = vadd.f32 %v11724_v28, %v11723_v4  ;;  %v5858_v4 = vsel %vm641_vm3, %v16475_v5, 0.0  ;;  %v5597_v28 = vmul.f32 0.0038461538, %v5584_v23 }
 0x73e   : > { %5859 = vadd.xlane.f32.xlu0 %v5858_v4  ;;  %v5599_v4 = vmul.f32 0.0038461538, %v5596_v20 }
 0x73f   : > { %v11726_v53 = vpop.f32.mrb[104].mxu1  ;;  %v16493_v15 = vsub.f32 %v16308_v10, %v5597_v28 }
 0x740   : > { %v11727_v59 = vpop.f32.mrb[105].mxu1  ;;  %v16517_v20 = vsub.f32 %v16322_v41, %v5599_v4  ;;  %v16520_v19 = vsub.f32 %v16325_v45, %v5599_v4  ;;  %v16523_v57 = vsub.f32 %v16329_v56, %v5599_v4 }
 0x741   : > { %v16465_v12 = vadd.f32 %v11727_v59, %v11726_v53  ;;  %v5861_v59 = vsel %vm648_vm4, %v16478_v24, 0.0 }
 0x742   : > { %5862 = vadd.xlane.f32.xlu1 %v5861_v59  ;;  %v5784_v55 = vmul.f32 %v16517_v20, %v16517_v20  ;;  %v5785_v16 = vmul.f32 %v16520_v19, %v16520_v19  ;;  %v5786_v44 = vmul.f32 %v16523_v57, %v16523_v57 }
 0x743   : > { %v11729_v27 = vpop.f32.mrb[106].mxu1 }
 0x744   : > { %v11730_v33 = vpop.f32.mrb[107].mxu1  ;;  %v5797_v4 = vsel %vm373_vm1, %v5784_v55, 0.0 }
 0x745   : > { %v16467_v58 = vadd.f32 %v11730_v33, %v11729_v27  ;;  %v16487_v27 = vsub.f32 %v16302_v52, %v5597_v28  ;;  %v16490_v33 = vsub.f32 %v16305_v34, %v5597_v28  ;;  %v5780_v28 = vmul.f32 %v16493_v15, %v16493_v15 }
 0x747   : > { %v5778_v17 = vmul.f32 %v16487_v27, %v16487_v27  ;;  %v5779_v13 = vmul.f32 %v16490_v33, %v16490_v33  ;;  %v5788_v59 = vsel %vm363_vm0, %v5780_v28, 0.0 }
 0x749   : > { %v5787_v22 = vadd.f32 %v5779_v13, %v5778_v17  ;;  %v5798_v13 = vsel %vm373_vm1, %v5785_v16, 0.0  ;;  %v4509_v16 = vmul.f32 %v16215_v18, %v16385_v43 }
 0x74a   : > { %v16469_v29 = vpop.trf.xlu1  ;;  %v5799_v17 = vadd.f32 %v5798_v13, %v5797_v4 }
 0x74b   : > { %v5789_v9 = vadd.f32 %v5788_v59, %v5787_v22 }
 0x74d   : > { %5790 = vadd.xlane.f32.xlu0 %v5789_v9 }
 0x786   : > { %v5589_v46 = vpop.xlane.xlu1 %5588 }
 0x787   : > { %v5598_v53 = vmul.f32 0.0038461538, %v5589_v46 }
 0x789   : > { %v16496_v63 = vsub.f32 %v16360_v47, %v5598_v53  ;;  %v16499_v23 = vsub.f32 %v16363_v3, %v5598_v53  ;;  %v16502_v46 = vsub.f32 %v16315_v2, %v5598_v53 }
 0x78b   : > { %v5781_v35 = vmul.f32 %v16496_v63, %v16496_v63  ;;  %v5782_v21 = vmul.f32 %v16499_v23, %v16499_v23  ;;  %v5783_v53 = vmul.f32 %v16502_v46, %v16502_v46 }
 0x78d   : > { %v5792_v6 = vadd.f32 %v5782_v21, %v5781_v35  ;;  %v5793_v62 = vsel %vm363_vm0, %v5783_v53, 0.0  ;;  %v5800_v21 = vsel %vm377_vm2, %v5786_v44, 0.0  ;;  %v3945_v53 = vrot.slane %v16357_v54, 4  ;;  %v18635_v44 = vld [vmem:[#allocation22_spill] sm:$0xff] }
 0x78e   : > { %v5801_v22 = vadd.f32 %v5800_v21, %v5799_v17 }
 0x78f   : > { %v5794_v37 = vadd.f32 %v5793_v62, %v5792_v6  ;;  %v3946_v55 = vadd.f32 %v3945_v53, %v16357_v54 }
 0x791   : > { %5795 = vadd.xlane.f32.xlu0 %v5794_v37  ;;  %v4547_v37 = vrot.slane %v4528_v32, %v18635_v44  ;;  %v3947_v21 = vrot.slane %v3946_v55, 2 }
 0x793   : > { %v3948_v43 = vadd.f32 %v3947_v21, %v3946_v55 }
 0x795   : > { %5802 = vadd.xlane.f32.xlu0 %v5801_v22 }
 0x7ca   : > { %v4239_v35 = vpop.f32.mrb[84].mxu0 }
 0x7cb   : > { %v12582_v28 = vpop.f32.mrb[85].mxu0  ;;  %v4253_v61 = vsel %vm1333_vm14, %v4239_v35, 0.0  ;;  %v4714_v35 = vrot.slane %v16469_v29, %v18635_v44  ;;  %v3949_v44 = vrot.slane %v3948_v43, 1 }
 0x7cc   : > { %v4548_v28 = vmul.f32 %v4547_v37, %v4509_v16 }
 0x7ce   : > { %v4244_v59 = vpop.f32.mrb[86].mxu0 }
 0x7cf   : > { %v4254_v9 = vsel %vm1333_vm14, %v4244_v59, 0.0  ;;  %v12585_v62 = vpop.f32.mrb[87].mxu0 }
 0x7d0   : > { %v4255_v6 = vadd.f32 %v4254_v9, %v4253_v61  ;;  %v4510_v61 = vmul.f32 %v16218_v26, %v16393_v25  ;;  %v11000_v9 = vclamps-f32 %v4548_v28, 1.0 }
 0x7d2   : > { %v4249_v4 = vpop.f32.mrb[88].mxu0  ;;  %v4549_v41 = vmul.f32 %v4547_v37, %v4510_v61  ;;  %v3950_v61 = vadd.f32 %v3949_v44, %v3948_v43 }
 0x7d3   : > { %v4256_v13 = vsel %vm1337_vm15, %v4249_v4, 0.0  ;;  %v12588_v17 = vpop.f32.mrb[89].mxu0 }
 0x7d4   : > { %v4257_v22 = vadd.f32 %v4256_v13, %v4255_v6  ;;  %v4511_v6 = vmul.f32 %v16226_v51, %v16403_v7  ;;  %v11001_v21 = vclamps-f32 %v4549_v41, 1.0 }
 0x7d6   : > { %v4258_v59 = vrot.slane %v4257_v22, 4  ;;  %v4647_v62 = vpop.f32.mrb[90].mxu0 }
 0x7d7   : > { %v4676_v54 = vmul.f32 %v16345_v60, %v4647_v62  ;;  %v12612_v18 = vpop.f32.mrb[91].mxu0 }
 0x7d8   : > { %v4259_v32 = vadd.f32 %v4258_v59, %v4257_v22  ;;  %v4550_v22 = vmul.f32 %v4547_v37, %v4511_v6  ;;  %v14508_v37 = vld [vmem:[%s18366_s6] sm:$0x1] }
 0x7d9   : > { %v4715_v53 = vmul.f32 %v4714_v35, %v4676_v54 }
 0x7da   : > { %v4260_v4 = vrot.slane %v4259_v32, 2  ;;  %v4652_v17 = vpop.f32.mrb[92].mxu0  ;;  %v11002_v18 = vclamps-f32 %v4550_v22, 1.0 }
 0x7db   : > { %v11009_v29 = vclamps-f32 %v4715_v53, 1.0  ;;  %v4677_v16 = vmul.f32 %v16348_v11, %v4652_v17  ;;  %v12615_v13 = vpop.f32.mrb[93].mxu0 }
 0x7dc   : > { %v4261_v14 = vadd.f32 %v4260_v4, %v4259_v32 }
 0x7dd   : > { %v16552_v26 = vsub.f32 %v11000_v9, %v11009_v29  ;;  %v4716_v60 = vmul.f32 %v4714_v35, %v4677_v16 }
 0x7de   : > { %v4262_v25 = vrot.slane %v4261_v14, 1  ;;  %v4657_v55 = vpop.f32.mrb[94].mxu0 }
 0x7df   : > { %v11010_v28 = vclamps-f32 %v4716_v60, 1.0  ;;  %v4678_v59 = vmul.f32 %v16351_v36, %v4657_v55  ;;  %v12618_v62 = vpop.f32.mrb[95].mxu0  ;;  %v5249_v32 = vsel %vm1346_vm11, %v16552_v26, 0.0 }
 0x7e0   : > { %v4263_v51 = vadd.f32 %v4262_v25, %v4261_v14 }
 0x7e1   : > { %v16555_v7 = vsub.f32 %v11001_v21, %v11010_v28  ;;  %v4717_v11 = vmul.f32 %v4714_v35, %v4678_v59 }
 0x7e2   : > { %v4264_v54 = vadd.f32 %v4263_v51, %v3950_v61 }
 0x7e3   : > { %v5250_v53 = vsel %vm1346_vm11, %v16555_v7, 0.0  ;;  %v11011_v41 = vclamps-f32 %v4717_v11, 1.0 }
 0x7e4   : > { %v4265_v36 = vadd.f32 %v14508_v37, %v4264_v54  ;;  %v5251_v9 = vadd.f32 %v5250_v53, %v5249_v32 }
 0x7e5   : > { %v16564_v44 = vsub.f32 %v11002_v18, %v11011_v41 }
 0x7e6   : > { %10981 = vst.msk [vmem:[%s15636_s25 + $0x2] sm:$0x1] %vm1670_vm9, %v4265_v36 }
 0x7e7   : > { %v5252_v14 = vsel %vm1350_vm12, %v16564_v44, 0.0 }
 0x7e8   : > { %v5253_v35 = vadd.f32 %v5252_v14, %v5251_v9 }
 0x7ea   : > { %v5254_v43 = vrot.slane %v5253_v35, 4 }
 0x7ec   : > { %v5255_v4 = vadd.f32 %v5254_v43, %v5253_v35 }
 0x7ee   : > { %v5256_v17 = vrot.slane %v5255_v4, 2 }
 0x7f0   : > { %v5257_v6 = vadd.f32 %v5256_v17, %v5255_v4 }
 0x7f2   : > { %v5258_v29 = vrot.slane %v5257_v6, 1 }
 0x7f4   : > { %v5259_v16 = vadd.f32 %v5258_v29, %v5257_v6 }
 0x7f6   : > { %v5260_v13 = vmul.f32 %v5259_v16, %v16552_v26  ;;  %v5261_v60 = vmul.f32 %v5259_v16, %v16555_v7  ;;  %v5262_v25 = vmul.f32 %v5259_v16, %v16564_v44  ;;  %v11678_v55 = vpop.f32.mrb[96].mxu0 }
 0x7f7   : > { %v11679_v21 = vpop.f32.mrb[97].mxu0 }
 0x7f8   : > { %v5263_v22 = vmul.f32 0.31622776, %v5260_v13  ;;  %v5264_v28 = vmul.f32 0.31622776, %v5261_v60  ;;  %v5265_v59 = vmul.f32 0.31622776, %v5262_v25  ;;  %v11680_v62 = vadd.f32 %v11679_v21, %v11678_v55 }
 0x7fa   : > { %14177 = vtanh.f32 %v5263_v22  ;;  %v4961_v61 = vadd.f32 %v11680_v62, %v16457_v0  ;;  %v11681_v51 = vpop.f32.mrb[98].mxu0 }
 0x7fb   : > { %14179 = vtanh.f32 %v5264_v28  ;;  %v11682_v11 = vpop.f32.mrb[99].mxu0 }
 0x7fc   : > { %14181 = vtanh.f32 %v5265_v59  ;;  %v11683_v54 = vadd.f32 %v11682_v11, %v11681_v51  ;;  %v16604_v51 = vld [vmem:[%s18363_s3 + $0x10] sm:$0xf]  ;;  %v13497_v11 = vpack.c.bf16 %v16496_v63, %v16487_v27 }
 0x7fe   : > { %v4966_v18 = vadd.f32 %v11683_v54, %v16459_v48  ;;  %v11684_v32 = vpop.f32.mrb[100].mxu0  ;;  %v13500_v54 = vpack.c.bf16 %v16502_v46, %v16493_v15 }
 0x7ff   : > { %v11685_v53 = vpop.f32.mrb[101].mxu0 }
 0x800   : > { %v11686_v41 = vadd.f32 %v11685_v53, %v11684_v32 }
 0x802   : > { %v4971_v37 = vadd.f32 %v11686_v41, %v16461_v49  ;;  %v5129_v36 = vpop.f32.mrb[102].mxu0 }
 0x803   : > { %v5130_v9 = vadd.f32 %v16463_v38, %v5129_v36  ;;  %v12634_v14 = vpop.f32.mrb[103].mxu0 }
 0x804   : > { %v14178_v35 = vpop.eup %14177 }
 0x805   : > { %v14180_v43 = vpop.eup %14179  ;;  %v5269_v4 = vmul.f32 1.442695, %v14178_v35  ;;  %14183 = vrcp.f32 %v5130_v9  ;;  %v18639_v9 = vld [vmem:[#allocation25_spill] sm:$0xff] }
 0x806   : > { %v14182_v0 = vpop.eup %14181  ;;  %v5134_v17 = vpop.f32.mrb[104].mxu0  ;;  %v5271_v6 = vmul.f32 1.442695, %v14180_v43  ;;  %v6043_v14 = vrot.slane %v18639_v9, 4 }
 0x807   : > { %14185 = vpow2.f32 %v5269_v4  ;;  %v5273_v29 = vmul.f32 1.442695, %v14182_v0  ;;  %v5135_v48 = vadd.f32 %v16465_v12, %v5134_v17  ;;  %v12637_v16 = vpop.f32.mrb[105].mxu0 }
 0x808   : > { %14187 = vpow2.f32 %v5271_v6  ;;  %v6044_v35 = vadd.f32 %v6043_v14, %v18639_v9 }
 0x809   : > { %14189 = vpow2.f32 %v5273_v29  ;;  %v6033_v29 = vadd.f32 %v16363_v3, %v16305_v34 }
 0x80a   : > { %14191 = vrcp.f32 %v5135_v48  ;;  %v5139_v49 = vpop.f32.mrb[106].mxu0  ;;  %v6045_v43 = vrot.slane %v6044_v35, 2 }
 0x80b   : > { %v5140_v13 = vadd.f32 %v16467_v58, %v5139_v49  ;;  %v12640_v38 = vpop.f32.mrb[107].mxu0  ;;  %v6025_v49 = vadd.f32 %v16360_v47, %v16302_v52 }
 0x80c   : > { %v6046_v4 = vadd.f32 %v6045_v43, %v6044_v35 }
 0x80d   : > { %14193 = vrcp.f32 %v5140_v13  ;;  %v18640_v13 = vld [vmem:[#allocation3_spill] sm:$0xff] }
 0x80e   : > { %v6047_v0 = vrot.slane %v6046_v4, 1  ;;  %v6034_v38 = vadd.f32 %v6033_v29, %v18640_v13 }
 0x80f   : > { %v14184_v60 = vpop.eup %14183 }
 0x810   : > { %v5144_v25 = vmul.f32 %v14184_v60, %v4961_v61  ;;  %v6048_v6 = vadd.f32 %v6047_v0, %v6046_v4  ;;  %v18644_v4 = vld [vmem:[#allocation5_spill] sm:$0xff]  ;;  %v18645_v0 = vld [vmem:[#allocation6_spill] sm:$0xff] }
 0x811   : > { %v14186_v55 = vpop.eup %14185 }
 0x812   : > { %v14188_v21 = vpop.eup %14187  ;;  %12650 = vmatmul.mubr.msk.f32.vlgmr.msra.gmra.mrb[108].mxu0 %vm18636_vm8, %v5144_v25  ;;  %v5275_v22 = vmul.f32 %v14186_v55, %v16552_v26  ;;  %v14509_v26 = vld [vmem:[%s18365_s5] sm:$0x3]  ;;  %v6051_v48 = vmul.f32 %v16308_v10, %v6048_v6  ;;  %v18641_v25 = vld [vmem:[#allocation23_spill] sm:$0xff] }
 0x813   : > { %v14190_v28 = vpop.eup %14189  ;;  %13494 = vmatpush3.bf16.msra.mxu0 %v18574_v31  ;;  %12652 = vmatprep.mubr.msk.f32.mxu0 %vm14557_vm5, %v18551_v8  ;;  %v5276_v12 = vmul.f32 %v14188_v21, %v16555_v7  ;;  %v13495_v7 = vpack.c.bf16 %v16499_v23, %v16490_v33 }
 0x814   : > { %v14192_v59 = vpop.eup %14191  ;;  %12665 = vmatmul.mubr.msk.f32.vlgmr.msra.gmra.mrb[108].mxu1 %vm1346_vm11, %v5275_v22  ;;  %12677 = vmatprep.subr.mxu0 %v18551_v8  ;;  %v5277_v58 = vmul.f32 %v14190_v28, %v16564_v44  ;;  %v6060_v60 = vmul.f32 0.31622776, %v6051_v48  ;;  %v18647_v48 = vld [vmem:[#allocation8_spill] sm:$0xff] }
 0x815   : > { %v5146_v62 = vmul.f32 %v14192_v59, %v4966_v18  ;;  %12667 = vmatprep.mubr.msk.f32.mxu1 %vm14557_vm5, %v18551_v8  ;;  %12689 = vmatpush3.msk.msra.mxu1 %vm18637_vm13, %v14509_v26  ;;  %vm18638_vm13 = vmmov %vm18636_vm8 }
 0x816   : > { %13503 = vmatprep.subr.bf16.mxu1 %v18552_v39 }
 0x817   : > { %v14194_v61 = vpop.eup %14193  ;;  %12653 = vmatmul.mubr.msk.f32.gmra.mrb[110].mxu0 %vm18636_vm8, %v5146_v62  ;;  %vm18661_vm8 = vcmask 15360  }
 0x818   : > { %12655 = vmatprep.mubr.msk.f32.mxu0 %vm14557_vm5, %v18551_v8  ;;  %12668 = vmatmul.mubr.msk.f32.gmra.mrb[110].mxu1 %vm1346_vm11, %v5276_v12  ;;  %v5148_v44 = vmul.f32 %v14194_v61, %v4971_v37  ;;  %v6054_v61 = vmul.f32 %v16315_v2, %v6048_v6 }
 0x819   : > { %12678 = vmatpush3.msk.msra.mxu0 %vm373_vm1, %v16604_v51  ;;  %12670 = vmatprep.mubr.msk.f32.mxu1 %vm14557_vm5, %v18551_v8 }
 0x81a   : > { %13496 = vmatprep.subr.bf16.mxu0 %v13495_v7 }
 0x81b   : > { %12656 = vmatmul.mubr.msk.f32.gmra.mrb[112].mxu0 %vm18638_vm13, %v5148_v44  ;;  %vm18663_vm13 = vmmov %vm18661_vm8 }
 0x81c   : > { %12671 = vmatmul.mubr.msk.f32.gmra.mrb[112].mxu1 %vm1346_vm11, %v5277_v58  ;;  %12679 = vmatprep.mubr.msk.f32.mxu0 %vm14557_vm5, %v18551_v8 }
 0x81d   : > { %12690 = vmatprep.mubr.msk.f32.mxu1 %vm14557_vm5, %v18551_v8 }
 0x81f   : > { %12680 = vmatmul.mubr.msk.f32.vlgmr.msra.gmra.mrb[114].mxu0 %vm1346_vm11, %v14186_v55  ;;  %v6026_v55 = vadd.f32 %v6025_v49, %v18641_v25  ;;  %v18648_v49 = vld [vmem:[#allocation9_spill] sm:$0xff] }
 0x820   : > { %12682 = vmatprep.mubr.msk.f32.mxu0 %vm14557_vm5, %v18551_v8  ;;  %13498 = vmatpush1.bf16.xpose.msra.mxu0 %v13497_v11 }
 0x821   : > { %5622 = vmatprep.subr.mxu0 %v16520_v19  ;;  %v6027_v22 = vrot.slane %v6026_v55, 4 }
 0x823   : > { %12683 = vmatmul.mubr.msk.f32.gmra.mrb[116].mxu0 %vm1346_vm11, %v14188_v21  ;;  %v6035_v21 = vrot.slane %v6034_v38, 4  ;;  %v6028_v12 = vadd.f32 %v6027_v22, %v6026_v55  ;;  %v18650_v22 = vld [vmem:[#allocation11_spill] sm:$0xff] }
 0x824   : > { %12685 = vmatprep.mubr.msk.f32.mxu0 %vm14557_vm5, %v18551_v8 }
 0x825   : > { %v6029_v62 = vrot.slane %v6028_v12, 2 }
 0x827   : > { %12686 = vmatmul.mubr.msk.f32.gmra.mrb[118].mxu0 %vm1346_vm11, %v14190_v28  ;;  %v6036_v28 = vadd.f32 %v6035_v21, %v6034_v38  ;;  %v6030_v44 = vadd.f32 %v6029_v62, %v6028_v12  ;;  %v18651_v12 = vld [vmem:[#allocation12_spill] sm:$0xff] }
 0x828   : > { %5623 = vmatpush1.xpose.msra.mxu0 %v16517_v20  ;;  %5682 = vmatprep.mubr.f32.mxu0 %v16490_v33  ;;  %v5860_v33 = vpop.xlane.xlu0 %5859 }
 0x829   : > { %13499 = vmatprep.subr.bf16.mxu0 %v18552_v39  ;;  %v5865_v18 = vmul.f32 0.0625, %v5860_v33  ;;  %v6037_v59 = vrot.slane %v6036_v28, 2  ;;  %v6031_v33 = vrot.slane %v6030_v44, 1 }
 0x82b   : > { %5683 = vmatmul.mubr.f32.vlgmr.msra.gmra.mrb[120].mxu0 %v16487_v27  ;;  %v5857_v27 = vpop.xlane.xlu1 %5856  ;;  %v6038_v26 = vadd.f32 %v6037_v59, %v6036_v28 }
 0x82c   : > { %13502 = vmatpush3.bf16.xpose.msk.msra.mxu0 %vm14789_vm7, %v13500_v54  ;;  %5687 = vmatprep.mubr.f32.mxu0 %v16499_v23  ;;  %v5864_v23 = vmul.f32 0.0625, %v5857_v27  ;;  %v5791_v41 = vpop.xlane.xlu0 %5790  ;;  %v6057_v54 = vmul.f32 %v16329_v56, %v6048_v6  ;;  %v6063_v27 = vmul.f32 0.31622776, %v6054_v61  ;;  %v18646_v6 = vld [vmem:[#allocation7_spill] sm:$0xff] }
 0x82d   : > { %12703 = vmatprep.subr.mxu0 %v18551_v8  ;;  %14195 = vrsqrt.f32 %v5791_v41  ;;  %v6039_v11 = vrot.slane %v6038_v26, 1 }
 0x82f   : > { %5688 = vmatmul.mubr.f32.gmra.mrb[122].mxu0 %v16496_v63  ;;  %v16654_v63 = vsub.f32 %v16475_v5, %v5865_v18  ;;  %v6066_v18 = vmul.f32 0.31622776, %v6057_v54 }
 0x830   : > { %5692 = vmatprep.mubr.f32.mxu0 %v16520_v19  ;;  %v16651_v19 = vsub.f32 %v16472_v42, %v5864_v23  ;;  %v5796_v36 = vpop.xlane.xlu0 %5795  ;;  %v6040_v23 = vadd.f32 %v6039_v11, %v6038_v26  ;;  %v18652_v26 = vld [vmem:[#allocation13_spill] sm:$0xff]  ;;  %v18653_v11 = vld [vmem:[#allocation14_spill] sm:$0xff] }
 0x831   : > { %v5960_v53 = vmul.f32 %v16654_v63, %v16654_v63  ;;  %14197 = vrsqrt.f32 %v5796_v36 }
 0x833   : > { %5693 = vmatmul.mubr.f32.gmra.mrb[124].mxu0 %v16517_v20  ;;  %v5863_v20 = vpop.xlane.xlu1 %5862  ;;  %v5965_v5 = vsel %vm641_vm3, %v5960_v53, 0.0 }
 0x834   : > { %12704 = vmatpush3.xpose.msk.msra.mxu0 %vm363_vm0, %v16523_v57  ;;  %12705 = vmatprep.mubr.msk.f32.mxu0 %vm14557_vm5, %v18551_v8  ;;  %v5866_v32 = vmul.f32 0.0625, %v5863_v20  ;;  %v5803_v17 = vpop.xlane.xlu0 %5802  ;;  %v6032_v20 = vadd.f32 %v6031_v33, %v6030_v44 }
 0x835   : > { %12729 = vmatprep.subr.mxu0 %v18551_v8  ;;  %14199 = vrsqrt.f32 %v5803_v17 }
 0x836   : > { %v16667_v42 = vsub.f32 %v16478_v24, %v5866_v32  ;;  %14201 = vtanh.f32 %v6060_v60  ;;  %v6049_v53 = vmul.f32 %v16302_v52, %v6032_v20  ;;  %v6052_v41 = vmul.f32 %v16360_v47, %v6032_v20  ;;  %v18642_v52 = vld [vmem:[#allocation4_spill] sm:$0xff]  ;;  %v18649_v60 = vld [vmem:[#allocation10_spill] sm:$0xff] }
 0x837   : > { %12706 = vmatmul.mubr.msk.f32.vlgmr.msra.gmra.mrb[120].mxu0 %vm363_vm0, %v16493_v15  ;;  %v5959_v15 = vmul.f32 %v16651_v19, %v16651_v19  ;;  %v16677_v24 = vpop.eup %14195 }
 0x838   : > { %12708 = vmatprep.mubr.msk.f32.mxu0 %vm14557_vm5, %v18551_v8  ;;  %12730 = vmatpush3.msk.msra.mxu0 %vm373_vm1, %v16428_v1 }
 0x839   : > { %13540 = vmatprep.subr.bf16.mxu0 %v14793_v30  ;;  %v5962_v1 = vsel %vm641_vm3, %v5959_v15, 0.0  ;;  %5810 = vxpose.xlu0.b32.start [1/3] (short) (narrow) %v16677_v24, 8  ;;  %v6050_v15 = vmul.f32 %v16305_v34, %v6040_v23  ;;  %v6056_v34 = vmul.f32 %v16325_v45, %v6040_v23 }
 0x83a   : > { %5963 = vadd.xlane.f32.xlu1 %v5962_v1 }
 0x83b   : > { %12709 = vmatmul.mubr.msk.f32.gmra.mrb[122].mxu0 %vm363_vm0, %v16502_v46  ;;  %v5961_v46 = vmul.f32 %v16667_v42, %v16667_v42  ;;  %v6059_v1 = vmul.f32 0.31622776, %v6050_v15  ;;  %v6065_v43 = vmul.f32 0.31622776, %v6056_v34  ;;  %v16777_v34 = vld [vmem:[%s14615_s8 + $0x190] sm:$0xff] }
 0x83c   : > { %12711 = vmatprep.mubr.msk.f32.mxu0 %vm14557_vm5, %v18551_v8 }
 0x83d   : > { %v5968_v37 = vsel %vm648_vm4, %v5961_v46, 0.0 }
 0x83e   : > { %5966 = vadd.xlane.f32.xlu1 %v5965_v5  ;;  %v6053_v5 = vmul.f32 %v16363_v3, %v6040_v23  ;;  %v18643_v3 = vld [vmem:[#allocation21_spill] sm:$0xff] }
 0x83f   : > { %12712 = vmatmul.mubr.msk.f32.gmra.mrb[124].mxu0 %vm363_vm0, %v16523_v57  ;;  %v16680_v57 = vpop.eup %14197  ;;  %v6055_v14 = vmul.f32 %v18643_v3, %v6032_v20  ;;  %v18656_v20 = vld [vmem:[#allocation17_spill] sm:$0xff] }
 0x840   : > { %12731 = vmatprep.mubr.msk.f32.mxu0 %vm14557_vm5, %v18551_v8  ;;  %5811 = vxpose.xlu0.b32.cont [2/3] (short) (narrow) %v16680_v57, 8  ;;  %v16688_v16 = vpop.eup %14199  ;;  %v6062_v9 = vmul.f32 0.31622776, %v6053_v5  ;;  %v16784_v3 = vld [vmem:[%s14615_s8 + $0x198] sm:$0xf] }
 0x841   : > { %v14202_v58 = vpop.eup %14201  ;;  %v6064_v45 = vmul.f32 0.31622776, %v6055_v14  ;;  %18657 = vst [vmem:[#allocation29_spill] sm:$0xff] %v16784_v3  ;;  %v16787_v14 = vld [vmem:[%s14615_s8 + $0x1a0] sm:$0xf] }
 0x842   : > { %5969 = vadd.xlane.f32.xlu1 %v5968_v37  ;;  %v6080_v7 = vmul.f32 1.442695, %v14202_v58  ;;  %v6058_v37 = vmul.f32 0.31622776, %v6049_v53 }
 0x844   : > { %5812 = vxpose.xlu0.b32.end [3/3] (short) (narrow) %v16688_v16, 8  ;;  %14203 = vpow2.f32 %v6080_v7 }
 0x845   : > { %14205 = vtanh.f32 %v6063_v27  ;;  %v18654_v27 = vld [vmem:[#allocation15_spill] sm:$0xff] }
 0x846   : > { %14207 = vtanh.f32 %v6066_v18 }
 0x847   : > { %14209 = vtanh.f32 %v6059_v1 }
 0x848   : > { %14211 = vtanh.f32 %v6058_v37  ;;  %v16770_v37 = vld [vmem:[%s14615_s8 + $0x178] sm:$0xff] }
 0x849   : > { %14213 = vtanh.f32 %v6062_v9  ;;  %v16781_v9 = vsel %vm363_vm0, %v16777_v34, 0.0 }
 0x84e   : > { %v16698_v32 = vpop.eup %14203 }
 0x84f   : > { %v6096_v46 = vmul.f32 %v16698_v32, %v16308_v10  ;;  %v14206_v36 = vpop.eup %14205  ;;  %v6061_v10 = vmul.f32 0.31622776, %v6052_v41  ;;  %v16767_v41 = vld [vmem:[%s14615_s8 + $0x170] sm:$0xff] }
 0x850   : > { %v6086_v47 = vmul.f32 1.442695, %v14206_v36  ;;  %v14208_v35 = vpop.eup %14207 }
 0x851   : > { %12732 = vmatmul.mubr.msk.f32.vlgmr.msra.gmra.mrb[126].mxu0 %vm363_vm0, %v6096_v46  ;;  %14215 = vtanh.f32 %v6061_v10  ;;  %v6092_v17 = vmul.f32 1.442695, %v14208_v35  ;;  %v14210_v29 = vpop.eup %14209  ;;  %v16764_v46 = vld [vmem:[%s14615_s8 + $0x168] sm:$0xff] }
 0x852   : > { %13542 = vmatpush3.bf16.msra.mxu0 %v14817_v40  ;;  %12734 = vmatprep.mubr.msk.f32.mxu0 %vm14557_vm5, %v18551_v8  ;;  %14217 = vpow2.f32 %v6086_v47  ;;  %v6078_v13 = vmul.f32 1.442695, %v14210_v29  ;;  %v14212_v38 = vpop.eup %14211  ;;  %v6878_v36 = vadd.f32 %v16767_v41, %v16764_v46  ;;  %v16791_v35 = vld [vmem:[%s14615_s8 + $0x1a8] sm:$0xf] }
 0x853   : > { %13544 = vmatprep.subr.bf16.mxu0 %v18642_v52  ;;  %14219 = vtanh.f32 %v6065_v43  ;;  %v14214_v25 = vpop.eup %14213  ;;  %v6076_v21 = vmul.f32 1.442695, %v14212_v38  ;;  %v16795_v43 = vsel %vm373_vm1, %v16784_v3, 0.0  ;;  %v6891_v29 = vsel %vm377_vm2, %v16791_v35, 0.0 }
 0x854   : > { %14221 = vtanh.f32 %v6064_v45  ;;  %v6084_v59 = vmul.f32 1.442695, %v14214_v25  ;;  %18658 = vst [vmem:[#allocation28_spill] sm:$0xff] %v16795_v43  ;;  %v16799_v45 = vsel %vm373_vm1, %v16787_v14, 0.0 }
 0x855   : > { %14223 = vpow2.f32 %v6092_v17  ;;  %18659 = vst [vmem:[#allocation27_spill] sm:$0xff] %v16799_v45  ;;  %v6890_v17 = vadd.f32 %v16799_v45, %v16795_v43 }
 0x856   : > { %13546 = vmatpush3.bf16.msra.mxu0 %v18644_v4  ;;  %14225 = vpow2.f32 %v6078_v13 }
 0x857   : > { %13548 = vmatprep.subr.bf16.mxu0 %v18645_v0  ;;  %14227 = vpow2.f32 %v6076_v21  ;;  %v6892_v38 = vadd.f32 %v6891_v29, %v6890_v17 }
 0x858   : > { %14229 = vpow2.f32 %v6084_v59 }
 0x85a   : > { %13550 = vmatpush3.bf16.msra.mxu0 %v18646_v6 }
 0x85b   : > { %13552 = vmatprep.subr.bf16.mxu0 %v18647_v48  ;;  %v14216_v55 = vpop.eup %14215 }
 0x85c   : > { %v16719_v28 = vpop.eup %14217  ;;  %v6082_v61 = vmul.f32 1.442695, %v14216_v55 }
 0x85d   : > { %v14220_v58 = vpop.eup %14219  ;;  %v6099_v7 = vmul.f32 %v16719_v28, %v16315_v2  ;;  %v18655_v2 = vld [vmem:[#allocation16_spill] sm:$0xff] }
 0x85e   : > { %13554 = vmatpush3.bf16.msra.mxu0 %v18648_v49  ;;  %v14222_v62 = vpop.eup %14221  ;;  %v6090_v54 = vmul.f32 1.442695, %v14220_v58  ;;  %14231 = vpow2.f32 %v6082_v61 }
 0x85f   : > { %13556 = vmatprep.subr.bf16.mxu0 %v18649_v60  ;;  %v16725_v44 = vpop.eup %14223  ;;  %12735 = vmatmul.mubr.msk.f32.gmra.mrb[128].mxu0 %vm363_vm0, %v6099_v7  ;;  %v6088_v23 = vmul.f32 1.442695, %v14222_v62 }
 0x860   : > { %12737 = vmatprep.mubr.msk.f32.mxu0 %vm14557_vm5, %v18551_v8  ;;  %v6102_v33 = vmul.f32 %v16725_v44, %v16329_v56  ;;  %14233 = vpow2.f32 %v6090_v54  ;;  %v16735_v18 = vpop.eup %14225 }
 0x861   : > { %14235 = vpow2.f32 %v6088_v23  ;;  %v16741_v15 = vpop.eup %14227 }
 0x862   : > { %13558 = vmatpush3.bf16.msra.mxu0 %v18650_v22  ;;  %v16743_v56 = vpop.eup %14229 }
 0x863   : > { %13560 = vmatprep.subr.bf16.mxu0 %v18651_v12  ;;  %12738 = vmatmul.mubr.msk.f32.gmra.mrb[130].mxu0 %vm363_vm0, %v6102_v33 }
 0x864   : > { %6345 = vmatprep.mubr.f32.mxu0 %v16735_v18 }
 0x866   : > { %13562 = vmatpush3.bf16.msra.mxu0 %v18652_v26 }
 0x867   : > { %13564 = vmatprep.subr.bf16.mxu0 %v18653_v11 }
 0x868   : > { %v16749_v53 = vpop.eup %14231 }
 0x86a   : > { %13566 = vmatpush3.bf16.msra.mxu0 %v18654_v27  ;;  %v16751_v1 = vpop.eup %14233 }
 0x86b   : > { %13568 = vmatprep.subr.bf16.mxu0 %v18655_v2  ;;  %v16758_v5 = vpop.eup %14235 }
 0x86e   : > { %13570 = vmatpush3.bf16.msra.mxu0 %v18656_v20 }
 0x86f   : > { %13578 = vmatprep.subr.bf16.mxu0 %v18552_v39 }
 0x871   : > { %6346 = vmatmul.mubr.f32.vlgmr.msra.gmra.mrb[132].mxu0 %v16741_v15 }
 0x872   : > { %6350 = vmatprep.mubr.f32.mxu0 %v16743_v56  ;;  %13580 = vmatpush3.bf16.msra.mxu0 %v18574_v31 }
 0x873   : > { %12772 = vmatprep.subr.mxu0 %v18551_v8 }
 0x875   : > { %6351 = vmatmul.mubr.f32.gmra.mrb[134].mxu0 %v16749_v53 }
 0x876   : > { %6355 = vmatprep.mubr.f32.mxu0 %v16751_v1  ;;  %12773 = vmatpush3.msk.msra.mxu0 %vm373_vm1, %v16604_v51  ;;  %v6879_v51 = vsel %vm363_vm0, %v16770_v37, 0.0 }
 0x877   : > { %12798 = vmatprep.subr.mxu0 %v18551_v8  ;;  %v6880_v10 = vadd.f32 %v6879_v51, %v6878_v36  ;;  %v7339_v47 = vadd.f32 %v16781_v9, %v6879_v51 }
 0x879   : > { %6356 = vmatmul.mubr.f32.gmra.mrb[136].mxu0 %v16758_v5  ;;  %6881 = vadd.xlane.f32.xlu0 %v6880_v10  ;;  %v16805_v13 = vadd.f32 %v7339_v47, %v6891_v29 }
 0x87a   : > { %12774 = vmatprep.mubr.msk.f32.mxu0 %vm14557_vm5, %v18551_v8 }
 0x87b   : > { %18660 = vst [vmem:[#allocation24_spill] sm:$0xff] %v16805_v13 }
 0x87d   : > { %6893 = vadd.xlane.f32.xlu0 %v6892_v38 }
 0x8c7   : > { %v5964_v25 = vpop.xlane.xlu1 %5963 }
 0x8c8   : > { %14237 = vrsqrt.f32 %v5964_v25 }
 0x8cb   : > { %v5967_v55 = vpop.xlane.xlu1 %5966 }
 0x8cc   : > { %14239 = vrsqrt.f32 %v5967_v55 }
 0x8cf   : > { %v5970_v21 = vpop.xlane.xlu1 %5969 }
 0x8d0   : > { %14241 = vrsqrt.f32 %v5970_v21 }
 0x8d2   : > { %v16807_v59 = vpop.eup %14237 }
 0x8d3   : > { %5977 = vxpose.xlu1.b32.start [1/3] (short) (narrow) %v16807_v59, 8 }
 0x8d6   : > { %v16810_v58 = vpop.eup %14239 }
 0x8d7   : > { %5978 = vxpose.xlu1.b32.cont [2/3] (short) (narrow) %v16810_v58, 8 }
 0x8da   : > { %v16813_v62 = vpop.eup %14241 }
 0x8db   : > { %5979 = vxpose.xlu1.b32.end [3/3] (short) (narrow) %v16813_v62, 8 }
 0x8e5   : > { %v5224_v7 = vpop.f32.mrb[108].mxu0 }
 0x8e6   : > { %v12651_v61 = vpop.f32.mrb[109].mxu0  ;;  %v5238_v36 = vsel %vm1333_vm14, %v5224_v7, 0.0 }
 0x8e7   : > { %v5353_v54 = vpop.f32.mrb[108].mxu1 }
 0x8e8   : > { %v12666_v33 = vpop.f32.mrb[109].mxu1 }
 0x8ea   : > { %v5229_v23 = vpop.f32.mrb[110].mxu0 }
 0x8eb   : > { %v5239_v51 = vsel %vm1333_vm14, %v5229_v23, 0.0  ;;  %v12654_v10 = vpop.f32.mrb[111].mxu0  ;;  %v5358_v47 = vpop.f32.mrb[110].mxu1 }
 0x8ec   : > { %v5240_v17 = vadd.f32 %v5239_v51, %v5238_v36  ;;  %v12669_v29 = vpop.f32.mrb[111].mxu1  ;;  %v16822_v51 = vld [vmem:[%s14615_s8 + $0x180] sm:$0xff] }
 0x8ed   : > { %v16825_v29 = vld [vmem:[%s14615_s8 + $0x188] sm:$0xff] }
 0x8ee   : > { %v5234_v38 = vpop.f32.mrb[112].mxu0 }
 0x8ef   : > { %v5241_v25 = vsel %vm1337_vm15, %v5234_v38, 0.0  ;;  %v12657_v55 = vpop.f32.mrb[113].mxu0  ;;  %v5363_v21 = vpop.f32.mrb[112].mxu1 }
 0x8f0   : > { %v16819_v43 = vadd.f32 %v5241_v25, %v5240_v17  ;;  %v12672_v61 = vpop.f32.mrb[113].mxu1  ;;  %v6883_v17 = vadd.f32 %v16825_v29, %v16822_v51  ;;  %v13504_v25 = vpack.c.bf16 %v16654_v63, %v16651_v19 }
 0x8f2   : > { %v5442_v33 = vpop.f32.mrb[114].mxu0 }
 0x8f3   : > { %14243 = vrcp.f32 %v5442_v33  ;;  %v12681_v45 = vpop.f32.mrb[115].mxu0 }
 0x8f6   : > { %v5447_v7 = vpop.f32.mrb[116].mxu0 }
 0x8f7   : > { %14245 = vrcp.f32 %v5447_v7  ;;  %v12684_v23 = vpop.f32.mrb[117].mxu0 }
 0x8f8   : > { %v14511_v23 = vld [vmem:[%s14615_s8 + $0x128] sm:$0xff] }
 0x8fa   : > { %v5452_v10 = vpop.f32.mrb[118].mxu0 }
 0x8fb   : > { %14247 = vrcp.f32 %v5452_v10  ;;  %v12687_v36 = vpop.f32.mrb[119].mxu0 }
 0x8fd   : > { %v14244_v13 = vpop.eup %14243 }
 0x8fe   : > { %v5457_v38 = vmul.f32 %v14244_v13, %v5353_v54  ;;  %v6885_v13 = vadd.f32 %v16781_v9, %v6883_v17  ;;  %v14514_v17 = vld [vmem:[%s14615_s8 + $0x138] sm:$0xff] }
 0x900   : > { %12691 = vmatmul.mubr.msk.f32.vlgmr.msra.gmra.mrb[114].mxu1 %vm18661_vm8, %v5457_v38 }
 0x901   : > { %v14246_v45 = vpop.eup %14245  ;;  %13506 = vmatpush3.bf16.xpose.msk.msra.mxu1 %vm14747_vm6, %v13504_v25  ;;  %12693 = vmatprep.mubr.msk.f32.mxu1 %vm14557_vm5, %v18551_v8  ;;  %v6097_v25 = vmul.f32 %v14514_v17, %v16749_v53  ;;  %v18664_v53 = vld [vmem:[#allocation18_spill] sm:$0xff] }
 0x902   : > { %v5459_v61 = vmul.f32 %v14246_v45, %v5358_v47  ;;  %12718 = vmatprep.subr.mxu1 %v18551_v8  ;;  %6886 = vadd.xlane.f32.xlu1 %v6885_v13  ;;  %v16890_v45 = vld [vmem:[%s18362_s2 + $0x100] sm:$0xf] }
 0x904   : > { %12694 = vmatmul.mubr.msk.f32.gmra.mrb[116].mxu1 %vm18663_vm13, %v5459_v61  ;;  %vm18668_vm13 = vcmask 211968  }
 0x905   : > { %v14248_v54 = vpop.eup %14247  ;;  %12696 = vmatprep.mubr.msk.f32.mxu1 %vm14557_vm5, %v18551_v8 }
 0x906   : > { %v5461_v33 = vmul.f32 %v14248_v54, %v5363_v21 }
 0x908   : > { %12697 = vmatmul.mubr.msk.f32.gmra.mrb[118].mxu1 %vm18661_vm8, %v5461_v33  ;;  %vm18669_vm8 = vcmask 1041408  }
 0x909   : > { %12719 = vmatpush3.xpose.msk.msra.mxu1 %vm641_vm3, %v16667_v42  ;;  %12720 = vmatprep.mubr.msk.f32.mxu1 %vm14557_vm5, %v18551_v8 }
 0x90a   : > { %13508 = vmatprep.subr.bf16.mxu1 %v14793_v30  ;;  %v16847_v9 = vpop.f32.mrb[120].mxu0 }
 0x90b   : > { %v12707_v47 = vpop.f32.mrb[121].mxu0 }
 0x90c   : > { %12721 = vmatmul.mubr.msk.f32.vlgmr.msra.gmra.mrb[120].mxu1 %vm641_vm3, %v16651_v19  ;;  %v6095_v19 = vmul.f32 %v14511_v23, %v16735_v18  ;;  %v14513_v18 = vld [vmem:[%s14615_s8 + $0x140] sm:$0xff] }
 0x90d   : > { %13510 = vmatpush3.bf16.msra.mxu1 %v14817_v40  ;;  %12723 = vmatprep.mubr.msk.f32.mxu1 %vm14557_vm5, %v18551_v8  ;;  %v6098_v38 = vmul.f32 %v14513_v18, %v16743_v56  ;;  %v14517_v56 = vld [vmem:[%s14615_s8 + $0x150] sm:$0xf] }
 0x90e   : > { %13512 = vmatprep.subr.bf16.mxu1 %v18642_v52  ;;  %v16855_v21 = vpop.f32.mrb[122].mxu0  ;;  %v6100_v13 = vmul.f32 %v14517_v56, %v16758_v5  ;;  %v16937_v56 = vld [vmem:[%s14654_s11 + $0x80] sm:$0xff] }
 0x90f   : > { %v12710_v7 = vpop.f32.mrb[123].mxu0 }
 0x910   : > { %12724 = vmatmul.mubr.msk.f32.gmra.mrb[122].mxu1 %vm641_vm3, %v16654_v63  ;;  %v14512_v63 = vld [vmem:[%s14615_s8 + $0x120] sm:$0xff] }
 0x911   : > { %13514 = vmatpush3.bf16.msra.mxu1 %v18644_v4  ;;  %12726 = vmatprep.mubr.msk.f32.mxu1 %vm14557_vm5, %v18551_v8 }
 0x912   : > { %13516 = vmatprep.subr.bf16.mxu1 %v18645_v0  ;;  %v16865_v10 = vpop.f32.mrb[124].mxu0 }
 0x913   : > { %v12713_v36 = vpop.f32.mrb[125].mxu0 }
 0x914   : > { %12727 = vmatmul.mubr.msk.f32.gmra.mrb[124].mxu1 %vm641_vm3, %v16667_v42  ;;  %v6094_v42 = vmul.f32 %v14512_v63, %v16741_v15  ;;  %v14516_v15 = vld [vmem:[%s14615_s8 + $0x158] sm:$0xf] }
 0x915   : > { %13518 = vmatpush3.bf16.msra.mxu1 %v18646_v6  ;;  %6176 = vmatprep.mubr.f32.mxu1 %v6095_v19  ;;  %v6101_v61 = vmul.f32 %v14516_v15, %v16751_v1  ;;  %v18665_v1 = vld [vmem:[#allocation19_spill] sm:$0xff] }
 0x916   : > { %13520 = vmatprep.subr.bf16.mxu1 %v18647_v48 }
 0x919   : > { %13522 = vmatpush3.bf16.msra.mxu1 %v18648_v49 }
 0x91a   : > { %13524 = vmatprep.subr.bf16.mxu1 %v18649_v60 }
 0x91d   : > { %13526 = vmatpush3.bf16.msra.mxu1 %v18650_v22 }
 0x91e   : > { %13528 = vmatprep.subr.bf16.mxu1 %v18651_v12 }
 0x921   : > { %13530 = vmatpush3.bf16.msra.mxu1 %v18652_v26 }
 0x922   : > { %13532 = vmatprep.subr.bf16.mxu1 %v18653_v11 }
 0x925   : > { %13534 = vmatpush3.bf16.msra.mxu1 %v18654_v27 }
 0x926   : > { %13536 = vmatprep.subr.bf16.mxu1 %v18655_v2 }
 0x929   : > { %13538 = vmatpush3.bf16.msra.mxu1 %v18656_v20 }
 0x92a   : > { %12740 = vmatprep.subr.mxu1 %v18551_v8 }
 0x92c   : > { %6177 = vmatmul.mubr.f32.vlgmr.msra.gmra.mrb[126].mxu1 %v6094_v42 }
 0x92d   : > { %12741 = vmatpush3.msk.msra.mxu1 %vm373_vm1, %v16890_v45  ;;  %6181 = vmatprep.mubr.f32.mxu1 %v6098_v38 }
 0x92e   : > { %13571 = vmatprep.subr.bf16.mxu1 %v18552_v39 }
 0x930   : > { %6182 = vmatmul.mubr.f32.gmra.mrb[128].mxu1 %v6097_v25  ;;  %v5826_v25 = vpop.trf.xlu0 }
 0x931   : > { %6186 = vmatprep.mubr.f32.mxu1 %v6101_v61  ;;  %v16934_v61 = vld [vmem:[%s14654_s11 + $0x78] sm:$0xff] }
 0x934   : > { %6187 = vmatmul.mubr.f32.gmra.mrb[130].mxu1 %v6100_v13  ;;  %v16940_v13 = vld [vmem:[%s14654_s11 + $0x88] sm:$0xf] }
 0x935   : > { %12742 = vmatprep.mubr.msk.f32.mxu1 %vm14557_vm5, %v18551_v8 }
 0x938   : > { %12743 = vmatmul.mubr.msk.f32.vlgmr.msra.gmra.mrb[132].mxu1 %vm363_vm0, %v16698_v32  ;;  %v16919_v32 = vpop.f32.mrb[126].mxu0 }
 0x939   : > { %12745 = vmatprep.mubr.msk.f32.mxu1 %vm14557_vm5, %v18551_v8  ;;  %13573 = vmatpush3.bf16.msra.mxu1 %v18664_v53  ;;  %v12733_v54 = vpop.f32.mrb[127].mxu0 }
 0x93a   : > { %13574 = vmatprep.subr.bf16.mxu1 %v18552_v39  ;;  %v6882_v54 = vpop.xlane.xlu0 %6881 }
 0x93c   : > { %12746 = vmatmul.mubr.msk.f32.gmra.mrb[134].mxu1 %vm363_vm0, %v16719_v28  ;;  %v16921_v28 = vpop.f32.mrb[128].mxu0 }
 0x93d   : > { %12748 = vmatprep.mubr.msk.f32.mxu1 %vm14557_vm5, %v18551_v8  ;;  %13577 = vmatpush3.bf16.msk.msra.mxu1 %vm15097_vm10, %v18665_v1  ;;  %v12736_v33 = vpop.f32.mrb[129].mxu0 }
 0x93e   : > { %13581 = vmatprep.subr.bf16.mxu1 %v18552_v39  ;;  %v16923_v47 = vpop.f32.mrb[130].mxu0 }
 0x93f   : > { %v12739_v7 = vpop.f32.mrb[131].mxu0 }
 0x940   : > { %12749 = vmatmul.mubr.msk.f32.gmra.mrb[136].mxu1 %vm363_vm0, %v16725_v44  ;;  %v7153_v7 = vsel %vm641_vm3, %v16934_v61, 0.0 }
 0x941   : > { %12759 = vmatprep.mubr.msk.f32.mxu1 %vm14557_vm5, %v18551_v8  ;;  %7154 = vadd.xlane.f32.xlu1 %v7153_v7  ;;  %v6894_v7 = vpop.xlane.xlu0 %6893 }
 0x944   : > { %v11848_v23 = vpop.f32.mrb[132].mxu0 }
 0x945   : > { %v11849_v19 = vpop.f32.mrb[133].mxu0 }
 0x946   : > { %v16925_v36 = vadd.f32 %v11849_v19, %v11848_v23  ;;  %v7156_v23 = vsel %vm641_vm3, %v16937_v56, 0.0  ;;  %v6895_v19 = vmul.f32 0.0038461538, %v6882_v54 }
 0x947   : > { %7157 = vadd.xlane.f32.xlu0 %v7156_v23  ;;  %v6897_v23 = vmul.f32 0.0038461538, %v6894_v7 }
 0x948   : > { %v11851_v44 = vpop.f32.mrb[134].mxu0  ;;  %v16955_v5 = vsub.f32 %v16770_v37, %v6895_v19 }
 0x949   : > { %v11852_v63 = vpop.f32.mrb[135].mxu0  ;;  %v16979_v7 = vsub.f32 %v16784_v3, %v6897_v23  ;;  %v16982_v27 = vsub.f32 %v16787_v14, %v6897_v23  ;;  %v16985_v11 = vsub.f32 %v16791_v35, %v6897_v23 }
 0x94a   : > { %v16927_v42 = vadd.f32 %v11852_v63, %v11851_v44  ;;  %v7159_v63 = vsel %vm648_vm4, %v16940_v13, 0.0 }
 0x94b   : > { %7160 = vadd.xlane.f32.xlu1 %v7159_v63  ;;  %v7082_v49 = vmul.f32 %v16979_v7, %v16979_v7  ;;  %v7083_v48 = vmul.f32 %v16982_v27, %v16982_v27  ;;  %v7084_v6 = vmul.f32 %v16985_v11, %v16985_v11 }
 0x94c   : > { %v11854_v18 = vpop.f32.mrb[136].mxu0 }
 0x94d   : > { %v11855_v38 = vpop.f32.mrb[137].mxu0  ;;  %v7095_v23 = vsel %vm373_vm1, %v7082_v49, 0.0 }
 0x94e   : > { %v16929_v17 = vadd.f32 %v11855_v38, %v11854_v18  ;;  %v16949_v18 = vsub.f32 %v16764_v46, %v6895_v19  ;;  %v16952_v38 = vsub.f32 %v16767_v41, %v6895_v19  ;;  %v7078_v19 = vmul.f32 %v16955_v5, %v16955_v5 }
 0x950   : > { %v7076_v53 = vmul.f32 %v16949_v18, %v16949_v18  ;;  %v7077_v55 = vmul.f32 %v16952_v38, %v16952_v38  ;;  %v7086_v63 = vsel %vm363_vm0, %v7078_v19, 0.0 }
 0x952   : > { %v7085_v26 = vadd.f32 %v7077_v55, %v7076_v53  ;;  %v7096_v55 = vsel %vm373_vm1, %v7083_v48, 0.0  ;;  %v5807_v48 = vmul.f32 %v16677_v24, %v16847_v9 }
 0x953   : > { %v16931_v15 = vpop.trf.xlu1  ;;  %v7097_v53 = vadd.f32 %v7096_v55, %v7095_v23 }
 0x954   : > { %v7087_v60 = vadd.f32 %v7086_v63, %v7085_v26 }
 0x956   : > { %7088 = vadd.xlane.f32.xlu0 %v7087_v60 }
 0x98f   : > { %v6887_v33 = vpop.xlane.xlu1 %6886 }
 0x990   : > { %v6896_v44 = vmul.f32 0.0038461538, %v6887_v33 }
 0x992   : > { %v16958_v1 = vsub.f32 %v16822_v51, %v6896_v44  ;;  %v16961_v54 = vsub.f32 %v16825_v29, %v6896_v44  ;;  %v16964_v33 = vsub.f32 %v16777_v34, %v6896_v44 }
 0x994   : > { %v7079_v20 = vmul.f32 %v16958_v1, %v16958_v1  ;;  %v7080_v2 = vmul.f32 %v16961_v54, %v16961_v54  ;;  %v7081_v44 = vmul.f32 %v16964_v33, %v16964_v33 }
 0x996   : > { %v7090_v12 = vadd.f32 %v7080_v2, %v7079_v20  ;;  %v7091_v22 = vsel %vm363_vm0, %v7081_v44, 0.0  ;;  %v7098_v2 = vsel %vm377_vm2, %v7084_v6, 0.0  ;;  %v5243_v44 = vrot.slane %v16819_v43, 4  ;;  %v18667_v6 = vld [vmem:[#allocation22_spill] sm:$0xff] }
 0x997   : > { %v7099_v26 = vadd.f32 %v7098_v2, %v7097_v53 }
 0x998   : > { %v7092_v0 = vadd.f32 %v7091_v22, %v7090_v12  ;;  %v5244_v49 = vadd.f32 %v5243_v44, %v16819_v43 }
 0x99a   : > { %7093 = vadd.xlane.f32.xlu0 %v7092_v0  ;;  %v5845_v0 = vrot.slane %v5826_v25, %v18667_v6  ;;  %v5245_v2 = vrot.slane %v5244_v49, 2 }
 0x99c   : > { %v5246_v9 = vadd.f32 %v5245_v2, %v5244_v49 }
 0x99e   : > { %7100 = vadd.xlane.f32.xlu0 %v7099_v26 }
 0x9d3   : > { %v5537_v20 = vpop.f32.mrb[114].mxu1 }
 0x9d4   : > { %v12692_v19 = vpop.f32.mrb[115].mxu1  ;;  %v5551_v4 = vsel %vm1333_vm14, %v5537_v20, 0.0  ;;  %v6012_v20 = vrot.slane %v16931_v15, %v18667_v6  ;;  %v5247_v6 = vrot.slane %v5246_v9, 1 }
 0x9d5   : > { %v5846_v19 = vmul.f32 %v5845_v0, %v5807_v48 }
 0x9d7   : > { %v5542_v63 = vpop.f32.mrb[116].mxu1 }
 0x9d8   : > { %v5552_v60 = vsel %vm1333_vm14, %v5542_v63, 0.0  ;;  %v12695_v22 = vpop.f32.mrb[117].mxu1 }
 0x9d9   : > { %v5553_v12 = vadd.f32 %v5552_v60, %v5551_v4  ;;  %v5808_v4 = vmul.f32 %v16680_v57, %v16855_v21  ;;  %v11055_v60 = vclamps-f32 %v5846_v19, 1.0 }
 0x9db   : > { %v5547_v23 = vpop.f32.mrb[118].mxu1  ;;  %v5847_v3 = vmul.f32 %v5845_v0, %v5808_v4  ;;  %v5248_v4 = vadd.f32 %v5247_v6, %v5246_v9 }
 0x9dc   : > { %v5554_v55 = vsel %vm1337_vm15, %v5547_v23, 0.0  ;;  %v12698_v53 = vpop.f32.mrb[119].mxu1 }
 0x9dd   : > { %v5555_v26 = vadd.f32 %v5554_v55, %v5553_v12  ;;  %v5809_v12 = vmul.f32 %v16688_v16, %v16865_v10  ;;  %v11056_v2 = vclamps-f32 %v5847_v3, 1.0 }
 0x9df   : > { %v5556_v63 = vrot.slane %v5555_v26, 4  ;;  %v5945_v22 = vpop.f32.mrb[120].mxu1 }
 0x9e0   : > { %v5974_v43 = vmul.f32 %v16807_v59, %v5945_v22  ;;  %v12722_v24 = vpop.f32.mrb[121].mxu1 }
 0x9e1   : > { %v5557_v25 = vadd.f32 %v5556_v63, %v5555_v26  ;;  %v5848_v26 = vmul.f32 %v5845_v0, %v5809_v12  ;;  %v14518_v0 = vld [vmem:[%s18366_s6] sm:$0x1] }
 0x9e2   : > { %v6013_v44 = vmul.f32 %v6012_v20, %v5974_v43 }
 0x9e3   : > { %v5558_v23 = vrot.slane %v5557_v25, 2  ;;  %v5950_v53 = vpop.f32.mrb[122].mxu1  ;;  %v11057_v24 = vclamps-f32 %v5848_v26, 1.0 }
 0x9e4   : > { %v11064_v15 = vclamps-f32 %v6013_v44, 1.0  ;;  %v5975_v48 = vmul.f32 %v16810_v58, %v5950_v53  ;;  %v12725_v55 = vpop.f32.mrb[123].mxu1 }
 0x9e5   : > { %v5559_v52 = vadd.f32 %v5558_v23, %v5557_v25 }
 0x9e6   : > { %v17014_v57 = vsub.f32 %v11055_v60, %v11064_v15  ;;  %v6014_v59 = vmul.f32 %v6012_v20, %v5975_v48 }
 0x9e7   : > { %v5560_v21 = vrot.slane %v5559_v52, 1  ;;  %v5955_v49 = vpop.f32.mrb[124].mxu1 }
 0x9e8   : > { %v11065_v19 = vclamps-f32 %v6014_v59, 1.0  ;;  %v5976_v63 = vmul.f32 %v16813_v62, %v5955_v49  ;;  %v12728_v22 = vpop.f32.mrb[125].mxu1  ;;  %v6547_v25 = vsel %vm1346_vm11, %v17014_v57, 0.0 }
 0x9e9   : > { %v5561_v16 = vadd.f32 %v5560_v21, %v5559_v52 }
 0x9ea   : > { %v17017_v10 = vsub.f32 %v11056_v2, %v11065_v19  ;;  %v6015_v58 = vmul.f32 %v6012_v20, %v5976_v63 }
 0x9eb   : > { %v5562_v43 = vadd.f32 %v5561_v16, %v5248_v4 }
 0x9ec   : > { %v6548_v44 = vsel %vm1346_vm11, %v17017_v10, 0.0  ;;  %v11066_v3 = vclamps-f32 %v6015_v58, 1.0 }
 0x9ed   : > { %v5563_v62 = vadd.f32 %v14518_v0, %v5562_v43  ;;  %v6549_v60 = vadd.f32 %v6548_v44, %v6547_v25 }
 0x9ee   : > { %v17026_v6 = vsub.f32 %v11057_v24, %v11066_v3 }
 0x9ef   : > { %11036 = vst.msk [vmem:[%s15636_s25 + $0x3] sm:$0x1] %vm1670_vm9, %v5563_v62 }
 0x9f0   : > { %v6550_v52 = vsel %vm1350_vm12, %v17026_v6, 0.0 }
 0x9f1   : > { %v6551_v20 = vadd.f32 %v6550_v52, %v6549_v60 }
 0x9f3   : > { %v6552_v9 = vrot.slane %v6551_v20, 4 }
 0x9f5   : > { %v6553_v23 = vadd.f32 %v6552_v9, %v6551_v20 }
 0x9f7   : > { %v6554_v53 = vrot.slane %v6553_v23, 2 }
 0x9f9   : > { %v6555_v12 = vadd.f32 %v6554_v53, %v6553_v23 }
 0x9fb   : > { %v6556_v15 = vrot.slane %v6555_v12, 1 }
 0x9fd   : > { %v6557_v48 = vadd.f32 %v6556_v15, %v6555_v12 }
 0x9ff   : > { %v6558_v55 = vmul.f32 %v6557_v48, %v17014_v57  ;;  %v6559_v59 = vmul.f32 %v6557_v48, %v17017_v10  ;;  %v6560_v21 = vmul.f32 %v6557_v48, %v17026_v6  ;;  %v11803_v49 = vpop.f32.mrb[126].mxu1 }
 0xa00   : > { %v11804_v2 = vpop.f32.mrb[127].mxu1 }
 0xa01   : > { %v6561_v26 = vmul.f32 0.31622776, %v6558_v55  ;;  %v6562_v19 = vmul.f32 0.31622776, %v6559_v59  ;;  %v6563_v63 = vmul.f32 0.31622776, %v6560_v21  ;;  %v11805_v22 = vadd.f32 %v11804_v2, %v11803_v49 }
 0xa03   : > { %14249 = vtanh.f32 %v6561_v26  ;;  %v6259_v4 = vadd.f32 %v11805_v22, %v16919_v32  ;;  %v11806_v16 = vpop.f32.mrb[128].mxu1 }
 0xa04   : > { %14251 = vtanh.f32 %v6562_v19  ;;  %v11807_v58 = vpop.f32.mrb[129].mxu1 }
 0xa05   : > { %14253 = vtanh.f32 %v6563_v63  ;;  %v11808_v43 = vadd.f32 %v11807_v58, %v11806_v16  ;;  %v17066_v16 = vld [vmem:[%s18363_s3 + $0x10] sm:$0xf]  ;;  %v13586_v58 = vpack.c.bf16 %v16958_v1, %v16949_v18 }
 0xa07   : > { %v6264_v24 = vadd.f32 %v11808_v43, %v16921_v28  ;;  %v11809_v25 = vpop.f32.mrb[130].mxu1  ;;  %v13589_v43 = vpack.c.bf16 %v16964_v33, %v16955_v5 }
 0xa08   : > { %v11810_v44 = vpop.f32.mrb[131].mxu1 }
 0xa09   : > { %v11811_v3 = vadd.f32 %v11810_v44, %v11809_v25 }
 0xa0b   : > { %v6269_v0 = vadd.f32 %v11811_v3, %v16923_v47  ;;  %v6427_v62 = vpop.f32.mrb[132].mxu1 }
 0xa0c   : > { %v6428_v60 = vadd.f32 %v16925_v36, %v6427_v62  ;;  %v12744_v52 = vpop.f32.mrb[133].mxu1 }
 0xa0d   : > { %v14250_v20 = vpop.eup %14249 }
 0xa0e   : > { %v14252_v9 = vpop.eup %14251  ;;  %v6567_v23 = vmul.f32 1.442695, %v14250_v20  ;;  %14255 = vrcp.f32 %v6428_v60  ;;  %v18671_v60 = vld [vmem:[#allocation24_spill] sm:$0xff] }
 0xa0f   : > { %v14254_v32 = vpop.eup %14253  ;;  %v6432_v53 = vpop.f32.mrb[134].mxu1  ;;  %v6569_v12 = vmul.f32 1.442695, %v14252_v9  ;;  %v7341_v52 = vrot.slane %v18671_v60, 4 }
 0xa10   : > { %14257 = vpow2.f32 %v6567_v23  ;;  %v6571_v15 = vmul.f32 1.442695, %v14254_v32  ;;  %v6433_v28 = vadd.f32 %v16927_v42, %v6432_v53  ;;  %v12747_v48 = vpop.f32.mrb[135].mxu1 }
 0xa11   : > { %14259 = vpow2.f32 %v6569_v12  ;;  %v7342_v20 = vadd.f32 %v7341_v52, %v18671_v60 }
 0xa12   : > { %14261 = vpow2.f32 %v6571_v15  ;;  %v7331_v15 = vadd.f32 %v16825_v29, %v16767_v41 }
 0xa13   : > { %14263 = vrcp.f32 %v6433_v28  ;;  %v6437_v47 = vpop.f32.mrb[136].mxu1  ;;  %v7343_v9 = vrot.slane %v7342_v20, 2 }
 0xa14   : > { %v6438_v55 = vadd.f32 %v16929_v17, %v6437_v47  ;;  %v12750_v36 = vpop.f32.mrb[137].mxu1  ;;  %v7323_v47 = vadd.f32 %v16822_v51, %v16764_v46 }
 0xa15   : > { %v7344_v23 = vadd.f32 %v7343_v9, %v7342_v20 }
 0xa16   : > { %14265 = vrcp.f32 %v6438_v55  ;;  %v18672_v55 = vld [vmem:[#allocation27_spill] sm:$0xff] }
 0xa17   : > { %v7345_v32 = vrot.slane %v7344_v23, 1  ;;  %v7332_v36 = vadd.f32 %v7331_v15, %v18672_v55 }
 0xa18   : > { %v14256_v59 = vpop.eup %14255 }
 0xa19   : > { %v6442_v21 = vmul.f32 %v14256_v59, %v6259_v4  ;;  %v7346_v12 = vadd.f32 %v7345_v32, %v7344_v23  ;;  %v18676_v23 = vld [vmem:[#allocation5_spill] sm:$0xff]  ;;  %v18677_v32 = vld [vmem:[#allocation6_spill] sm:$0xff] }
 0xa1a   : > { %v14258_v49 = vpop.eup %14257 }
 0xa1b   : > { %v14260_v2 = vpop.eup %14259  ;;  %12760 = vmatmul.mubr.msk.f32.vlgmr.msra.gmra.mrb[138].mxu1 %vm18668_vm13, %v6442_v21  ;;  %v6573_v26 = vmul.f32 %v14258_v49, %v17014_v57  ;;  %v14519_v57 = vld [vmem:[%s18365_s5] sm:$0x3]  ;;  %v7349_v28 = vmul.f32 %v16770_v37, %v7346_v12  ;;  %v18673_v21 = vld [vmem:[#allocation28_spill] sm:$0xff] }
 0xa1c   : > { %v14262_v19 = vpop.eup %14261  ;;  %13583 = vmatpush3.bf16.msra.mxu1 %v18574_v31  ;;  %12762 = vmatprep.mubr.msk.f32.mxu1 %vm14557_vm5, %v18551_v8  ;;  %v6574_v42 = vmul.f32 %v14260_v2, %v17017_v10  ;;  %v13584_v10 = vpack.c.bf16 %v16961_v54, %v16952_v38 }
 0xa1d   : > { %v14264_v63 = vpop.eup %14263  ;;  %12775 = vmatmul.mubr.msk.f32.vlgmr.msra.gmra.mrb[138].mxu0 %vm1346_vm11, %v6573_v26  ;;  %12787 = vmatprep.subr.mxu1 %v18551_v8  ;;  %v6575_v17 = vmul.f32 %v14262_v19, %v17026_v6  ;;  %v7358_v59 = vmul.f32 0.31622776, %v7349_v28  ;;  %v18679_v28 = vld [vmem:[#allocation8_spill] sm:$0xff] }
 0xa1e   : > { %v6444_v22 = vmul.f32 %v14264_v63, %v6264_v24  ;;  %12777 = vmatprep.mubr.msk.f32.mxu0 %vm14557_vm5, %v18551_v8  ;;  %12799 = vmatpush3.msk.msra.mxu0 %vm18669_vm8, %v14519_v57  ;;  %vm18670_vm8 = vmmov %vm18668_vm13 }
 0xa1f   : > { %13592 = vmatprep.subr.bf16.mxu0 %v18552_v39 }
 0xa20   : > { %v14266_v4 = vpop.eup %14265  ;;  %12763 = vmatmul.mubr.msk.f32.gmra.mrb[140].mxu1 %vm18668_vm13, %v6444_v22  ;;  %vm18693_vm13 = vcmask 15360  }
 0xa21   : > { %12765 = vmatprep.mubr.msk.f32.mxu1 %vm14557_vm5, %v18551_v8  ;;  %12778 = vmatmul.mubr.msk.f32.gmra.mrb[140].mxu0 %vm1346_vm11, %v6574_v42  ;;  %v6446_v6 = vmul.f32 %v14266_v4, %v6269_v0  ;;  %v7352_v4 = vmul.f32 %v16777_v34, %v7346_v12 }
 0xa22   : > { %12788 = vmatpush3.msk.msra.mxu1 %vm373_vm1, %v17066_v16  ;;  %12780 = vmatprep.mubr.msk.f32.mxu0 %vm14557_vm5, %v18551_v8 }
 0xa23   : > { %13585 = vmatprep.subr.bf16.mxu1 %v13584_v10 }
 0xa24   : > { %12766 = vmatmul.mubr.msk.f32.gmra.mrb[142].mxu1 %vm18670_vm8, %v6446_v6  ;;  %vm18695_vm8 = vmmov %vm18693_vm13 }
 0xa25   : > { %12781 = vmatmul.mubr.msk.f32.gmra.mrb[142].mxu0 %vm1346_vm11, %v6575_v17  ;;  %12789 = vmatprep.mubr.msk.f32.mxu1 %vm14557_vm5, %v18551_v8 }
 0xa26   : > { %12800 = vmatprep.mubr.msk.f32.mxu0 %vm14557_vm5, %v18551_v8 }
 0xa28   : > { %12790 = vmatmul.mubr.msk.f32.vlgmr.msra.gmra.mrb[144].mxu1 %vm1346_vm11, %v14258_v49  ;;  %v7324_v49 = vadd.f32 %v7323_v47, %v18673_v21  ;;  %v18680_v47 = vld [vmem:[#allocation9_spill] sm:$0xff] }
 0xa29   : > { %12792 = vmatprep.mubr.msk.f32.mxu1 %vm14557_vm5, %v18551_v8  ;;  %13587 = vmatpush1.bf16.xpose.msra.mxu1 %v13586_v58 }
 0xa2a   : > { %6920 = vmatprep.subr.mxu1 %v16982_v27  ;;  %v7325_v26 = vrot.slane %v7324_v49, 4 }
 0xa2c   : > { %12793 = vmatmul.mubr.msk.f32.gmra.mrb[146].mxu1 %vm1346_vm11, %v14260_v2  ;;  %v7333_v2 = vrot.slane %v7332_v36, 4  ;;  %v7326_v42 = vadd.f32 %v7325_v26, %v7324_v49  ;;  %v18682_v26 = vld [vmem:[#allocation11_spill] sm:$0xff] }
 0xa2d   : > { %12795 = vmatprep.mubr.msk.f32.mxu1 %vm14557_vm5, %v18551_v8 }
 0xa2e   : > { %v7327_v22 = vrot.slane %v7326_v42, 2 }
 0xa30   : > { %12796 = vmatmul.mubr.msk.f32.gmra.mrb[148].mxu1 %vm1346_vm11, %v14262_v19  ;;  %v7334_v19 = vadd.f32 %v7333_v2, %v7332_v36  ;;  %v7328_v6 = vadd.f32 %v7327_v22, %v7326_v42  ;;  %v18683_v42 = vld [vmem:[#allocation12_spill] sm:$0xff] }
 0xa31   : > { %6921 = vmatpush1.xpose.msra.mxu1 %v16979_v7  ;;  %6980 = vmatprep.mubr.f32.mxu1 %v16952_v38  ;;  %v7158_v38 = vpop.xlane.xlu0 %7157 }
 0xa32   : > { %13588 = vmatprep.subr.bf16.mxu1 %v18552_v39  ;;  %v7163_v24 = vmul.f32 0.0625, %v7158_v38  ;;  %v7335_v63 = vrot.slane %v7334_v19, 2  ;;  %v7329_v38 = vrot.slane %v7328_v6, 1 }
 0xa34   : > { %6981 = vmatmul.mubr.f32.vlgmr.msra.gmra.mrb[150].mxu1 %v16949_v18  ;;  %v7155_v18 = vpop.xlane.xlu1 %7154  ;;  %v7336_v57 = vadd.f32 %v7335_v63, %v7334_v19 }
 0xa35   : > { %13591 = vmatpush3.bf16.xpose.msk.msra.mxu1 %vm14789_vm7, %v13589_v43  ;;  %6985 = vmatprep.mubr.f32.mxu1 %v16961_v54  ;;  %v7162_v54 = vmul.f32 0.0625, %v7155_v18  ;;  %v7089_v3 = vpop.xlane.xlu0 %7088  ;;  %v7355_v43 = vmul.f32 %v16791_v35, %v7346_v12  ;;  %v7361_v18 = vmul.f32 0.31622776, %v7352_v4  ;;  %v18678_v12 = vld [vmem:[#allocation7_spill] sm:$0xff] }
 0xa36   : > { %12813 = vmatprep.subr.mxu1 %v18551_v8  ;;  %14267 = vrsqrt.f32 %v7089_v3  ;;  %v7337_v58 = vrot.slane %v7336_v57, 1 }
 0xa38   : > { %6986 = vmatmul.mubr.f32.gmra.mrb[152].mxu1 %v16958_v1  ;;  %v17116_v1 = vsub.f32 %v16937_v56, %v7163_v24  ;;  %v7364_v24 = vmul.f32 0.31622776, %v7355_v43 }
 0xa39   : > { %6990 = vmatprep.mubr.f32.mxu1 %v16982_v27  ;;  %v17113_v27 = vsub.f32 %v16934_v61, %v7162_v54  ;;  %v7094_v62 = vpop.xlane.xlu0 %7093  ;;  %v7338_v54 = vadd.f32 %v7337_v58, %v7336_v57  ;;  %v18684_v57 = vld [vmem:[#allocation13_spill] sm:$0xff]  ;;  %v18685_v58 = vld [vmem:[#allocation14_spill] sm:$0xff] }
 0xa3a   : > { %v7258_v44 = vmul.f32 %v17116_v1, %v17116_v1  ;;  %14269 = vrsqrt.f32 %v7094_v62 }
 0xa3c   : > { %6991 = vmatmul.mubr.f32.gmra.mrb[154].mxu1 %v16979_v7  ;;  %v7161_v7 = vpop.xlane.xlu1 %7160  ;;  %v7263_v56 = vsel %vm641_vm3, %v7258_v44, 0.0 }
 0xa3d   : > { %12814 = vmatpush3.xpose.msk.msra.mxu1 %vm363_vm0, %v16985_v11  ;;  %12815 = vmatprep.mubr.msk.f32.mxu1 %vm14557_vm5, %v18551_v8  ;;  %v7164_v25 = vmul.f32 0.0625, %v7161_v7  ;;  %v7101_v53 = vpop.xlane.xlu0 %7100  ;;  %v7330_v7 = vadd.f32 %v7329_v38, %v7328_v6 }
 0xa3e   : > { %12839 = vmatprep.subr.mxu1 %v18551_v8  ;;  %14271 = vrsqrt.f32 %v7101_v53 }
 0xa3f   : > { %v17129_v61 = vsub.f32 %v16940_v13, %v7164_v25  ;;  %14273 = vtanh.f32 %v7358_v59  ;;  %v7347_v44 = vmul.f32 %v16764_v46, %v7330_v7  ;;  %v7350_v3 = vmul.f32 %v16822_v51, %v7330_v7  ;;  %v18674_v46 = vld [vmem:[#allocation4_spill] sm:$0xff]  ;;  %v18681_v59 = vld [vmem:[#allocation10_spill] sm:$0xff] }
 0xa40   : > { %12816 = vmatmul.mubr.msk.f32.vlgmr.msra.gmra.mrb[150].mxu1 %vm363_vm0, %v16955_v5  ;;  %v7257_v5 = vmul.f32 %v17113_v27, %v17113_v27  ;;  %v17139_v13 = vpop.eup %14267 }
 0xa41   : > { %12818 = vmatprep.mubr.msk.f32.mxu1 %vm14557_vm5, %v18551_v8  ;;  %12840 = vmatpush3.msk.msra.mxu1 %vm373_vm1, %v16890_v45 }
 0xa42   : > { %13629 = vmatprep.subr.bf16.mxu1 %v14793_v30  ;;  %v7260_v45 = vsel %vm641_vm3, %v7257_v5, 0.0  ;;  %7108 = vxpose.xlu0.b32.start [1/3] (short) (narrow) %v17139_v13, 8  ;;  %v7348_v5 = vmul.f32 %v16767_v41, %v7338_v54  ;;  %v7354_v41 = vmul.f32 %v16787_v14, %v7338_v54 }
 0xa43   : > { %7261 = vadd.xlane.f32.xlu1 %v7260_v45 }
 0xa44   : > { %12819 = vmatmul.mubr.msk.f32.gmra.mrb[152].mxu1 %vm363_vm0, %v16964_v33  ;;  %v7259_v33 = vmul.f32 %v17129_v61, %v17129_v61  ;;  %v7357_v45 = vmul.f32 0.31622776, %v7348_v5  ;;  %v7363_v9 = vmul.f32 0.31622776, %v7354_v41  ;;  %v17239_v41 = vld [vmem:[%s14615_s8 + $0x1d8] sm:$0xff] }
 0xa45   : > { %12821 = vmatprep.mubr.msk.f32.mxu1 %vm14557_vm5, %v18551_v8 }
 0xa46   : > { %v7266_v0 = vsel %vm648_vm4, %v7259_v33, 0.0 }
 0xa47   : > { %7264 = vadd.xlane.f32.xlu1 %v7263_v56  ;;  %v7351_v56 = vmul.f32 %v16825_v29, %v7338_v54  ;;  %v18675_v29 = vld [vmem:[#allocation29_spill] sm:$0xff] }
 0xa48   : > { %12822 = vmatmul.mubr.msk.f32.gmra.mrb[154].mxu1 %vm363_vm0, %v16985_v11  ;;  %v17142_v11 = vpop.eup %14269  ;;  %v7353_v52 = vmul.f32 %v18675_v29, %v7330_v7  ;;  %v18688_v7 = vld [vmem:[#allocation17_spill] sm:$0xff]  ;;  %v17246_v29 = vld [vmem:[%s14615_s8 + $0x1e0] sm:$0xf] }
 0xa49   : > { %12841 = vmatprep.mubr.msk.f32.mxu1 %vm14557_vm5, %v18551_v8  ;;  %7109 = vxpose.xlu0.b32.cont [2/3] (short) (narrow) %v17142_v11, 8  ;;  %v17150_v48 = vpop.eup %14271  ;;  %v7360_v60 = vmul.f32 0.31622776, %v7351_v56  ;;  %18689 = vst [vmem:[#allocation26_spill] sm:$0xff] %v17246_v29 }
 0xa4a   : > { %v14274_v17 = vpop.eup %14273  ;;  %v7362_v14 = vmul.f32 0.31622776, %v7353_v52  ;;  %v17249_v52 = vld [vmem:[%s14615_s8 + $0x1e8] sm:$0xf] }
 0xa4b   : > { %7267 = vadd.xlane.f32.xlu1 %v7266_v0  ;;  %v7378_v10 = vmul.f32 1.442695, %v14274_v17  ;;  %v7356_v0 = vmul.f32 0.31622776, %v7347_v44 }
 0xa4d   : > { %7110 = vxpose.xlu0.b32.end [3/3] (short) (narrow) %v17150_v48, 8  ;;  %14275 = vpow2.f32 %v7378_v10 }
 0xa4e   : > { %14277 = vtanh.f32 %v7361_v18  ;;  %v18686_v18 = vld [vmem:[#allocation15_spill] sm:$0xff] }
 0xa4f   : > { %14279 = vtanh.f32 %v7364_v24 }
 0xa50   : > { %14281 = vtanh.f32 %v7357_v45 }
 0xa51   : > { %14283 = vtanh.f32 %v7356_v0  ;;  %v17232_v0 = vld [vmem:[%s14615_s8 + $0x1c0] sm:$0xff] }
 0xa52   : > { %14285 = vtanh.f32 %v7360_v60  ;;  %v17243_v60 = vsel %vm363_vm0, %v17239_v41, 0.0 }
 0xa57   : > { %v17160_v25 = vpop.eup %14275 }
 0xa58   : > { %v7394_v33 = vmul.f32 %v17160_v25, %v16770_v37  ;;  %v14278_v62 = vpop.eup %14277  ;;  %v7359_v37 = vmul.f32 0.31622776, %v7350_v3  ;;  %v17229_v3 = vld [vmem:[%s14615_s8 + $0x1b8] sm:$0xff] }
 0xa59   : > { %v7384_v51 = vmul.f32 1.442695, %v14278_v62  ;;  %v14280_v20 = vpop.eup %14279 }
 0xa5a   : > { %12842 = vmatmul.mubr.msk.f32.vlgmr.msra.gmra.mrb[156].mxu1 %vm363_vm0, %v7394_v33  ;;  %14287 = vtanh.f32 %v7359_v37  ;;  %v7390_v53 = vmul.f32 1.442695, %v14280_v20  ;;  %v14282_v15 = vpop.eup %14281  ;;  %v17226_v33 = vld [vmem:[%s14615_s8 + $0x1b0] sm:$0xff] }
 0xa5b   : > { %13631 = vmatpush3.bf16.msra.mxu1 %v14817_v40  ;;  %12844 = vmatprep.mubr.msk.f32.mxu1 %vm14557_vm5, %v18551_v8  ;;  %14289 = vpow2.f32 %v7384_v51  ;;  %v7376_v55 = vmul.f32 1.442695, %v14282_v15  ;;  %v14284_v36 = vpop.eup %14283  ;;  %v8176_v62 = vadd.f32 %v17229_v3, %v17226_v33  ;;  %v17253_v20 = vld [vmem:[%s14615_s8 + $0x1f0] sm:$0xf] }
 0xa5c   : > { %13633 = vmatprep.subr.bf16.mxu1 %v18674_v46  ;;  %14291 = vtanh.f32 %v7363_v9  ;;  %v14286_v21 = vpop.eup %14285  ;;  %v7374_v2 = vmul.f32 1.442695, %v14284_v36  ;;  %v17257_v9 = vsel %vm373_vm1, %v17246_v29, 0.0  ;;  %v8189_v15 = vsel %vm377_vm2, %v17253_v20, 0.0 }
 0xa5d   : > { %14293 = vtanh.f32 %v7362_v14  ;;  %v7382_v63 = vmul.f32 1.442695, %v14286_v21  ;;  %18690 = vst [vmem:[#allocation25_spill] sm:$0xff] %v17257_v9  ;;  %v17261_v14 = vsel %vm373_vm1, %v17249_v52, 0.0 }
 0xa5e   : > { %14295 = vpow2.f32 %v7390_v53  ;;  %18691 = vst [vmem:[#allocation3_spill] sm:$0xff] %v17261_v14  ;;  %v8188_v53 = vadd.f32 %v17261_v14, %v17257_v9 }
 0xa5f   : > { %13635 = vmatpush3.bf16.msra.mxu1 %v18676_v23  ;;  %14297 = vpow2.f32 %v7376_v55 }
 0xa60   : > { %13637 = vmatprep.subr.bf16.mxu1 %v18677_v32  ;;  %14299 = vpow2.f32 %v7374_v2  ;;  %v8190_v36 = vadd.f32 %v8189_v15, %v8188_v53 }
 0xa61   : > { %14301 = vpow2.f32 %v7382_v63 }
 0xa63   : > { %13639 = vmatpush3.bf16.msra.mxu1 %v18678_v12 }
 0xa64   : > { %13641 = vmatprep.subr.bf16.mxu1 %v18679_v28  ;;  %v14288_v49 = vpop.eup %14287 }
 0xa65   : > { %v17181_v19 = vpop.eup %14289  ;;  %v7380_v4 = vmul.f32 1.442695, %v14288_v49 }
 0xa66   : > { %v14292_v17 = vpop.eup %14291  ;;  %v7397_v10 = vmul.f32 %v17181_v19, %v16777_v34  ;;  %v18687_v34 = vld [vmem:[#allocation16_spill] sm:$0xff] }
 0xa67   : > { %13643 = vmatpush3.bf16.msra.mxu1 %v18680_v47  ;;  %v14294_v22 = vpop.eup %14293  ;;  %v7388_v43 = vmul.f32 1.442695, %v14292_v17  ;;  %14303 = vpow2.f32 %v7380_v4 }
 0xa68   : > { %13645 = vmatprep.subr.bf16.mxu1 %v18681_v59  ;;  %v17187_v6 = vpop.eup %14295  ;;  %12845 = vmatmul.mubr.msk.f32.gmra.mrb[158].mxu1 %vm363_vm0, %v7397_v10  ;;  %v7386_v54 = vmul.f32 1.442695, %v14294_v22 }
 0xa69   : > { %12847 = vmatprep.mubr.msk.f32.mxu1 %vm14557_vm5, %v18551_v8  ;;  %v7400_v38 = vmul.f32 %v17187_v6, %v16791_v35  ;;  %14305 = vpow2.f32 %v7388_v43  ;;  %v17197_v24 = vpop.eup %14297 }
 0xa6a   : > { %14307 = vpow2.f32 %v7386_v54  ;;  %v17203_v5 = vpop.eup %14299 }
 0xa6b   : > { %13647 = vmatpush3.bf16.msra.mxu1 %v18682_v26  ;;  %v17205_v35 = vpop.eup %14301 }
 0xa6c   : > { %13649 = vmatprep.subr.bf16.mxu1 %v18683_v42  ;;  %12848 = vmatmul.mubr.msk.f32.gmra.mrb[160].mxu1 %vm363_vm0, %v7400_v38 }
 0xa6d   : > { %7643 = vmatprep.mubr.f32.mxu1 %v17197_v24 }
 0xa6f   : > { %13651 = vmatpush3.bf16.msra.mxu1 %v18684_v57 }
 0xa70   : > { %13653 = vmatprep.subr.bf16.mxu1 %v18685_v58 }
 0xa71   : > { %v17211_v44 = vpop.eup %14303 }
 0xa73   : > { %13655 = vmatpush3.bf16.msra.mxu1 %v18686_v18  ;;  %v17213_v45 = vpop.eup %14305 }
 0xa74   : > { %13657 = vmatprep.subr.bf16.mxu1 %v18687_v34  ;;  %v17220_v56 = vpop.eup %14307 }
 0xa77   : > { %13659 = vmatpush3.bf16.msra.mxu1 %v18688_v7 }
 0xa78   : > { %13667 = vmatprep.subr.bf16.mxu1 %v18552_v39 }
 0xa7a   : > { %7644 = vmatmul.mubr.f32.vlgmr.msra.gmra.mrb[162].mxu1 %v17203_v5 }
 0xa7b   : > { %7648 = vmatprep.mubr.f32.mxu1 %v17205_v35  ;;  %13669 = vmatpush3.bf16.msra.mxu1 %v18574_v31 }
 0xa7c   : > { %12882 = vmatprep.subr.mxu1 %v18551_v8 }
 0xa7e   : > { %7649 = vmatmul.mubr.f32.gmra.mrb[164].mxu1 %v17211_v44 }
 0xa7f   : > { %7653 = vmatprep.mubr.f32.mxu1 %v17213_v45  ;;  %12883 = vmatpush3.msk.msra.mxu1 %vm373_vm1, %v17066_v16  ;;  %v8177_v16 = vsel %vm363_vm0, %v17232_v0, 0.0 }
 0xa80   : > { %12908 = vmatprep.subr.mxu1 %v18551_v8  ;;  %v8178_v37 = vadd.f32 %v8177_v16, %v8176_v62  ;;  %v8637_v51 = vadd.f32 %v17243_v60, %v8177_v16 }
 0xa82   : > { %7654 = vmatmul.mubr.f32.gmra.mrb[166].mxu1 %v17220_v56  ;;  %8179 = vadd.xlane.f32.xlu0 %v8178_v37  ;;  %v17267_v55 = vadd.f32 %v8637_v51, %v8189_v15 }
 0xa83   : > { %12884 = vmatprep.mubr.msk.f32.mxu1 %vm14557_vm5, %v18551_v8 }
 0xa84   : > { %18692 = vst [vmem:[#allocation23_spill] sm:$0xff] %v17267_v55 }
 0xa86   : > { %8191 = vadd.xlane.f32.xlu0 %v8190_v36 }
 0xad0   : > { %v7262_v21 = vpop.xlane.xlu1 %7261 }
 0xad1   : > { %14309 = vrsqrt.f32 %v7262_v21 }
 0xad4   : > { %v7265_v49 = vpop.xlane.xlu1 %7264 }
 0xad5   : > { %14311 = vrsqrt.f32 %v7265_v49 }
 0xad8   : > { %v7268_v2 = vpop.xlane.xlu1 %7267 }
 0xad9   : > { %14313 = vrsqrt.f32 %v7268_v2 }
 0xadb   : > { %v17269_v63 = vpop.eup %14309 }
 0xadc   : > { %7275 = vxpose.xlu1.b32.start [1/3] (short) (narrow) %v17269_v63, 8 }
 0xadf   : > { %v17272_v17 = vpop.eup %14311 }
 0xae0   : > { %7276 = vxpose.xlu1.b32.cont [2/3] (short) (narrow) %v17272_v17, 8 }
 0xae3   : > { %v17275_v22 = vpop.eup %14313 }
 0xae4   : > { %7277 = vxpose.xlu1.b32.end [3/3] (short) (narrow) %v17275_v22, 8 }
 0xaee   : > { %v6522_v10 = vpop.f32.mrb[138].mxu1 }
 0xaef   : > { %v12761_v4 = vpop.f32.mrb[139].mxu1  ;;  %v6536_v62 = vsel %vm1333_vm14, %v6522_v10, 0.0 }
 0xaf0   : > { %v6651_v43 = vpop.f32.mrb[138].mxu0 }
 0xaf1   : > { %v12776_v38 = vpop.f32.mrb[139].mxu0 }
 0xaf3   : > { %v6527_v54 = vpop.f32.mrb[140].mxu1 }
 0xaf4   : > { %v6537_v16 = vsel %vm1333_vm14, %v6527_v54, 0.0  ;;  %v12764_v37 = vpop.f32.mrb[141].mxu1  ;;  %v6656_v51 = vpop.f32.mrb[140].mxu0 }
 0xaf5   : > { %v6538_v53 = vadd.f32 %v6537_v16, %v6536_v62  ;;  %v12779_v15 = vpop.f32.mrb[141].mxu0  ;;  %v17284_v16 = vld [vmem:[%s14615_s8 + $0x1c8] sm:$0xff] }
 0xaf6   : > { %v17287_v15 = vld [vmem:[%s14615_s8 + $0x1d0] sm:$0xff] }
 0xaf7   : > { %v6532_v36 = vpop.f32.mrb[142].mxu1 }
 0xaf8   : > { %v6539_v21 = vsel %vm1337_vm15, %v6532_v36, 0.0  ;;  %v12767_v49 = vpop.f32.mrb[143].mxu1  ;;  %v6661_v2 = vpop.f32.mrb[142].mxu0 }
 0xaf9   : > { %v17281_v9 = vadd.f32 %v6539_v21, %v6538_v53  ;;  %v12782_v4 = vpop.f32.mrb[143].mxu0  ;;  %v8181_v53 = vadd.f32 %v17287_v15, %v17284_v16  ;;  %v13593_v21 = vpack.c.bf16 %v17116_v1, %v17113_v27 }
 0xafb   : > { %v6740_v38 = vpop.f32.mrb[144].mxu1 }
 0xafc   : > { %14315 = vrcp.f32 %v6740_v38  ;;  %v12791_v14 = vpop.f32.mrb[145].mxu1 }
 0xaff   : > { %v6745_v10 = vpop.f32.mrb[146].mxu1 }
 0xb00   : > { %14317 = vrcp.f32 %v6745_v10  ;;  %v12794_v54 = vpop.f32.mrb[147].mxu1 }
 0xb01   : > { %v14521_v54 = vld [vmem:[%s14615_s8 + $0x170] sm:$0xff] }
 0xb03   : > { %v6750_v37 = vpop.f32.mrb[148].mxu1 }
 0xb04   : > { %14319 = vrcp.f32 %v6750_v37  ;;  %v12797_v62 = vpop.f32.mrb[149].mxu1 }
 0xb06   : > { %v14316_v55 = vpop.eup %14315 }
 0xb07   : > { %v6755_v36 = vmul.f32 %v14316_v55, %v6651_v43  ;;  %v8183_v55 = vadd.f32 %v17243_v60, %v8181_v53  ;;  %v14524_v53 = vld [vmem:[%s14615_s8 + $0x180] sm:$0xff] }
 0xb09   : > { %12801 = vmatmul.mubr.msk.f32.vlgmr.msra.gmra.mrb[144].mxu0 %vm18693_vm13, %v6755_v36  ;;  %vm18696_vm13 = vmmov %vm18695_vm8 }
 0xb0a   : > { %v14318_v14 = vpop.eup %14317  ;;  %13595 = vmatpush3.bf16.xpose.msk.msra.mxu0 %vm14747_vm6, %v13593_v21  ;;  %12803 = vmatprep.mubr.msk.f32.mxu0 %vm14557_vm5, %v18551_v8  ;;  %v7395_v21 = vmul.f32 %v14524_v53, %v17211_v44  ;;  %v18697_v44 = vld [vmem:[#allocation18_spill] sm:$0xff] }
 0xb0b   : > { %v6757_v4 = vmul.f32 %v14318_v14, %v6656_v51  ;;  %12828 = vmatprep.subr.mxu0 %v18551_v8  ;;  %8184 = vadd.xlane.f32.xlu1 %v8183_v55  ;;  %v17352_v14 = vld [vmem:[%s18362_s2 + $0x100] sm:$0xf] }
 0xb0d   : > { %12804 = vmatmul.mubr.msk.f32.gmra.mrb[146].mxu0 %vm18695_vm8, %v6757_v4  ;;  %vm18701_vm8 = vcmask 211968  }
 0xb0e   : > { %v14320_v43 = vpop.eup %14319  ;;  %12806 = vmatprep.mubr.msk.f32.mxu0 %vm14557_vm5, %v18551_v8 }
 0xb0f   : > { %v6759_v38 = vmul.f32 %v14320_v43, %v6661_v2 }
 0xb11   : > { %12807 = vmatmul.mubr.msk.f32.gmra.mrb[148].mxu0 %vm18696_vm13, %v6759_v38  ;;  %vm18702_vm13 = vcmask 1041408  }
 0xb12   : > { %12829 = vmatpush3.xpose.msk.msra.mxu0 %vm641_vm3, %v17129_v61  ;;  %12830 = vmatprep.mubr.msk.f32.mxu0 %vm14557_vm5, %v18551_v8 }
 0xb13   : > { %13597 = vmatprep.subr.bf16.mxu0 %v14793_v30  ;;  %v17309_v60 = vpop.f32.mrb[150].mxu1 }
 0xb14   : > { %v12817_v51 = vpop.f32.mrb[151].mxu1 }
 0xb15   : > { %12831 = vmatmul.mubr.msk.f32.vlgmr.msra.gmra.mrb[150].mxu0 %vm641_vm3, %v17113_v27  ;;  %v7393_v27 = vmul.f32 %v14521_v54, %v17197_v24  ;;  %v14523_v24 = vld [vmem:[%s14615_s8 + $0x188] sm:$0xff] }
 0xb16   : > { %13599 = vmatpush3.bf16.msra.mxu0 %v14817_v40  ;;  %12833 = vmatprep.mubr.msk.f32.mxu0 %vm14557_vm5, %v18551_v8  ;;  %v7396_v36 = vmul.f32 %v14523_v24, %v17205_v35  ;;  %v14527_v35 = vld [vmem:[%s14615_s8 + $0x198] sm:$0xf] }
 0xb17   : > { %13601 = vmatprep.subr.bf16.mxu0 %v18674_v46  ;;  %v17317_v2 = vpop.f32.mrb[152].mxu1  ;;  %v7398_v55 = vmul.f32 %v14527_v35, %v17220_v56  ;;  %v17399_v35 = vld [vmem:[%s14654_s11 + $0x98] sm:$0xff] }
 0xb18   : > { %v12820_v10 = vpop.f32.mrb[153].mxu1 }
 0xb19   : > { %12834 = vmatmul.mubr.msk.f32.gmra.mrb[152].mxu0 %vm641_vm3, %v17116_v1  ;;  %v14522_v1 = vld [vmem:[%s14615_s8 + $0x168] sm:$0xff] }
 0xb1a   : > { %13603 = vmatpush3.bf16.msra.mxu0 %v18676_v23  ;;  %12836 = vmatprep.mubr.msk.f32.mxu0 %vm14557_vm5, %v18551_v8 }
 0xb1b   : > { %13605 = vmatprep.subr.bf16.mxu0 %v18677_v32  ;;  %v17327_v37 = vpop.f32.mrb[154].mxu1 }
 0xb1c   : > { %v12823_v62 = vpop.f32.mrb[155].mxu1 }
 0xb1d   : > { %12837 = vmatmul.mubr.msk.f32.gmra.mrb[154].mxu0 %vm641_vm3, %v17129_v61  ;;  %v7392_v61 = vmul.f32 %v14522_v1, %v17203_v5  ;;  %v14526_v5 = vld [vmem:[%s14615_s8 + $0x1a0] sm:$0xf] }
 0xb1e   : > { %13607 = vmatpush3.bf16.msra.mxu0 %v18678_v12  ;;  %7474 = vmatprep.mubr.f32.mxu0 %v7393_v27  ;;  %v7399_v4 = vmul.f32 %v14526_v5, %v17213_v45  ;;  %v18698_v45 = vld [vmem:[#allocation19_spill] sm:$0xff] }
 0xb1f   : > { %13609 = vmatprep.subr.bf16.mxu0 %v18679_v28 }
 0xb22   : > { %13611 = vmatpush3.bf16.msra.mxu0 %v18680_v47 }
 0xb23   : > { %13613 = vmatprep.subr.bf16.mxu0 %v18681_v59 }
 0xb26   : > { %13615 = vmatpush3.bf16.msra.mxu0 %v18682_v26 }
 0xb27   : > { %13617 = vmatprep.subr.bf16.mxu0 %v18683_v42 }
 0xb2a   : > { %13619 = vmatpush3.bf16.msra.mxu0 %v18684_v57 }
 0xb2b   : > { %13621 = vmatprep.subr.bf16.mxu0 %v18685_v58 }
 0xb2e   : > { %13623 = vmatpush3.bf16.msra.mxu0 %v18686_v18 }
 0xb2f   : > { %13625 = vmatprep.subr.bf16.mxu0 %v18687_v34 }
 0xb32   : > { %13627 = vmatpush3.bf16.msra.mxu0 %v18688_v7 }
 0xb33   : > { %12850 = vmatprep.subr.mxu0 %v18551_v8 }
 0xb35   : > { %7475 = vmatmul.mubr.f32.vlgmr.msra.gmra.mrb[156].mxu0 %v7392_v61 }
 0xb36   : > { %12851 = vmatpush3.msk.msra.mxu0 %vm373_vm1, %v17352_v14  ;;  %7479 = vmatprep.mubr.f32.mxu0 %v7396_v36 }
 0xb37   : > { %13660 = vmatprep.subr.bf16.mxu0 %v18552_v39 }
 0xb39   : > { %7480 = vmatmul.mubr.f32.gmra.mrb[158].mxu0 %v7395_v21  ;;  %v7124_v21 = vpop.trf.xlu0 }
 0xb3a   : > { %7484 = vmatprep.mubr.f32.mxu0 %v7399_v4  ;;  %v17396_v4 = vld [vmem:[%s14654_s11 + $0x90] sm:$0xff] }
 0xb3d   : > { %7485 = vmatmul.mubr.f32.gmra.mrb[160].mxu0 %v7398_v55  ;;  %v17402_v55 = vld [vmem:[%s14654_s11 + $0xa0] sm:$0xf] }
 0xb3e   : > { %12852 = vmatprep.mubr.msk.f32.mxu0 %vm14557_vm5, %v18551_v8 }
 0xb41   : > { %12853 = vmatmul.mubr.msk.f32.vlgmr.msra.gmra.mrb[162].mxu0 %vm363_vm0, %v17160_v25  ;;  %v17381_v25 = vpop.f32.mrb[156].mxu1 }
 0xb42   : > { %12855 = vmatprep.mubr.msk.f32.mxu0 %vm14557_vm5, %v18551_v8  ;;  %13662 = vmatpush3.bf16.msra.mxu0 %v18697_v44  ;;  %v12843_v43 = vpop.f32.mrb[157].mxu1 }
 0xb43   : > { %13663 = vmatprep.subr.bf16.mxu0 %v18552_v39  ;;  %v8180_v43 = vpop.xlane.xlu0 %8179 }
 0xb45   : > { %12856 = vmatmul.mubr.msk.f32.gmra.mrb[164].mxu0 %vm363_vm0, %v17181_v19  ;;  %v17383_v19 = vpop.f32.mrb[158].mxu1 }
 0xb46   : > { %12858 = vmatprep.mubr.msk.f32.mxu0 %vm14557_vm5, %v18551_v8  ;;  %13666 = vmatpush3.bf16.msk.msra.mxu0 %vm15097_vm10, %v18698_v45  ;;  %v12846_v38 = vpop.f32.mrb[159].mxu1 }
 0xb47   : > { %13670 = vmatprep.subr.bf16.mxu0 %v18552_v39  ;;  %v17385_v51 = vpop.f32.mrb[160].mxu1 }
 0xb48   : > { %v12849_v10 = vpop.f32.mrb[161].mxu1 }
 0xb49   : > { %12859 = vmatmul.mubr.msk.f32.gmra.mrb[166].mxu0 %vm363_vm0, %v17187_v6  ;;  %v8451_v10 = vsel %vm641_vm3, %v17396_v4, 0.0 }
 0xb4a   : > { %12869 = vmatprep.mubr.msk.f32.mxu0 %vm14557_vm5, %v18551_v8  ;;  %8452 = vadd.xlane.f32.xlu1 %v8451_v10  ;;  %v8192_v10 = vpop.xlane.xlu0 %8191 }
 0xb4d   : > { %v11973_v54 = vpop.f32.mrb[162].mxu1 }
 0xb4e   : > { %v11974_v27 = vpop.f32.mrb[163].mxu1 }
 0xb4f   : > { %v17387_v62 = vadd.f32 %v11974_v27, %v11973_v54  ;;  %v8454_v54 = vsel %vm641_vm3, %v17399_v35, 0.0  ;;  %v8193_v27 = vmul.f32 0.0038461538, %v8180_v43 }
 0xb50   : > { %8455 = vadd.xlane.f32.xlu0 %v8454_v54  ;;  %v8195_v54 = vmul.f32 0.0038461538, %v8192_v10 }
 0xb51   : > { %v11976_v6 = vpop.f32.mrb[164].mxu1  ;;  %v17417_v56 = vsub.f32 %v17232_v0, %v8193_v27 }
 0xb52   : > { %v11977_v1 = vpop.f32.mrb[165].mxu1  ;;  %v17441_v10 = vsub.f32 %v17246_v29, %v8195_v54  ;;  %v17444_v18 = vsub.f32 %v17249_v52, %v8195_v54  ;;  %v17447_v58 = vsub.f32 %v17253_v20, %v8195_v54 }
 0xb53   : > { %v17389_v61 = vadd.f32 %v11977_v1, %v11976_v6  ;;  %v8457_v1 = vsel %vm648_vm4, %v17402_v55, 0.0 }
 0xb54   : > { %8458 = vadd.xlane.f32.xlu1 %v8457_v1  ;;  %v8380_v47 = vmul.f32 %v17441_v10, %v17441_v10  ;;  %v8381_v28 = vmul.f32 %v17444_v18, %v17444_v18  ;;  %v8382_v12 = vmul.f32 %v17447_v58, %v17447_v58 }
 0xb55   : > { %v11979_v24 = vpop.f32.mrb[166].mxu1 }
 0xb56   : > { %v11980_v36 = vpop.f32.mrb[167].mxu1  ;;  %v8393_v54 = vsel %vm373_vm1, %v8380_v47, 0.0 }
 0xb57   : > { %v17391_v53 = vadd.f32 %v11980_v36, %v11979_v24  ;;  %v17411_v24 = vsub.f32 %v17226_v33, %v8193_v27  ;;  %v17414_v36 = vsub.f32 %v17229_v3, %v8193_v27  ;;  %v8376_v27 = vmul.f32 %v17417_v56, %v17417_v56 }
 0xb59   : > { %v8374_v44 = vmul.f32 %v17411_v24, %v17411_v24  ;;  %v8375_v49 = vmul.f32 %v17414_v36, %v17414_v36  ;;  %v8384_v1 = vsel %vm363_vm0, %v8376_v27, 0.0 }
 0xb5b   : > { %v8383_v57 = vadd.f32 %v8375_v49, %v8374_v44  ;;  %v8394_v49 = vsel %vm373_vm1, %v8381_v28, 0.0  ;;  %v7105_v28 = vmul.f32 %v17139_v13, %v17309_v60 }
 0xb5c   : > { %v17393_v5 = vpop.trf.xlu1  ;;  %v8395_v44 = vadd.f32 %v8394_v49, %v8393_v54 }
 0xb5d   : > { %v8385_v59 = vadd.f32 %v8384_v1, %v8383_v57 }
 0xb5f   : > { %8386 = vadd.xlane.f32.xlu0 %v8385_v59 }
 0xb98   : > { %v8185_v38 = vpop.xlane.xlu1 %8184 }
 0xb99   : > { %v8194_v6 = vmul.f32 0.0038461538, %v8185_v38 }
 0xb9b   : > { %v17420_v45 = vsub.f32 %v17284_v16, %v8194_v6  ;;  %v17423_v43 = vsub.f32 %v17287_v15, %v8194_v6  ;;  %v17426_v38 = vsub.f32 %v17239_v41, %v8194_v6 }
 0xb9d   : > { %v8377_v7 = vmul.f32 %v17420_v45, %v17420_v45  ;;  %v8378_v34 = vmul.f32 %v17423_v43, %v17423_v43  ;;  %v8379_v6 = vmul.f32 %v17426_v38, %v17426_v38 }
 0xb9f   : > { %v8388_v42 = vadd.f32 %v8378_v34, %v8377_v7  ;;  %v8389_v26 = vsel %vm363_vm0, %v8379_v6, 0.0  ;;  %v8396_v34 = vsel %vm377_vm2, %v8382_v12, 0.0  ;;  %v6541_v6 = vrot.slane %v17281_v9, 4  ;;  %v18700_v12 = vld [vmem:[#allocation22_spill] sm:$0xff] }
 0xba0   : > { %v8397_v57 = vadd.f32 %v8396_v34, %v8395_v44 }
 0xba1   : > { %v8390_v32 = vadd.f32 %v8389_v26, %v8388_v42  ;;  %v6542_v47 = vadd.f32 %v6541_v6, %v17281_v9 }
 0xba3   : > { %8391 = vadd.xlane.f32.xlu0 %v8390_v32  ;;  %v7143_v32 = vrot.slane %v7124_v21, %v18700_v12  ;;  %v6543_v34 = vrot.slane %v6542_v47, 2 }
 0xba5   : > { %v6544_v60 = vadd.f32 %v6543_v34, %v6542_v47 }
 0xba7   : > { %8398 = vadd.xlane.f32.xlu0 %v8397_v57 }
 0xbdc   : > { %v6835_v7 = vpop.f32.mrb[144].mxu0 }
 0xbdd   : > { %v12802_v27 = vpop.f32.mrb[145].mxu0  ;;  %v6849_v23 = vsel %vm1333_vm14, %v6835_v7, 0.0  ;;  %v7310_v7 = vrot.slane %v17393_v5, %v18700_v12  ;;  %v6545_v12 = vrot.slane %v6544_v60, 1 }
 0xbde   : > { %v7144_v27 = vmul.f32 %v7143_v32, %v7105_v28 }
 0xbe0   : > { %v6840_v1 = vpop.f32.mrb[146].mxu0 }
 0xbe1   : > { %v6850_v59 = vsel %vm1333_vm14, %v6840_v1, 0.0  ;;  %v12805_v26 = vpop.f32.mrb[147].mxu0 }
 0xbe2   : > { %v6851_v42 = vadd.f32 %v6850_v59, %v6849_v23  ;;  %v7106_v23 = vmul.f32 %v17142_v11, %v17317_v2  ;;  %v11110_v59 = vclamps-f32 %v7144_v27, 1.0 }
 0xbe4   : > { %v6845_v54 = vpop.f32.mrb[148].mxu0  ;;  %v7145_v29 = vmul.f32 %v7143_v32, %v7106_v23  ;;  %v6546_v23 = vadd.f32 %v6545_v12, %v6544_v60 }
 0xbe5   : > { %v6852_v49 = vsel %vm1337_vm15, %v6845_v54, 0.0  ;;  %v12808_v44 = vpop.f32.mrb[149].mxu0 }
 0xbe6   : > { %v6853_v57 = vadd.f32 %v6852_v49, %v6851_v42  ;;  %v7107_v42 = vmul.f32 %v17150_v48, %v17327_v37  ;;  %v11111_v34 = vclamps-f32 %v7145_v29, 1.0 }
 0xbe8   : > { %v6854_v1 = vrot.slane %v6853_v57, 4  ;;  %v7243_v26 = vpop.f32.mrb[150].mxu0 }
 0xbe9   : > { %v7272_v9 = vmul.f32 %v17269_v63, %v7243_v26  ;;  %v12832_v13 = vpop.f32.mrb[151].mxu0 }
 0xbea   : > { %v6855_v21 = vadd.f32 %v6854_v1, %v6853_v57  ;;  %v7146_v57 = vmul.f32 %v7143_v32, %v7107_v42  ;;  %v14528_v32 = vld [vmem:[%s18366_s6] sm:$0x1] }
 0xbeb   : > { %v7311_v6 = vmul.f32 %v7310_v7, %v7272_v9 }
 0xbec   : > { %v6856_v54 = vrot.slane %v6855_v21, 2  ;;  %v7248_v44 = vpop.f32.mrb[152].mxu0  ;;  %v11112_v13 = vclamps-f32 %v7146_v57, 1.0 }
 0xbed   : > { %v11119_v5 = vclamps-f32 %v7311_v6, 1.0  ;;  %v7273_v28 = vmul.f32 %v17272_v17, %v7248_v44  ;;  %v12835_v49 = vpop.f32.mrb[153].mxu0 }
 0xbee   : > { %v6857_v46 = vadd.f32 %v6856_v54, %v6855_v21 }
 0xbef   : > { %v17476_v11 = vsub.f32 %v11110_v59, %v11119_v5  ;;  %v7312_v63 = vmul.f32 %v7310_v7, %v7273_v28 }
 0xbf0   : > { %v6858_v2 = vrot.slane %v6857_v46, 1  ;;  %v7253_v47 = vpop.f32.mrb[154].mxu0 }
 0xbf1   : > { %v11120_v27 = vclamps-f32 %v7312_v63, 1.0  ;;  %v7274_v1 = vmul.f32 %v17275_v22, %v7253_v47  ;;  %v12838_v26 = vpop.f32.mrb[155].mxu0  ;;  %v7845_v21 = vsel %vm1346_vm11, %v17476_v11, 0.0 }
 0xbf2   : > { %v6859_v48 = vadd.f32 %v6858_v2, %v6857_v46 }
 0xbf3   : > { %v17479_v37 = vsub.f32 %v11111_v34, %v11120_v27  ;;  %v7313_v17 = vmul.f32 %v7310_v7, %v7274_v1 }
 0xbf4   : > { %v6860_v9 = vadd.f32 %v6859_v48, %v6546_v23 }
 0xbf5   : > { %v7846_v6 = vsel %vm1346_vm11, %v17479_v37, 0.0  ;;  %v11121_v29 = vclamps-f32 %v7313_v17, 1.0 }
 0xbf6   : > { %v6861_v22 = vadd.f32 %v14528_v32, %v6860_v9  ;;  %v7847_v59 = vadd.f32 %v7846_v6, %v7845_v21 }
 0xbf7   : > { %v17488_v12 = vsub.f32 %v11112_v13, %v11121_v29 }
 0xbf8   : > { %11091 = vst.msk [vmem:[%s15636_s25 + $0x4] sm:$0x1] %vm1670_vm9, %v6861_v22 }
 0xbf9   : > { %v7848_v46 = vsel %vm1350_vm12, %v17488_v12, 0.0 }
 0xbfa   : > { %v7849_v7 = vadd.f32 %v7848_v46, %v7847_v59 }
 0xbfc   : > { %v7850_v60 = vrot.slane %v7849_v7, 4 }
 0xbfe   : > { %v7851_v54 = vadd.f32 %v7850_v60, %v7849_v7 }
 0xc00   : > { %v7852_v44 = vrot.slane %v7851_v54, 2 }
 0xc02   : > { %v7853_v42 = vadd.f32 %v7852_v44, %v7851_v54 }
 0xc04   : > { %v7854_v5 = vrot.slane %v7853_v42, 1 }
 0xc06   : > { %v7855_v28 = vadd.f32 %v7854_v5, %v7853_v42 }
 0xc08   : > { %v7856_v49 = vmul.f32 %v7855_v28, %v17476_v11  ;;  %v7857_v63 = vmul.f32 %v7855_v28, %v17479_v37  ;;  %v7858_v2 = vmul.f32 %v7855_v28, %v17488_v12  ;;  %v11928_v47 = vpop.f32.mrb[156].mxu0 }
 0xc09   : > { %v11929_v34 = vpop.f32.mrb[157].mxu0 }
 0xc0a   : > { %v7859_v57 = vmul.f32 0.31622776, %v7856_v49  ;;  %v7860_v27 = vmul.f32 0.31622776, %v7857_v63  ;;  %v7861_v1 = vmul.f32 0.31622776, %v7858_v2  ;;  %v11930_v26 = vadd.f32 %v11929_v34, %v11928_v47 }
 0xc0c   : > { %14321 = vtanh.f32 %v7859_v57  ;;  %v7557_v23 = vadd.f32 %v11930_v26, %v17381_v25  ;;  %v11931_v48 = vpop.f32.mrb[158].mxu0 }
 0xc0d   : > { %14323 = vtanh.f32 %v7860_v27  ;;  %v11932_v17 = vpop.f32.mrb[159].mxu0 }
 0xc0e   : > { %14325 = vtanh.f32 %v7861_v1  ;;  %v11933_v9 = vadd.f32 %v11932_v17, %v11931_v48  ;;  %v17528_v48 = vld [vmem:[%s18363_s3 + $0x10] sm:$0xf]  ;;  %v13675_v17 = vpack.c.bf16 %v17420_v45, %v17411_v24 }
 0xc10   : > { %v7562_v13 = vadd.f32 %v11933_v9, %v17383_v19  ;;  %v11934_v21 = vpop.f32.mrb[160].mxu0  ;;  %v13678_v9 = vpack.c.bf16 %v17426_v38, %v17417_v56 }
 0xc11   : > { %v11935_v6 = vpop.f32.mrb[161].mxu0 }
 0xc12   : > { %v11936_v29 = vadd.f32 %v11935_v6, %v11934_v21 }
 0xc14   : > { %v7567_v32 = vadd.f32 %v11936_v29, %v17385_v51  ;;  %v7725_v22 = vpop.f32.mrb[162].mxu0 }
 0xc15   : > { %v7726_v59 = vadd.f32 %v17387_v62, %v7725_v22  ;;  %v12854_v46 = vpop.f32.mrb[163].mxu0 }
 0xc16   : > { %v14322_v7 = vpop.eup %14321 }
 0xc17   : > { %v14324_v60 = vpop.eup %14323  ;;  %v7865_v54 = vmul.f32 1.442695, %v14322_v7  ;;  %14327 = vrcp.f32 %v7726_v59  ;;  %v18704_v59 = vld [vmem:[#allocation23_spill] sm:$0xff] }
 0xc18   : > { %v14326_v25 = vpop.eup %14325  ;;  %v7730_v44 = vpop.f32.mrb[164].mxu0  ;;  %v7867_v42 = vmul.f32 1.442695, %v14324_v60  ;;  %v8639_v46 = vrot.slane %v18704_v59, 4 }
 0xc19   : > { %14329 = vpow2.f32 %v7865_v54  ;;  %v7869_v5 = vmul.f32 1.442695, %v14326_v25  ;;  %v7731_v19 = vadd.f32 %v17389_v61, %v7730_v44  ;;  %v12857_v28 = vpop.f32.mrb[165].mxu0 }
 0xc1a   : > { %14331 = vpow2.f32 %v7867_v42  ;;  %v8640_v7 = vadd.f32 %v8639_v46, %v18704_v59 }
 0xc1b   : > { %14333 = vpow2.f32 %v7869_v5  ;;  %v8629_v5 = vadd.f32 %v17287_v15, %v17229_v3 }
 0xc1c   : > { %14335 = vrcp.f32 %v7731_v19  ;;  %v7735_v51 = vpop.f32.mrb[166].mxu0  ;;  %v8641_v60 = vrot.slane %v8640_v7, 2 }
 0xc1d   : > { %v7736_v49 = vadd.f32 %v17391_v53, %v7735_v51  ;;  %v12860_v62 = vpop.f32.mrb[167].mxu0  ;;  %v8621_v51 = vadd.f32 %v17284_v16, %v17226_v33 }
 0xc1e   : > { %v8642_v54 = vadd.f32 %v8641_v60, %v8640_v7 }
 0xc1f   : > { %14337 = vrcp.f32 %v7736_v49  ;;  %v18705_v49 = vld [vmem:[#allocation3_spill] sm:$0xff] }
 0xc20   : > { %v8643_v25 = vrot.slane %v8642_v54, 1  ;;  %v8630_v62 = vadd.f32 %v8629_v5, %v18705_v49 }
 0xc21   : > { %v14328_v63 = vpop.eup %14327 }
 0xc22   : > { %v7740_v2 = vmul.f32 %v14328_v63, %v7557_v23  ;;  %v8644_v42 = vadd.f32 %v8643_v25, %v8642_v54  ;;  %v18709_v54 = vld [vmem:[#allocation5_spill] sm:$0xff]  ;;  %v18710_v25 = vld [vmem:[#allocation6_spill] sm:$0xff] }
 0xc23   : > { %v14330_v47 = vpop.eup %14329 }
 0xc24   : > { %v14332_v34 = vpop.eup %14331  ;;  %12870 = vmatmul.mubr.msk.f32.vlgmr.msra.gmra.mrb[168].mxu0 %vm18701_vm8, %v7740_v2  ;;  %v7871_v57 = vmul.f32 %v14330_v47, %v17476_v11  ;;  %v14529_v11 = vld [vmem:[%s18365_s5] sm:$0x3]  ;;  %v8647_v19 = vmul.f32 %v17232_v0, %v8644_v42  ;;  %v18706_v2 = vld [vmem:[#allocation25_spill] sm:$0xff] }
 0xc25   : > { %v14334_v27 = vpop.eup %14333  ;;  %13672 = vmatpush3.bf16.msra.mxu0 %v18574_v31  ;;  %12872 = vmatprep.mubr.msk.f32.mxu0 %vm14557_vm5, %v18551_v8  ;;  %v7872_v61 = vmul.f32 %v14332_v34, %v17479_v37  ;;  %v13673_v37 = vpack.c.bf16 %v17423_v43, %v17414_v36 }
 0xc26   : > { %v14336_v1 = vpop.eup %14335  ;;  %12885 = vmatmul.mubr.msk.f32.vlgmr.msra.gmra.mrb[168].mxu1 %vm1346_vm11, %v7871_v57  ;;  %12897 = vmatprep.subr.mxu0 %v18551_v8  ;;  %v7873_v53 = vmul.f32 %v14334_v27, %v17488_v12  ;;  %v8656_v63 = vmul.f32 0.31622776, %v8647_v19  ;;  %v18712_v19 = vld [vmem:[#allocation8_spill] sm:$0xff] }
 0xc27   : > { %v7742_v26 = vmul.f32 %v14336_v1, %v7562_v13  ;;  %12887 = vmatprep.mubr.msk.f32.mxu1 %vm14557_vm5, %v18551_v8  ;;  %12909 = vmatpush3.msk.msra.mxu1 %vm18702_vm13, %v14529_v11  ;;  %vm18703_vm13 = vmmov %vm18701_vm8 }
 0xc28   : > { %13681 = vmatprep.subr.bf16.mxu1 %v18552_v39 }
 0xc29   : > { %v14338_v23 = vpop.eup %14337  ;;  %12873 = vmatmul.mubr.msk.f32.gmra.mrb[170].mxu0 %vm18701_vm8, %v7742_v26  ;;  %vm18726_vm8 = vcmask 15360  }
 0xc2a   : > { %12875 = vmatprep.mubr.msk.f32.mxu0 %vm14557_vm5, %v18551_v8  ;;  %12888 = vmatmul.mubr.msk.f32.gmra.mrb[170].mxu1 %vm1346_vm11, %v7872_v61  ;;  %v7744_v12 = vmul.f32 %v14338_v23, %v7567_v32  ;;  %v8650_v23 = vmul.f32 %v17239_v41, %v8644_v42 }
 0xc2b   : > { %12898 = vmatpush3.msk.msra.mxu0 %vm373_vm1, %v17528_v48  ;;  %12890 = vmatprep.mubr.msk.f32.mxu1 %vm14557_vm5, %v18551_v8 }
 0xc2c   : > { %13674 = vmatprep.subr.bf16.mxu0 %v13673_v37 }
 0xc2d   : > { %12876 = vmatmul.mubr.msk.f32.gmra.mrb[172].mxu0 %vm18703_vm13, %v7744_v12  ;;  %vm18728_vm13 = vmmov %vm18726_vm8 }
 0xc2e   : > { %12891 = vmatmul.mubr.msk.f32.gmra.mrb[172].mxu1 %vm1346_vm11, %v7873_v53  ;;  %12899 = vmatprep.mubr.msk.f32.mxu0 %vm14557_vm5, %v18551_v8 }
 0xc2f   : > { %12910 = vmatprep.mubr.msk.f32.mxu1 %vm14557_vm5, %v18551_v8 }
 0xc31   : > { %12900 = vmatmul.mubr.msk.f32.vlgmr.msra.gmra.mrb[174].mxu0 %vm1346_vm11, %v14330_v47  ;;  %v8622_v47 = vadd.f32 %v8621_v51, %v18706_v2  ;;  %v18713_v51 = vld [vmem:[#allocation9_spill] sm:$0xff] }
 0xc32   : > { %12902 = vmatprep.mubr.msk.f32.mxu0 %vm14557_vm5, %v18551_v8  ;;  %13676 = vmatpush1.bf16.xpose.msra.mxu0 %v13675_v17 }
 0xc33   : > { %8218 = vmatprep.subr.mxu0 %v17444_v18  ;;  %v8623_v57 = vrot.slane %v8622_v47, 4 }
 0xc35   : > { %12903 = vmatmul.mubr.msk.f32.gmra.mrb[176].mxu0 %vm1346_vm11, %v14332_v34  ;;  %v8631_v34 = vrot.slane %v8630_v62, 4  ;;  %v8624_v61 = vadd.f32 %v8623_v57, %v8622_v47  ;;  %v18715_v57 = vld [vmem:[#allocation11_spill] sm:$0xff] }
 0xc36   : > { %12905 = vmatprep.mubr.msk.f32.mxu0 %vm14557_vm5, %v18551_v8 }
 0xc37   : > { %v8625_v26 = vrot.slane %v8624_v61, 2 }
 0xc39   : > { %12906 = vmatmul.mubr.msk.f32.gmra.mrb[178].mxu0 %vm1346_vm11, %v14334_v27  ;;  %v8632_v27 = vadd.f32 %v8631_v34, %v8630_v62  ;;  %v8626_v12 = vadd.f32 %v8625_v26, %v8624_v61  ;;  %v18716_v61 = vld [vmem:[#allocation12_spill] sm:$0xff] }
 0xc3a   : > { %8219 = vmatpush1.xpose.msra.mxu0 %v17441_v10  ;;  %8278 = vmatprep.mubr.f32.mxu0 %v17414_v36  ;;  %v8456_v36 = vpop.xlane.xlu0 %8455 }
 0xc3b   : > { %13677 = vmatprep.subr.bf16.mxu0 %v18552_v39  ;;  %v8461_v13 = vmul.f32 0.0625, %v8456_v36  ;;  %v8633_v1 = vrot.slane %v8632_v27, 2  ;;  %v8627_v36 = vrot.slane %v8626_v12, 1 }
 0xc3d   : > { %8279 = vmatmul.mubr.f32.vlgmr.msra.gmra.mrb[180].mxu0 %v17411_v24  ;;  %v8453_v24 = vpop.xlane.xlu1 %8452  ;;  %v8634_v11 = vadd.f32 %v8633_v1, %v8632_v27 }
 0xc3e   : > { %13680 = vmatpush3.bf16.xpose.msk.msra.mxu0 %vm14789_vm7, %v13678_v9  ;;  %8283 = vmatprep.mubr.f32.mxu0 %v17423_v43  ;;  %v8460_v43 = vmul.f32 0.0625, %v8453_v24  ;;  %v8387_v29 = vpop.xlane.xlu0 %8386  ;;  %v8653_v9 = vmul.f32 %v17253_v20, %v8644_v42  ;;  %v8659_v24 = vmul.f32 0.31622776, %v8650_v23  ;;  %v18711_v42 = vld [vmem:[#allocation7_spill] sm:$0xff] }
 0xc3f   : > { %12923 = vmatprep.subr.mxu0 %v18551_v8  ;;  %14339 = vrsqrt.f32 %v8387_v29  ;;  %v8635_v17 = vrot.slane %v8634_v11, 1 }
 0xc41   : > { %8284 = vmatmul.mubr.f32.gmra.mrb[182].mxu0 %v17420_v45  ;;  %v17578_v45 = vsub.f32 %v17399_v35, %v8461_v13  ;;  %v8662_v13 = vmul.f32 0.31622776, %v8653_v9 }
 0xc42   : > { %8288 = vmatprep.mubr.f32.mxu0 %v17444_v18  ;;  %v17575_v18 = vsub.f32 %v17396_v4, %v8460_v43  ;;  %v8392_v22 = vpop.xlane.xlu0 %8391  ;;  %v8636_v43 = vadd.f32 %v8635_v17, %v8634_v11  ;;  %v18717_v11 = vld [vmem:[#allocation13_spill] sm:$0xff]  ;;  %v18718_v17 = vld [vmem:[#allocation14_spill] sm:$0xff] }
 0xc43   : > { %v8556_v6 = vmul.f32 %v17578_v45, %v17578_v45  ;;  %14341 = vrsqrt.f32 %v8392_v22 }
 0xc45   : > { %8289 = vmatmul.mubr.f32.gmra.mrb[184].mxu0 %v17441_v10  ;;  %v8459_v10 = vpop.xlane.xlu1 %8458  ;;  %v8561_v35 = vsel %vm641_vm3, %v8556_v6, 0.0 }
 0xc46   : > { %12924 = vmatpush3.xpose.msk.msra.mxu0 %vm363_vm0, %v17447_v58  ;;  %12925 = vmatprep.mubr.msk.f32.mxu0 %vm14557_vm5, %v18551_v8  ;;  %v8462_v21 = vmul.f32 0.0625, %v8459_v10  ;;  %v8399_v44 = vpop.xlane.xlu0 %8398  ;;  %v8628_v10 = vadd.f32 %v8627_v36, %v8626_v12 }
 0xc47   : > { %12949 = vmatprep.subr.mxu0 %v18551_v8  ;;  %14343 = vrsqrt.f32 %v8399_v44 }
 0xc48   : > { %v17591_v4 = vsub.f32 %v17402_v55, %v8462_v21  ;;  %14345 = vtanh.f32 %v8656_v63  ;;  %v8645_v6 = vmul.f32 %v17226_v33, %v8628_v10  ;;  %v8648_v29 = vmul.f32 %v17284_v16, %v8628_v10  ;;  %v18707_v33 = vld [vmem:[#allocation4_spill] sm:$0xff]  ;;  %v18714_v63 = vld [vmem:[#allocation10_spill] sm:$0xff] }
 0xc49   : > { %12926 = vmatmul.mubr.msk.f32.vlgmr.msra.gmra.mrb[180].mxu0 %vm363_vm0, %v17417_v56  ;;  %v8555_v56 = vmul.f32 %v17575_v18, %v17575_v18  ;;  %v17601_v55 = vpop.eup %14339 }
 0xc4a   : > { %12928 = vmatprep.mubr.msk.f32.mxu0 %vm14557_vm5, %v18551_v8  ;;  %12950 = vmatpush3.msk.msra.mxu0 %vm373_vm1, %v17352_v14 }
 0xc4b   : > { %13718 = vmatprep.subr.bf16.mxu0 %v14793_v30  ;;  %v8558_v14 = vsel %vm641_vm3, %v8555_v56, 0.0  ;;  %8406 = vxpose.xlu0.b32.start [1/3] (short) (narrow) %v17601_v55, 8  ;;  %v8646_v56 = vmul.f32 %v17229_v3, %v8636_v43  ;;  %v8652_v3 = vmul.f32 %v17249_v52, %v8636_v43 }
 0xc4c   : > { %8559 = vadd.xlane.f32.xlu1 %v8558_v14 }
 0xc4d   : > { %12929 = vmatmul.mubr.msk.f32.gmra.mrb[182].mxu0 %vm363_vm0, %v17426_v38  ;;  %v8557_v38 = vmul.f32 %v17591_v4, %v17591_v4  ;;  %v8655_v14 = vmul.f32 0.31622776, %v8646_v56  ;;  %v8661_v60 = vmul.f32 0.31622776, %v8652_v3  ;;  %v17701_v3 = vld [vmem:[%s14615_s8 + $0x220] sm:$0xff] }
 0xc4e   : > { %12931 = vmatprep.mubr.msk.f32.mxu0 %vm14557_vm5, %v18551_v8 }
 0xc4f   : > { %v8564_v32 = vsel %vm648_vm4, %v8557_v38, 0.0 }
 0xc50   : > { %8562 = vadd.xlane.f32.xlu1 %v8561_v35  ;;  %v8649_v35 = vmul.f32 %v17287_v15, %v8636_v43  ;;  %v18708_v15 = vld [vmem:[#allocation26_spill] sm:$0xff] }
 0xc51   : > { %12932 = vmatmul.mubr.msk.f32.gmra.mrb[184].mxu0 %vm363_vm0, %v17447_v58  ;;  %v17604_v58 = vpop.eup %14341  ;;  %v8651_v46 = vmul.f32 %v18708_v15, %v8628_v10  ;;  %v18721_v10 = vld [vmem:[#allocation17_spill] sm:$0xff]  ;;  %v17708_v15 = vld [vmem:[%s14615_s8 + $0x228] sm:$0xf] }
 0xc52   : > { %12951 = vmatprep.mubr.msk.f32.mxu0 %vm14557_vm5, %v18551_v8  ;;  %8407 = vxpose.xlu0.b32.cont [2/3] (short) (narrow) %v17604_v58, 8  ;;  %v17612_v28 = vpop.eup %14343  ;;  %v8658_v59 = vmul.f32 0.31622776, %v8649_v35  ;;  %18722 = vst [vmem:[#allocation21_spill] sm:$0xff] %v17708_v15 }
 0xc53   : > { %v14346_v53 = vpop.eup %14345  ;;  %v8660_v52 = vmul.f32 0.31622776, %v8651_v46  ;;  %v17711_v46 = vld [vmem:[%s14615_s8 + $0x230] sm:$0xf] }
 0xc54   : > { %8565 = vadd.xlane.f32.xlu1 %v8564_v32  ;;  %v8676_v37 = vmul.f32 1.442695, %v14346_v53  ;;  %v8654_v32 = vmul.f32 0.31622776, %v8645_v6 }
 0xc56   : > { %8408 = vxpose.xlu0.b32.end [3/3] (short) (narrow) %v17612_v28, 8  ;;  %14347 = vpow2.f32 %v8676_v37 }
 0xc57   : > { %14349 = vtanh.f32 %v8659_v24  ;;  %v18719_v24 = vld [vmem:[#allocation15_spill] sm:$0xff] }
 0xc58   : > { %14351 = vtanh.f32 %v8662_v13 }
 0xc59   : > { %14353 = vtanh.f32 %v8655_v14 }
 0xc5a   : > { %14355 = vtanh.f32 %v8654_v32  ;;  %v17694_v32 = vld [vmem:[%s14615_s8 + $0x208] sm:$0xff] }
 0xc5b   : > { %14357 = vtanh.f32 %v8658_v59  ;;  %v17705_v59 = vsel %vm363_vm0, %v17701_v3, 0.0 }
 0xc60   : > { %v17622_v21 = vpop.eup %14347 }
 0xc61   : > { %v8692_v38 = vmul.f32 %v17622_v21, %v17232_v0  ;;  %v14350_v22 = vpop.eup %14349  ;;  %v8657_v0 = vmul.f32 0.31622776, %v8648_v29  ;;  %v17691_v29 = vld [vmem:[%s14615_s8 + $0x200] sm:$0xff] }
 0xc62   : > { %v8682_v16 = vmul.f32 1.442695, %v14350_v22  ;;  %v14352_v7 = vpop.eup %14351 }
 0xc63   : > { %12952 = vmatmul.mubr.msk.f32.vlgmr.msra.gmra.mrb[186].mxu0 %vm363_vm0, %v8692_v38  ;;  %14359 = vtanh.f32 %v8657_v0  ;;  %v8688_v44 = vmul.f32 1.442695, %v14352_v7  ;;  %v14354_v5 = vpop.eup %14353  ;;  %v17688_v38 = vld [vmem:[%s14615_s8 + $0x1f8] sm:$0xff] }
 0xc64   : > { %13720 = vmatpush3.bf16.msra.mxu0 %v14817_v40  ;;  %12954 = vmatprep.mubr.msk.f32.mxu0 %vm14557_vm5, %v18551_v8  ;;  %14361 = vpow2.f32 %v8682_v16  ;;  %v8674_v49 = vmul.f32 1.442695, %v14354_v5  ;;  %v14356_v62 = vpop.eup %14355  ;;  %v9474_v22 = vadd.f32 %v17691_v29, %v17688_v38  ;;  %v17715_v7 = vld [vmem:[%s14615_s8 + $0x238] sm:$0xf] }
 0xc65   : > { %13722 = vmatprep.subr.bf16.mxu0 %v18707_v33  ;;  %14363 = vtanh.f32 %v8661_v60  ;;  %v14358_v2 = vpop.eup %14357  ;;  %v8672_v34 = vmul.f32 1.442695, %v14356_v62  ;;  %v17719_v60 = vsel %vm373_vm1, %v17708_v15, 0.0  ;;  %v9487_v5 = vsel %vm377_vm2, %v17715_v7, 0.0 }
 0xc66   : > { %14365 = vtanh.f32 %v8660_v52  ;;  %v8680_v1 = vmul.f32 1.442695, %v14358_v2  ;;  %18723 = vst [vmem:[#allocation24_spill] sm:$0xff] %v17719_v60  ;;  %v17723_v52 = vsel %vm373_vm1, %v17711_v46, 0.0 }
 0xc67   : > { %14367 = vpow2.f32 %v8688_v44  ;;  %18724 = vst [vmem:[#allocation27_spill] sm:$0xff] %v17723_v52  ;;  %v9486_v44 = vadd.f32 %v17723_v52, %v17719_v60 }
 0xc68   : > { %13724 = vmatpush3.bf16.msra.mxu0 %v18709_v54  ;;  %14369 = vpow2.f32 %v8674_v49 }
 0xc69   : > { %13726 = vmatprep.subr.bf16.mxu0 %v18710_v25  ;;  %14371 = vpow2.f32 %v8672_v34  ;;  %v9488_v62 = vadd.f32 %v9487_v5, %v9486_v44 }
 0xc6a   : > { %14373 = vpow2.f32 %v8680_v1 }
 0xc6c   : > { %13728 = vmatpush3.bf16.msra.mxu0 %v18711_v42 }
 0xc6d   : > { %13730 = vmatprep.subr.bf16.mxu0 %v18712_v19  ;;  %v14360_v47 = vpop.eup %14359 }
 0xc6e   : > { %v17643_v27 = vpop.eup %14361  ;;  %v8678_v23 = vmul.f32 1.442695, %v14360_v47 }
 0xc6f   : > { %v14364_v53 = vpop.eup %14363  ;;  %v8695_v37 = vmul.f32 %v17643_v27, %v17239_v41  ;;  %v18720_v41 = vld [vmem:[#allocation16_spill] sm:$0xff] }
 0xc70   : > { %13732 = vmatpush3.bf16.msra.mxu0 %v18713_v51  ;;  %v14366_v26 = vpop.eup %14365  ;;  %v8686_v9 = vmul.f32 1.442695, %v14364_v53  ;;  %14375 = vpow2.f32 %v8678_v23 }
 0xc71   : > { %13734 = vmatprep.subr.bf16.mxu0 %v18714_v63  ;;  %v17649_v12 = vpop.eup %14367  ;;  %12955 = vmatmul.mubr.msk.f32.gmra.mrb[188].mxu0 %vm363_vm0, %v8695_v37  ;;  %v8684_v43 = vmul.f32 1.442695, %v14366_v26 }
 0xc72   : > { %12957 = vmatprep.mubr.msk.f32.mxu0 %vm14557_vm5, %v18551_v8  ;;  %v8698_v36 = vmul.f32 %v17649_v12, %v17253_v20  ;;  %14377 = vpow2.f32 %v8686_v9  ;;  %v17659_v13 = vpop.eup %14369 }
 0xc73   : > { %14379 = vpow2.f32 %v8684_v43  ;;  %v17665_v56 = vpop.eup %14371 }
 0xc74   : > { %13736 = vmatpush3.bf16.msra.mxu0 %v18715_v57  ;;  %v17667_v20 = vpop.eup %14373 }
 0xc75   : > { %13738 = vmatprep.subr.bf16.mxu0 %v18716_v61  ;;  %12958 = vmatmul.mubr.msk.f32.gmra.mrb[190].mxu0 %vm363_vm0, %v8698_v36 }
 0xc76   : > { %8941 = vmatprep.mubr.f32.mxu0 %v17659_v13 }
 0xc78   : > { %13740 = vmatpush3.bf16.msra.mxu0 %v18717_v11 }
 0xc79   : > { %13742 = vmatprep.subr.bf16.mxu0 %v18718_v17 }
 0xc7a   : > { %v17673_v6 = vpop.eup %14375 }
 0xc7c   : > { %13744 = vmatpush3.bf16.msra.mxu0 %v18719_v24  ;;  %v17675_v14 = vpop.eup %14377 }
 0xc7d   : > { %13746 = vmatprep.subr.bf16.mxu0 %v18720_v41  ;;  %v17682_v35 = vpop.eup %14379 }
 0xc80   : > { %13748 = vmatpush3.bf16.msra.mxu0 %v18721_v10 }
 0xc81   : > { %13756 = vmatprep.subr.bf16.mxu0 %v18552_v39 }
 0xc83   : > { %8942 = vmatmul.mubr.f32.vlgmr.msra.gmra.mrb[192].mxu0 %v17665_v56 }
 0xc84   : > { %8946 = vmatprep.mubr.f32.mxu0 %v17667_v20  ;;  %13758 = vmatpush3.bf16.msra.mxu0 %v18574_v31 }
 0xc85   : > { %12992 = vmatprep.subr.mxu0 %v18551_v8 }
 0xc87   : > { %8947 = vmatmul.mubr.f32.gmra.mrb[194].mxu0 %v17673_v6 }
 0xc88   : > { %8951 = vmatprep.mubr.f32.mxu0 %v17675_v14  ;;  %12993 = vmatpush3.msk.msra.mxu0 %vm373_vm1, %v17528_v48  ;;  %v9475_v48 = vsel %vm363_vm0, %v17694_v32, 0.0 }
 0xc89   : > { %13018 = vmatprep.subr.mxu0 %v18551_v8  ;;  %v9476_v0 = vadd.f32 %v9475_v48, %v9474_v22  ;;  %v9935_v16 = vadd.f32 %v17705_v59, %v9475_v48 }
 0xc8b   : > { %8952 = vmatmul.mubr.f32.gmra.mrb[196].mxu0 %v17682_v35  ;;  %9477 = vadd.xlane.f32.xlu0 %v9476_v0  ;;  %v17729_v49 = vadd.f32 %v9935_v16, %v9487_v5 }
 0xc8c   : > { %12994 = vmatprep.mubr.msk.f32.mxu0 %vm14557_vm5, %v18551_v8 }
 0xc8d   : > { %18725 = vst [vmem:[#allocation28_spill] sm:$0xff] %v17729_v49 }
 0xc8f   : > { %9489 = vadd.xlane.f32.xlu0 %v9488_v62 }
 0xcd9   : > { %v8560_v2 = vpop.xlane.xlu1 %8559 }
 0xcda   : > { %14381 = vrsqrt.f32 %v8560_v2 }
 0xcdd   : > { %v8563_v47 = vpop.xlane.xlu1 %8562 }
 0xcde   : > { %14383 = vrsqrt.f32 %v8563_v47 }
 0xce1   : > { %v8566_v34 = vpop.xlane.xlu1 %8565 }
 0xce2   : > { %14385 = vrsqrt.f32 %v8566_v34 }
 0xce4   : > { %v17731_v1 = vpop.eup %14381 }
 0xce5   : > { %8573 = vxpose.xlu1.b32.start [1/3] (short) (narrow) %v17731_v1, 8 }
 0xce8   : > { %v17734_v53 = vpop.eup %14383 }
 0xce9   : > { %8574 = vxpose.xlu1.b32.cont [2/3] (short) (narrow) %v17734_v53, 8 }
 0xcec   : > { %v17737_v26 = vpop.eup %14385 }
 0xced   : > { %8575 = vxpose.xlu1.b32.end [3/3] (short) (narrow) %v17737_v26, 8 }
 0xcf7   : > { %v7820_v37 = vpop.f32.mrb[168].mxu0 }
 0xcf8   : > { %v12871_v23 = vpop.f32.mrb[169].mxu0  ;;  %v7834_v22 = vsel %vm1333_vm14, %v7820_v37, 0.0 }
 0xcf9   : > { %v7949_v9 = vpop.f32.mrb[168].mxu1 }
 0xcfa   : > { %v12886_v36 = vpop.f32.mrb[169].mxu1 }
 0xcfc   : > { %v7825_v43 = vpop.f32.mrb[170].mxu0 }
 0xcfd   : > { %v7835_v48 = vsel %vm1333_vm14, %v7825_v43, 0.0  ;;  %v12874_v0 = vpop.f32.mrb[171].mxu0  ;;  %v7954_v16 = vpop.f32.mrb[170].mxu1 }
 0xcfe   : > { %v7836_v44 = vadd.f32 %v7835_v48, %v7834_v22  ;;  %v12889_v5 = vpop.f32.mrb[171].mxu1  ;;  %v17746_v48 = vld [vmem:[%s14615_s8 + $0x210] sm:$0xff] }
 0xcff   : > { %v17749_v5 = vld [vmem:[%s14615_s8 + $0x218] sm:$0xff] }
 0xd00   : > { %v7830_v62 = vpop.f32.mrb[172].mxu0 }
 0xd01   : > { %v7837_v2 = vsel %vm1337_vm15, %v7830_v62, 0.0  ;;  %v12877_v47 = vpop.f32.mrb[173].mxu0  ;;  %v7959_v34 = vpop.f32.mrb[172].mxu1 }
 0xd02   : > { %v17743_v60 = vadd.f32 %v7837_v2, %v7836_v44  ;;  %v12892_v23 = vpop.f32.mrb[173].mxu1  ;;  %v9479_v44 = vadd.f32 %v17749_v5, %v17746_v48  ;;  %v13682_v2 = vpack.c.bf16 %v17578_v45, %v17575_v18 }
 0xd04   : > { %v8038_v36 = vpop.f32.mrb[174].mxu0 }
 0xd05   : > { %14387 = vrcp.f32 %v8038_v36  ;;  %v12901_v52 = vpop.f32.mrb[175].mxu0 }
 0xd08   : > { %v8043_v37 = vpop.f32.mrb[176].mxu0 }
 0xd09   : > { %14389 = vrcp.f32 %v8043_v37  ;;  %v12904_v43 = vpop.f32.mrb[177].mxu0 }
 0xd0a   : > { %v14531_v43 = vld [vmem:[%s14615_s8 + $0x1b8] sm:$0xff] }
 0xd0c   : > { %v8048_v0 = vpop.f32.mrb[178].mxu0 }
 0xd0d   : > { %14391 = vrcp.f32 %v8048_v0  ;;  %v12907_v22 = vpop.f32.mrb[179].mxu0 }
 0xd0f   : > { %v14388_v49 = vpop.eup %14387 }
 0xd10   : > { %v8053_v62 = vmul.f32 %v14388_v49, %v7949_v9  ;;  %v9481_v49 = vadd.f32 %v17705_v59, %v9479_v44  ;;  %v14534_v44 = vld [vmem:[%s14615_s8 + $0x1c8] sm:$0xff] }
 0xd12   : > { %12911 = vmatmul.mubr.msk.f32.vlgmr.msra.gmra.mrb[174].mxu1 %vm18726_vm8, %v8053_v62 }
 0xd13   : > { %v14390_v52 = vpop.eup %14389  ;;  %13684 = vmatpush3.bf16.xpose.msk.msra.mxu1 %vm14747_vm6, %v13682_v2  ;;  %12913 = vmatprep.mubr.msk.f32.mxu1 %vm14557_vm5, %v18551_v8  ;;  %v8693_v2 = vmul.f32 %v14534_v44, %v17673_v6  ;;  %v18729_v6 = vld [vmem:[#allocation18_spill] sm:$0xff] }
 0xd14   : > { %v8055_v23 = vmul.f32 %v14390_v52, %v7954_v16  ;;  %12938 = vmatprep.subr.mxu1 %v18551_v8  ;;  %9482 = vadd.xlane.f32.xlu1 %v9481_v49  ;;  %v17814_v52 = vld [vmem:[%s18362_s2 + $0x100] sm:$0xf] }
 0xd16   : > { %12914 = vmatmul.mubr.msk.f32.gmra.mrb[176].mxu1 %vm18728_vm13, %v8055_v23  ;;  %vm18734_vm13 = vcmask 1041408  }
 0xd17   : > { %v14392_v9 = vpop.eup %14391  ;;  %12916 = vmatprep.mubr.msk.f32.mxu1 %vm14557_vm5, %v18551_v8 }
 0xd18   : > { %v8057_v36 = vmul.f32 %v14392_v9, %v7959_v34 }
 0xd1a   : > { %12917 = vmatmul.mubr.msk.f32.gmra.mrb[178].mxu1 %vm18726_vm8, %v8057_v36 }
 0xd1b   : > { %12939 = vmatpush3.xpose.msk.msra.mxu1 %vm641_vm3, %v17591_v4  ;;  %12940 = vmatprep.mubr.msk.f32.mxu1 %vm14557_vm5, %v18551_v8 }
 0xd1c   : > { %13686 = vmatprep.subr.bf16.mxu1 %v14793_v30  ;;  %v17771_v59 = vpop.f32.mrb[180].mxu0 }
 0xd1d   : > { %v12927_v16 = vpop.f32.mrb[181].mxu0 }
 0xd1e   : > { %12941 = vmatmul.mubr.msk.f32.vlgmr.msra.gmra.mrb[180].mxu1 %vm641_vm3, %v17575_v18  ;;  %v8691_v18 = vmul.f32 %v14531_v43, %v17659_v13  ;;  %v14533_v13 = vld [vmem:[%s14615_s8 + $0x1d0] sm:$0xff] }
 0xd1f   : > { %13688 = vmatpush3.bf16.msra.mxu1 %v14817_v40  ;;  %12943 = vmatprep.mubr.msk.f32.mxu1 %vm14557_vm5, %v18551_v8  ;;  %v8694_v62 = vmul.f32 %v14533_v13, %v17667_v20  ;;  %v14537_v20 = vld [vmem:[%s14615_s8 + $0x1e0] sm:$0xf] }
 0xd20   : > { %13690 = vmatprep.subr.bf16.mxu1 %v18707_v33  ;;  %v17779_v34 = vpop.f32.mrb[182].mxu0  ;;  %v8696_v49 = vmul.f32 %v14537_v20, %v17682_v35  ;;  %v17861_v20 = vld [vmem:[%s14654_s11 + $0xb0] sm:$0xff] }
 0xd21   : > { %v12930_v37 = vpop.f32.mrb[183].mxu0 }
 0xd22   : > { %12944 = vmatmul.mubr.msk.f32.gmra.mrb[182].mxu1 %vm641_vm3, %v17578_v45  ;;  %v14532_v45 = vld [vmem:[%s14615_s8 + $0x1b0] sm:$0xff] }
 0xd23   : > { %13692 = vmatpush3.bf16.msra.mxu1 %v18709_v54  ;;  %12946 = vmatprep.mubr.msk.f32.mxu1 %vm14557_vm5, %v18551_v8 }
 0xd24   : > { %13694 = vmatprep.subr.bf16.mxu1 %v18710_v25  ;;  %v17789_v0 = vpop.f32.mrb[184].mxu0 }
 0xd25   : > { %v12933_v22 = vpop.f32.mrb[185].mxu0 }
 0xd26   : > { %12947 = vmatmul.mubr.msk.f32.gmra.mrb[184].mxu1 %vm641_vm3, %v17591_v4  ;;  %v8690_v4 = vmul.f32 %v14532_v45, %v17665_v56  ;;  %v14536_v56 = vld [vmem:[%s14615_s8 + $0x1e8] sm:$0xf] }
 0xd27   : > { %13696 = vmatpush3.bf16.msra.mxu1 %v18711_v42  ;;  %8772 = vmatprep.mubr.f32.mxu1 %v8691_v18  ;;  %v8697_v23 = vmul.f32 %v14536_v56, %v17675_v14  ;;  %v18730_v14 = vld [vmem:[#allocation19_spill] sm:$0xff] }
 0xd28   : > { %13698 = vmatprep.subr.bf16.mxu1 %v18712_v19 }
 0xd2b   : > { %13700 = vmatpush3.bf16.msra.mxu1 %v18713_v51 }
 0xd2c   : > { %13702 = vmatprep.subr.bf16.mxu1 %v18714_v63 }
 0xd2f   : > { %13704 = vmatpush3.bf16.msra.mxu1 %v18715_v57 }
 0xd30   : > { %13706 = vmatprep.subr.bf16.mxu1 %v18716_v61 }
 0xd33   : > { %13708 = vmatpush3.bf16.msra.mxu1 %v18717_v11 }
 0xd34   : > { %13710 = vmatprep.subr.bf16.mxu1 %v18718_v17 }
 0xd37   : > { %13712 = vmatpush3.bf16.msra.mxu1 %v18719_v24 }
 0xd38   : > { %13714 = vmatprep.subr.bf16.mxu1 %v18720_v41 }
 0xd3b   : > { %13716 = vmatpush3.bf16.msra.mxu1 %v18721_v10 }
 0xd3c   : > { %12960 = vmatprep.subr.mxu1 %v18551_v8 }
 0xd3e   : > { %8773 = vmatmul.mubr.f32.vlgmr.msra.gmra.mrb[186].mxu1 %v8690_v4 }
 0xd3f   : > { %12961 = vmatpush3.msk.msra.mxu1 %vm373_vm1, %v17814_v52  ;;  %8777 = vmatprep.mubr.f32.mxu1 %v8694_v62 }
 0xd40   : > { %13749 = vmatprep.subr.bf16.mxu1 %v18552_v39 }
 0xd42   : > { %8778 = vmatmul.mubr.f32.gmra.mrb[188].mxu1 %v8693_v2  ;;  %v8422_v2 = vpop.trf.xlu0 }
 0xd43   : > { %8782 = vmatprep.mubr.f32.mxu1 %v8697_v23  ;;  %v17858_v23 = vld [vmem:[%s14654_s11 + $0xa8] sm:$0xff] }
 0xd46   : > { %8783 = vmatmul.mubr.f32.gmra.mrb[190].mxu1 %v8696_v49  ;;  %v17864_v49 = vld [vmem:[%s14654_s11 + $0xb8] sm:$0xf] }
 0xd47   : > { %12962 = vmatprep.mubr.msk.f32.mxu1 %vm14557_vm5, %v18551_v8 }
 0xd4a   : > { %12963 = vmatmul.mubr.msk.f32.vlgmr.msra.gmra.mrb[192].mxu1 %vm363_vm0, %v17622_v21  ;;  %v17843_v21 = vpop.f32.mrb[186].mxu0 }
 0xd4b   : > { %12965 = vmatprep.mubr.msk.f32.mxu1 %vm14557_vm5, %v18551_v8  ;;  %13751 = vmatpush3.bf16.msra.mxu1 %v18729_v6  ;;  %v12953_v9 = vpop.f32.mrb[187].mxu0 }
 0xd4c   : > { %13752 = vmatprep.subr.bf16.mxu1 %v18552_v39  ;;  %v9478_v9 = vpop.xlane.xlu0 %9477 }
 0xd4e   : > { %12966 = vmatmul.mubr.msk.f32.gmra.mrb[194].mxu1 %vm363_vm0, %v17643_v27  ;;  %v17845_v27 = vpop.f32.mrb[188].mxu0 }
 0xd4f   : > { %12968 = vmatprep.mubr.msk.f32.mxu1 %vm14557_vm5, %v18551_v8  ;;  %13755 = vmatpush3.bf16.msk.msra.mxu1 %vm15097_vm10, %v18730_v14  ;;  %v12956_v36 = vpop.f32.mrb[189].mxu0 }
 0xd50   : > { %13759 = vmatprep.subr.bf16.mxu1 %v18552_v39  ;;  %v17847_v16 = vpop.f32.mrb[190].mxu0 }
 0xd51   : > { %v12959_v37 = vpop.f32.mrb[191].mxu0 }
 0xd52   : > { %12969 = vmatmul.mubr.msk.f32.gmra.mrb[196].mxu1 %vm363_vm0, %v17649_v12  ;;  %v9749_v37 = vsel %vm641_vm3, %v17858_v23, 0.0 }
 0xd53   : > { %12979 = vmatprep.mubr.msk.f32.mxu1 %vm14557_vm5, %v18551_v8  ;;  %9750 = vadd.xlane.f32.xlu1 %v9749_v37  ;;  %v9490_v37 = vpop.xlane.xlu0 %9489 }
 0xd56   : > { %v12098_v43 = vpop.f32.mrb[192].mxu0 }
 0xd57   : > { %v12099_v18 = vpop.f32.mrb[193].mxu0 }
 0xd58   : > { %v17849_v22 = vadd.f32 %v12099_v18, %v12098_v43  ;;  %v9752_v43 = vsel %vm641_vm3, %v17861_v20, 0.0  ;;  %v9491_v18 = vmul.f32 0.0038461538, %v9478_v9 }
 0xd59   : > { %9753 = vadd.xlane.f32.xlu0 %v9752_v43  ;;  %v9493_v43 = vmul.f32 0.0038461538, %v9490_v37 }
 0xd5a   : > { %v12101_v12 = vpop.f32.mrb[194].mxu0  ;;  %v17879_v35 = vsub.f32 %v17694_v32, %v9491_v18 }
 0xd5b   : > { %v12102_v45 = vpop.f32.mrb[195].mxu0  ;;  %v17903_v37 = vsub.f32 %v17708_v15, %v9493_v43  ;;  %v17906_v24 = vsub.f32 %v17711_v46, %v9493_v43  ;;  %v17909_v17 = vsub.f32 %v17715_v7, %v9493_v43 }
 0xd5c   : > { %v17851_v4 = vadd.f32 %v12102_v45, %v12101_v12  ;;  %v9755_v45 = vsel %vm648_vm4, %v17864_v49, 0.0 }
 0xd5d   : > { %9756 = vadd.xlane.f32.xlu1 %v9755_v45  ;;  %v9678_v51 = vmul.f32 %v17903_v37, %v17903_v37  ;;  %v9679_v19 = vmul.f32 %v17906_v24, %v17906_v24  ;;  %v9680_v42 = vmul.f32 %v17909_v17, %v17909_v17 }
 0xd5e   : > { %v12104_v13 = vpop.f32.mrb[196].mxu0 }
 0xd5f   : > { %v12105_v62 = vpop.f32.mrb[197].mxu0  ;;  %v9691_v43 = vsel %vm373_vm1, %v9678_v51, 0.0 }
 0xd60   : > { %v17853_v44 = vadd.f32 %v12105_v62, %v12104_v13  ;;  %v17873_v13 = vsub.f32 %v17688_v38, %v9491_v18  ;;  %v17876_v62 = vsub.f32 %v17691_v29, %v9491_v18  ;;  %v9674_v18 = vmul.f32 %v17879_v35, %v17879_v35 }
 0xd62   : > { %v9672_v6 = vmul.f32 %v17873_v13, %v17873_v13  ;;  %v9673_v47 = vmul.f32 %v17876_v62, %v17876_v62  ;;  %v9682_v45 = vsel %vm363_vm0, %v9674_v18, 0.0 }
 0xd64   : > { %v9681_v11 = vadd.f32 %v9673_v47, %v9672_v6  ;;  %v9692_v47 = vsel %vm373_vm1, %v9679_v19, 0.0  ;;  %v8403_v19 = vmul.f32 %v17601_v55, %v17771_v59 }
 0xd65   : > { %v17855_v56 = vpop.trf.xlu1  ;;  %v9693_v6 = vadd.f32 %v9692_v47, %v9691_v43 }
 0xd66   : > { %v9683_v63 = vadd.f32 %v9682_v45, %v9681_v11 }
 0xd68   : > { %9684 = vadd.xlane.f32.xlu0 %v9683_v63 }
 0xda1   : > { %v9483_v36 = vpop.xlane.xlu1 %9482 }
 0xda2   : > { %v9492_v12 = vmul.f32 0.0038461538, %v9483_v36 }
 0xda4   : > { %v17882_v14 = vsub.f32 %v17746_v48, %v9492_v12  ;;  %v17885_v9 = vsub.f32 %v17749_v5, %v9492_v12  ;;  %v17888_v36 = vsub.f32 %v17701_v3, %v9492_v12 }
 0xda6   : > { %v9675_v10 = vmul.f32 %v17882_v14, %v17882_v14  ;;  %v9676_v41 = vmul.f32 %v17885_v9, %v17885_v9  ;;  %v9677_v12 = vmul.f32 %v17888_v36, %v17888_v36 }
 0xda8   : > { %v9686_v61 = vadd.f32 %v9676_v41, %v9675_v10  ;;  %v9687_v57 = vsel %vm363_vm0, %v9677_v12, 0.0  ;;  %v9694_v41 = vsel %vm377_vm2, %v9680_v42, 0.0  ;;  %v7839_v12 = vrot.slane %v17743_v60, 4  ;;  %v18732_v42 = vld [vmem:[#allocation22_spill] sm:$0xff] }
 0xda9   : > { %v9695_v11 = vadd.f32 %v9694_v41, %v9693_v6  ;;  %vm18733_vm2 = vcmask 211968  }
 0xdaa   : > { %v9688_v25 = vadd.f32 %v9687_v57, %v9686_v61  ;;  %v7840_v51 = vadd.f32 %v7839_v12, %v17743_v60  ;;  %vm18735_vm8 = vmmov %vm18733_vm2 }
 0xdac   : > { %9689 = vadd.xlane.f32.xlu0 %v9688_v25  ;;  %v8441_v25 = vrot.slane %v8422_v2, %v18732_v42  ;;  %v7841_v41 = vrot.slane %v7840_v51, 2 }
 0xdae   : > { %v7842_v59 = vadd.f32 %v7841_v41, %v7840_v51 }
 0xdb0   : > { %9696 = vadd.xlane.f32.xlu0 %v9695_v11 }
 0xde0   : > { %v9751_v50 = vpop.xlane.xlu1 %9750 }
 0xde5   : > { %v8133_v10 = vpop.f32.mrb[174].mxu1 }
 0xde6   : > { %v12912_v18 = vpop.f32.mrb[175].mxu1  ;;  %v8147_v54 = vsel %vm1333_vm14, %v8133_v10, 0.0  ;;  %v8608_v10 = vrot.slane %v17855_v56, %v18732_v42  ;;  %v7843_v42 = vrot.slane %v7842_v59, 1 }
 0xde7   : > { %v8442_v18 = vmul.f32 %v8441_v25, %v8403_v19 }
 0xde9   : > { %v8138_v45 = vpop.f32.mrb[176].mxu1 }
 0xdea   : > { %v8148_v63 = vsel %vm1333_vm14, %v8138_v45, 0.0  ;;  %v12915_v57 = vpop.f32.mrb[177].mxu1 }
 0xdeb   : > { %v8149_v61 = vadd.f32 %v8148_v63, %v8147_v54  ;;  %v8404_v54 = vmul.f32 %v17604_v58, %v17779_v34  ;;  %v11165_v63 = vclamps-f32 %v8442_v18, 1.0 }
 0xded   : > { %v8143_v43 = vpop.f32.mrb[178].mxu1  ;;  %v8443_v15 = vmul.f32 %v8441_v25, %v8404_v54  ;;  %v7844_v54 = vadd.f32 %v7843_v42, %v7842_v59 }
 0xdee   : > { %v8150_v47 = vsel %vm1337_vm15, %v8143_v43, 0.0  ;;  %v12918_v6 = vpop.f32.mrb[179].mxu1 }
 0xdef   : > { %v8151_v11 = vadd.f32 %v8150_v47, %v8149_v61  ;;  %v8405_v61 = vmul.f32 %v17612_v28, %v17789_v0  ;;  %v11166_v41 = vclamps-f32 %v8443_v15, 1.0 }
 0xdf1   : > { %v8152_v45 = vrot.slane %v8151_v11, 4  ;;  %v8541_v57 = vpop.f32.mrb[180].mxu1 }
 0xdf2   : > { %v8570_v60 = vmul.f32 %v17731_v1, %v8541_v57  ;;  %v12942_v55 = vpop.f32.mrb[181].mxu1 }
 0xdf3   : > { %v8153_v2 = vadd.f32 %v8152_v45, %v8151_v11  ;;  %v8444_v11 = vmul.f32 %v8441_v25, %v8405_v61  ;;  %v17950_v25 = vld [vmem:[%s18366_s6] sm:$0x1] }
 0xdf4   : > { %v8609_v12 = vmul.f32 %v8608_v10, %v8570_v60 }
 0xdf5   : > { %v8154_v43 = vrot.slane %v8153_v2, 2  ;;  %v8546_v6 = vpop.f32.mrb[182].mxu1  ;;  %v11167_v55 = vclamps-f32 %v8444_v11, 1.0 }
 0xdf6   : > { %v11174_v56 = vclamps-f32 %v8609_v12, 1.0  ;;  %v8571_v19 = vmul.f32 %v17734_v53, %v8546_v6  ;;  %v12945_v47 = vpop.f32.mrb[183].mxu1 }
 0xdf7   : > { %v8155_v33 = vadd.f32 %v8154_v43, %v8153_v2 }
 0xdf8   : > { %v17938_v58 = vsub.f32 %v11165_v63, %v11174_v56  ;;  %v8610_v1 = vmul.f32 %v8608_v10, %v8571_v19 }
 0xdf9   : > { %v8156_v34 = vrot.slane %v8155_v33, 1  ;;  %v8551_v51 = vpop.f32.mrb[184].mxu1 }
 0xdfa   : > { %v11175_v18 = vclamps-f32 %v8610_v1, 1.0  ;;  %v8572_v45 = vmul.f32 %v17737_v26, %v8551_v51  ;;  %v12948_v57 = vpop.f32.mrb[185].mxu1  ;;  %v9143_v2 = vsel %vm1346_vm11, %v17938_v58, 0.0 }
 0xdfb   : > { %v8157_v28 = vadd.f32 %v8156_v34, %v8155_v33 }
 0xdfc   : > { %v17941_v0 = vsub.f32 %v11166_v41, %v11175_v18  ;;  %v8611_v53 = vmul.f32 %v8608_v10, %v8572_v45 }
 0xdfd   : > { %v8158_v60 = vadd.f32 %v8157_v28, %v7844_v54 }
 0xdfe   : > { %v9144_v12 = vsel %vm1346_vm11, %v17941_v0, 0.0  ;;  %v11176_v15 = vclamps-f32 %v8611_v53, 1.0 }
 0xdff   : > { %v8159_v26 = vadd.f32 %v17950_v25, %v8158_v60  ;;  %v9145_v33 = vadd.f32 %v9144_v12, %v9143_v2 }
 0xe00   : > { %v17953_v42 = vsub.f32 %v11167_v55, %v11176_v15 }
 0xe01   : > { %11146 = vst.msk [vmem:[%s15636_s25 + $0x5] sm:$0x1] %vm1670_vm9, %v8159_v26 }
 0xe02   : > { %v9146_v10 = vsel %vm1350_vm12, %v17953_v42, 0.0 }
 0xe03   : > { %v9147_v59 = vadd.f32 %v9146_v10, %v9145_v33 }
 0xe05   : > { %v9148_v63 = vrot.slane %v9147_v59, 4 }
 0xe07   : > { %v9149_v43 = vadd.f32 %v9148_v63, %v9147_v59 }
 0xe09   : > { %v9150_v6 = vrot.slane %v9149_v43, 2 }
 0xe0b   : > { %v9151_v61 = vadd.f32 %v9150_v6, %v9149_v43 }
 0xe0d   : > { %v9152_v56 = vrot.slane %v9151_v61, 1 }
 0xe0f   : > { %v9153_v19 = vadd.f32 %v9152_v56, %v9151_v61 }
 0xe11   : > { %v9154_v47 = vmul.f32 %v9153_v19, %v17938_v58  ;;  %v9155_v1 = vmul.f32 %v9153_v19, %v17941_v0  ;;  %v9156_v34 = vmul.f32 %v9153_v19, %v17953_v42  ;;  %v12053_v51 = vpop.f32.mrb[186].mxu1 }
 0xe12   : > { %v12054_v41 = vpop.f32.mrb[187].mxu1 }
 0xe13   : > { %v9157_v11 = vmul.f32 0.31622776, %v9154_v47  ;;  %v9158_v18 = vmul.f32 0.31622776, %v9155_v1  ;;  %v9159_v45 = vmul.f32 0.31622776, %v9156_v34  ;;  %v12055_v57 = vadd.f32 %v12054_v41, %v12053_v51 }
 0xe15   : > { %14393 = vtanh.f32 %v9157_v11  ;;  %v8855_v54 = vadd.f32 %v12055_v57, %v17843_v21  ;;  %v12056_v28 = vpop.f32.mrb[188].mxu1 }
 0xe16   : > { %14395 = vtanh.f32 %v9158_v18  ;;  %v12057_v53 = vpop.f32.mrb[189].mxu1 }
 0xe17   : > { %14397 = vtanh.f32 %v9159_v45  ;;  %v12058_v60 = vadd.f32 %v12057_v53, %v12056_v28  ;;  %v17996_v53 = vld [vmem:[%s18363_s3 + $0x10] sm:$0xf] }
 0xe19   : > { %v8860_v55 = vadd.f32 %v12058_v60, %v17845_v27  ;;  %v12059_v2 = vpop.f32.mrb[190].mxu1  ;;  %v13764_v60 = vpack.c.bf16 %v17882_v14, %v17873_v13 }
 0xe1a   : > { %v12060_v12 = vpop.f32.mrb[191].mxu1 }
 0xe1b   : > { %v12061_v15 = vadd.f32 %v12060_v12, %v12059_v2 }
 0xe1d   : > { %v8865_v26 = vadd.f32 %v12061_v15, %v17847_v16  ;;  %v9023_v33 = vpop.f32.mrb[192].mxu1 }
 0xe1e   : > { %v9024_v10 = vadd.f32 %v17849_v22, %v9023_v33  ;;  %v12964_v59 = vpop.f32.mrb[193].mxu1 }
 0xe1f   : > { %v14394_v63 = vpop.eup %14393 }
 0xe20   : > { %v14396_v43 = vpop.eup %14395  ;;  %v9163_v6 = vmul.f32 1.442695, %v14394_v63  ;;  %14399 = vrcp.f32 %v9024_v10  ;;  %v18736_v10 = vld [vmem:[#allocation28_spill] sm:$0xff] }
 0xe21   : > { %v14398_v21 = vpop.eup %14397  ;;  %v9028_v61 = vpop.f32.mrb[194].mxu1  ;;  %v9165_v56 = vmul.f32 1.442695, %v14396_v43 }
 0xe22   : > { %14401 = vpow2.f32 %v9163_v6  ;;  %v9167_v19 = vmul.f32 1.442695, %v14398_v21  ;;  %v9029_v27 = vadd.f32 %v17851_v4, %v9028_v61  ;;  %v12967_v47 = vpop.f32.mrb[195].mxu1 }
 0xe23   : > { %14403 = vpow2.f32 %v9165_v56 }
 0xe24   : > { %14405 = vpow2.f32 %v9167_v19  ;;  %v9927_v19 = vadd.f32 %v17749_v5, %v17691_v29 }
 0xe25   : > { %14407 = vrcp.f32 %v9029_v27  ;;  %v9033_v16 = vpop.f32.mrb[196].mxu1 }
 0xe26   : > { %v9034_v1 = vadd.f32 %v17853_v44, %v9033_v16  ;;  %v12970_v22 = vpop.f32.mrb[197].mxu1  ;;  %v9919_v16 = vadd.f32 %v17746_v48, %v17688_v38 }
 0xe28   : > { %14409 = vrcp.f32 %v9034_v1  ;;  %v18737_v1 = vld [vmem:[#allocation27_spill] sm:$0xff] }
 0xe29   : > { %v9928_v22 = vadd.f32 %v9927_v19, %v18737_v1  ;;  %v18744_v1 = vld [vmem:[#allocation8_spill] sm:$0xff] }
 0xe2a   : > { %v14400_v34 = vpop.eup %14399 }
 0xe2b   : > { %v9038_v51 = vmul.f32 %v14400_v34, %v8855_v54 }
 0xe2c   : > { %v14402_v41 = vpop.eup %14401 }
 0xe2d   : > { %v14404_v11 = vpop.eup %14403  ;;  %12980 = vmatmul.mubr.msk.f32.vlgmr.msra.gmra.mrb[198].mxu1 %vm18733_vm2, %v9038_v51  ;;  %v9169_v18 = vmul.f32 %v14402_v41, %v17938_v58  ;;  %v17982_v58 = vld [vmem:[%s18365_s5] sm:$0x3] }
 0xe2e   : > { %v14406_v45 = vpop.eup %14405  ;;  %13761 = vmatpush3.bf16.msra.mxu1 %v18574_v31  ;;  %12982 = vmatprep.mubr.msk.f32.mxu1 %vm14557_vm5, %v18551_v8  ;;  %v9170_v4 = vmul.f32 %v14404_v11, %v17941_v0  ;;  %v13762_v0 = vpack.c.bf16 %v17885_v9, %v17876_v62 }
 0xe2f   : > { %v14408_v57 = vpop.eup %14407  ;;  %12995 = vmatmul.mubr.msk.f32.vlgmr.msra.gmra.mrb[198].mxu0 %vm1346_vm11, %v9169_v18  ;;  %13007 = vmatprep.subr.mxu1 %v18551_v8  ;;  %v9171_v44 = vmul.f32 %v14406_v45, %v17953_v42  ;;  %v9929_v18 = vrot.slane %v9928_v22, 4 }
 0xe30   : > { %v9040_v54 = vmul.f32 %v14408_v57, %v8860_v55  ;;  %12997 = vmatprep.mubr.msk.f32.mxu0 %vm14557_vm5, %v18551_v8  ;;  %13019 = vmatpush3.msk.msra.mxu0 %vm18734_vm13, %v17982_v58  ;;  %v13767_v55 = vpack.c.bf16 %v17888_v36, %v17879_v35 }
 0xe31   : > { %13770 = vmatprep.subr.bf16.mxu0 %v18552_v39 }
 0xe32   : > { %v14410_v28 = vpop.eup %14409  ;;  %12983 = vmatmul.mubr.msk.f32.gmra.mrb[200].mxu1 %vm18735_vm8, %v9040_v54 }
 0xe33   : > { %12985 = vmatprep.mubr.msk.f32.mxu1 %vm14557_vm5, %v18551_v8  ;;  %12998 = vmatmul.mubr.msk.f32.gmra.mrb[200].mxu0 %vm1346_vm11, %v9170_v4  ;;  %v9042_v42 = vmul.f32 %v14410_v28, %v8865_v26  ;;  %v9930_v4 = vadd.f32 %v9929_v18, %v9928_v22  ;;  %v18745_v22 = vld [vmem:[#allocation9_spill] sm:$0xff] }
 0xe34   : > { %13008 = vmatpush3.msk.msra.mxu1 %vm373_vm1, %v17996_v53  ;;  %13000 = vmatprep.mubr.msk.f32.mxu0 %vm14557_vm5, %v18551_v8 }
 0xe35   : > { %13763 = vmatprep.subr.bf16.mxu1 %v13762_v0 }
 0xe36   : > { %12986 = vmatmul.mubr.msk.f32.gmra.mrb[202].mxu1 %vm18733_vm2, %v9042_v42 }
 0xe37   : > { %13001 = vmatmul.mubr.msk.f32.gmra.mrb[202].mxu0 %vm1346_vm11, %v9171_v44  ;;  %13009 = vmatprep.mubr.msk.f32.mxu1 %vm14557_vm5, %v18551_v8  ;;  %v9931_v44 = vrot.slane %v9930_v4, 2 }
 0xe38   : > { %13020 = vmatprep.mubr.msk.f32.mxu0 %vm14557_vm5, %v18551_v8 }
 0xe39   : > { %v9932_v28 = vadd.f32 %v9931_v44, %v9930_v4  ;;  %v18747_v4 = vld [vmem:[#allocation11_spill] sm:$0xff]  ;;  %v18748_v44 = vld [vmem:[#allocation12_spill] sm:$0xff] }
 0xe3a   : > { %13010 = vmatmul.mubr.msk.f32.vlgmr.msra.gmra.mrb[204].mxu1 %vm1346_vm11, %v14402_v41  ;;  %v18738_v41 = vld [vmem:[#allocation24_spill] sm:$0xff] }
 0xe3b   : > { %13012 = vmatprep.mubr.msk.f32.mxu1 %vm14557_vm5, %v18551_v8  ;;  %13765 = vmatpush1.bf16.xpose.msra.mxu1 %v13764_v60 }
 0xe3c   : > { %9516 = vmatprep.subr.mxu1 %v17906_v24 }
 0xe3e   : > { %13013 = vmatmul.mubr.msk.f32.gmra.mrb[206].mxu1 %vm1346_vm11, %v14404_v11  ;;  %v9920_v11 = vadd.f32 %v9919_v16, %v18738_v41 }
 0xe3f   : > { %13015 = vmatprep.mubr.msk.f32.mxu1 %vm14557_vm5, %v18551_v8 }
 0xe42   : > { %13016 = vmatmul.mubr.msk.f32.gmra.mrb[208].mxu1 %vm1346_vm11, %v14406_v45  ;;  %v9921_v45 = vrot.slane %v9920_v11, 4 }
 0xe43   : > { %9517 = vmatpush1.xpose.msra.mxu1 %v17903_v37  ;;  %9576 = vmatprep.mubr.f32.mxu1 %v17876_v62  ;;  %v9758_v62 = vmul.f32 0.0625, %v9751_v50 }
 0xe44   : > { %13766 = vmatprep.subr.bf16.mxu1 %v18552_v39  ;;  %v9922_v57 = vadd.f32 %v9921_v45, %v9920_v11  ;;  %v18746_v11 = vld [vmem:[#allocation10_spill] sm:$0xff] }
 0xe46   : > { %9577 = vmatmul.mubr.f32.vlgmr.msra.gmra.mrb[210].mxu1 %v17873_v13  ;;  %v9754_v13 = vpop.xlane.xlu0 %9753  ;;  %v9923_v0 = vrot.slane %v9922_v57, 2 }
 0xe47   : > { %13769 = vmatpush3.bf16.xpose.msk.msra.mxu1 %vm14789_vm7, %v13767_v55  ;;  %9581 = vmatprep.mubr.f32.mxu1 %v17885_v9  ;;  %v9759_v9 = vmul.f32 0.0625, %v9754_v13  ;;  %v9933_v55 = vrot.slane %v9932_v28, 1 }
 0xe48   : > { %13033 = vmatprep.subr.mxu1 %v18551_v8  ;;  %v9924_v60 = vadd.f32 %v9923_v0, %v9922_v57 }
 0xe4a   : > { %9582 = vmatmul.mubr.f32.gmra.mrb[212].mxu1 %v17882_v14  ;;  %v18046_v14 = vsub.f32 %v17861_v20, %v9759_v9  ;;  %v9685_v26 = vpop.xlane.xlu0 %9684  ;;  %v9934_v9 = vadd.f32 %v9933_v55, %v9932_v28 }
 0xe4b   : > { %9586 = vmatprep.mubr.f32.mxu1 %v17906_v24  ;;  %v18043_v24 = vsub.f32 %v17858_v23, %v9758_v62  ;;  %14411 = vrsqrt.f32 %v9685_v26  ;;  %v9925_v62 = vrot.slane %v9924_v60, 1 }
 0xe4c   : > { %v9854_v12 = vmul.f32 %v18046_v14, %v18046_v14  ;;  %v9947_v26 = vmul.f32 %v17749_v5, %v9934_v9  ;;  %v18740_v5 = vld [vmem:[#allocation21_spill] sm:$0xff] }
 0xe4e   : > { %9587 = vmatmul.mubr.f32.gmra.mrb[214].mxu1 %v17903_v37  ;;  %v9757_v37 = vpop.xlane.xlu1 %9756  ;;  %v9690_v21 = vpop.xlane.xlu0 %9689 }
 0xe4f   : > { %13034 = vmatpush3.xpose.msk.msra.mxu1 %vm363_vm0, %v17909_v17  ;;  %13035 = vmatprep.mubr.msk.f32.mxu1 %vm14557_vm5, %v18551_v8  ;;  %v9760_v2 = vmul.f32 0.0625, %v9757_v37  ;;  %14413 = vrsqrt.f32 %v9690_v21  ;;  %v18741_v21 = vld [vmem:[#allocation5_spill] sm:$0xff] }
 0xe50   : > { %13059 = vmatprep.subr.mxu1 %v18551_v8 }
 0xe51   : > { %v18059_v20 = vsub.f32 %v17864_v49, %v9760_v2  ;;  %v9926_v2 = vadd.f32 %v9925_v62, %v9924_v60  ;;  %v18749_v60 = vld [vmem:[#allocation13_spill] sm:$0xff]  ;;  %v18750_v62 = vld [vmem:[#allocation14_spill] sm:$0xff] }
 0xe52   : > { %13036 = vmatmul.mubr.msk.f32.vlgmr.msra.gmra.mrb[210].mxu1 %vm363_vm0, %v17879_v35  ;;  %v9853_v35 = vmul.f32 %v18043_v24, %v18043_v24  ;;  %v9697_v56 = vpop.xlane.xlu0 %9696 }
 0xe53   : > { %13038 = vmatprep.mubr.msk.f32.mxu1 %vm14557_vm5, %v18551_v8  ;;  %13060 = vmatpush3.msk.msra.mxu1 %vm373_vm1, %v17814_v52  ;;  %v9855_v15 = vmul.f32 %v18059_v20, %v18059_v20  ;;  %14415 = vrsqrt.f32 %v9697_v56 }
 0xe54   : > { %13807 = vmatprep.subr.bf16.mxu1 %v14793_v30  ;;  %v9856_v23 = vsel %vm641_vm3, %v9853_v35, 0.0 }
 0xe55   : > { %9857 = vadd.xlane.f32.xlu1 %v9856_v23  ;;  %v9862_v33 = vsel %vm648_vm4, %v9855_v15, 0.0  ;;  %v18069_v49 = vpop.eup %14411  ;;  %vm18754_vm4 = vcmask 15360  }
 0xe56   : > { %13039 = vmatmul.mubr.msk.f32.gmra.mrb[212].mxu1 %vm363_vm0, %v17888_v36  ;;  %v9859_v36 = vsel %vm641_vm3, %v9854_v12, 0.0  ;;  %9704 = vxpose.xlu0.b32.start [1/3] (short) (narrow) %v18069_v49, 8  ;;  %v9944_v12 = vmul.f32 %v17691_v29, %v9934_v9  ;;  %v9950_v29 = vmul.f32 %v17711_v46, %v9934_v9  ;;  %vm18756_vm7 = vmmov %vm18754_vm4 }
 0xe57   : > { %13041 = vmatprep.mubr.msk.f32.mxu1 %vm14557_vm5, %v18551_v8  ;;  %vm18757_vm13 = vmmov %vm18754_vm4 }
 0xe58   : > { %v9953_v15 = vmul.f32 0.31622776, %v9944_v12 }
 0xe59   : > { %9860 = vadd.xlane.f32.xlu1 %v9859_v36  ;;  %v18077_v47 = vpop.eup %14413  ;;  %v9943_v36 = vmul.f32 %v17688_v38, %v9926_v2  ;;  %v9956_v38 = vmul.f32 0.31622776, %v9947_v26 }
 0xe5a   : > { %13042 = vmatmul.mubr.msk.f32.gmra.mrb[214].mxu1 %vm363_vm0, %v17909_v17  ;;  %v9937_v17 = vrot.slane %v18736_v10, 4  ;;  %9705 = vxpose.xlu0.b32.cont [2/3] (short) (narrow) %v18077_v47, 8 }
 0xe5b   : > { %13061 = vmatprep.mubr.msk.f32.mxu1 %vm14557_vm5, %v18551_v8 }
 0xe5c   : > { %v9938_v59 = vadd.f32 %v9937_v17, %v18736_v10  ;;  %v9946_v10 = vmul.f32 %v17746_v48, %v9926_v2  ;;  %v9952_v17 = vmul.f32 0.31622776, %v9943_v36  ;;  %v18753_v36 = vld [vmem:[#allocation17_spill] sm:$0xff] }
 0xe5d   : > { %9863 = vadd.xlane.f32.xlu1 %v9862_v33  ;;  %v18083_v51 = vpop.eup %14415 }
 0xe5e   : > { %v9939_v63 = vrot.slane %v9938_v59, 2  ;;  %9706 = vxpose.xlu0.b32.end [3/3] (short) (narrow) %v18083_v51, 8 }
 0xe60   : > { %v9940_v43 = vadd.f32 %v9939_v63, %v9938_v59  ;;  %v18739_v59 = vld [vmem:[#allocation4_spill] sm:$0xff]  ;;  %v9949_v63 = vmul.f32 %v18740_v5, %v9926_v2 }
 0xe62   : > { %v9941_v6 = vrot.slane %v9940_v43, 1  ;;  %v9958_v46 = vmul.f32 0.31622776, %v9949_v63 }
 0xe64   : > { %v9942_v61 = vadd.f32 %v9941_v6, %v9940_v43  ;;  %v9959_v6 = vmul.f32 0.31622776, %v9950_v29 }
 0xe66   : > { %v9945_v27 = vmul.f32 %v17694_v32, %v9942_v61  ;;  %v9948_v50 = vmul.f32 %v17701_v3, %v9942_v61  ;;  %v9951_v13 = vmul.f32 %v17715_v7, %v9942_v61  ;;  %v18742_v61 = vld [vmem:[#allocation6_spill] sm:$0xff] }
 0xe68   : > { %v9954_v34 = vmul.f32 0.31622776, %v9945_v27  ;;  %v9957_v37 = vmul.f32 0.31622776, %v9948_v50  ;;  %v9960_v35 = vmul.f32 0.31622776, %v9951_v13 }
 0xe69   : > { %v18743_v27 = vld [vmem:[#allocation7_spill] sm:$0xff] }
 0xe6a   : > { %14417 = vtanh.f32 %v9954_v34 }
 0xe74   : > { %v14418_v54 = vpop.eup %14417 }
 0xe75   : > { %v9974_v42 = vmul.f32 1.442695, %v14418_v54 }
 0xe77   : > { %14419 = vpow2.f32 %v9974_v42 }
 0xe78   : > { %14421 = vtanh.f32 %v9957_v37  ;;  %v18751_v37 = vld [vmem:[#allocation15_spill] sm:$0xff] }
 0xe79   : > { %14423 = vtanh.f32 %v9960_v35 }
 0xe7a   : > { %14425 = vtanh.f32 %v9953_v15 }
 0xe7b   : > { %14427 = vtanh.f32 %v9952_v17 }
 0xe7c   : > { %14429 = vtanh.f32 %v9956_v38 }
 0xe81   : > { %v18090_v23 = vpop.eup %14419 }
 0xe82   : > { %v9990_v33 = vmul.f32 %v18090_v23, %v17694_v32  ;;  %v14422_v43 = vpop.eup %14421  ;;  %v9955_v32 = vmul.f32 0.31622776, %v9946_v10 }
 0xe83   : > { %v14424_v48 = vpop.eup %14423  ;;  %v9980_v19 = vmul.f32 1.442695, %v14422_v43 }
 0xe84   : > { %13062 = vmatmul.mubr.msk.f32.vlgmr.msra.gmra.mrb[216].mxu1 %vm363_vm0, %v9990_v33  ;;  %v9986_v56 = vmul.f32 1.442695, %v14424_v48  ;;  %14431 = vtanh.f32 %v9955_v32  ;;  %v14426_v16 = vpop.eup %14425 }
 0xe85   : > { %13809 = vmatpush3.bf16.msra.mxu1 %v14817_v40  ;;  %13064 = vmatprep.mubr.msk.f32.mxu1 %vm14557_vm5, %v18551_v8  ;;  %14433 = vtanh.f32 %v9959_v6  ;;  %v9972_v34 = vmul.f32 1.442695, %v14426_v16  ;;  %v14428_v41 = vpop.eup %14427 }
 0xe86   : > { %13811 = vmatprep.subr.bf16.mxu1 %v18739_v59  ;;  %14435 = vpow2.f32 %v9980_v19  ;;  %v14430_v18 = vpop.eup %14429  ;;  %v9970_v45 = vmul.f32 1.442695, %v14428_v41 }
 0xe87   : > { %14437 = vtanh.f32 %v9958_v46  ;;  %v9978_v54 = vmul.f32 1.442695, %v14430_v18 }
 0xe88   : > { %14439 = vpow2.f32 %v9986_v56 }
 0xe89   : > { %13813 = vmatpush3.bf16.msra.mxu1 %v18741_v21  ;;  %14441 = vpow2.f32 %v9972_v34 }
 0xe8a   : > { %13815 = vmatprep.subr.bf16.mxu1 %v18742_v61  ;;  %14443 = vpow2.f32 %v9970_v45 }
 0xe8b   : > { %14445 = vpow2.f32 %v9978_v54 }
 0xe8d   : > { %13817 = vmatpush3.bf16.msra.mxu1 %v18743_v27 }
 0xe8e   : > { %13819 = vmatprep.subr.bf16.mxu1 %v18744_v1  ;;  %v14432_v57 = vpop.eup %14431 }
 0xe8f   : > { %v14434_v0 = vpop.eup %14433  ;;  %v9976_v50 = vmul.f32 1.442695, %v14432_v57 }
 0xe90   : > { %v18112_v28 = vpop.eup %14435  ;;  %v9984_v9 = vmul.f32 1.442695, %v14434_v0 }
 0xe91   : > { %13821 = vmatpush3.bf16.msra.mxu1 %v18745_v22  ;;  %v14438_v42 = vpop.eup %14437  ;;  %v9993_v55 = vmul.f32 %v18112_v28, %v17701_v3  ;;  %14447 = vpow2.f32 %v9976_v50  ;;  %v18752_v3 = vld [vmem:[#allocation16_spill] sm:$0xff] }
 0xe92   : > { %13823 = vmatprep.subr.bf16.mxu1 %v18746_v11  ;;  %v18117_v13 = vpop.eup %14439  ;;  %v9982_v2 = vmul.f32 1.442695, %v14438_v42  ;;  %14449 = vpow2.f32 %v9984_v9 }
 0xe93   : > { %13065 = vmatmul.mubr.msk.f32.gmra.mrb[218].mxu1 %vm363_vm0, %v9993_v55  ;;  %v9996_v35 = vmul.f32 %v18117_v13, %v17715_v7  ;;  %v18127_v12 = vpop.eup %14441 }
 0xe94   : > { %13067 = vmatprep.mubr.msk.f32.mxu1 %vm14557_vm5, %v18551_v8  ;;  %14451 = vpow2.f32 %v9982_v2  ;;  %v18133_v15 = vpop.eup %14443 }
 0xe95   : > { %13825 = vmatpush3.bf16.msra.mxu1 %v18747_v4  ;;  %v18135_v26 = vpop.eup %14445 }
 0xe96   : > { %13827 = vmatprep.subr.bf16.mxu1 %v18748_v44 }
 0xe97   : > { %13068 = vmatmul.mubr.msk.f32.gmra.mrb[220].mxu1 %vm363_vm0, %v9996_v35 }
 0xe98   : > { %10239 = vmatprep.mubr.f32.mxu1 %v18127_v12 }
 0xe99   : > { %13829 = vmatpush3.bf16.msra.mxu1 %v18749_v60 }
 0xe9a   : > { %13831 = vmatprep.subr.bf16.mxu1 %v18750_v62 }
 0xe9b   : > { %v18141_v7 = vpop.eup %14447 }
 0xe9c   : > { %v18143_v33 = vpop.eup %14449 }
 0xe9d   : > { %13833 = vmatpush3.bf16.msra.mxu1 %v18751_v37 }
 0xe9e   : > { %13835 = vmatprep.subr.bf16.mxu1 %v18752_v3  ;;  %v18150_v10 = vpop.eup %14451 }
 0xea1   : > { %13837 = vmatpush3.bf16.msra.mxu1 %v18753_v36 }
 0xea2   : > { %13845 = vmatprep.subr.bf16.mxu1 %v18552_v39 }
 0xea4   : > { %10240 = vmatmul.mubr.f32.vlgmr.msra.gmra.mrb[222].mxu1 %v18133_v15 }
 0xea5   : > { %10244 = vmatprep.mubr.f32.mxu1 %v18135_v26  ;;  %13847 = vmatpush3.bf16.msra.mxu1 %v18574_v31 }
 0xea6   : > { %13102 = vmatprep.subr.mxu1 %v18551_v8 }
 0xea8   : > { %10245 = vmatmul.mubr.f32.gmra.mrb[224].mxu1 %v18141_v7 }
 0xea9   : > { %10249 = vmatprep.mubr.f32.mxu1 %v18143_v33  ;;  %13103 = vmatpush3.msk.msra.mxu1 %vm373_vm1, %v17996_v53 }
 0xeaa   : > { %13128 = vmatprep.subr.mxu1 %v18551_v8 }
 0xeac   : > { %10250 = vmatmul.mubr.f32.gmra.mrb[226].mxu1 %v18150_v10 }
 0xead   : > { %13104 = vmatprep.mubr.msk.f32.mxu1 %vm14557_vm5, %v18551_v8 }
 0xee2   : > { %v9858_v17 = vpop.xlane.xlu1 %9857 }
 0xee3   : > { %14453 = vrsqrt.f32 %v9858_v17 }
 0xee6   : > { %v9861_v29 = vpop.xlane.xlu1 %9860 }
 0xee7   : > { %14455 = vrsqrt.f32 %v9861_v29 }
 0xeea   : > { %v9864_v38 = vpop.xlane.xlu1 %9863 }
 0xeeb   : > { %14457 = vrsqrt.f32 %v9864_v38 }
 0xeed   : > { %v18155_v5 = vpop.eup %14453 }
 0xeee   : > { %9871 = vxpose.xlu1.b32.start [1/3] (short) (narrow) %v18155_v5, 8 }
 0xef1   : > { %v18158_v63 = vpop.eup %14455 }
 0xef2   : > { %9872 = vxpose.xlu1.b32.cont [2/3] (short) (narrow) %v18158_v63, 8 }
 0xef5   : > { %v18161_v43 = vpop.eup %14457 }
 0xef6   : > { %9873 = vxpose.xlu1.b32.end [3/3] (short) (narrow) %v18161_v43, 8 }
 0xf00   : > { %v9118_v32 = vpop.f32.mrb[198].mxu1 }
 0xf01   : > { %v12981_v48 = vpop.f32.mrb[199].mxu1  ;;  %v9132_v19 = vsel %vm1333_vm14, %v9118_v32, 0.0 }
 0xf02   : > { %v9247_v6 = vpop.f32.mrb[198].mxu0 }
 0xf03   : > { %v12996_v46 = vpop.f32.mrb[199].mxu0 }
 0xf04   : > { %v13771_v46 = vpack.c.bf16 %v18046_v14, %v18043_v24 }
 0xf05   : > { %v9123_v56 = vpop.f32.mrb[200].mxu1 }
 0xf06   : > { %v9133_v16 = vsel %vm1333_vm14, %v9123_v56, 0.0  ;;  %v12984_v34 = vpop.f32.mrb[201].mxu1  ;;  %v9252_v41 = vpop.f32.mrb[200].mxu0 }
 0xf07   : > { %v9134_v18 = vadd.f32 %v9133_v16, %v9132_v19  ;;  %v12999_v45 = vpop.f32.mrb[201].mxu0 }
 0xf09   : > { %v9128_v57 = vpop.f32.mrb[202].mxu1 }
 0xf0a   : > { %v9135_v54 = vsel %vm1337_vm15, %v9128_v57, 0.0  ;;  %v12987_v0 = vpop.f32.mrb[203].mxu1  ;;  %v9257_v42 = vpop.f32.mrb[202].mxu0 }
 0xf0b   : > { %v18167_v55 = vadd.f32 %v9135_v54, %v9134_v18  ;;  %v13002_v50 = vpop.f32.mrb[203].mxu0 }
 0xf0d   : > { %v9336_v9 = vpop.f32.mrb[204].mxu1 }
 0xf0e   : > { %14459 = vrcp.f32 %v9336_v9  ;;  %v13011_v35 = vpop.f32.mrb[205].mxu1  ;;  %v9137_v9 = vrot.slane %v18167_v55, 4 }
 0xf11   : > { %v9341_v2 = vpop.f32.mrb[206].mxu1 }
 0xf12   : > { %14461 = vrcp.f32 %v9341_v2  ;;  %v13014_v17 = vpop.f32.mrb[207].mxu1  ;;  %v9720_v2 = vpop.trf.xlu0 }
 0xf15   : > { %v9346_v29 = vpop.f32.mrb[208].mxu1 }
 0xf16   : > { %14463 = vrcp.f32 %v9346_v29  ;;  %v13017_v38 = vpop.f32.mrb[209].mxu1 }
 0xf18   : > { %v14460_v32 = vpop.eup %14459 }
 0xf19   : > { %v9351_v48 = vmul.f32 %v14460_v32, %v9247_v6  ;;  %v9138_v32 = vadd.f32 %v9137_v9, %v18167_v55 }
 0xf1b   : > { %13021 = vmatmul.mubr.msk.f32.vlgmr.msra.gmra.mrb[204].mxu0 %vm18754_vm4, %v9351_v48 }
 0xf1c   : > { %v14462_v56 = vpop.eup %14461  ;;  %13773 = vmatpush3.bf16.xpose.msk.msra.mxu0 %vm14747_vm6, %v13771_v46  ;;  %13023 = vmatprep.mubr.msk.f32.mxu0 %vm14557_vm5, %v18551_v8 }
 0xf1d   : > { %v9353_v16 = vmul.f32 %v14462_v56, %v9252_v41  ;;  %13048 = vmatprep.subr.mxu0 %v18551_v8  ;;  %v18761_v56 = vld [vmem:[#allocation22_spill] sm:$0xff] }
 0xf1e   : > { %v9739_v19 = vrot.slane %v9720_v2, %v18761_v56 }
 0xf1f   : > { %13024 = vmatmul.mubr.msk.f32.gmra.mrb[206].mxu0 %vm18756_vm7, %v9353_v16 }
 0xf20   : > { %v14464_v34 = vpop.eup %14463  ;;  %13026 = vmatprep.mubr.msk.f32.mxu0 %vm14557_vm5, %v18551_v8 }
 0xf21   : > { %v9355_v6 = vmul.f32 %v14464_v34, %v9257_v42 }
 0xf23   : > { %13027 = vmatmul.mubr.msk.f32.gmra.mrb[208].mxu0 %vm18757_vm13, %v9355_v6 }
 0xf24   : > { %13049 = vmatpush3.xpose.msk.msra.mxu0 %vm641_vm3, %v18059_v20  ;;  %13050 = vmatprep.mubr.msk.f32.mxu0 %vm14557_vm5, %v18551_v8 }
 0xf25   : > { %13775 = vmatprep.subr.bf16.mxu0 %v14793_v30  ;;  %v18186_v41 = vpop.f32.mrb[210].mxu1  ;;  %v14541_v30 = vld [vmem:[%s14615_s8 + $0x200] sm:$0xff] }
 0xf26   : > { %v13037_v18 = vpop.f32.mrb[211].mxu1  ;;  %v9701_v46 = vmul.f32 %v18069_v49, %v18186_v41 }
 0xf27   : > { %13051 = vmatmul.mubr.msk.f32.vlgmr.msra.gmra.mrb[210].mxu0 %vm641_vm3, %v18043_v24  ;;  %v9989_v24 = vmul.f32 %v14541_v30, %v18127_v12 }
 0xf28   : > { %13777 = vmatpush3.bf16.msra.mxu0 %v14817_v40  ;;  %13053 = vmatprep.mubr.msk.f32.mxu0 %vm14557_vm5, %v18551_v8 }
 0xf29   : > { %13779 = vmatprep.subr.bf16.mxu0 %v18739_v59  ;;  %v18194_v45 = vpop.f32.mrb[212].mxu1 }
 0xf2a   : > { %v13040_v57 = vpop.f32.mrb[213].mxu1  ;;  %v9702_v55 = vmul.f32 %v18077_v47, %v18194_v45 }
 0xf2b   : > { %13054 = vmatmul.mubr.msk.f32.gmra.mrb[212].mxu0 %vm641_vm3, %v18046_v14  ;;  %v14542_v14 = vld [vmem:[%s14615_s8 + $0x1f8] sm:$0xff]  ;;  %v9139_v57 = vrot.slane %v9138_v32, 2 }
 0xf2c   : > { %13781 = vmatpush3.bf16.msra.mxu0 %v18741_v21  ;;  %13056 = vmatprep.mubr.msk.f32.mxu0 %vm14557_vm5, %v18551_v8  ;;  %v14543_v21 = vld [vmem:[%s14615_s8 + $0x218] sm:$0xff] }
 0xf2d   : > { %13783 = vmatprep.subr.bf16.mxu0 %v18742_v61  ;;  %v18204_v40 = vpop.f32.mrb[214].mxu1  ;;  %v9992_v61 = vmul.f32 %v14543_v21, %v18135_v26  ;;  %v9140_v41 = vadd.f32 %v9139_v57, %v9138_v32 }
 0xf2e   : > { %v13043_v59 = vpop.f32.mrb[215].mxu1 }
 0xf2f   : > { %13057 = vmatmul.mubr.msk.f32.gmra.mrb[214].mxu0 %vm641_vm3, %v18059_v20  ;;  %v9988_v20 = vmul.f32 %v14542_v14, %v18133_v15  ;;  %v9740_v59 = vmul.f32 %v9739_v19, %v9701_v46  ;;  %vm18763_vm3 = vcmask 1041408  }
 0xf30   : > { %13785 = vmatpush3.bf16.msra.mxu0 %v18743_v27  ;;  %10070 = vmatprep.mubr.f32.mxu0 %v9989_v24  ;;  %v14544_v27 = vld [vmem:[%s14615_s8 + $0x210] sm:$0xff] }
 0xf31   : > { %13787 = vmatprep.subr.bf16.mxu0 %v18744_v1  ;;  %v9991_v1 = vmul.f32 %v14544_v27, %v18141_v7 }
 0xf34   : > { %13789 = vmatpush3.bf16.msra.mxu0 %v18745_v22  ;;  %v14545_v22 = vld [vmem:[%s14615_s8 + $0x230] sm:$0xf] }
 0xf35   : > { %13791 = vmatprep.subr.bf16.mxu0 %v18746_v11  ;;  %v9995_v11 = vmul.f32 %v14545_v22, %v18143_v33 }
 0xf38   : > { %13793 = vmatpush3.bf16.msra.mxu0 %v18747_v4  ;;  %v14546_v4 = vld [vmem:[%s14615_s8 + $0x228] sm:$0xf] }
 0xf39   : > { %13795 = vmatprep.subr.bf16.mxu0 %v18748_v44  ;;  %v9994_v44 = vmul.f32 %v14546_v4, %v18150_v10  ;;  %v9741_v4 = vmul.f32 %v9739_v19, %v9702_v55 }
 0xf3c   : > { %13797 = vmatpush3.bf16.msra.mxu0 %v18749_v60  ;;  %v18759_v60 = vld [vmem:[#allocation19_spill] sm:$0xff] }
 0xf3d   : > { %13799 = vmatprep.subr.bf16.mxu0 %v18750_v62 }
 0xf40   : > { %13801 = vmatpush3.bf16.msra.mxu0 %v18751_v37 }
 0xf41   : > { %13803 = vmatprep.subr.bf16.mxu0 %v18752_v3 }
 0xf44   : > { %13805 = vmatpush3.bf16.msra.mxu0 %v18753_v36 }
 0xf45   : > { %13070 = vmatprep.subr.mxu0 %v18551_v8 }
 0xf47   : > { %10071 = vmatmul.mubr.f32.vlgmr.msra.gmra.mrb[216].mxu0 %v9988_v20 }
 0xf48   : > { %13071 = vmatpush3.msk.msra.mxu0 %vm373_vm1, %v17814_v52  ;;  %10075 = vmatprep.mubr.f32.mxu0 %v9992_v61  ;;  %v18758_v52 = vld [vmem:[#allocation18_spill] sm:$0xff] }
 0xf49   : > { %13838 = vmatprep.subr.bf16.mxu0 %v18552_v39 }
 0xf4b   : > { %10076 = vmatmul.mubr.f32.gmra.mrb[218].mxu0 %v9991_v1  ;;  %v11220_v1 = vclamps-f32 %v9740_v59, 1.0 }
 0xf4c   : > { %10080 = vmatprep.mubr.f32.mxu0 %v9995_v11 }
 0xf4f   : > { %10081 = vmatmul.mubr.f32.gmra.mrb[220].mxu0 %v9994_v44  ;;  %v9703_v44 = vmul.f32 %v18083_v51, %v18204_v40 }
 0xf50   : > { %13072 = vmatprep.mubr.msk.f32.mxu0 %vm14557_vm5, %v18551_v8 }
 0xf53   : > { %13073 = vmatmul.mubr.msk.f32.vlgmr.msra.gmra.mrb[222].mxu0 %vm363_vm0, %v18090_v23 }
 0xf54   : > { %13075 = vmatprep.mubr.msk.f32.mxu0 %vm14557_vm5, %v18551_v8  ;;  %13840 = vmatpush3.bf16.msra.mxu0 %v18758_v52 }
 0xf55   : > { %13841 = vmatprep.subr.bf16.mxu0 %v18552_v39 }
 0xf57   : > { %13076 = vmatmul.mubr.msk.f32.gmra.mrb[224].mxu0 %vm363_vm0, %v18112_v28  ;;  %v18253_v23 = vpop.f32.mrb[216].mxu1 }
 0xf58   : > { %13078 = vmatprep.mubr.msk.f32.mxu0 %vm14557_vm5, %v18551_v8  ;;  %13844 = vmatpush3.bf16.msk.msra.mxu0 %vm15097_vm10, %v18759_v60  ;;  %v13063_v37 = vpop.f32.mrb[217].mxu1 }
 0xf59   : > { %13848 = vmatprep.subr.bf16.mxu0 %v18552_v39  ;;  %v9141_v37 = vrot.slane %v9140_v41, 1 }
 0xf5b   : > { %13079 = vmatmul.mubr.msk.f32.gmra.mrb[226].mxu0 %vm363_vm0, %v18117_v13  ;;  %vm18762_vm0 = vmmov %vm18733_vm2 }
 0xf5c   : > { %13089 = vmatprep.mubr.msk.f32.mxu0 %vm14557_vm5, %v18551_v8  ;;  %vm18764_vm6 = vmmov %vm18762_vm0 }
 0xf5d   : > { %vm18765_vm10 = vmmov %vm18762_vm0 }
 0xf66   : > { %v18255_v3 = vpop.f32.mrb[218].mxu1 }
 0xf67   : > { %v13066_v28 = vpop.f32.mrb[219].mxu1 }
 0xf6a   : > { %v18257_v12 = vpop.f32.mrb[220].mxu1 }
 0xf6b   : > { %v13069_v36 = vpop.f32.mrb[221].mxu1 }
 0xf6e   : > { %v9887_v34 = vpop.trf.xlu1 }
 0xf6f   : > { %v9906_v24 = vrot.slane %v9887_v34, %v18761_v56 }
 0xf77   : > { %v12223_v15 = vpop.f32.mrb[222].mxu1 }
 0xf78   : > { %v12224_v26 = vpop.f32.mrb[223].mxu1 }
 0xf79   : > { %v18259_v7 = vadd.f32 %v12224_v26, %v12223_v15  ;;  %v11221_v15 = vclamps-f32 %v9741_v4, 1.0  ;;  %v9742_v26 = vmul.f32 %v9739_v19, %v9703_v44 }
 0xf7b   : > { %v12226_v39 = vpop.f32.mrb[224].mxu1 }
 0xf7c   : > { %v12227_v33 = vpop.f32.mrb[225].mxu1 }
 0xf7d   : > { %v18261_v10 = vadd.f32 %v12227_v33, %v12226_v39 }
 0xf7f   : > { %v12229_v13 = vpop.f32.mrb[226].mxu1 }
 0xf80   : > { %v12230_v54 = vpop.f32.mrb[227].mxu1 }
 0xf81   : > { %v18263_v0 = vadd.f32 %v12230_v54, %v12229_v13  ;;  %v9142_v54 = vadd.f32 %v9141_v37, %v9140_v41 }
 0xfee   : > { %v9431_v42 = vpop.f32.mrb[204].mxu0 }
 0xfef   : > { %v13022_v50 = vpop.f32.mrb[205].mxu0  ;;  %v9445_v17 = vsel %vm1333_vm14, %v9431_v42, 0.0 }
 0xff0   : > { %v11222_v50 = vclamps-f32 %v9742_v26, 1.0 }
 0xff2   : > { %v9436_v35 = vpop.f32.mrb[206].mxu0 }
 0xff3   : > { %v9446_v29 = vsel %vm1333_vm14, %v9436_v35, 0.0  ;;  %v13025_v38 = vpop.f32.mrb[207].mxu0 }
 0xff4   : > { %v9447_v48 = vadd.f32 %v9446_v29, %v9445_v17 }
 0xff6   : > { %v9441_v16 = vpop.f32.mrb[208].mxu0 }
 0xff7   : > { %v9448_v6 = vsel %vm1337_vm15, %v9441_v16, 0.0  ;;  %v13028_v18 = vpop.f32.mrb[209].mxu0 }
 0xff8   : > { %v9449_v30 = vadd.f32 %v9448_v6, %v9447_v48 }
 0xffa   : > { %v9450_v14 = vrot.slane %v9449_v30, 4  ;;  %v9839_v20 = vpop.f32.mrb[210].mxu0 }
 0xffb   : > { %v9868_v21 = vmul.f32 %v18155_v5, %v9839_v20  ;;  %v13052_v49 = vpop.f32.mrb[211].mxu0 }
 0xffc   : > { %v9451_v61 = vadd.f32 %v9450_v14, %v9449_v30 }
 0xffd   : > { %v9907_v27 = vmul.f32 %v9906_v24, %v9868_v21 }
 0xffe   : > { %v9452_v22 = vrot.slane %v9451_v61, 2  ;;  %v9844_v11 = vpop.f32.mrb[212].mxu0 }
 0xfff   : > { %v11229_v52 = vclamps-f32 %v9907_v27, 1.0  ;;  %v9869_v60 = vmul.f32 %v18158_v63, %v9844_v11  ;;  %v13055_v62 = vpop.f32.mrb[213].mxu0 }
0x1000   : > { %v9453_v28 = vadd.f32 %v9452_v22, %v9451_v61 }
0x1001   : > { %v18280_v47 = vsub.f32 %v11220_v1, %v11229_v52  ;;  %v9908_v5 = vmul.f32 %v9906_v24, %v9869_v60 }
0x1002   : > { %v9454_v45 = vrot.slane %v9453_v28, 1  ;;  %v9849_v36 = vpop.f32.mrb[214].mxu0 }
0x1003   : > { %v11230_v39 = vclamps-f32 %v9908_v5, 1.0  ;;  %v9870_v33 = vmul.f32 %v18161_v43, %v9849_v36  ;;  %v13058_v13 = vpop.f32.mrb[215].mxu0  ;;  %v10441_v9 = vsel %vm1346_vm11, %v18280_v47, 0.0 }
0x1004   : > { %v9455_v51 = vadd.f32 %v9454_v45, %v9453_v28 }
0x1005   : > { %v18283_v40 = vsub.f32 %v11221_v15, %v11230_v39  ;;  %v9909_v63 = vmul.f32 %v9906_v24, %v9870_v33 }
0x1006   : > { %v9456_v42 = vadd.f32 %v9455_v51, %v9142_v54 }
0x1007   : > { %v10442_v35 = vsel %vm1346_vm11, %v18283_v40, 0.0  ;;  %v11231_v2 = vclamps-f32 %v9909_v63, 1.0 }
0x1008   : > { %v9457_v17 = vadd.f32 %v17950_v25, %v9456_v42  ;;  %v10443_v29 = vadd.f32 %v10442_v35, %v10441_v9 }
0x1009   : > { %v18290_v38 = vsub.f32 %v11222_v50, %v11231_v2 }
0x100a   : > { %11201 = vst.msk [vmem:[%s15636_s25 + $0x6] sm:$0x1] %vm1670_vm9, %v9457_v17 }
0x100b   : > { %v10444_v43 = vsel %vm1350_vm12, %v18290_v38, 0.0 }
0x100c   : > { %v10445_v32 = vadd.f32 %v10444_v43, %v10443_v29 }
0x100e   : > { %v10446_v48 = vrot.slane %v10445_v32, 4 }
0x1010   : > { %v10447_v46 = vadd.f32 %v10446_v48, %v10445_v32 }
0x1012   : > { %v10448_v56 = vrot.slane %v10447_v46, 2 }
0x1014   : > { %v10449_v19 = vadd.f32 %v10448_v56, %v10447_v46 }
0x1016   : > { %v10450_v16 = vrot.slane %v10449_v19, 1 }
0x1018   : > { %v10451_v34 = vadd.f32 %v10450_v16, %v10449_v19 }
0x101a   : > { %v10452_v6 = vmul.f32 %v10451_v34, %v18280_v47  ;;  %v10453_v18 = vmul.f32 %v10451_v34, %v18283_v40  ;;  %v10454_v25 = vmul.f32 %v10451_v34, %v18290_v38  ;;  %v12178_v57 = vpop.f32.mrb[216].mxu0 }
0x101b   : > { %v12179_v30 = vpop.f32.mrb[217].mxu0 }
0x101c   : > { %v10455_v24 = vmul.f32 0.31622776, %v10452_v6  ;;  %v10456_v59 = vmul.f32 0.31622776, %v10453_v18  ;;  %v10457_v14 = vmul.f32 0.31622776, %v10454_v25  ;;  %v12180_v20 = vadd.f32 %v12179_v30, %v12178_v57 }
0x101e   : > { %14465 = vtanh.f32 %v10455_v24  ;;  %v10153_v55 = vadd.f32 %v12180_v20, %v18253_v23  ;;  %v12181_v21 = vpop.f32.mrb[218].mxu0 }
0x101f   : > { %14467 = vtanh.f32 %v10456_v59  ;;  %v12182_v49 = vpop.f32.mrb[219].mxu0 }
0x1020   : > { %14469 = vtanh.f32 %v10457_v14  ;;  %v12183_v41 = vadd.f32 %v12182_v49, %v12181_v21 }
0x1022   : > { %v10158_v61 = vadd.f32 %v12183_v41, %v18255_v3  ;;  %v12184_v27 = vpop.f32.mrb[220].mxu0 }
0x1023   : > { %v12185_v1 = vpop.f32.mrb[221].mxu0 }
0x1024   : > { %v12186_v22 = vadd.f32 %v12185_v1, %v12184_v27 }
0x1026   : > { %v10163_v11 = vadd.f32 %v12186_v22, %v18257_v12  ;;  %v10321_v4 = vpop.f32.mrb[222].mxu0 }
0x1027   : > { %v10322_v44 = vadd.f32 %v18259_v7, %v10321_v4  ;;  %v13074_v52 = vpop.f32.mrb[223].mxu0 }
0x1028   : > { %v14466_v60 = vpop.eup %14465 }
0x1029   : > { %v14468_v62 = vpop.eup %14467  ;;  %v10461_v37 = vmul.f32 1.442695, %v14466_v60  ;;  %14471 = vrcp.f32 %v10322_v44 }
0x102a   : > { %v14470_v23 = vpop.eup %14469  ;;  %v10326_v28 = vpop.f32.mrb[224].mxu0  ;;  %v10463_v5 = vmul.f32 1.442695, %v14468_v62 }
0x102b   : > { %14473 = vpow2.f32 %v10461_v37  ;;  %v10465_v45 = vmul.f32 1.442695, %v14470_v23  ;;  %v10327_v3 = vadd.f32 %v18261_v10, %v10326_v28  ;;  %v13077_v36 = vpop.f32.mrb[225].mxu0 }
0x102c   : > { %14475 = vpow2.f32 %v10463_v5 }
0x102d   : > { %14477 = vpow2.f32 %v10465_v45 }
0x102e   : > { %14479 = vrcp.f32 %v10327_v3  ;;  %v10331_v12 = vpop.f32.mrb[226].mxu0 }
0x102f   : > { %v10332_v15 = vadd.f32 %v18263_v0, %v10331_v12  ;;  %v13080_v7 = vpop.f32.mrb[227].mxu0 }
0x1031   : > { %14481 = vrcp.f32 %v10332_v15 }
0x1033   : > { %v14472_v26 = vpop.eup %14471 }
0x1034   : > { %v10336_v39 = vmul.f32 %v14472_v26, %v10153_v55 }
0x1035   : > { %v14474_v33 = vpop.eup %14473 }
0x1036   : > { %v14476_v13 = vpop.eup %14475  ;;  %13090 = vmatmul.mubr.msk.f32.vlgmr.msra.gmra.mrb[228].mxu0 %vm18762_vm0, %v10336_v39  ;;  %v10467_v54 = vmul.f32 %v14474_v33, %v18280_v47  ;;  %v14547_v39 = vld [vmem:[%s18366_s6] sm:$0x1] }
0x1037   : > { %v14478_v51 = vpop.eup %14477  ;;  %13850 = vmatpush3.bf16.msra.mxu0 %v18574_v31  ;;  %13092 = vmatprep.mubr.msk.f32.mxu0 %vm14557_vm5, %v18551_v8  ;;  %v10468_v10 = vmul.f32 %v14476_v13, %v18283_v40 }
0x1038   : > { %v14480_v63 = vpop.eup %14479  ;;  %13105 = vmatmul.mubr.msk.f32.vlgmr.msra.gmra.mrb[228].mxu1 %vm1346_vm11, %v10467_v54  ;;  %13117 = vmatprep.subr.mxu0 %v18551_v8  ;;  %v10469_v0 = vmul.f32 %v14478_v51, %v18290_v38 }
0x1039   : > { %v10338_v42 = vmul.f32 %v14480_v63, %v10158_v61  ;;  %13107 = vmatprep.mubr.msk.f32.mxu1 %vm14557_vm5, %v18551_v8  ;;  %13129 = vmatpush3.msk.msra.mxu1 %vm18763_vm3, %v17982_v58 }
0x103b   : > { %v14482_v31 = vpop.eup %14481  ;;  %13093 = vmatmul.mubr.msk.f32.gmra.mrb[230].mxu0 %vm18764_vm6, %v10338_v42 }
0x103c   : > { %13095 = vmatprep.mubr.msk.f32.mxu0 %vm14557_vm5, %v18551_v8  ;;  %13108 = vmatmul.mubr.msk.f32.gmra.mrb[230].mxu1 %vm1346_vm11, %v10468_v10  ;;  %v10340_v47 = vmul.f32 %v14482_v31, %v10163_v11 }
0x103d   : > { %13118 = vmatpush3.msk.msra.mxu0 %vm373_vm1, %v17996_v53  ;;  %13110 = vmatprep.mubr.msk.f32.mxu1 %vm14557_vm5, %v18551_v8  ;;  %vm18766_vm1 = vmmov %vm18754_vm4 }
0x103e   : > { %vm18768_vm12 = vmmov %vm18766_vm1 }
0x103f   : > { %13096 = vmatmul.mubr.msk.f32.gmra.mrb[232].mxu0 %vm18765_vm10, %v10340_v47 }
0x1040   : > { %13111 = vmatmul.mubr.msk.f32.gmra.mrb[232].mxu1 %vm1346_vm11, %v10469_v0  ;;  %13119 = vmatprep.mubr.msk.f32.mxu0 %vm14557_vm5, %v18551_v8 }
0x1041   : > { %13130 = vmatprep.mubr.msk.f32.mxu1 %vm14557_vm5, %v18551_v8 }
0x1043   : > { %13120 = vmatmul.mubr.msk.f32.vlgmr.msra.gmra.mrb[234].mxu0 %vm1346_vm11, %v14474_v33 }
0x1044   : > { %13122 = vmatprep.mubr.msk.f32.mxu0 %vm14557_vm5, %v18551_v8 }
0x1047   : > { %13123 = vmatmul.mubr.msk.f32.gmra.mrb[236].mxu0 %vm1346_vm11, %v14476_v13 }
0x1048   : > { %13125 = vmatprep.mubr.msk.f32.mxu0 %vm14557_vm5, %v18551_v8 }
0x104b   : > { %13126 = vmatmul.mubr.msk.f32.gmra.mrb[238].mxu0 %vm1346_vm11, %v14478_v51  ;;  %vm18767_vm11 = vmmov %vm18766_vm1 }
0x1109   : > { %v10416_v58 = vpop.f32.mrb[228].mxu0 }
0x110a   : > { %v13091_v53 = vpop.f32.mrb[229].mxu0  ;;  %v10430_v35 = vsel %vm1333_vm14, %v10416_v58, 0.0 }
0x110b   : > { %v10545_v40 = vpop.f32.mrb[228].mxu1 }
0x110c   : > { %v13106_v50 = vpop.f32.mrb[229].mxu1 }
0x110e   : > { %v10421_v9 = vpop.f32.mrb[230].mxu0 }
0x110f   : > { %v10431_v2 = vsel %vm1333_vm14, %v10421_v9, 0.0  ;;  %v13094_v17 = vpop.f32.mrb[231].mxu0  ;;  %v10550_v29 = vpop.f32.mrb[230].mxu1 }
0x1110   : > { %v10432_v38 = vadd.f32 %v10431_v2, %v10430_v35  ;;  %v13109_v43 = vpop.f32.mrb[231].mxu1 }
0x1112   : > { %v10426_v32 = vpop.f32.mrb[232].mxu0 }
0x1113   : > { %v10433_v48 = vsel %vm1337_vm15, %v10426_v32, 0.0  ;;  %v13097_v46 = vpop.f32.mrb[233].mxu0  ;;  %v10555_v56 = vpop.f32.mrb[232].mxu1 }
0x1114   : > { %v10434_v19 = vadd.f32 %v10433_v48, %v10432_v38  ;;  %v13112_v16 = vpop.f32.mrb[233].mxu1 }
0x1116   : > { %v10634_v34 = vpop.f32.mrb[234].mxu0  ;;  %v10435_v61 = vrot.slane %v10434_v19, 4 }
0x1117   : > { %14483 = vrcp.f32 %v10634_v34  ;;  %v13121_v6 = vpop.f32.mrb[235].mxu0 }
0x1118   : > { %v10436_v4 = vadd.f32 %v10435_v61, %v10434_v19 }
0x111a   : > { %v10639_v18 = vpop.f32.mrb[236].mxu0 }
0x111b   : > { %14485 = vrcp.f32 %v10639_v18  ;;  %v13124_v25 = vpop.f32.mrb[237].mxu0 }
0x111e   : > { %v10644_v57 = vpop.f32.mrb[238].mxu0 }
0x111f   : > { %14487 = vrcp.f32 %v10644_v57  ;;  %v13127_v30 = vpop.f32.mrb[239].mxu0 }
0x1121   : > { %v14484_v24 = vpop.eup %14483 }
0x1122   : > { %v10649_v59 = vmul.f32 %v14484_v24, %v10545_v40 }
0x1124   : > { %13131 = vmatmul.mubr.msk.f32.vlgmr.msra.gmra.mrb[234].mxu1 %vm18766_vm1, %v10649_v59 }
0x1125   : > { %v14486_v14 = vpop.eup %14485  ;;  %13133 = vmatprep.mubr.msk.f32.mxu1 %vm14557_vm5, %v18551_v8 }
0x1126   : > { %v10651_v20 = vmul.f32 %v14486_v14, %v10550_v29 }
0x1128   : > { %13134 = vmatmul.mubr.msk.f32.gmra.mrb[236].mxu1 %vm18767_vm11, %v10651_v20 }
0x1129   : > { %v14488_v55 = vpop.eup %14487  ;;  %13136 = vmatprep.mubr.msk.f32.mxu1 %vm14557_vm5, %v18551_v8  ;;  %v10437_v8 = vrot.slane %v10436_v4, 2 }
0x112a   : > { %v10653_v21 = vmul.f32 %v14488_v55, %v10555_v56 }
0x112b   : > { %v10438_v28 = vadd.f32 %v10437_v8, %v10436_v4 }
0x112c   : > { %13137 = vmatmul.mubr.msk.f32.gmra.mrb[238].mxu1 %vm18768_vm12, %v10653_v21 }
0x112d   : > { %v10439_v3 = vrot.slane %v10438_v28, 1 }
0x112f   : > { %v10440_v15 = vadd.f32 %v10439_v3, %v10438_v28 }
0x11f7   : > { %v10729_v49 = vpop.f32.mrb[234].mxu1 }
0x11f8   : > { %v13132_v41 = vpop.f32.mrb[235].mxu1  ;;  %v10743_v1 = vsel %vm1333_vm14, %v10729_v49, 0.0 }
0x11fb   : > { %v10734_v27 = vpop.f32.mrb[236].mxu1 }
0x11fc   : > { %v10744_v22 = vsel %vm1333_vm14, %v10734_v27, 0.0  ;;  %v13135_v11 = vpop.f32.mrb[237].mxu1 }
0x11fd   : > { %v10745_v44 = vadd.f32 %v10744_v22, %v10743_v1 }
0x11ff   : > { %v10739_v52 = vpop.f32.mrb[238].mxu1 }
0x1200   : > { %v10746_v60 = vsel %vm1337_vm15, %v10739_v52, 0.0  ;;  %v13138_v62 = vpop.f32.mrb[239].mxu1 }
0x1201   : > { %v10747_v37 = vadd.f32 %v10746_v60, %v10745_v44 }
0x1203   : > { %v10748_v23 = vrot.slane %v10747_v37, 4 }
0x1205   : > { %v10749_v5 = vadd.f32 %v10748_v23, %v10747_v37 }
0x1207   : > { %v10750_v45 = vrot.slane %v10749_v5, 2 }
0x1209   : > { %v10751_v36 = vadd.f32 %v10750_v45, %v10749_v5 }
0x120b   : > { %v10752_v12 = vrot.slane %v10751_v36, 1 }
0x120d   : > { %v10753_v7 = vadd.f32 %v10752_v12, %v10751_v36 }
0x120f   : > { %v10754_v26 = vadd.f32 %v10753_v7, %v10440_v15 }
0x1211   : > { %v10755_v33 = vadd.f32 %v14547_v39, %v10754_v26 }
0x1213   : > { %11256 = vst.msk [vmem:[%s15636_s25 + $0x7] sm:$0x1] %vm1670_vm9, %v10755_v33 }
0x1214 PF: > { %s17_s24 = sadd.s32 1, %s14554_s24  }
0x1215   : > { %p14_p4 = scmp.ge.s32.totalorder %s17_s24, 4  }
0x1217   :  { %16 = sbr.rel (!%p14_p4) target bundleno = 1 (0x1), region = 102 }

</bundles_post_ra>
